<compile_context>
chip_gen: v5e
topology: v5e:2x2
jax: 0.10.0
libtpu: 0.0.40
codegen_flags: <defaults>
</compile_context>

<pallas_src>
from functools import partial

import numpy as np
import jax
import jax.numpy as jnp
from jax.experimental import pallas as pl
from jax.experimental.pallas import tpu as pltpu

NEG_SLOPE = 0.01                     # nn.LeakyReLU default slope
K = 5                                # conv kernel size
PAD = 2                              # conv padding
H1, W1, C0, C1 = 28, 28, 3, 16       # conv1: 28x28, 3 -> 16 channels
H2, W2, C2 = 14, 14, 32              # conv2: 14x14, 16 -> 32 channels
FLAT = 7 * 7 * C2                    # 1568
HID, OUT = 100, 27

# Lane-dense layout constants.
XCOLS = W1 * C0                      # 84  : input row lanes, (w, c) order
PCOLS1 = W1 + 2 * PAD                # 32  : padded W for conv1
LANES1 = PCOLS1 * C0                 # 96  : xpad row lanes
H1_TILE = 32                         # rows computed per image for conv1 (mult of 8)
XPAD_ROWS = H1_TILE + K - 1          # 36  : padded rows + slack for shifted windows
CONV1_COLS = W1 * C1                 # 448 : conv1 matmul output lanes (parity-major)
HALF1 = CONV1_COLS // 2              # 224

PCOLS2 = W2 + 2 * PAD                # 18
LANES2 = PCOLS2 * C1                 # 288
H2_TILE = 16                         # rows computed per image for conv2 (mult of 8)
Z1PAD_ROWS = H2_TILE + K - 1         # 20
CONV2_COLS = W2 * C2                 # 448
HALF2 = CONV2_COLS // 2              # 224


# ----------------------------------------------------------------------------
# Fused kernel
# ----------------------------------------------------------------------------
def _dlrelu_after_pool(x):
    # lrelu(maxpool(lrelu(x))) == where(maxpool(x) > 0, ., slope^2 * .)
    # because LeakyReLU is strictly increasing (commutes with max).
    return jnp.where(x > 0.0, x, (NEG_SLOPE * NEG_SLOPE) * x)


def _cnn_fused_kernel(x_ref, wt1_ref, wt2_ref, wf1_ref, bf1_ref, wf2_ref,
                      bf2_ref, o_ref,
                      xpad_ref, z1pad_ref, lhs1_ref, lhs2_ref, flat_ref):
    bt = x_ref.shape[0]
    cdt = wt1_ref.dtype                      # MXU input dtype (bf16 or f32)

    # ---- stage input into a lane-dense padded buffer; zero the HALO only ----
    # xpad: (bt, 36, 96); rows 2..29 hold the image rows, lanes 6..89 hold the
    # image cols*channels; everything else is the zero halo (re-zeroed each
    # step -> correct under "parallel" grid sharding).
    xpad_ref[:, 0:PAD, :] = jnp.zeros((bt, PAD, LANES1), cdt)
    xpad_ref[:, PAD + H1:XPAD_ROWS, :] = jnp.zeros(
        (bt, XPAD_ROWS - PAD - H1, LANES1), cdt)
    xpad_ref[:, PAD:PAD + H1, 0:PAD * C0] = jnp.zeros((bt, H1, PAD * C0), cdt)
    xpad_ref[:, PAD:PAD + H1, LANES1 - PAD * C0:LANES1] = jnp.zeros(
        (bt, H1, PAD * C0), cdt)
    xpad_ref[:, PAD:PAD + H1, PAD * C0:PAD * C0 + XCOLS] = x_ref[...]

    # ---- conv1: pack 5 row-shifted windows side by side -> one wide-K dot ---
    # lhs1 row (b*32 + h) holds [xpad[b, h+0, :], ..., xpad[b, h+4, :]]
    # (rows h=28..31 per image are junk and get dropped after the dot).
    for kh in range(K):
        win = xpad_ref[:, kh:kh + H1_TILE, :]                # (bt, 32, 96)
        lhs1_ref[:, kh * LANES1:(kh + 1) * LANES1] = win.reshape(
            bt * H1_TILE, LANES1)
    acc1 = jnp.dot(lhs1_ref[...], wt1_ref[...],
                   preferred_element_type=jnp.float32)       # (bt*32, 448)
    acc1 = acc1.reshape(bt, H1_TILE, CONV1_COLS)

    # ---- 2x2 maxpool (H via row pairs, W via parity lane-halves) + dlrelu ---
    a = acc1[:, 0:H1, :].reshape(bt, H1 // 2, 2, CONV1_COLS)
    hp = jnp.maximum(a[:, :, 0, :], a[:, :, 1, :])           # (bt, 14, 448)
    wp = jnp.maximum(hp[:, :, 0:HALF1], hp[:, :, HALF1:CONV1_COLS])
    z1 = _dlrelu_after_pool(wp).astype(cdt)                  # (bt, 14, 224)

    # ---- stage z1 into the padded conv2 buffer; halo-only zeroing -----------
    z1pad_ref[:, 0:PAD, :] = jnp.zeros((bt, PAD, LANES2), cdt)
    z1pad_ref[:, PAD + H2:Z1PAD_ROWS, :] = jnp.zeros(
        (bt, Z1PAD_ROWS - PAD - H2, LANES2), cdt)
    z1pad_ref[:, PAD:PAD + H2, 0:PAD * C1] = jnp.zeros((bt, H2, PAD * C1), cdt)
    z1pad_ref[:, PAD:PAD + H2, LANES2 - PAD * C1:LANES2] = jnp.zeros(
        (bt, H2, PAD * C1), cdt)
    z1pad_ref[:, PAD:PAD + H2, PAD * C1:PAD * C1 + H2 * C1] = z1

    # ---- conv2: same structure, K = 5*288 = 1440 -----------------------------
    for kh in range(K):
        win = z1pad_ref[:, kh:kh + H2_TILE, :]               # (bt, 16, 288)
        lhs2_ref[:, kh * LANES2:(kh + 1) * LANES2] = win.reshape(
            bt * H2_TILE, LANES2)
    acc2 = jnp.dot(lhs2_ref[...], wt2_ref[...],
                   preferred_element_type=jnp.float32)       # (bt*16, 448)
    acc2 = acc2.reshape(bt, H2_TILE, CONV2_COLS)

    a2 = acc2[:, 0:H2, :].reshape(bt, H2 // 2, 2, CONV2_COLS)
    hp2 = jnp.maximum(a2[:, :, 0, :], a2[:, :, 1, :])        # (bt, 7, 448)
    wp2 = jnp.maximum(hp2[:, :, 0:HALF2], hp2[:, :, HALF2:CONV2_COLS])
    z2 = _dlrelu_after_pool(wp2).astype(cdt)                 # (bt, 7, 224)

    # ---- flatten (h, w, c) via 7 lane-offset stores (no cross-tile reshape) -
    for r in range(7):
        flat_ref[:, r * HALF2:(r + 1) * HALF2] = z2[:, r, :]

    # ---- MLP head ------------------------------------------------------------
    h = jnp.dot(flat_ref[...], wf1_ref[...],
                preferred_element_type=jnp.float32) + bf1_ref[...]
    h = jnp.where(h > 0.0, h, NEG_SLOPE * h).astype(cdt)
    out = jnp.dot(h, wf2_ref[...],
                  preferred_element_type=jnp.float32) + bf2_ref[...]
    o_ref[...] = out.astype(o_ref.dtype)


# ----------------------------------------------------------------------------
# Wrapper
# ----------------------------------------------------------------------------
@partial(jax.jit, static_argnames=("block_batch", "compute_dtype"))
def cnn_forward(x_nchw, params, *, block_batch=32, compute_dtype=jnp.bfloat16):
    """x_nchw: (N, 3, 28, 28) f32 -> logits (N, 27) f32.

    block_batch: 32-64 is a good default on v7x (64 MiB VMEM / 2 TCs); 64-128
    also fits on v5e/v6e (128 MiB).  compute_dtype=jnp.float32 gives the exact
    f32 MXU path; bf16 (default) keeps f32 accumulation + f32 epilogue."""
    n = x_nchw.shape[0]

    # Layout plumbing only (tiny, once, XLA-side): NCHW -> (N, H, W*C) bf16.
    x = jnp.transpose(x_nchw, (0, 2, 3, 1)).reshape(n, H1, XCOLS)
    x = x.astype(compute_dtype)

    bt = block_batch if n >= block_batch else n
    n_pad = pl.cdiv(n, bt) * bt
    if n_pad != n:
        x = jnp.pad(x, ((0, n_pad - n), (0, 0), (0, 0)))

    wt1 = params["wt_conv1"].astype(compute_dtype)    # (480, 448)
    wt2 = params["wt_conv2"].astype(compute_dtype)    # (1440, 448)
    wf1 = params["w_fc1"].astype(compute_dtype)       # (1568, 100)
    wf2 = params["w_fc2"].astype(compute_dtype)       # (100, 27)
    b1 = params["b_fc1"].astype(jnp.float32)          # (1, 100)
    b2 = params["b_fc2"].astype(jnp.float32)          # (1, 27)

    out = pl.pallas_call(
        _cnn_fused_kernel,
        out_shape=jax.ShapeDtypeStruct((n_pad, OUT), jnp.float32),
        grid=(n_pad // bt,),
        in_specs=[
            pl.BlockSpec((bt, H1, XCOLS), lambda i: (i, 0, 0)),
            # Weights: constant index_maps -> resident across grid steps.
            pl.BlockSpec((K * LANES1, CONV1_COLS), lambda i: (0, 0)),
            pl.BlockSpec((K * LANES2, CONV2_COLS), lambda i: (0, 0)),
            pl.BlockSpec((FLAT, HID), lambda i: (0, 0)),
            pl.BlockSpec((1, HID), lambda i: (0, 0)),
            pl.BlockSpec((HID, OUT), lambda i: (0, 0)),
            pl.BlockSpec((1, OUT), lambda i: (0, 0)),
        ],
        out_specs=pl.BlockSpec((bt, OUT), lambda i: (i, 0)),
        scratch_shapes=[
            pltpu.VMEM((bt, XPAD_ROWS, LANES1), compute_dtype),       # xpad
            pltpu.VMEM((bt, Z1PAD_ROWS, LANES2), compute_dtype),      # z1pad
            pltpu.VMEM((bt * H1_TILE, K * LANES1), compute_dtype),    # lhs1
            pltpu.VMEM((bt * H2_TILE, K * LANES2), compute_dtype),    # lhs2
            pltpu.VMEM((bt, FLAT), compute_dtype),                    # flat
        ],
        compiler_params=pltpu.CompilerParams(
            dimension_semantics=("parallel",),
            vmem_limit_bytes=32 * 1024 * 1024,
        ),
    )(x, wt1, wt2, wf1, b1, wf2, b2)
    return out[:n]


# ----------------------------------------------------------------------------
# Parameters (torch layouts) + conversion to kernel layouts
# ----------------------------------------------------------------------------
def init_torch_params(key):
    """Deterministic synthetic parameters in PyTorch's native layouts."""
    ks = jax.random.split(key, 6)
    s = 0.05
    return {
        "conv1.weight": s * jax.random.normal(ks[0], (C1, C0, K, K), jnp.float32),
        "conv2.weight": s * jax.random.normal(ks[1], (C2, C1, K, K), jnp.float32),
        "fc1.weight":   s * jax.random.normal(ks[2], (HID, C2 * 7 * 7), jnp.float32),
        "fc1.bias":     s * jax.random.normal(ks[3], (HID,), jnp.float32),
        "fc2.weight":   s * jax.random.normal(ks[4], (OUT, HID), jnp.float32),
        "fc2.bias":     s * jax.random.normal(ks[5], (OUT,), jnp.float32),
    }


def _conv_row_toeplitz(w_oihw, w_out, pad_cols):
    """torch Conv2d weight (Cout, Cin, 5, 5) -> (5*pad_cols*Cin, w_out*Cout)
    row-Toeplitz slab.  Rows are indexed (kh, padded_col, cin); output columns
    are parity-major (w_out%2, w_out//2, cout) so the W-axis 2x2 maxpool of the
    conv result is just max(lane-half0, lane-half1)."""
    w = np.asarray(w_oihw, np.float32)          # (Cout, Cin, 5, 5)
    cout, cin = w.shape[0], w.shape[1]
    t = np.zeros((K, pad_cols, cin, w_out, cout), np.float32)
    for kw in range(K):
        for wo in range(w_out):
            # padded input column p = wo + kw feeds output column wo via tap kw
            t[:, wo + kw, :, wo, :] = np.transpose(w[:, :, :, kw], (2, 1, 0))
    t = t.reshape(K, pad_cols, cin, w_out // 2, 2, cout)
    t = np.transpose(t, (0, 1, 2, 4, 3, 5))     # parity-major output columns
    return jnp.asarray(t.reshape(K * pad_cols * cin, w_out * cout))


def prepare_params(p):
    """Convert torch-layout weights into the layouts the fused kernel expects."""
    wt1 = _conv_row_toeplitz(p["conv1.weight"], W1, PCOLS1)   # (480, 448)
    wt2 = _conv_row_toeplitz(p["conv2.weight"], W2, PCOLS2)   # (1440, 448)
    # torch flattens NCHW (columns ordered (c, h, w)); the kernel flattens its
    # pooled output as (h, w, c) -> permute fc1 columns, then transpose.
    wf1 = np.asarray(p["fc1.weight"], np.float32).reshape(HID, C2, 7, 7)
    wf1 = np.transpose(wf1, (0, 2, 3, 1)).reshape(HID, FLAT).T      # (1568, 100)
    return {
        "wt_conv1": wt1,
        "wt_conv2": wt2,
        "w_fc1": jnp.asarray(wf1),
        "b_fc1": jnp.asarray(p["fc1.bias"]).reshape(1, HID),
        "w_fc2": jnp.asarray(np.asarray(p["fc2.weight"], np.float32).T),  # (100, 27)
        "b_fc2": jnp.asarray(p["fc2.bias"]).reshape(1, OUT),
    }


# ----------------------------------------------------------------------------
# Pure-JAX reference (mirrors the PyTorch module) for correctness checking
# ----------------------------------------------------------------------------
def cnn_reference(x_nchw, torch_params):
    hi = jax.lax.Precision.HIGHEST
    lrelu = lambda v: jnp.where(v > 0, v, NEG_SLOPE * v)

    def block(x, w):
        y = jax.lax.conv_general_dilated(
            x, w, window_strides=(1, 1), padding=((PAD, PAD), (PAD, PAD)),
            dimension_numbers=("NCHW", "OIHW", "NCHW"), precision=hi)
        y = lrelu(y)
        y = jax.lax.reduce_window(y, -jnp.inf, jax.lax.max,
                                  (1, 1, 2, 2), (1, 1, 2, 2), "VALID")
        return lrelu(y)

    y = block(x_nchw, torch_params["conv1.weight"])
    y = block(y, torch_params["conv2.weight"])
    flat = y.reshape(y.shape[0], -1)                          # NCHW flatten
    h = lrelu(jnp.dot(flat, torch_params["fc1.weight"].T, precision=hi)
              + torch_params["fc1.bias"])
    return (jnp.dot(h, torch_params["fc2.weight"].T, precision=hi)
            + torch_params["fc2.bias"])


# ----------------------------------------------------------------------------
if __name__ == "__main__":
    key = jax.random.PRNGKey(0)
    kx, kp = jax.random.split(key)
    # 28x28 spatial is required by the module's 32*7*7 flatten.
    x = jax.random.normal(kx, (2, 3, 28, 28), jnp.float32)
    torch_params = init_torch_params(kp)
    params = prepare_params(torch_params)

    ref = cnn_reference(x, torch_params)

    # Exact-path check (f32 MXU inputs) against a HIGHEST-precision reference.
    out_f32 = jax.block_until_ready(
        cnn_forward(x, params, compute_dtype=jnp.float32))
    assert out_f32.shape == (2, OUT) and out_f32.dtype == jnp.float32
    err_f32 = float(jnp.max(jnp.abs(out_f32 - ref)))
    assert bool(jnp.allclose(out_f32, ref, atol=2e-3, rtol=2e-3)), err_f32

    # Default fast path: bf16 MXU inputs, f32 accumulation + f32 epilogue.
    out = jax.block_until_ready(cnn_forward(x, params))
    assert out.shape == (2, OUT) and out.dtype == jnp.float32
    assert bool(jnp.all(jnp.isfinite(out)))
    err_bf16 = float(jnp.max(jnp.abs(out - ref)))
    assert bool(jnp.allclose(out, ref, atol=5e-2, rtol=5e-2)), err_bf16

    print("KERNEL_OK")
</pallas_src>

<mosaic_0001>
module attributes {stable_mosaic.version = 11 : i64} {
  func.func @_cnn_fused_kernel(%arg0: i32, %arg1: memref<2x28x84xf32, #tpu.memory_space<vmem>>, %arg2: memref<480x448xf32, #tpu.memory_space<vmem>>, %arg3: memref<1440x448xf32, #tpu.memory_space<vmem>>, %arg4: memref<1568x100xf32, #tpu.memory_space<vmem>>, %arg5: memref<1x100xf32, #tpu.memory_space<vmem>>, %arg6: memref<100x27xf32, #tpu.memory_space<vmem>>, %arg7: memref<1x27xf32, #tpu.memory_space<vmem>>, %arg8: memref<2x27xf32, #tpu.memory_space<vmem>>, %arg9: memref<2x36x96xf32, #tpu.memory_space<vmem>>, %arg10: memref<2x20x288xf32, #tpu.memory_space<vmem>>, %arg11: memref<64x480xf32, #tpu.memory_space<vmem>>, %arg12: memref<32x1440xf32, #tpu.memory_space<vmem>>, %arg13: memref<2x1568xf32, #tpu.memory_space<vmem>>) attributes {dimension_semantics = [#tpu.dimension_semantics<parallel>], iteration_bounds = array<i64: 1>, scalar_prefetch = 0 : i64, scratch_operands = 5 : i64, tpu.core_type = #tpu.core_type<tc>, window_params = [{transform_indices = @transform_0, window_bounds = array<i64: 2, 28, 84>}, {pipeline_mode = #tpu.pipeline_mode<synchronous>, transform_indices = @transform_1, window_bounds = array<i64: 480, 448>}, {pipeline_mode = #tpu.pipeline_mode<synchronous>, transform_indices = @transform_2, window_bounds = array<i64: 1440, 448>}, {pipeline_mode = #tpu.pipeline_mode<synchronous>, transform_indices = @transform_3, window_bounds = array<i64: 1568, 100>}, {pipeline_mode = #tpu.pipeline_mode<synchronous>, transform_indices = @transform_4, window_bounds = array<i64: 1, 100>}, {pipeline_mode = #tpu.pipeline_mode<synchronous>, transform_indices = @transform_5, window_bounds = array<i64: 100, 27>}, {pipeline_mode = #tpu.pipeline_mode<synchronous>, transform_indices = @transform_6, window_bounds = array<i64: 1, 27>}, {transform_indices = @transform_7, window_bounds = array<i64: 2, 27>}]} {
    %cst = arith.constant 0.000000e+00 : f32
    %0 = vector.broadcast %cst : f32 to vector<2x2x96xf32>
    %c0 = arith.constant 0 : index
    %c0_0 = arith.constant 0 : index
    %c0_1 = arith.constant 0 : index
    %1 = vector.load %arg9[%c0, %c0_0, %c0_1] : memref<2x36x96xf32, #tpu.memory_space<vmem>>, vector<2x2x96xf32>
    tpu.vector_store %arg9[%c0, %c0_0, %c0_1], %0 {strides = array<i32>} : memref<2x36x96xf32, #tpu.memory_space<vmem>>, vector<2x2x96xf32>,
    %cst_2 = arith.constant 0.000000e+00 : f32
    %2 = vector.broadcast %cst_2 : f32 to vector<2x6x96xf32>
    %c0_3 = arith.constant 0 : index
    %c30 = arith.constant 30 : index
    %c0_4 = arith.constant 0 : index
    %3 = vector.load %arg9[%c0_3, %c30, %c0_4] : memref<2x36x96xf32, #tpu.memory_space<vmem>>, vector<2x6x96xf32>
    tpu.vector_store %arg9[%c0_3, %c30, %c0_4], %2 {strides = array<i32>} : memref<2x36x96xf32, #tpu.memory_space<vmem>>, vector<2x6x96xf32>,
    %cst_5 = arith.constant 0.000000e+00 : f32
    %4 = vector.broadcast %cst_5 : f32 to vector<2x28x6xf32>
    %c0_6 = arith.constant 0 : index
    %c2 = arith.constant 2 : index
    %c0_7 = arith.constant 0 : index
    %5 = vector.load %arg9[%c0_6, %c2, %c0_7] : memref<2x36x96xf32, #tpu.memory_space<vmem>>, vector<2x28x6xf32>
    tpu.vector_store %arg9[%c0_6, %c2, %c0_7], %4 {strides = array<i32>} : memref<2x36x96xf32, #tpu.memory_space<vmem>>, vector<2x28x6xf32>,
    %cst_8 = arith.constant 0.000000e+00 : f32
    %6 = vector.broadcast %cst_8 : f32 to vector<2x28x6xf32>
    %c0_9 = arith.constant 0 : index
    %c2_10 = arith.constant 2 : index
    %c90 = arith.constant 90 : index
    %7 = vector.load %arg9[%c0_9, %c2_10, %c90] : memref<2x36x96xf32, #tpu.memory_space<vmem>>, vector<2x28x6xf32>
    tpu.vector_store %arg9[%c0_9, %c2_10, %c90], %6 {strides = array<i32>} : memref<2x36x96xf32, #tpu.memory_space<vmem>>, vector<2x28x6xf32>,
    %c0_11 = arith.constant 0 : index
    %c0_12 = arith.constant 0 : index
    %c0_13 = arith.constant 0 : index
    %8 = vector.load %arg1[%c0_11, %c0_12, %c0_13] : memref<2x28x84xf32, #tpu.memory_space<vmem>>, vector<2x28x84xf32>
    %c0_14 = arith.constant 0 : index
    %c2_15 = arith.constant 2 : index
    %c6 = arith.constant 6 : index
    %9 = vector.load %arg9[%c0_14, %c2_15, %c6] : memref<2x36x96xf32, #tpu.memory_space<vmem>>, vector<2x28x84xf32>
    tpu.vector_store %arg9[%c0_14, %c2_15, %c6], %8 {strides = array<i32>} : memref<2x36x96xf32, #tpu.memory_space<vmem>>, vector<2x28x84xf32>,
    %c0_16 = arith.constant 0 : index
    %c0_17 = arith.constant 0 : index
    %c0_18 = arith.constant 0 : index
    %10 = vector.load %arg9[%c0_16, %c0_17, %c0_18] : memref<2x36x96xf32, #tpu.memory_space<vmem>>, vector<2x32x96xf32>
    %11 = vector.shape_cast %10 : vector<2x32x96xf32> to vector<64x96xf32>
    %c0_19 = arith.constant 0 : index
    %c0_20 = arith.constant 0 : index
    %12 = vector.load %arg11[%c0_19, %c0_20] : memref<64x480xf32, #tpu.memory_space<vmem>>, vector<64x96xf32>
    tpu.vector_store %arg11[%c0_19, %c0_20], %11 {strides = array<i32>} : memref<64x480xf32, #tpu.memory_space<vmem>>, vector<64x96xf32>,
    %c0_21 = arith.constant 0 : index
    %c1 = arith.constant 1 : index
    %c0_22 = arith.constant 0 : index
    %13 = vector.load %arg9[%c0_21, %c1, %c0_22] : memref<2x36x96xf32, #tpu.memory_space<vmem>>, vector<2x32x96xf32>
    %14 = vector.shape_cast %13 : vector<2x32x96xf32> to vector<64x96xf32>
    %c0_23 = arith.constant 0 : index
    %c96 = arith.constant 96 : index
    %15 = vector.load %arg11[%c0_23, %c96] : memref<64x480xf32, #tpu.memory_space<vmem>>, vector<64x96xf32>
    tpu.vector_store %arg11[%c0_23, %c96], %14 {strides = array<i32>} : memref<64x480xf32, #tpu.memory_space<vmem>>, vector<64x96xf32>,
    %c0_24 = arith.constant 0 : index
    %c2_25 = arith.constant 2 : index
    %c0_26 = arith.constant 0 : index
    %16 = vector.load %arg9[%c0_24, %c2_25, %c0_26] : memref<2x36x96xf32, #tpu.memory_space<vmem>>, vector<2x32x96xf32>
    %17 = vector.shape_cast %16 : vector<2x32x96xf32> to vector<64x96xf32>
    %c0_27 = arith.constant 0 : index
    %c192 = arith.constant 192 : index
    %18 = vector.load %arg11[%c0_27, %c192] : memref<64x480xf32, #tpu.memory_space<vmem>>, vector<64x96xf32>
    tpu.vector_store %arg11[%c0_27, %c192], %17 {strides = array<i32>} : memref<64x480xf32, #tpu.memory_space<vmem>>, vector<64x96xf32>,
    %c0_28 = arith.constant 0 : index
    %c3 = arith.constant 3 : index
    %c0_29 = arith.constant 0 : index
    %19 = vector.load %arg9[%c0_28, %c3, %c0_29] : memref<2x36x96xf32, #tpu.memory_space<vmem>>, vector<2x32x96xf32>
    %20 = vector.shape_cast %19 : vector<2x32x96xf32> to vector<64x96xf32>
    %c0_30 = arith.constant 0 : index
    %c288 = arith.constant 288 : index
    %21 = vector.load %arg11[%c0_30, %c288] : memref<64x480xf32, #tpu.memory_space<vmem>>, vector<64x96xf32>
    tpu.vector_store %arg11[%c0_30, %c288], %20 {strides = array<i32>} : memref<64x480xf32, #tpu.memory_space<vmem>>, vector<64x96xf32>,
    %c0_31 = arith.constant 0 : index
    %c4 = arith.constant 4 : index
    %c0_32 = arith.constant 0 : index
    %22 = vector.load %arg9[%c0_31, %c4, %c0_32] : memref<2x36x96xf32, #tpu.memory_space<vmem>>, vector<2x32x96xf32>
    %23 = vector.shape_cast %22 : vector<2x32x96xf32> to vector<64x96xf32>
    %c0_33 = arith.constant 0 : index
    %c384 = arith.constant 384 : index
    %24 = vector.load %arg11[%c0_33, %c384] : memref<64x480xf32, #tpu.memory_space<vmem>>, vector<64x96xf32>
    tpu.vector_store %arg11[%c0_33, %c384], %23 {strides = array<i32>} : memref<64x480xf32, #tpu.memory_space<vmem>>, vector<64x96xf32>,
    %c0_34 = arith.constant 0 : index
    %c0_35 = arith.constant 0 : index
    %25 = vector.load %arg11[%c0_34, %c0_35] : memref<64x480xf32, #tpu.memory_space<vmem>>, vector<64x480xf32>
    %c0_36 = arith.constant 0 : index
    %c0_37 = arith.constant 0 : index
    %26 = vector.load %arg2[%c0_36, %c0_37] : memref<480x448xf32, #tpu.memory_space<vmem>>, vector<480x448xf32>
    %cst_38 = arith.constant dense<0.000000e+00> : vector<64x448xf32>
    %27 = tpu.matmul %25, %26, %cst_38 {dimension_numbers = #tpu.dot_dimension_numbers<[1], [0], [0], [1], [0, 0, 1, 1], [], []>} : vector<64x480xf32>, vector<480x448xf32>, vector<64x448xf32> -> vector<64x448xf32>
    %28 = vector.shape_cast %27 : vector<64x448xf32> to vector<2x32x448xf32>
    %29 = vector.extract_strided_slice %28 {offsets = [0, 0, 0], sizes = [2, 28, 448], strides = [1, 1, 1]} : vector<2x32x448xf32> to vector<2x28x448xf32>
    %30 = vector.shape_cast %29 : vector<2x28x448xf32> to vector<2x14x2x448xf32>
    %31 = vector.extract_strided_slice %30 {offsets = [0, 0, 0, 0], sizes = [2, 14, 1, 448], strides = [1, 1, 1, 1]} : vector<2x14x2x448xf32> to vector<2x14x1x448xf32>
    %32 = vector.shape_cast %31 : vector<2x14x1x448xf32> to vector<2x14x448xf32>
    %33 = vector.extract_strided_slice %30 {offsets = [0, 0, 1, 0], sizes = [2, 14, 1, 448], strides = [1, 1, 1, 1]} : vector<2x14x2x448xf32> to vector<2x14x1x448xf32>
    %34 = vector.shape_cast %33 : vector<2x14x1x448xf32> to vector<2x14x448xf32>
    %35 = arith.maximumf %32, %34 : vector<2x14x448xf32>
    %36 = vector.extract_strided_slice %35 {offsets = [0, 0, 0], sizes = [2, 14, 224], strides = [1, 1, 1]} : vector<2x14x448xf32> to vector<2x14x224xf32>
    %37 = vector.extract_strided_slice %35 {offsets = [0, 0, 224], sizes = [2, 14, 224], strides = [1, 1, 1]} : vector<2x14x448xf32> to vector<2x14x224xf32>
    %38 = arith.maximumf %36, %37 : vector<2x14x224xf32>
    %cst_39 = arith.constant 0.000000e+00 : f32
    %39 = vector.broadcast %cst_39 : f32 to vector<2x14x224xf32>
    %40 = arith.cmpf ogt, %38, %39 : vector<2x14x224xf32>
    %cst_40 = arith.constant 9.99999974E-5 : f32
    %41 = vector.broadcast %cst_40 : f32 to vector<2x14x224xf32>
    %42 = arith.mulf %41, %38 : vector<2x14x224xf32>
    %43 = arith.select %40, %38, %42 : vector<2x14x224xi1>, vector<2x14x224xf32>
    %cst_41 = arith.constant 0.000000e+00 : f32
    %44 = vector.broadcast %cst_41 : f32 to vector<2x2x288xf32>
    %c0_42 = arith.constant 0 : index
    %c0_43 = arith.constant 0 : index
    %c0_44 = arith.constant 0 : index
    %45 = vector.load %arg10[%c0_42, %c0_43, %c0_44] : memref<2x20x288xf32, #tpu.memory_space<vmem>>, vector<2x2x288xf32>
    tpu.vector_store %arg10[%c0_42, %c0_43, %c0_44], %44 {strides = array<i32>} : memref<2x20x288xf32, #tpu.memory_space<vmem>>, vector<2x2x288xf32>,
    %cst_45 = arith.constant 0.000000e+00 : f32
    %46 = vector.broadcast %cst_45 : f32 to vector<2x4x288xf32>
    %c0_46 = arith.constant 0 : index
    %c16 = arith.constant 16 : index
    %c0_47 = arith.constant 0 : index
    %47 = vector.load %arg10[%c0_46, %c16, %c0_47] : memref<2x20x288xf32, #tpu.memory_space<vmem>>, vector<2x4x288xf32>
    tpu.vector_store %arg10[%c0_46, %c16, %c0_47], %46 {strides = array<i32>} : memref<2x20x288xf32, #tpu.memory_space<vmem>>, vector<2x4x288xf32>,
    %cst_48 = arith.constant 0.000000e+00 : f32
    %48 = vector.broadcast %cst_48 : f32 to vector<2x14x32xf32>
    %c0_49 = arith.constant 0 : index
    %c2_50 = arith.constant 2 : index
    %c0_51 = arith.constant 0 : index
    %49 = vector.load %arg10[%c0_49, %c2_50, %c0_51] : memref<2x20x288xf32, #tpu.memory_space<vmem>>, vector<2x14x32xf32>
    tpu.vector_store %arg10[%c0_49, %c2_50, %c0_51], %48 {strides = array<i32>} : memref<2x20x288xf32, #tpu.memory_space<vmem>>, vector<2x14x32xf32>,
    %cst_52 = arith.constant 0.000000e+00 : f32
    %50 = vector.broadcast %cst_52 : f32 to vector<2x14x32xf32>
    %c0_53 = arith.constant 0 : index
    %c2_54 = arith.constant 2 : index
    %c256 = arith.constant 256 : index
    %51 = vector.load %arg10[%c0_53, %c2_54, %c256] : memref<2x20x288xf32, #tpu.memory_space<vmem>>, vector<2x14x32xf32>
    tpu.vector_store %arg10[%c0_53, %c2_54, %c256], %50 {strides = array<i32>} : memref<2x20x288xf32, #tpu.memory_space<vmem>>, vector<2x14x32xf32>,
    %c0_55 = arith.constant 0 : index
    %c2_56 = arith.constant 2 : index
    %c32 = arith.constant 32 : index
    %52 = vector.load %arg10[%c0_55, %c2_56, %c32] : memref<2x20x288xf32, #tpu.memory_space<vmem>>, vector<2x14x224xf32>
    tpu.vector_store %arg10[%c0_55, %c2_56, %c32], %43 {strides = array<i32>} : memref<2x20x288xf32, #tpu.memory_space<vmem>>, vector<2x14x224xf32>,
    %c0_57 = arith.constant 0 : index
    %c0_58 = arith.constant 0 : index
    %c0_59 = arith.constant 0 : index
    %53 = vector.load %arg10[%c0_57, %c0_58, %c0_59] : memref<2x20x288xf32, #tpu.memory_space<vmem>>, vector<2x16x288xf32>
    %54 = vector.shape_cast %53 : vector<2x16x288xf32> to vector<32x288xf32>
    %c0_60 = arith.constant 0 : index
    %c0_61 = arith.constant 0 : index
    %55 = vector.load %arg12[%c0_60, %c0_61] : memref<32x1440xf32, #tpu.memory_space<vmem>>, vector<32x288xf32>
    tpu.vector_store %arg12[%c0_60, %c0_61], %54 {strides = array<i32>} : memref<32x1440xf32, #tpu.memory_space<vmem>>, vector<32x288xf32>,
    %c0_62 = arith.constant 0 : index
    %c1_63 = arith.constant 1 : index
    %c0_64 = arith.constant 0 : index
    %56 = vector.load %arg10[%c0_62, %c1_63, %c0_64] : memref<2x20x288xf32, #tpu.memory_space<vmem>>, vector<2x16x288xf32>
    %57 = vector.shape_cast %56 : vector<2x16x288xf32> to vector<32x288xf32>
    %c0_65 = arith.constant 0 : index
    %c288_66 = arith.constant 288 : index
    %58 = vector.load %arg12[%c0_65, %c288_66] : memref<32x1440xf32, #tpu.memory_space<vmem>>, vector<32x288xf32>
    tpu.vector_store %arg12[%c0_65, %c288_66], %57 {strides = array<i32>} : memref<32x1440xf32, #tpu.memory_space<vmem>>, vector<32x288xf32>,
    %c0_67 = arith.constant 0 : index
    %c2_68 = arith.constant 2 : index
    %c0_69 = arith.constant 0 : index
    %59 = vector.load %arg10[%c0_67, %c2_68, %c0_69] : memref<2x20x288xf32, #tpu.memory_space<vmem>>, vector<2x16x288xf32>
    %60 = vector.shape_cast %59 : vector<2x16x288xf32> to vector<32x288xf32>
    %c0_70 = arith.constant 0 : index
    %c576 = arith.constant 576 : index
    %61 = vector.load %arg12[%c0_70, %c576] : memref<32x1440xf32, #tpu.memory_space<vmem>>, vector<32x288xf32>
    tpu.vector_store %arg12[%c0_70, %c576], %60 {strides = array<i32>} : memref<32x1440xf32, #tpu.memory_space<vmem>>, vector<32x288xf32>,
    %c0_71 = arith.constant 0 : index
    %c3_72 = arith.constant 3 : index
    %c0_73 = arith.constant 0 : index
    %62 = vector.load %arg10[%c0_71, %c3_72, %c0_73] : memref<2x20x288xf32, #tpu.memory_space<vmem>>, vector<2x16x288xf32>
    %63 = vector.shape_cast %62 : vector<2x16x288xf32> to vector<32x288xf32>
    %c0_74 = arith.constant 0 : index
    %c864 = arith.constant 864 : index
    %64 = vector.load %arg12[%c0_74, %c864] : memref<32x1440xf32, #tpu.memory_space<vmem>>, vector<32x288xf32>
    tpu.vector_store %arg12[%c0_74, %c864], %63 {strides = array<i32>} : memref<32x1440xf32, #tpu.memory_space<vmem>>, vector<32x288xf32>,
    %c0_75 = arith.constant 0 : index
    %c4_76 = arith.constant 4 : index
    %c0_77 = arith.constant 0 : index
    %65 = vector.load %arg10[%c0_75, %c4_76, %c0_77] : memref<2x20x288xf32, #tpu.memory_space<vmem>>, vector<2x16x288xf32>
    %66 = vector.shape_cast %65 : vector<2x16x288xf32> to vector<32x288xf32>
    %c0_78 = arith.constant 0 : index
    %c1152 = arith.constant 1152 : index
    %67 = vector.load %arg12[%c0_78, %c1152] : memref<32x1440xf32, #tpu.memory_space<vmem>>, vector<32x288xf32>
    tpu.vector_store %arg12[%c0_78, %c1152], %66 {strides = array<i32>} : memref<32x1440xf32, #tpu.memory_space<vmem>>, vector<32x288xf32>,
    %c0_79 = arith.constant 0 : index
    %c0_80 = arith.constant 0 : index
    %68 = vector.load %arg12[%c0_79, %c0_80] : memref<32x1440xf32, #tpu.memory_space<vmem>>, vector<32x1440xf32>
    %c0_81 = arith.constant 0 : index
    %c0_82 = arith.constant 0 : index
    %69 = vector.load %arg3[%c0_81, %c0_82] : memref<1440x448xf32, #tpu.memory_space<vmem>>, vector<1440x448xf32>
    %cst_83 = arith.constant dense<0.000000e+00> : vector<32x448xf32>
    %70 = tpu.matmul %68, %69, %cst_83 {dimension_numbers = #tpu.dot_dimension_numbers<[1], [0], [0], [1], [0, 0, 1, 1], [], []>} : vector<32x1440xf32>, vector<1440x448xf32>, vector<32x448xf32> -> vector<32x448xf32>
    %71 = vector.shape_cast %70 : vector<32x448xf32> to vector<2x16x448xf32>
    %72 = vector.extract_strided_slice %71 {offsets = [0, 0, 0], sizes = [2, 14, 448], strides = [1, 1, 1]} : vector<2x16x448xf32> to vector<2x14x448xf32>
    %73 = vector.shape_cast %72 : vector<2x14x448xf32> to vector<2x7x2x448xf32>
    %74 = vector.extract_strided_slice %73 {offsets = [0, 0, 0, 0], sizes = [2, 7, 1, 448], strides = [1, 1, 1, 1]} : vector<2x7x2x448xf32> to vector<2x7x1x448xf32>
    %75 = vector.shape_cast %74 : vector<2x7x1x448xf32> to vector<2x7x448xf32>
    %76 = vector.extract_strided_slice %73 {offsets = [0, 0, 1, 0], sizes = [2, 7, 1, 448], strides = [1, 1, 1, 1]} : vector<2x7x2x448xf32> to vector<2x7x1x448xf32>
    %77 = vector.shape_cast %76 : vector<2x7x1x448xf32> to vector<2x7x448xf32>
    %78 = arith.maximumf %75, %77 : vector<2x7x448xf32>
    %79 = vector.extract_strided_slice %78 {offsets = [0, 0, 0], sizes = [2, 7, 224], strides = [1, 1, 1]} : vector<2x7x448xf32> to vector<2x7x224xf32>
    %80 = vector.extract_strided_slice %78 {offsets = [0, 0, 224], sizes = [2, 7, 224], strides = [1, 1, 1]} : vector<2x7x448xf32> to vector<2x7x224xf32>
    %81 = arith.maximumf %79, %80 : vector<2x7x224xf32>
    %cst_84 = arith.constant 0.000000e+00 : f32
    %82 = vector.broadcast %cst_84 : f32 to vector<2x7x224xf32>
    %83 = arith.cmpf ogt, %81, %82 : vector<2x7x224xf32>
    %cst_85 = arith.constant 9.99999974E-5 : f32
    %84 = vector.broadcast %cst_85 : f32 to vector<2x7x224xf32>
    %85 = arith.mulf %84, %81 : vector<2x7x224xf32>
    %86 = arith.select %83, %81, %85 : vector<2x7x224xi1>, vector<2x7x224xf32>
    %87 = vector.extract_strided_slice %86 {offsets = [0, 0, 0], sizes = [2, 1, 224], strides = [1, 1, 1]} : vector<2x7x224xf32> to vector<2x1x224xf32>
    %88 = vector.shape_cast %87 : vector<2x1x224xf32> to vector<2x224xf32>
    %c0_86 = arith.constant 0 : index
    %c0_87 = arith.constant 0 : index
    %89 = vector.load %arg13[%c0_86, %c0_87] : memref<2x1568xf32, #tpu.memory_space<vmem>>, vector<2x224xf32>
    tpu.vector_store %arg13[%c0_86, %c0_87], %88 {strides = array<i32>} : memref<2x1568xf32, #tpu.memory_space<vmem>>, vector<2x224xf32>,
    %90 = vector.extract_strided_slice %86 {offsets = [0, 1, 0], sizes = [2, 1, 224], strides = [1, 1, 1]} : vector<2x7x224xf32> to vector<2x1x224xf32>
    %91 = vector.shape_cast %90 : vector<2x1x224xf32> to vector<2x224xf32>
    %c0_88 = arith.constant 0 : index
    %c224 = arith.constant 224 : index
    %92 = vector.load %arg13[%c0_88, %c224] : memref<2x1568xf32, #tpu.memory_space<vmem>>, vector<2x224xf32>
    tpu.vector_store %arg13[%c0_88, %c224], %91 {strides = array<i32>} : memref<2x1568xf32, #tpu.memory_space<vmem>>, vector<2x224xf32>,
    %93 = vector.extract_strided_slice %86 {offsets = [0, 2, 0], sizes = [2, 1, 224], strides = [1, 1, 1]} : vector<2x7x224xf32> to vector<2x1x224xf32>
    %94 = vector.shape_cast %93 : vector<2x1x224xf32> to vector<2x224xf32>
    %c0_89 = arith.constant 0 : index
    %c448 = arith.constant 448 : index
    %95 = vector.load %arg13[%c0_89, %c448] : memref<2x1568xf32, #tpu.memory_space<vmem>>, vector<2x224xf32>
    tpu.vector_store %arg13[%c0_89, %c448], %94 {strides = array<i32>} : memref<2x1568xf32, #tpu.memory_space<vmem>>, vector<2x224xf32>,
    %96 = vector.extract_strided_slice %86 {offsets = [0, 3, 0], sizes = [2, 1, 224], strides = [1, 1, 1]} : vector<2x7x224xf32> to vector<2x1x224xf32>
    %97 = vector.shape_cast %96 : vector<2x1x224xf32> to vector<2x224xf32>
    %c0_90 = arith.constant 0 : index
    %c672 = arith.constant 672 : index
    %98 = vector.load %arg13[%c0_90, %c672] : memref<2x1568xf32, #tpu.memory_space<vmem>>, vector<2x224xf32>
    tpu.vector_store %arg13[%c0_90, %c672], %97 {strides = array<i32>} : memref<2x1568xf32, #tpu.memory_space<vmem>>, vector<2x224xf32>,
    %99 = vector.extract_strided_slice %86 {offsets = [0, 4, 0], sizes = [2, 1, 224], strides = [1, 1, 1]} : vector<2x7x224xf32> to vector<2x1x224xf32>
    %100 = vector.shape_cast %99 : vector<2x1x224xf32> to vector<2x224xf32>
    %c0_91 = arith.constant 0 : index
    %c896 = arith.constant 896 : index
    %101 = vector.load %arg13[%c0_91, %c896] : memref<2x1568xf32, #tpu.memory_space<vmem>>, vector<2x224xf32>
    tpu.vector_store %arg13[%c0_91, %c896], %100 {strides = array<i32>} : memref<2x1568xf32, #tpu.memory_space<vmem>>, vector<2x224xf32>,
    %102 = vector.extract_strided_slice %86 {offsets = [0, 5, 0], sizes = [2, 1, 224], strides = [1, 1, 1]} : vector<2x7x224xf32> to vector<2x1x224xf32>
    %103 = vector.shape_cast %102 : vector<2x1x224xf32> to vector<2x224xf32>
    %c0_92 = arith.constant 0 : index
    %c1120 = arith.constant 1120 : index
    %104 = vector.load %arg13[%c0_92, %c1120] : memref<2x1568xf32, #tpu.memory_space<vmem>>, vector<2x224xf32>
    tpu.vector_store %arg13[%c0_92, %c1120], %103 {strides = array<i32>} : memref<2x1568xf32, #tpu.memory_space<vmem>>, vector<2x224xf32>,
    %105 = vector.extract_strided_slice %86 {offsets = [0, 6, 0], sizes = [2, 1, 224], strides = [1, 1, 1]} : vector<2x7x224xf32> to vector<2x1x224xf32>
    %106 = vector.shape_cast %105 : vector<2x1x224xf32> to vector<2x224xf32>
    %c0_93 = arith.constant 0 : index
    %c1344 = arith.constant 1344 : index
    %107 = vector.load %arg13[%c0_93, %c1344] : memref<2x1568xf32, #tpu.memory_space<vmem>>, vector<2x224xf32>
    tpu.vector_store %arg13[%c0_93, %c1344], %106 {strides = array<i32>} : memref<2x1568xf32, #tpu.memory_space<vmem>>, vector<2x224xf32>,
    %c0_94 = arith.constant 0 : index
    %c0_95 = arith.constant 0 : index
    %108 = vector.load %arg13[%c0_94, %c0_95] : memref<2x1568xf32, #tpu.memory_space<vmem>>, vector<2x1568xf32>
    %c0_96 = arith.constant 0 : index
    %c0_97 = arith.constant 0 : index
    %109 = vector.load %arg4[%c0_96, %c0_97] : memref<1568x100xf32, #tpu.memory_space<vmem>>, vector<1568x100xf32>
    %cst_98 = arith.constant dense<0.000000e+00> : vector<2x100xf32>
    %110 = tpu.matmul %108, %109, %cst_98 {dimension_numbers = #tpu.dot_dimension_numbers<[1], [0], [0], [1], [0, 0, 1, 1], [], []>} : vector<2x1568xf32>, vector<1568x100xf32>, vector<2x100xf32> -> vector<2x100xf32>
    %c0_99 = arith.constant 0 : index
    %c0_100 = arith.constant 0 : index
    %111 = vector.load %arg5[%c0_99, %c0_100] : memref<1x100xf32, #tpu.memory_space<vmem>>, vector<1x100xf32>
    %112 = vector.broadcast %111 : vector<1x100xf32> to vector<2x100xf32>
    %113 = arith.addf %110, %112 : vector<2x100xf32>
    %cst_101 = arith.constant 0.000000e+00 : f32
    %114 = vector.broadcast %cst_101 : f32 to vector<2x100xf32>
    %115 = arith.cmpf ogt, %113, %114 : vector<2x100xf32>
    %cst_102 = arith.constant 0.00999999977 : f32
    %116 = vector.broadcast %cst_102 : f32 to vector<2x100xf32>
    %117 = arith.mulf %116, %113 : vector<2x100xf32>
    %118 = arith.select %115, %113, %117 : vector<2x100xi1>, vector<2x100xf32>
    %c0_103 = arith.constant 0 : index
    %c0_104 = arith.constant 0 : index
    %119 = vector.load %arg6[%c0_103, %c0_104] : memref<100x27xf32, #tpu.memory_space<vmem>>, vector<100x27xf32>
    %cst_105 = arith.constant dense<0.000000e+00> : vector<2x27xf32>
    %120 = tpu.matmul %118, %119, %cst_105 {dimension_numbers = #tpu.dot_dimension_numbers<[1], [0], [0], [1], [0, 0, 1, 1], [], []>} : vector<2x100xf32>, vector<100x27xf32>, vector<2x27xf32> -> vector<2x27xf32>
    %c0_106 = arith.constant 0 : index
    %c0_107 = arith.constant 0 : index
    %121 = vector.load %arg7[%c0_106, %c0_107] : memref<1x27xf32, #tpu.memory_space<vmem>>, vector<1x27xf32>
    %122 = vector.broadcast %121 : vector<1x27xf32> to vector<2x27xf32>
    %123 = arith.addf %120, %122 : vector<2x27xf32>
    %c0_108 = arith.constant 0 : index
    %c0_109 = arith.constant 0 : index
    %124 = vector.load %arg8[%c0_108, %c0_109] : memref<2x27xf32, #tpu.memory_space<vmem>>, vector<2x27xf32>
    tpu.vector_store %arg8[%c0_108, %c0_109], %123 {strides = array<i32>} : memref<2x27xf32, #tpu.memory_space<vmem>>, vector<2x27xf32>,
    return
  }
  func.func @transform_0(%arg0: i32) -> (i32, i32, i32) {
    %c0_i32 = arith.constant 0 : i32
    %c0_i32_0 = arith.constant 0 : i32
    %c0_i32_1 = arith.constant 0 : i32
    return %arg0, %c0_i32, %c0_i32_0 : i32, i32, i32
  }
  func.func @transform_1(%arg0: i32) -> (i32, i32) {
    %c0_i32 = arith.constant 0 : i32
    %c0_i32_0 = arith.constant 0 : i32
    %c0_i32_1 = arith.constant 0 : i32
    return %c0_i32, %c0_i32_0 : i32, i32
  }
  func.func @transform_2(%arg0: i32) -> (i32, i32) {
    %c0_i32 = arith.constant 0 : i32
    %c0_i32_0 = arith.constant 0 : i32
    %c0_i32_1 = arith.constant 0 : i32
    return %c0_i32, %c0_i32_0 : i32, i32
  }
  func.func @transform_3(%arg0: i32) -> (i32, i32) {
    %c0_i32 = arith.constant 0 : i32
    %c0_i32_0 = arith.constant 0 : i32
    %c0_i32_1 = arith.constant 0 : i32
    return %c0_i32, %c0_i32_0 : i32, i32
  }
  func.func @transform_4(%arg0: i32) -> (i32, i32) {
    %c0_i32 = arith.constant 0 : i32
    %c0_i32_0 = arith.constant 0 : i32
    %c0_i32_1 = arith.constant 0 : i32
    return %c0_i32, %c0_i32_0 : i32, i32
  }
  func.func @transform_5(%arg0: i32) -> (i32, i32) {
    %c0_i32 = arith.constant 0 : i32
    %c0_i32_0 = arith.constant 0 : i32
    %c0_i32_1 = arith.constant 0 : i32
    return %c0_i32, %c0_i32_0 : i32, i32
  }
  func.func @transform_6(%arg0: i32) -> (i32, i32) {
    %c0_i32 = arith.constant 0 : i32
    %c0_i32_0 = arith.constant 0 : i32
    %c0_i32_1 = arith.constant 0 : i32
    return %c0_i32, %c0_i32_0 : i32, i32
  }
  func.func @transform_7(%arg0: i32) -> (i32, i32) {
    %c0_i32 = arith.constant 0 : i32
    %c0_i32_0 = arith.constant 0 : i32
    return %arg0, %c0_i32 : i32, i32
  }
}

</mosaic_0001>

<bundles_post_ra>
// kernel: cnn_forward.1
= control target key start
LH: loop header
LB: loop body
LE: loop exit
PB: predicated region body
PF: predicated region fallthrough
CT: control target
= control target key end

     0   :  { %s5908_s28 = smov 6   ;;  %s11784_s0 = inlined_call_operand.vmem [shape: f32[2,28,84], index: 0, kind: input, shape index: {}]   ;;  %s11785_s1 = inlined_call_operand.vmem [shape: f32[480,448], index: 1, kind: input, shape index: {}]   ;;  %s11786_s2 = inlined_call_operand.vmem [shape: f32[1440,448], index: 2, kind: input, shape index: {}]   ;;  %s11787_s3 = inlined_call_operand.vmem [shape: f32[1568,100], index: 3, kind: input, shape index: {}]   ;;  %s11788_s4 = inlined_call_operand.vmem [shape: f32[1,100], index: 4, kind: input, shape index: {}]   ;;  %s11789_s5 = inlined_call_operand.vmem [shape: f32[100,27], index: 5, kind: input, shape index: {}]   ;;  %s11790_s6 = inlined_call_operand.vmem [shape: f32[1,27], index: 6, kind: input, shape index: {}]   ;;  %s11791_s7 = inlined_call_operand.hbm [shape: f32[2,27], index: 7, kind: output, shape index: {}]  }
   0x1   :  { %v53_v0 = vld [vmem:[%s11784_s0] sm:$0xff]  ;;  %v55_v1 = vld [vmem:[%s11784_s0 + $0x10] sm:$0xff] }
   0x2   :  { %69 = vrot.lane.b32.xlu0 %v53_v0, %s5908_s28  ;;  %73 = vrot.lane.b32.xlu1 %v55_v1, %s5908_s28  ;;  %v57_v2 = vld [vmem:[%s11784_s0 + $0x20] sm:$0xff] }
   0x3   :  { %77 = vrot.lane.b32.xlu2 %v57_v2, %s5908_s28 }
   0x4   :  { %12 = vsyncpa [#allocation8], 0  ;;  %v54_v3 = vld [vmem:[%s11784_s0 + $0x8] sm:$0xff]  ;;  %v56_v4 = vld [vmem:[%s11784_s0 + $0x18] sm:$0xf]  ;;  %vm33_vm0 = vcmask 48128  }
   0x5   :  { %v58_v5 = vld [vmem:[%s11784_s0 + $0x28] sm:$0xff]  ;;  %v59_v6 = vld [vmem:[%s11784_s0 + $0x30] sm:$0xff]  ;;  %v60_v7 = vld [vmem:[%s11784_s0 + $0x38] sm:$0xf]  ;;  %v11792_v8 = vmov 0.0   ;;  %vm43_vm1 = vcmask 786128  }
   0x6   :  { %34 = vst.msk [vmem:[#allocation2 + $0x2] sm:$0xff] %vm33_vm0, %v11792_v8  ;;  %v569_v9 = vld [vmem:[%s11785_s1 + $0x760] sm:$0xff]  ;;  %vm30_vm2 = vcmask 783360   ;;  %vm37_vm3 = vcmask 44032   ;;  %vm47_vm4 = vcmask 782032   ;;  %vm27_vm5 = vcmask 779264  }
   0x7   :  { %44 = vst.msk [vmem:[#allocation2 + $0x2] sm:$0xff] %vm43_vm1, %v11792_v8  ;;  %v565_v10 = vld [vmem:[%s11785_s1 + $0x740] sm:$0xff]  ;;  %724 = vmatpush.msra.mxu3 %v569_v9  ;;  %vm93_vm6 = vcmask 736304   ;;  %vm11800_vm7 = vcmask 785408   ;;  %vm97_vm8 = vcmask 732208   ;;  %s5910_s18 = smov 64  }
   0x8   :  { %35 = vst.msk [vmem:[#allocation2 + $0xa] sm:$0xff] %vm33_vm0, %v11792_v8  ;;  %v561_v11 = vld [vmem:[%s11785_s1 + $0x720] sm:$0xff]  ;;  %s5911_s19 = smov 32   ;;  %s5912_s20 = smov 96   ;;  %vm220_vm9 = vcmask 261120   ;;  %vm276_vm10 = vcmask 1047808  }
   0x9   :  { %36 = vst.msk [vmem:[#allocation2 + $0x12] sm:$0xff] %vm33_vm0, %v11792_v8  ;;  %725 = vmatpush.msra.mxu3 %v565_v10  ;;  %v557_v12 = vld [vmem:[%s11785_s1 + $0x700] sm:$0xff]  ;;  %vm11799_vm11 = vcmask 1048320   ;;  %vm11802_vm12 = vcmask 523264   ;;  %vm11801_vm13 = vcmask 1048064   ;;  %vm11798_vm14 = vcmask 1041408  }
   0xa   :  { %71 = vrot.lane.b32.xlu0 %v54_v3, %s5908_s28  ;;  %75 = vrot.lane.b32.xlu1 %v56_v4, %s5908_s28  ;;  %39 = vst.msk [vmem:[#allocation2 + $0x2a] sm:$0xff] %vm33_vm0, %v11792_v8  ;;  %v553_v13 = vld [vmem:[%s11785_s1 + $0x6e0] sm:$0xff]  ;;  %vm11795_vm15 = vcmask 1045508   ;;  %s5913_s25 = smov [#allocation7]   ;;  %s5689_s29 = sshll.u32 %s11791_s7, 4  ;;  %s5690_s29 = int_to_ptr.hbm [resolvable:$true] %s5689_s29 }
   0xb   :  { %79 = vrot.lane.b32.xlu2 %v58_v5, %s5908_s28  ;;  %40 = vst.msk [vmem:[#allocation2 + $0x32] sm:$0xff] %vm33_vm0, %v11792_v8  ;;  %726 = vmatpush.msra.mxu3 %v561_v11  ;;  %v549_v14 = vld [vmem:[%s11785_s1 + $0x6c0] sm:$0xff]  ;;  %s5687_s26 = sshll.u32 %s5913_s25, 4  ;;  %s5688_s26 = int_to_ptr.vmem [resolvable:$true] %s5687_s26 }
   0xc   :  { %41 = vst.msk [vmem:[#allocation2 + $0x3a] sm:$0xff] %vm33_vm0, %v11792_v8  ;;  %v545_v15 = vld [vmem:[%s11785_s1 + $0x6a0] sm:$0xff]  ;;  %vm11797_vm0 = vcmask 1043458  }
   0xd   :  { %1867 = vst [vmem:[#allocation3] sm:$0x3] %v11792_v8  ;;  %727 = vmatpush.msra.mxu3 %v557_v12  ;;  %v541_v16 = vld [vmem:[%s11785_s1 + $0x680] sm:$0xff] }
   0xe   :  { %1868 = vst [vmem:[#allocation3 + $0x8] sm:$0x3] %v11792_v8  ;;  %v537_v17 = vld [vmem:[%s11785_s1 + $0x660] sm:$0xff] }
   0xf   :  { %1871 = vst [vmem:[#allocation3 + $0x48] sm:$0x3] %v11792_v8  ;;  %728 = vmatpush.msra.mxu3 %v553_v13  ;;  %v533_v18 = vld [vmem:[%s11785_s1 + $0x640] sm:$0xff] }
  0x10   :  { %1872 = vst [vmem:[#allocation3 + $0x50] sm:$0x3] %v11792_v8  ;;  %v529_v19 = vld [vmem:[%s11785_s1 + $0x620] sm:$0xff] }
  0x11   :  { %1874 = vst [vmem:[#allocation3 + $0x30] sm:$0xf] %v11792_v8  ;;  %729 = vmatpush.msra.mxu3 %v549_v14  ;;  %v525_v21 = vld [vmem:[%s11785_s1 + $0x600] sm:$0xff] }
  0x12   :  { %81 = vrot.lane.b32.xlu0 %v59_v6, %s5908_s28  ;;  %1875 = vst [vmem:[#allocation3 + $0x38] sm:$0xf] %v11792_v8  ;;  %v521_v1 = vld [vmem:[%s11785_s1 + $0x5e0] sm:$0xff] }
  0x13   :  { %1878 = vst [vmem:[#allocation3 + $0x78] sm:$0xf] %v11792_v8  ;;  %730 = vmatpush.msra.mxu3 %v545_v15  ;;  %v517_v2 = vld [vmem:[%s11785_s1 + $0x5c0] sm:$0xff]  ;;  %679 = vmatpush.msra.mxu2 %v521_v1 }
  0x14   :  { %1879 = vst [vmem:[#allocation3 + $0x80] sm:$0xf] %v11792_v8  ;;  %v513_v3 = vld [vmem:[%s11785_s1 + $0x5a0] sm:$0xff] }
  0x15   :  { %45 = vst.msk [vmem:[#allocation2 + $0xa] sm:$0xff] %vm43_vm1, %v11792_v8  ;;  %731 = vmatpush.msra.mxu3 %v541_v16  ;;  %680 = vmatpush.msra.mxu2 %v517_v2  ;;  %v509_v16 = vld [vmem:[%s11785_s1 + $0x580] sm:$0xff] }
  0x16   :  { %46 = vst.msk [vmem:[#allocation2 + $0x12] sm:$0xff] %vm43_vm1, %v11792_v8  ;;  %v465_v1 = vld [vmem:[%s11785_s1 + $0x420] sm:$0xff] }
  0x17   :  { %49 = vst.msk [vmem:[#allocation2 + $0x2a] sm:$0xff] %vm43_vm1, %v11792_v8  ;;  %732 = vmatpush.msra.mxu3 %v537_v17  ;;  %681 = vmatpush.msra.mxu2 %v513_v3  ;;  %v393_v17 = vld [vmem:[%s11785_s1 + $0x1e0] sm:$0xff]  ;;  %v350_v3 = vld [vmem:[%s11785_s1 + $0x88] sm:$0xff] }
  0x18   :  { %50 = vst.msk [vmem:[#allocation2 + $0x32] sm:$0xff] %vm43_vm1, %v11792_v8  ;;  %597 = vmatpush.msra.mxu0 %v393_v17  ;;  %v349_v2 = vld [vmem:[%s11785_s1 + $0x80] sm:$0xff] }
  0x19   :  { %51 = vst.msk [vmem:[#allocation2 + $0x3a] sm:$0xff] %vm43_vm1, %v11792_v8  ;;  %733 = vmatpush.msra.mxu3 %v533_v18  ;;  %v394_v18 = vld [vmem:[%s11785_s1 + $0x1e8] sm:$0xff]  ;;  %682 = vmatpush.msra.mxu2 %v509_v16  ;;  %v333_v17 = vld [vmem:[%s11785_s1] sm:$0xff]  ;;  %vm1317_vm1 = vcmask 1045504  }
  0x1a   :  { %83 = vrot.lane.b32.xlu0 %v60_v7, %s5908_s28  ;;  %31 = vst.msk [vmem:[#allocation2 + $0x1e] sm:$0x3f] %vm30_vm2, %v11792_v8  ;;  %v570_v16 = vld [vmem:[%s11785_s1 + $0x768] sm:$0xff] }
  0x1b   :  { %38 = vst.msk [vmem:[#allocation2 + $0x1a] sm:$0xf] %vm37_vm3, %v11792_v8  ;;  %734 = vmatpush.msra.mxu3 %v529_v19  ;;  %v457_v19 = vld [vmem:[%s11785_s1 + $0x3e0] sm:$0xff] }
  0x1c   :  { %48 = vst.msk [vmem:[#allocation2 + $0x1a] sm:$0xf] %vm47_vm4, %v11792_v8  ;;  %638 = vmatpush.msra.mxu1 %v457_v19 }
  0x1d   :  { %32 = vst.msk [vmem:[#allocation2 + $0x46] sm:$0x3f] %vm30_vm2, %v11792_v8  ;;  %735 = vmatpush.msra.mxu3 %v525_v21  ;;  %v389_v21 = vld [vmem:[%s11785_s1 + $0x1c0] sm:$0xff]  ;;  %vm1313_vm2 = vcmask 1043456  }
  0x1e   :  { %42 = vst.msk [vmem:[#allocation2 + $0x42] sm:$0xf] %vm37_vm3, %v11792_v8  ;;  %598 = vmatpush.msra.mxu0 %v389_v21  ;;  %v458_v21 = vld [vmem:[%s11785_s1 + $0x3e8] sm:$0xff]  ;;  %vm11796_vm3 = vcmask 1045506  }
  0x1f   :  { %52 = vst.msk [vmem:[#allocation2 + $0x42] sm:$0xf] %vm47_vm4, %v11792_v8  ;;  %761 = vmatpush.msrb.mxu3 %v394_v18  ;;  %v334_v18 = vld [vmem:[%s11785_s1 + $0x8] sm:$0xff] }
  0x20   :  { %28 = vst.msk [vmem:[#allocation2] sm:$0x3] %vm27_vm5, %v11792_v8 }
  0x21   :  { %29 = vst.msk [vmem:[#allocation2 + $0x28] sm:$0x3] %vm27_vm5, %v11792_v8 }
  0x22   :  { %1883 = vst.msk [vmem:[#allocation3 + $0x18] sm:$0xff] %vm220_vm9, %v11792_v8 }
  0x23   :  { %1885 = vst.msk [vmem:[#allocation3 + $0x60] sm:$0xff] %vm220_vm9, %v11792_v8 }
  0x24   :  { %1887 = vst.msk [vmem:[#allocation3 + $0x28] sm:$0xff] %vm220_vm9, %v11792_v8 }
  0x25   :  { %1889 = vst.msk [vmem:[#allocation3 + $0x70] sm:$0xff] %vm220_vm9, %v11792_v8 }
  0x5d   :  { %v78_v20 = vpop.permute.xlu2 %77 }
  0x5e   :  { %99 = vst.msk [vmem:[#allocation2 + $0x2a] sm:$0xff] %vm93_vm6, %v78_v20  ;;  %v505_v20 = vld [vmem:[%s11785_s1 + $0x560] sm:$0xff] }
  0x5f   :  { %683 = vmatpush.msra.mxu2 %v505_v20  ;;  %v397_v20 = vld [vmem:[%s11785_s1 + $0x200] sm:$0xff] }
  0x65   :  { %v80_v22 = vpop.permute.xlu2 %79  ;;  %v107_v30 = vld [vmem:[#allocation2 + $0x28] sm:$0xff] }
  0x66   :  { %100 = vst.msk [vmem:[#allocation2 + $0x32] sm:$0xff] %vm93_vm6, %v80_v22  ;;  %v182_v63 = vld [vmem:[#allocation2 + $0x2a] sm:$0xff]  ;;  %v390_v22 = vld [vmem:[%s11785_s1 + $0x1c8] sm:$0xff] }
  0x67   :  { %116 = vst.msk [vmem:[#allocation4 + $0x80] sm:$0xff] %vm11800_vm7, %v107_v30  ;;  %v124_v0 = vld [vmem:[#allocation2 + $0x29] sm:$0xff]  ;;  %762 = vmatpush.msrb.mxu3 %v390_v22  ;;  %v381_v30 = vld [vmem:[%s11785_s1 + $0x180] sm:$0xff]  ;;  %v522_v22 = vld [vmem:[%s11785_s1 + $0x5e8] sm:$0xff] }
  0x6d   :  { %v289_v25 = vld [vmem:[#allocation2 + $0x2c] sm:$0xff] }
  0x6e   :  { %297 = vst.msk [vmem:[#allocation4 + $0x98] sm:$0xff] %vm11800_vm7, %v289_v25  ;;  %v108_v31 = vld [vmem:[#allocation2 + $0x30] sm:$0xff]  ;;  %v385_v25 = vld [vmem:[%s11785_s1 + $0x1a0] sm:$0xff] }
  0x6f   :  { %117 = vst.msk [vmem:[#allocation4 + $0xa0] sm:$0xff] %vm11800_vm7, %v108_v31  ;;  %v240_v58 = vld [vmem:[#allocation2 + $0x2b] sm:$0xff]  ;;  %v382_v31 = vld [vmem:[%s11785_s1 + $0x188] sm:$0xff]  ;;  %599 = vmatpush.msra.mxu0 %v385_v25 }
  0x70   :  { %v183_v6 = vld [vmem:[#allocation2 + $0x32] sm:$0xff]  ;;  %v518_v25 = vld [vmem:[%s11785_s1 + $0x5c8] sm:$0xff] }
  0x71   :  { %v125_v7 = vld [vmem:[#allocation2 + $0x31] sm:$0xff]  ;;  %600 = vmatpush.msra.mxu0 %v381_v30  ;;  %v446_v30 = vld [vmem:[%s11785_s1 + $0x388] sm:$0xff] }
  0x74   :  { %v70_v23 = vpop.permute.xlu0 %69  ;;  %v74_v24 = vpop.permute.xlu1 %73 }
  0x75   :  { %94 = vst.msk [vmem:[#allocation2 + $0x2] sm:$0xff] %vm93_vm6, %v70_v23  ;;  %v320_v4 = vld [vmem:[#allocation4 + $0x98] sm:$0xff] }
  0x76   :  { %96 = vst.msk [vmem:[#allocation2 + $0x12] sm:$0xff] %vm93_vm6, %v74_v24  ;;  %v453_v23 = vld [vmem:[%s11785_s1 + $0x3c0] sm:$0xff] }
  0x77   :  { %v501_v24 = vld [vmem:[%s11785_s1 + $0x540] sm:$0xff]  ;;  %639 = vmatpush.msra.mxu1 %v453_v23  ;;  %v454_v23 = vld [vmem:[%s11785_s1 + $0x3c8] sm:$0xff] }
  0x78   :  { %684 = vmatpush.msra.mxu2 %v501_v24  ;;  %v566_v24 = vld [vmem:[%s11785_s1 + $0x748] sm:$0xff] }
  0x7c   :  { %v72_v26 = vpop.permute.xlu0 %71  ;;  %v178_v27 = vld [vmem:[#allocation2 + $0x2] sm:$0xff]  ;;  %v76_v28 = vpop.permute.xlu1 %75 }
  0x7d   :  { %95 = vst.msk [vmem:[#allocation2 + $0xa] sm:$0xff] %vm93_vm6, %v72_v26  ;;  %194 = vrot.lane.b32.xlu1 %v178_v27, %s5910_s18  ;;  %v103_v29 = vld [vmem:[#allocation2] sm:$0xff]  ;;  %v180_v54 = vld [vmem:[#allocation2 + $0x12] sm:$0xff] }
  0x7e   :  { %98 = vst.msk [vmem:[#allocation2 + $0x1a] sm:$0xf] %vm97_vm8, %v76_v28  ;;  %v120_v32 = vld [vmem:[#allocation2 + $0x1] sm:$0xff]  ;;  %v449_v28 = vld [vmem:[%s11785_s1 + $0x3a0] sm:$0xff] }
  0x7f   :  { %112 = vst.msk [vmem:[#allocation4] sm:$0xff] %vm11800_vm7, %v103_v29  ;;  %v386_v26 = vld [vmem:[%s11785_s1 + $0x1a8] sm:$0xff]  ;;  %v497_v29 = vld [vmem:[%s11785_s1 + $0x520] sm:$0xff]  ;;  %640 = vmatpush.msra.mxu1 %v449_v28 }
  0x80   :  { %763 = vmatpush.msrb.mxu3 %v386_v26  ;;  %685 = vmatpush.msra.mxu2 %v497_v29  ;;  %v562_v28 = vld [vmem:[%s11785_s1 + $0x728] sm:$0xff] }
  0x81   :  { %v514_v29 = vld [vmem:[%s11785_s1 + $0x5a8] sm:$0xff] }
  0x82   :  { %764 = vmatpush.msrb.mxu3 %v382_v31  ;;  %v510_v31 = vld [vmem:[%s11785_s1 + $0x588] sm:$0xff] }
  0x84   :  { %v285_v33 = vld [vmem:[#allocation2 + $0x4] sm:$0xff]  ;;  %v286_v34 = vld [vmem:[#allocation2 + $0xc] sm:$0xff]  ;;  %v82_v36 = vpop.permute.xlu0 %81 }
  0x85   :  { %v237_v35 = vld [vmem:[#allocation2 + $0xb] sm:$0xff]  ;;  %293 = vst.msk [vmem:[#allocation4 + $0x18] sm:$0xff] %vm11800_vm7, %v285_v33  ;;  %v287_v37 = vld [vmem:[#allocation2 + $0x14] sm:$0xff]  ;;  %v288_v38 = vld [vmem:[#allocation2 + $0x1c] sm:$0xff]  ;;  %136 = vrot.lane.b32.xlu1 %v120_v32, %s5912_s20 }
  0x86   :  { %254 = vrot.lane.b32.xlu0 %v237_v35, %s5911_s19  ;;  %v236_v39 = vld [vmem:[#allocation2 + $0x3] sm:$0xff]  ;;  %294 = vst.msk [vmem:[#allocation4 + $0x38] sm:$0xff] %vm11800_vm7, %v286_v34  ;;  %v105_v41 = vld [vmem:[#allocation2 + $0x10] sm:$0xff]  ;;  %v106_v42 = vld [vmem:[#allocation2 + $0x18] sm:$0xff] }
  0x87   :  { %252 = vrot.lane.b32.xlu2 %v236_v39, %s5911_s19  ;;  %295 = vst.msk [vmem:[#allocation4 + $0x58] sm:$0xff] %vm11800_vm7, %v287_v37  ;;  %v104_v40 = vld [vmem:[#allocation2 + $0x8] sm:$0xff]  ;;  %v238_v43 = vld [vmem:[#allocation2 + $0x13] sm:$0xff]  ;;  %v239_v50 = vld [vmem:[#allocation2 + $0x1b] sm:$0xff] }
  0x88   :  { %296 = vst.msk [vmem:[#allocation4 + $0x78] sm:$0xff] %vm11800_vm7, %v288_v38  ;;  %v179_v46 = vld [vmem:[#allocation2 + $0xa] sm:$0xff]  ;;  %v181_v59 = vld [vmem:[#allocation2 + $0x1a] sm:$0xff] }
  0x89   :  { %101 = vst.msk [vmem:[#allocation2 + $0x3a] sm:$0xff] %vm93_vm6, %v82_v36  ;;  %v121_v47 = vld [vmem:[#allocation2 + $0x9] sm:$0xff]  ;;  %v122_v55 = vld [vmem:[#allocation2 + $0x11] sm:$0xff]  ;;  %v123_v60 = vld [vmem:[#allocation2 + $0x19] sm:$0xff] }
  0x8a   :  { %113 = vst.msk [vmem:[#allocation4 + $0x20] sm:$0xff] %vm11800_vm7, %v104_v40  ;;  %v445_v32 = vld [vmem:[%s11785_s1 + $0x380] sm:$0xff]  ;;  %v378_v35 = vld [vmem:[%s11785_s1 + $0x168] sm:$0xff] }
  0x8b   :  { %114 = vst.msk [vmem:[#allocation4 + $0x40] sm:$0xff] %vm11800_vm7, %v105_v41  ;;  %v493_v33 = vld [vmem:[%s11785_s1 + $0x500] sm:$0xff]  ;;  %641 = vmatpush.msra.mxu1 %v445_v32  ;;  %765 = vmatpush.msrb.mxu3 %v378_v35  ;;  %v374_v39 = vld [vmem:[%s11785_s1 + $0x148] sm:$0xff] }
  0x8c   :  { %v6069_v44 = vld [vmem:[#allocation4 + $0x18] sm:$0xff]  ;;  %v84_v45 = vpop.permute.xlu0 %83  ;;  %115 = vst.msk [vmem:[#allocation4 + $0x60] sm:$0xff] %vm11800_vm7, %v106_v42  ;;  %686 = vmatpush.msra.mxu2 %v493_v33  ;;  %v558_v32 = vld [vmem:[%s11785_s1 + $0x708] sm:$0xff] }
  0x8d   :  { %5698 = vmatmul.msk.f32.vlgmr.msra.gmra.mxu3 %vm11800_vm7, %v6069_v44  ;;  %102 = vst.msk [vmem:[#allocation2 + $0x42] sm:$0xf] %vm97_vm8, %v84_v45  ;;  %138 = vrot.lane.b32.xlu1 %v121_v47, %s5912_s20  ;;  %v6080_v51 = vld [vmem:[#allocation4 + $0x38] sm:$0xff]  ;;  %v442_v35 = vld [vmem:[%s11785_s1 + $0x368] sm:$0xff]  ;;  %vm1974_vm8 = vcmask 1043459  }
  0x8e   :  { %256 = vrot.lane.b32.xlu0 %v238_v43, %s5911_s19  ;;  %v6090_v57 = vld [vmem:[#allocation4 + $0x58] sm:$0xff]  ;;  %v370_v43 = vld [vmem:[%s11785_s1 + $0x128] sm:$0xff]  ;;  %766 = vmatpush.msrb.mxu3 %v374_v39 }
  0x8f   :  { %196 = vrot.lane.b32.xlu2 %v179_v46, %s5910_s18  ;;  %v6097_v61 = vld [vmem:[#allocation4 + $0x78] sm:$0xff]  ;;  %v502_v39 = vld [vmem:[%s11785_s1 + $0x548] sm:$0xff] }
  0x90   :  { %v290_v48 = vld [vmem:[#allocation2 + $0x34] sm:$0xff]  ;;  %767 = vmatpush.msrb.mxu3 %v370_v43 }
  0x91   :  { %298 = vst.msk [vmem:[#allocation4 + $0xb8] sm:$0xff] %vm11800_vm7, %v290_v48  ;;  %v109_v49 = vld [vmem:[#allocation2 + $0x38] sm:$0xff]  ;;  %v366_v48 = vld [vmem:[%s11785_s1 + $0x108] sm:$0xff] }
  0x92   :  { %118 = vst.msk [vmem:[#allocation4 + $0xc0] sm:$0xff] %vm11800_vm7, %v109_v49  ;;  %v241_v62 = vld [vmem:[#allocation2 + $0x33] sm:$0xff]  ;;  %768 = vmatpush.msrb.mxu3 %v366_v48  ;;  %v430_v48 = vld [vmem:[%s11785_s1 + $0x308] sm:$0xff] }
  0x93   :  { %v184_v11 = vld [vmem:[#allocation2 + $0x3a] sm:$0xff] }
  0x94   :  { %v291_v52 = vld [vmem:[#allocation2 + $0x3c] sm:$0xff]  ;;  %v292_v53 = vld [vmem:[#allocation2 + $0x44] sm:$0xff] }
  0x95   :  { %5699 = vmatmul.msk.f32.gmra.mxu3 %vm11800_vm7, %v6080_v51  ;;  %299 = vst.msk [vmem:[#allocation4 + $0xd8] sm:$0xff] %vm11800_vm7, %v291_v52  ;;  %140 = vrot.lane.b32.xlu1 %v122_v55, %s5912_s20  ;;  %v110_v56 = vld [vmem:[#allocation2 + $0x40] sm:$0xff]  ;;  %v377_v34 = vld [vmem:[%s11785_s1 + $0x160] sm:$0xff] }
  0x96   :  { %258 = vrot.lane.b32.xlu0 %v239_v50, %s5911_s19  ;;  %300 = vst.msk [vmem:[#allocation4 + $0xf8] sm:$0xff] %vm11800_vm7, %v292_v53  ;;  %v242_v5 = vld [vmem:[#allocation2 + $0x3b] sm:$0xff]  ;;  %v243_v10 = vld [vmem:[#allocation2 + $0x43] sm:$0xff]  ;;  %601 = vmatpush.msra.mxu0 %v377_v34 }
  0x97   :  { %198 = vrot.lane.b32.xlu2 %v180_v54, %s5910_s18  ;;  %119 = vst.msk [vmem:[#allocation4 + $0xe0] sm:$0xff] %vm11800_vm7, %v110_v56  ;;  %v126_v12 = vld [vmem:[#allocation2 + $0x39] sm:$0xff]  ;;  %v185_v14 = vld [vmem:[#allocation2 + $0x42] sm:$0xff] }
  0x98   :  { %v324_v9 = vld [vmem:[#allocation4 + $0xb8] sm:$0xff]  ;;  %v127_v15 = vld [vmem:[#allocation2 + $0x41] sm:$0xff] }
  0x99   :  { %v441_v36 = vld [vmem:[%s11785_s1 + $0x360] sm:$0xff]  ;;  %v362_v53 = vld [vmem:[%s11785_s1 + $0xe8] sm:$0xff] }
  0x9a   :  { %v489_v37 = vld [vmem:[%s11785_s1 + $0x4e0] sm:$0xff]  ;;  %642 = vmatpush.msra.mxu1 %v441_v36  ;;  %769 = vmatpush.msrb.mxu3 %v362_v53  ;;  %v506_v36 = vld [vmem:[%s11785_s1 + $0x568] sm:$0xff] }
  0x9b   :  { %v373_v38 = vld [vmem:[%s11785_s1 + $0x140] sm:$0xff]  ;;  %687 = vmatpush.msra.mxu2 %v489_v37  ;;  %v438_v37 = vld [vmem:[%s11785_s1 + $0x348] sm:$0xff] }
  0x9c   :  { %v328_v13 = vld [vmem:[#allocation4 + $0xd8] sm:$0xff]  ;;  %602 = vmatpush.msra.mxu0 %v373_v38  ;;  %v554_v38 = vld [vmem:[%s11785_s1 + $0x6e8] sm:$0xff] }
  0x9d   :  { %5700 = vmatmul.msk.f32.gmra.mxu3 %vm11800_vm7, %v6090_v57  ;;  %142 = vrot.lane.b32.xlu1 %v123_v60, %s5912_s20  ;;  %v332_v27 = vld [vmem:[#allocation4 + $0xf8] sm:$0xff] }
  0x9e   :  { %260 = vrot.lane.b32.xlu0 %v240_v58, %s5911_s19  ;;  %v437_v40 = vld [vmem:[%s11785_s1 + $0x340] sm:$0xff]  ;;  %v358_v58 = vld [vmem:[%s11785_s1 + $0xc8] sm:$0xff] }
  0x9f   :  { %200 = vrot.lane.b32.xlu2 %v181_v59, %s5910_s18  ;;  %v485_v41 = vld [vmem:[%s11785_s1 + $0x4c0] sm:$0xff]  ;;  %643 = vmatpush.msra.mxu1 %v437_v40 }
  0xa0   :  { %v369_v42 = vld [vmem:[%s11785_s1 + $0x120] sm:$0xff]  ;;  %688 = vmatpush.msra.mxu2 %v485_v41  ;;  %770 = vmatpush.msrb.mxu3 %v358_v58 }
  0xa1   :  { %v433_v45 = vld [vmem:[%s11785_s1 + $0x320] sm:$0xff]  ;;  %603 = vmatpush.msra.mxu0 %v369_v42 }
  0xa2   :  { %v481_v46 = vld [vmem:[%s11785_s1 + $0x4a0] sm:$0xff]  ;;  %644 = vmatpush.msra.mxu1 %v433_v45  ;;  %v434_v45 = vld [vmem:[%s11785_s1 + $0x328] sm:$0xff] }
  0xa3   :  { %v365_v47 = vld [vmem:[%s11785_s1 + $0x100] sm:$0xff]  ;;  %689 = vmatpush.msra.mxu2 %v481_v46  ;;  %v550_v46 = vld [vmem:[%s11785_s1 + $0x6c8] sm:$0xff] }
  0xa4   :  { %604 = vmatpush.msra.mxu0 %v365_v47  ;;  %v429_v49 = vld [vmem:[%s11785_s1 + $0x300] sm:$0xff]  ;;  %v498_v47 = vld [vmem:[%s11785_s1 + $0x528] sm:$0xff] }
  0xa5   :  { %5701 = vmatmul.msk.f32.gmra.mxu3 %vm11800_vm7, %v6097_v61  ;;  %144 = vrot.lane.b32.xlu1 %v124_v0, %s5912_s20  ;;  %v477_v50 = vld [vmem:[%s11785_s1 + $0x480] sm:$0xff] }
  0xa6   :  { %262 = vrot.lane.b32.xlu0 %v241_v62, %s5911_s19  ;;  %645 = vmatpush.msra.mxu1 %v429_v49  ;;  %v361_v52 = vld [vmem:[%s11785_s1 + $0xe0] sm:$0xff]  ;;  %v494_v49 = vld [vmem:[%s11785_s1 + $0x508] sm:$0xff] }
  0xa7   :  { %202 = vrot.lane.b32.xlu2 %v182_v63, %s5910_s18  ;;  %690 = vmatpush.msra.mxu2 %v477_v50  ;;  %v425_v54 = vld [vmem:[%s11785_s1 + $0x2e0] sm:$0xff]  ;;  %v354_v63 = vld [vmem:[%s11785_s1 + $0xa8] sm:$0xff] }
  0xa8   :  { %605 = vmatpush.msra.mxu0 %v361_v52  ;;  %v473_v55 = vld [vmem:[%s11785_s1 + $0x460] sm:$0xff]  ;;  %646 = vmatpush.msra.mxu1 %v425_v54  ;;  %v546_v50 = vld [vmem:[%s11785_s1 + $0x6a8] sm:$0xff] }
  0xa9   :  { %v357_v56 = vld [vmem:[%s11785_s1 + $0xc0] sm:$0xff]  ;;  %691 = vmatpush.msra.mxu2 %v473_v55  ;;  %771 = vmatpush.msrb.mxu3 %v354_v63  ;;  %v391_v63 = vld [vmem:[%s11785_s1 + $0x1d0] sm:$0xff] }
  0xaa   :  { %v421_v59 = vld [vmem:[%s11785_s1 + $0x2c0] sm:$0xff]  ;;  %606 = vmatpush.msra.mxu0 %v357_v56 }
  0xab   :  { %v469_v60 = vld [vmem:[%s11785_s1 + $0x440] sm:$0xff]  ;;  %647 = vmatpush.msra.mxu1 %v421_v59  ;;  %772 = vmatpush.msrb.mxu3 %v350_v3  ;;  %v426_v59 = vld [vmem:[%s11785_s1 + $0x2e8] sm:$0xff] }
  0xac   :  { %v353_v62 = vld [vmem:[%s11785_s1 + $0xa0] sm:$0xff]  ;;  %692 = vmatpush.msra.mxu2 %v469_v60  ;;  %v395_v60 = vld [vmem:[%s11785_s1 + $0x1f0] sm:$0xff]  ;;  %v486_v3 = vld [vmem:[%s11785_s1 + $0x4c8] sm:$0xff] }
  0xad   :  { %5702 = vmatmul.msk.f32.gmra.mxu3 %vm11800_vm7, %v320_v4  ;;  %146 = vrot.lane.b32.xlu1 %v125_v7, %s5912_s20  ;;  %v417_v0 = vld [vmem:[%s11785_s1 + $0x2a0] sm:$0xff]  ;;  %v346_v7 = vld [vmem:[%s11785_s1 + $0x68] sm:$0xff] }
  0xae   :  { %264 = vrot.lane.b32.xlu0 %v242_v5, %s5911_s19  ;;  %607 = vmatpush.msra.mxu0 %v353_v62  ;;  %v413_v4 = vld [vmem:[%s11785_s1 + $0x280] sm:$0xff]  ;;  %v490_v62 = vld [vmem:[%s11785_s1 + $0x4e8] sm:$0xff] }
  0xaf   :  { %204 = vrot.lane.b32.xlu2 %v183_v6, %s5910_s18  ;;  %648 = vmatpush.msra.mxu1 %v417_v0  ;;  %v461_v5 = vld [vmem:[%s11785_s1 + $0x400] sm:$0xff]  ;;  %v422_v0 = vld [vmem:[%s11785_s1 + $0x2c8] sm:$0xff] }
  0xb0   :  { %693 = vmatpush.msra.mxu2 %v465_v1  ;;  %608 = vmatpush.msra.mxu0 %v349_v2  ;;  %v345_v6 = vld [vmem:[%s11785_s1 + $0x60] sm:$0xff]  ;;  %v542_v1 = vld [vmem:[%s11785_s1 + $0x688] sm:$0xff]  ;;  %v387_v2 = vld [vmem:[%s11785_s1 + $0x1b0] sm:$0xff] }
  0xb1   :  { %649 = vmatpush.msra.mxu1 %v413_v4  ;;  %773 = vmatpush.msrb.mxu3 %v346_v7 }
  0xb2   :  { %694 = vmatpush.msra.mxu2 %v461_v5  ;;  %609 = vmatpush.msra.mxu0 %v345_v6 }
  0xb4   :  { %888 = vmatpush.msrb.mxu2 %v570_v16  ;;  %v375_v16 = vld [vmem:[%s11785_s1 + $0x150] sm:$0xff] }
  0xb5   :  { %5703 = vmatmul.msk.f32.gmra.mxu3 %vm11800_vm7, %v324_v9  ;;  %148 = vrot.lane.b32.xlu1 %v126_v12, %s5912_s20  ;;  %v409_v9 = vld [vmem:[%s11785_s1 + $0x260] sm:$0xff] }
  0xb6   :  { %266 = vrot.lane.b32.xlu0 %v243_v10, %s5911_s19  ;;  %v341_v10 = vld [vmem:[%s11785_s1 + $0x40] sm:$0xff]  ;;  %650 = vmatpush.msra.mxu1 %v409_v9  ;;  %v383_v9 = vld [vmem:[%s11785_s1 + $0x190] sm:$0xff] }
  0xb7   :  { %206 = vrot.lane.b32.xlu2 %v184_v11, %s5910_s18  ;;  %v342_v11 = vld [vmem:[%s11785_s1 + $0x48] sm:$0xff]  ;;  %v405_v12 = vld [vmem:[%s11785_s1 + $0x240] sm:$0xff]  ;;  %610 = vmatpush.msra.mxu0 %v341_v10 }
  0xb8   :  { %774 = vmatpush.msrb.mxu3 %v342_v11  ;;  %651 = vmatpush.msra.mxu1 %v405_v12  ;;  %v418_v12 = vld [vmem:[%s11785_s1 + $0x2a8] sm:$0xff] }
  0xb9   :  { %889 = vmatpush.msrb.mxu2 %v566_v24 }
  0xbb   :  { %890 = vmatpush.msrb.mxu2 %v562_v28  ;;  %v410_v28 = vld [vmem:[%s11785_s1 + $0x268] sm:$0xff] }
  0xbd   :  { %5704 = vmatmul.msk.f32.gmra.mxu3 %vm11800_vm7, %v328_v13  ;;  %150 = vrot.lane.b32.xlu1 %v127_v15, %s5912_s20  ;;  %v337_v13 = vld [vmem:[%s11785_s1 + $0x20] sm:$0xff] }
  0xbe   :  { %v401_v15 = vld [vmem:[%s11785_s1 + $0x220] sm:$0xff]  ;;  %611 = vmatpush.msra.mxu0 %v337_v13  ;;  %891 = vmatpush.msrb.mxu2 %v558_v32  ;;  %v538_v13 = vld [vmem:[%s11785_s1 + $0x668] sm:$0xff] }
  0xbf   :  { %208 = vrot.lane.b32.xlu2 %v185_v14, %s5910_s18  ;;  %v338_v14 = vld [vmem:[%s11785_s1 + $0x28] sm:$0xff]  ;;  %652 = vmatpush.msra.mxu1 %v401_v15 }
  0xc0   :  { %775 = vmatpush.msrb.mxu3 %v338_v14  ;;  %612 = vmatpush.msra.mxu0 %v333_v17  ;;  %v379_v14 = vld [vmem:[%s11785_s1 + $0x170] sm:$0xff]  ;;  %v482_v15 = vld [vmem:[%s11785_s1 + $0x4a8] sm:$0xff] }
  0xc1   :  { %653 = vmatpush.msra.mxu1 %v397_v20  ;;  %892 = vmatpush.msrb.mxu2 %v554_v38  ;;  %v414_v17 = vld [vmem:[%s11785_s1 + $0x288] sm:$0xff] }
  0xc2   :  { %776 = vmatpush.msrb.mxu3 %v334_v18  ;;  %802 = vmatpush.msrb.mxu0 %v458_v21  ;;  %v371_v18 = vld [vmem:[%s11785_s1 + $0x130] sm:$0xff]  ;;  %v534_v20 = vld [vmem:[%s11785_s1 + $0x648] sm:$0xff] }
  0xc3   :  { %843 = vmatpush.msrb.mxu1 %v522_v22  ;;  %893 = vmatpush.msrb.mxu2 %v550_v46  ;;  %v406_v32 = vld [vmem:[%s11785_s1 + $0x248] sm:$0xff] }
  0xc4   :  { %803 = vmatpush.msrb.mxu0 %v454_v23  ;;  %925 = vmatpush.msra.mxu3 %v395_v60 }
  0xc5   :  { %5705 = vmatmul.msk.f32.gmra.mxu3 %vm11800_vm7, %v332_v27  ;;  %844 = vmatpush.msrb.mxu1 %v518_v25  ;;  %v450_v27 = vld [vmem:[%s11785_s1 + $0x3a8] sm:$0xff]  ;;  %v367_v25 = vld [vmem:[%s11785_s1 + $0x110] sm:$0xff] }
  0xc6   :  { %804 = vmatpush.msrb.mxu0 %v450_v27  ;;  %894 = vmatpush.msrb.mxu2 %v546_v50  ;;  %v398_v50 = vld [vmem:[%s11785_s1 + $0x208] sm:$0xff] }
  0xc7   :  { %845 = vmatpush.msrb.mxu1 %v514_v29  ;;  %926 = vmatpush.msra.mxu3 %v391_v63  ;;  %v363_v29 = vld [vmem:[%s11785_s1 + $0xf0] sm:$0xff] }
  0xc8   :  { %805 = vmatpush.msrb.mxu0 %v446_v30  ;;  %895 = vmatpush.msrb.mxu2 %v542_v1  ;;  %v474_v30 = vld [vmem:[%s11785_s1 + $0x468] sm:$0xff]  ;;  %v335_v63 = vld [vmem:[%s11785_s1 + $0x10] sm:$0xff] }
  0xc9   :  { %846 = vmatpush.msrb.mxu1 %v510_v31  ;;  %927 = vmatpush.msra.mxu3 %v387_v2  ;;  %v359_v31 = vld [vmem:[%s11785_s1 + $0xd0] sm:$0xff] }
  0xca   :  { %806 = vmatpush.msrb.mxu0 %v442_v35  ;;  %896 = vmatpush.msrb.mxu2 %v538_v13  ;;  %v470_v35 = vld [vmem:[%s11785_s1 + $0x448] sm:$0xff]  ;;  %v459_v1 = vld [vmem:[%s11785_s1 + $0x3f0] sm:$0xff] }
  0xcb   :  { %847 = vmatpush.msrb.mxu1 %v506_v36  ;;  %928 = vmatpush.msra.mxu3 %v383_v9 }
  0xcc   :  { %807 = vmatpush.msrb.mxu0 %v438_v37  ;;  %897 = vmatpush.msrb.mxu2 %v534_v20  ;;  %v511_v20 = vld [vmem:[%s11785_s1 + $0x590] sm:$0xff] }
  0xcd   :  { %848 = vmatpush.msrb.mxu1 %v502_v39  ;;  %929 = vmatpush.msra.mxu3 %v379_v14 }
  0xce   :  { %808 = vmatpush.msrb.mxu0 %v434_v45  ;;  %v526_v45 = vld [vmem:[%s11785_s1 + $0x608] sm:$0xff] }
  0xcf   :  { %849 = vmatpush.msrb.mxu1 %v498_v47  ;;  %930 = vmatpush.msra.mxu3 %v375_v16  ;;  %v347_v47 = vld [vmem:[%s11785_s1 + $0x70] sm:$0xff] }
  0xd0   :  { %809 = vmatpush.msrb.mxu0 %v430_v48  ;;  %v466_v48 = vld [vmem:[%s11785_s1 + $0x428] sm:$0xff]  ;;  %v451_v16 = vld [vmem:[%s11785_s1 + $0x3b0] sm:$0xff] }
  0xd1   :  { %850 = vmatpush.msrb.mxu1 %v494_v49  ;;  %931 = vmatpush.msra.mxu3 %v371_v18  ;;  %v343_v49 = vld [vmem:[%s11785_s1 + $0x50] sm:$0xff] }
  0xd2   :  { %810 = vmatpush.msrb.mxu0 %v426_v59  ;;  %v515_v18 = vld [vmem:[%s11785_s1 + $0x5b0] sm:$0xff] }
  0xd3   :  { %851 = vmatpush.msrb.mxu1 %v490_v62  ;;  %932 = vmatpush.msra.mxu3 %v367_v25 }
  0xd4   :  { %811 = vmatpush.msrb.mxu0 %v422_v0 }
  0xd5   :  { %852 = vmatpush.msrb.mxu1 %v486_v3  ;;  %933 = vmatpush.msra.mxu3 %v363_v29  ;;  %v523_v3 = vld [vmem:[%s11785_s1 + $0x5f0] sm:$0xff] }
  0xd6   :  { %812 = vmatpush.msrb.mxu0 %v418_v12  ;;  %v443_v29 = vld [vmem:[%s11785_s1 + $0x370] sm:$0xff] }
  0xd7   :  { %853 = vmatpush.msrb.mxu1 %v482_v15  ;;  %934 = vmatpush.msra.mxu3 %v359_v31  ;;  %v439_v31 = vld [vmem:[%s11785_s1 + $0x350] sm:$0xff] }
  0xd8   :  { %813 = vmatpush.msrb.mxu0 %v414_v17  ;;  %v563_v17 = vld [vmem:[%s11785_s1 + $0x730] sm:$0xff] }
  0xda   :  { %814 = vmatpush.msrb.mxu0 %v410_v28 }
  0xdc   :  { %815 = vmatpush.msrb.mxu0 %v406_v32  ;;  %v555_v32 = vld [vmem:[%s11785_s1 + $0x6f0] sm:$0xff] }
  0xe1   :  { %v253_v19 = vpop.permute.xlu2 %252 }
  0xe9   :  { %v6334_v26 = vpop.permute.xlu2 %196 }
  0xea   :  { %223 = vst.msk [vmem:[#allocation4 + $0x30] sm:$0xff] %vm220_vm9, %v6334_v26 }
  0xef   :  { %v195_v33 = vpop.permute.xlu1 %194 }
  0xf0   :  { %221 = vst.msk [vmem:[#allocation4 + $0x10] sm:$0xff] %vm220_vm9, %v195_v33 }
  0xf1   :  { %v6356_v34 = vpop.permute.xlu2 %198  ;;  %277 = vst.msk [vmem:[#allocation4 + $0x10] sm:$0xff] %vm276_vm10, %v253_v19  ;;  %v478_v19 = vld [vmem:[%s11785_s1 + $0x488] sm:$0xff] }
  0xf2   :  { %225 = vst.msk [vmem:[#allocation4 + $0x50] sm:$0xff] %vm220_vm9, %v6356_v34  ;;  %854 = vmatpush.msrb.mxu1 %v478_v19  ;;  %v447_v19 = vld [vmem:[%s11785_s1 + $0x390] sm:$0xff] }
  0xf4   :  { %855 = vmatpush.msrb.mxu1 %v474_v30  ;;  %v507_v30 = vld [vmem:[%s11785_s1 + $0x570] sm:$0xff] }
  0xf6   :  { %856 = vmatpush.msrb.mxu1 %v470_v35 }
  0xf7   :  { %v137_v41 = vpop.permute.xlu1 %136 }
  0xf8   :  { %v255_v40 = vpop.permute.xlu0 %254  ;;  %v6382_v43 = vld [vmem:[#allocation4 + $0x10] sm:$0xff]  ;;  %161 = vst.msk [vmem:[#allocation4] sm:$0xff] %vm11799_vm11, %v137_v41  ;;  %857 = vmatpush.msrb.mxu1 %v466_v48 }
  0xf9   :  { %278 = vst.msk [vmem:[#allocation4 + $0x30] sm:$0xff] %vm276_vm10, %v255_v40  ;;  %v6378_v42 = vpop.permute.xlu2 %200  ;;  %695 = vmatmul.f32.vlgmr.msra.gmra.mxu2 %v6382_v43  ;;  %v351_v40 = vld [vmem:[%s11785_s1 + $0x90] sm:$0xff]  ;;  %v396_v48 = vld [vmem:[%s11785_s1 + $0x1f8] sm:$0xff] }
  0xfa   :  { %227 = vst.msk [vmem:[#allocation4 + $0x70] sm:$0xff] %vm220_vm9, %v6378_v42 }
  0xfb   :  { %163 = vst.msk [vmem:[#allocation4 + $0x8] sm:$0xff] %vm11802_vm12, %v137_v41 }
  0xfc   :  { %219 = vst.msk [vmem:[#allocation4 + $0x8] sm:$0xff] %vm11801_vm13, %v195_v33  ;;  %v530_v33 = vld [vmem:[%s11785_s1 + $0x628] sm:$0xff] }
  0xfd   :  { %898 = vmatpush.msrb.mxu2 %v530_v33  ;;  %v503_v33 = vld [vmem:[%s11785_s1 + $0x550] sm:$0xff] }
  0xff   :  { %v139_v54 = vpop.permute.xlu1 %138  ;;  %v6413_v56 = vld [vmem:[#allocation4] sm:$0xff]  ;;  %899 = vmatpush.msrb.mxu2 %v526_v45  ;;  %v427_v45 = vld [vmem:[%s11785_s1 + $0x2f0] sm:$0xff] }
 0x100   :  { %v257_v52 = vpop.permute.xlu0 %256  ;;  %v6409_v55 = vld [vmem:[#allocation4 + $0x30] sm:$0xff]  ;;  %164 = vst.msk [vmem:[#allocation4 + $0x20] sm:$0xff] %vm11799_vm11, %v139_v54  ;;  %613 = vmatmul.f32.vlgmr.msra.gmra.mxu0 %v6413_v56  ;;  %777 = vmatmul.f32.vlgmr.msrb.gmra.mxu3 %v6413_v56 }
 0x101   :  { %279 = vst.msk [vmem:[#allocation4 + $0x50] sm:$0xff] %vm276_vm10, %v257_v52  ;;  %v6407_v53 = vpop.permute.xlu2 %202  ;;  %698 = vmatmul.f32.gmra.mxu2 %v6409_v55  ;;  %v462_v52 = vld [vmem:[%s11785_s1 + $0x408] sm:$0xff] }
 0x102   :  { %229 = vst.msk [vmem:[#allocation4 + $0x90] sm:$0xff] %vm220_vm9, %v6407_v53  ;;  %858 = vmatpush.msrb.mxu1 %v462_v52  ;;  %v543_v52 = vld [vmem:[%s11785_s1 + $0x690] sm:$0xff] }
 0x103   :  { %165 = vst.msk [vmem:[#allocation4 + $0x28] sm:$0xff] %vm11802_vm12, %v139_v54  ;;  %v6419_v58 = vld [vmem:[#allocation4 + $0x8] sm:$0xff] }
 0x104   :  { %222 = vst.msk [vmem:[#allocation4 + $0x28] sm:$0xff] %vm11801_vm13, %v6334_v26  ;;  %654 = vmatmul.f32.vlgmr.msra.gmra.mxu1 %v6419_v58  ;;  %v571_v54 = vld [vmem:[%s11785_s1 + $0x770] sm:$0xff] }
 0x105   :  { %1052 = vmatpush.msra.mxu2 %v571_v54  ;;  %1007 = vmatpush.msra.mxu1 %v523_v3  ;;  %v487_v54 = vld [vmem:[%s11785_s1 + $0x4d0] sm:$0xff] }
 0x106   :  { %v483_v3 = vld [vmem:[%s11785_s1 + $0x4b0] sm:$0xff] }
 0x107   :  { %v141_v6 = vpop.permute.xlu1 %140  ;;  %v6459_v10 = vld [vmem:[#allocation4 + $0x20] sm:$0xff] }
 0x108   :  { %v259_v4 = vpop.permute.xlu0 %258  ;;  %v6452_v7 = vld [vmem:[#allocation4 + $0x50] sm:$0xff]  ;;  %166 = vst.msk [vmem:[#allocation4 + $0x40] sm:$0xff] %vm11799_vm11, %v141_v6  ;;  %616 = vmatmul.f32.gmra.mxu0 %v6459_v10  ;;  %780 = vmatmul.f32.gmra.mxu3 %v6459_v10 }
 0x109   :  { %280 = vst.msk [vmem:[#allocation4 + $0x70] sm:$0xff] %vm276_vm10, %v259_v4  ;;  %v6450_v5 = vpop.permute.xlu2 %204  ;;  %701 = vmatmul.f32.gmra.mxu2 %v6452_v7  ;;  %v455_v4 = vld [vmem:[%s11785_s1 + $0x3d0] sm:$0xff] }
 0x10a   :  { %231 = vst.msk [vmem:[#allocation4 + $0xb0] sm:$0xff] %vm220_vm9, %v6450_v5 }
 0x10b   :  { %167 = vst.msk [vmem:[#allocation4 + $0x48] sm:$0xff] %vm11802_vm12, %v141_v6  ;;  %v6465_v11 = vld [vmem:[#allocation4 + $0x28] sm:$0xff] }
 0x10c   :  { %224 = vst.msk [vmem:[#allocation4 + $0x48] sm:$0xff] %vm11801_vm13, %v6356_v34  ;;  %657 = vmatmul.f32.gmra.mxu1 %v6465_v11  ;;  %v355_v34 = vld [vmem:[%s11785_s1 + $0xb0] sm:$0xff] }
 0x10d   :  { %935 = vmatpush.msra.mxu3 %v355_v34  ;;  %v519_v6 = vld [vmem:[%s11785_s1 + $0x5d0] sm:$0xff] }
 0x10e   :  { %1008 = vmatpush.msra.mxu1 %v519_v6  ;;  %v372_v6 = vld [vmem:[%s11785_s1 + $0x138] sm:$0xff] }
 0x10f   :  { %v143_v23 = vpop.permute.xlu1 %142  ;;  %v6508_v26 = vld [vmem:[#allocation4 + $0x40] sm:$0xff]  ;;  %936 = vmatpush.msra.mxu3 %v351_v40  ;;  %v431_v40 = vld [vmem:[%s11785_s1 + $0x310] sm:$0xff] }
 0x110   :  { %v261_v21 = vpop.permute.xlu0 %260  ;;  %v6501_v24 = vld [vmem:[#allocation4 + $0x70] sm:$0xff]  ;;  %168 = vst.msk [vmem:[#allocation4 + $0x60] sm:$0xff] %vm11799_vm11, %v143_v23  ;;  %619 = vmatmul.f32.gmra.mxu0 %v6508_v26  ;;  %783 = vmatmul.f32.gmra.mxu3 %v6508_v26 }
 0x111   :  { %281 = vst.msk [vmem:[#allocation4 + $0x90] sm:$0xff] %vm276_vm10, %v261_v21  ;;  %v6499_v22 = vpop.permute.xlu2 %206  ;;  %704 = vmatmul.f32.gmra.mxu2 %v6501_v24  ;;  %937 = vmatpush.msra.mxu3 %v347_v47  ;;  %v559_v21 = vld [vmem:[%s11785_s1 + $0x710] sm:$0xff]  ;;  %v6720_v47 = vpop.f32.mrf.mxu3 }
 0x112   :  { %233 = vst.msk [vmem:[#allocation4 + $0xd0] sm:$0xff] %vm220_vm9, %v6499_v22  ;;  %1009 = vmatpush.msra.mxu1 %v515_v18  ;;  %v364_v18 = vld [vmem:[%s11785_s1 + $0xf8] sm:$0xff] }
 0x113   :  { %169 = vst.msk [vmem:[#allocation4 + $0x68] sm:$0xff] %vm11802_vm12, %v143_v23  ;;  %v6514_v27 = vld [vmem:[#allocation4 + $0x48] sm:$0xff]  ;;  %938 = vmatpush.msra.mxu3 %v343_v49 }
 0x114   :  { %226 = vst.msk [vmem:[#allocation4 + $0x68] sm:$0xff] %vm11801_vm13, %v6378_v42  ;;  %660 = vmatmul.f32.gmra.mxu1 %v6514_v27  ;;  %v402_v42 = vld [vmem:[%s11785_s1 + $0x228] sm:$0xff]  ;;  %v491_v49 = vld [vmem:[%s11785_s1 + $0x4f0] sm:$0xff] }
 0x115   :  { %816 = vmatpush.msrb.mxu0 %v402_v42  ;;  %1010 = vmatpush.msra.mxu1 %v511_v20  ;;  %v547_v42 = vld [vmem:[%s11785_s1 + $0x6b0] sm:$0xff]  ;;  %v360_v20 = vld [vmem:[%s11785_s1 + $0xd8] sm:$0xff] }
 0x117   :  { %v145_v38 = vpop.permute.xlu1 %144  ;;  %v6554_v41 = vld [vmem:[#allocation4 + $0x60] sm:$0xff]  ;;  %817 = vmatpush.msrb.mxu0 %v398_v50  ;;  %1011 = vmatpush.msra.mxu1 %v507_v30  ;;  %v392_v50 = vld [vmem:[%s11785_s1 + $0x1d8] sm:$0xff] }
 0x118   :  { %v263_v36 = vpop.permute.xlu0 %262  ;;  %v6547_v39 = vld [vmem:[#allocation4 + $0x90] sm:$0xff]  ;;  %170 = vst.msk [vmem:[#allocation4 + $0x80] sm:$0xff] %vm11799_vm11, %v145_v38  ;;  %622 = vmatmul.f32.gmra.mxu0 %v6554_v41  ;;  %786 = vmatmul.f32.gmra.mxu3 %v6554_v41 }
 0x119   :  { %282 = vst.msk [vmem:[#allocation4 + $0xb0] sm:$0xff] %vm276_vm10, %v263_v36  ;;  %v6545_v37 = vpop.permute.xlu2 %208  ;;  %707 = vmatmul.f32.gmra.mxu2 %v6547_v39  ;;  %966 = vmatpush.msra.mxu0 %v459_v1  ;;  %v435_v36 = vld [vmem:[%s11785_s1 + $0x330] sm:$0xff]  ;;  %v380_v1 = vld [vmem:[%s11785_s1 + $0x178] sm:$0xff] }
 0x11a   :  { %235 = vst.msk [vmem:[#allocation4 + $0xf0] sm:$0xff] %vm220_vm9, %v6545_v37  ;;  %1012 = vmatpush.msra.mxu1 %v503_v33  ;;  %v527_v33 = vld [vmem:[%s11785_s1 + $0x610] sm:$0xff] }
 0x11b   :  { %171 = vst.msk [vmem:[#allocation4 + $0x88] sm:$0xff] %vm11802_vm12, %v145_v38  ;;  %v6566_v46 = vld [vmem:[#allocation4 + $0x68] sm:$0xff]  ;;  %967 = vmatpush.msra.mxu0 %v455_v4  ;;  %v6766_v4 = vpop.f32.mrf.mxu3 }
 0x11c   :  { %228 = vst.msk [vmem:[#allocation4 + $0x88] sm:$0xff] %vm11801_vm13, %v6407_v53  ;;  %663 = vmatmul.f32.gmra.mxu1 %v6566_v46  ;;  %v339_v53 = vld [vmem:[%s11785_s1 + $0x30] sm:$0xff] }
 0x11d   :  { %939 = vmatpush.msra.mxu3 %v339_v53  ;;  %968 = vmatpush.msra.mxu0 %v451_v16  ;;  %v499_v38 = vld [vmem:[%s11785_s1 + $0x530] sm:$0xff]  ;;  %v388_v53 = vld [vmem:[%s11785_s1 + $0x1b8] sm:$0xff] }
 0x11e   :  { %1013 = vmatpush.msra.mxu1 %v499_v38  ;;  %v368_v16 = vld [vmem:[%s11785_s1 + $0x118] sm:$0xff]  ;;  %v467_v38 = vld [vmem:[%s11785_s1 + $0x430] sm:$0xff] }
 0x11f   :  { %v147_v60 = vpop.permute.xlu1 %146  ;;  %v6600_v0 = vld [vmem:[#allocation4 + $0x80] sm:$0xff]  ;;  %940 = vmatpush.msra.mxu3 %v335_v63  ;;  %969 = vmatpush.msra.mxu0 %v447_v19  ;;  %v539_v63 = vld [vmem:[%s11785_s1 + $0x670] sm:$0xff] }
 0x120   :  { %v265_v59 = vpop.permute.xlu0 %264  ;;  %v6594_v62 = vld [vmem:[#allocation4 + $0xb0] sm:$0xff]  ;;  %172 = vst.msk [vmem:[#allocation4 + $0xa0] sm:$0xff] %vm11799_vm11, %v147_v60  ;;  %625 = vmatmul.f32.gmra.mxu0 %v6600_v0  ;;  %789 = vmatmul.f32.gmra.mxu3 %v6600_v0  ;;  %v475_v19 = vld [vmem:[%s11785_s1 + $0x470] sm:$0xff] }
 0x121   :  { %283 = vst.msk [vmem:[#allocation4 + $0xd0] sm:$0xff] %vm276_vm10, %v265_v59  ;;  %710 = vmatmul.f32.gmra.mxu2 %v6594_v62  ;;  %970 = vmatpush.msra.mxu0 %v443_v29  ;;  %v384_v59 = vld [vmem:[%s11785_s1 + $0x198] sm:$0xff]  ;;  %v471_v29 = vld [vmem:[%s11785_s1 + $0x450] sm:$0xff] }
 0x122   :  { %173 = vst.msk [vmem:[#allocation4 + $0xa8] sm:$0xff] %vm11802_vm12, %v147_v60  ;;  %1089 = vmatpush.msrb.mxu3 %v396_v48  ;;  %v419_v60 = vld [vmem:[%s11785_s1 + $0x2b0] sm:$0xff]  ;;  %v6852_v48 = vld [vmem:[#allocation4 + $0xb8] sm:$0xff] }
 0x123   :  { %230 = vst.msk [vmem:[#allocation4 + $0xa8] sm:$0xff] %vm11801_vm13, %v6450_v5  ;;  %v6610_v2 = vld [vmem:[#allocation4 + $0x88] sm:$0xff]  ;;  %971 = vmatpush.msra.mxu0 %v439_v31  ;;  %v6815_v30 = vpop.f32.mrf.mxu3  ;;  %v352_v31 = vld [vmem:[%s11785_s1 + $0x98] sm:$0xff] }
 0x124   :  { %666 = vmatmul.f32.gmra.mxu1 %v6610_v2  ;;  %v567_v5 = vld [vmem:[%s11785_s1 + $0x750] sm:$0xff]  ;;  %1090 = vmatpush.msrb.mxu3 %v392_v50 }
 0x125   :  { %1053 = vmatpush.msra.mxu2 %v567_v5  ;;  %972 = vmatpush.msra.mxu0 %v435_v36  ;;  %v415_v5 = vld [vmem:[%s11785_s1 + $0x290] sm:$0xff]  ;;  %v6828_v36 = vld [vmem:[#allocation4 + $0x98] sm:$0xff] }
 0x126   :  { %1091 = vmatpush.msrb.mxu3 %v388_v53  ;;  %v463_v50 = vld [vmem:[%s11785_s1 + $0x410] sm:$0xff]  ;;  %v524_v53 = vld [vmem:[%s11785_s1 + $0x5f8] sm:$0xff] }
 0x127   :  { %v149_v12 = vpop.permute.xlu1 %148  ;;  %v6627_v13 = vld [vmem:[#allocation4 + $0xa0] sm:$0xff]  ;;  %1054 = vmatpush.msra.mxu2 %v563_v17  ;;  %973 = vmatpush.msra.mxu0 %v431_v40  ;;  %v411_v17 = vld [vmem:[%s11785_s1 + $0x270] sm:$0xff]  ;;  %v344_v40 = vld [vmem:[%s11785_s1 + $0x58] sm:$0xff] }
 0x128   :  { %v267_v9 = vpop.permute.xlu0 %266  ;;  %v6629_v14 = vld [vmem:[#allocation4 + $0xd0] sm:$0xff]  ;;  %174 = vst.msk [vmem:[#allocation4 + $0xc0] sm:$0xff] %vm11799_vm11, %v149_v12  ;;  %628 = vmatmul.f32.gmra.mxu0 %v6627_v13  ;;  %792 = vmatmul.f32.gmra.mxu3 %v6627_v13 }
 0x129   :  { %284 = vst.msk [vmem:[#allocation4 + $0xf0] sm:$0xff] %vm276_vm10, %v267_v9  ;;  %713 = vmatmul.f32.gmra.mxu2 %v6629_v14  ;;  %974 = vmatpush.msra.mxu0 %v427_v45  ;;  %v479_v9 = vld [vmem:[%s11785_s1 + $0x490] sm:$0xff] }
 0x12a   :  { %175 = vst.msk [vmem:[#allocation4 + $0xc8] sm:$0xff] %vm11802_vm12, %v149_v12  ;;  %v6635_v15 = vld [vmem:[#allocation4 + $0xa8] sm:$0xff]  ;;  %1055 = vmatpush.msra.mxu2 %v559_v21  ;;  %1092 = vmatpush.msrb.mxu3 %v384_v59  ;;  %v568_v59 = vld [vmem:[%s11785_s1 + $0x758] sm:$0xff] }
 0x12b   :  { %232 = vst.msk [vmem:[#allocation4 + $0xc8] sm:$0xff] %vm11801_vm13, %v6499_v22  ;;  %v535_v12 = vld [vmem:[%s11785_s1 + $0x650] sm:$0xff]  ;;  %v6848_v45 = vpop.f32.mrf.mxu3 }
 0x12c   :  { %669 = vmatmul.f32.gmra.mxu1 %v6635_v15  ;;  %1056 = vmatpush.msra.mxu2 %v555_v32  ;;  %v531_v21 = vld [vmem:[%s11785_s1 + $0x630] sm:$0xff] }
 0x12d   :  { %1093 = vmatpush.msrb.mxu3 %v380_v1  ;;  %v403_v32 = vld [vmem:[%s11785_s1 + $0x230] sm:$0xff]  ;;  %v520_v1 = vld [vmem:[%s11785_s1 + $0x5d8] sm:$0xff] }
 0x12f   :  { %v151_v22 = vpop.permute.xlu1 %150  ;;  %v6659_v23 = vld [vmem:[#allocation4 + $0xc0] sm:$0xff] }
 0x130   :  { %v6661_v25 = vld [vmem:[#allocation4 + $0xf0] sm:$0xff]  ;;  %176 = vst.msk [vmem:[#allocation4 + $0xe0] sm:$0xff] %vm11799_vm11, %v151_v22  ;;  %631 = vmatmul.f32.gmra.mxu0 %v6659_v23  ;;  %795 = vmatmul.f32.gmra.mxu3 %v6659_v23 }
 0x131   :  { %177 = vst.msk [vmem:[#allocation4 + $0xe8] sm:$0xff] %vm11802_vm12, %v151_v22  ;;  %716 = vmatmul.f32.gmra.mxu2 %v6661_v25  ;;  %v356_v22 = vld [vmem:[%s11785_s1 + $0xb8] sm:$0xff]  ;;  %vm1881_vm12 = vcmask 261122  }
 0x132   :  { %v6667_v28 = vld [vmem:[#allocation4 + $0xc8] sm:$0xff]  ;;  %234 = vst.msk [vmem:[#allocation4 + $0xe8] sm:$0xff] %vm11801_vm13, %v6545_v37 }
 0x133   :  { %v551_v37 = vld [vmem:[%s11785_s1 + $0x6d0] sm:$0xff] }
 0x134   :  { %672 = vmatmul.f32.gmra.mxu1 %v6667_v28  ;;  %1057 = vmatpush.msra.mxu2 %v551_v37  ;;  %v348_v37 = vld [vmem:[%s11785_s1 + $0x78] sm:$0xff] }
 0x136   :  { %1058 = vmatpush.msra.mxu2 %v547_v42  ;;  %v340_v42 = vld [vmem:[%s11785_s1 + $0x38] sm:$0xff] }
 0x137   :  { %v6688_v34 = vld [vmem:[#allocation4 + $0xe0] sm:$0xff] }
 0x138   :  { %634 = vmatmul.f32.gmra.mxu0 %v6688_v34  ;;  %798 = vmatmul.f32.gmra.mxu3 %v6688_v34 }
 0x139   :  { %v6692_v35 = vld [vmem:[#allocation4 + $0xe8] sm:$0xff]  ;;  %5706 = vmatmul.msk.f32.vlgmr.msrb.gmra.mxu2 %vm11800_vm7, %v6069_v44 }
 0x13a   :  { %v495_v44 = vld [vmem:[%s11785_s1 + $0x510] sm:$0xff]  ;;  %1059 = vmatpush.msra.mxu2 %v543_v52  ;;  %v460_v52 = vld [vmem:[%s11785_s1 + $0x3f8] sm:$0xff] }
 0x13b   :  { %1014 = vmatpush.msra.mxu1 %v495_v44  ;;  %v399_v44 = vld [vmem:[%s11785_s1 + $0x210] sm:$0xff] }
 0x13c   :  { %675 = vmatmul.f32.gmra.mxu1 %v6692_v35  ;;  %1060 = vmatpush.msra.mxu2 %v539_v63  ;;  %v6882_v63 = vld [vmem:[#allocation4 + $0xd8] sm:$0xff] }
 0x13d   :  { %1015 = vmatpush.msra.mxu1 %v491_v49  ;;  %v336_v49 = vld [vmem:[%s11785_s1 + $0x18] sm:$0xff] }
 0x13e   :  { %1061 = vmatpush.msra.mxu2 %v535_v12 }
 0x13f   :  { %1016 = vmatpush.msra.mxu1 %v487_v54  ;;  %v456_v54 = vld [vmem:[%s11785_s1 + $0x3d8] sm:$0xff] }
 0x140   :  { %818 = vmatmul.f32.vlgmr.msrb.gmra.mxu0 %v6419_v58  ;;  %941 = vmatmul.f32.vlgmr.msra.gmra.mxu3 %v6413_v56 }
 0x141   :  { %5707 = vmatmul.msk.f32.gmra.mxu2 %vm11800_vm7, %v6080_v51  ;;  %v423_v51 = vld [vmem:[%s11785_s1 + $0x2d0] sm:$0xff]  ;;  %1017 = vmatpush.msra.mxu1 %v483_v3  ;;  %v452_v3 = vld [vmem:[%s11785_s1 + $0x3b8] sm:$0xff] }
 0x142   :  { %975 = vmatpush.msra.mxu0 %v423_v51  ;;  %1062 = vmatpush.msra.mxu2 %v531_v21  ;;  %v572_v51 = vld [vmem:[%s11785_s1 + $0x778] sm:$0xff]  ;;  %v6931_v21 = vld [vmem:[#allocation4 + $0x18] sm:$0xff] }
 0x143   :  { %1018 = vmatpush.msra.mxu1 %v479_v9  ;;  %v6904_v9 = vld [vmem:[#allocation4 + $0xf8] sm:$0xff] }
 0x144   :  { %859 = vmatmul.f32.vlgmr.msrb.gmra.mxu1 %v6382_v43  ;;  %976 = vmatpush.msra.mxu0 %v419_v60  ;;  %v6880_v60 = vpop.f32.mrf.mxu3 }
 0x145   :  { %1019 = vmatpush.msra.mxu1 %v475_v19  ;;  %1063 = vmatpush.msra.mxu2 %v527_v33  ;;  %v508_v19 = vld [vmem:[%s11785_s1 + $0x578] sm:$0xff] }
 0x146   :  { %977 = vmatpush.msra.mxu0 %v415_v5  ;;  %v516_v5 = vld [vmem:[%s11785_s1 + $0x5b8] sm:$0xff] }
 0x147   :  { %1020 = vmatpush.msra.mxu1 %v471_v29  ;;  %1216 = vmatpush.msrb.mxu2 %v572_v51  ;;  %v504_v29 = vld [vmem:[%s11785_s1 + $0x558] sm:$0xff] }
 0x148   :  { %821 = vmatmul.f32.gmra.mxu0 %v6465_v11  ;;  %944 = vmatmul.f32.gmra.mxu3 %v6459_v10 }
 0x149   :  { %5708 = vmatmul.msk.f32.gmra.mxu2 %vm11800_vm7, %v6090_v57  ;;  %v376_v57 = vld [vmem:[%s11785_s1 + $0x158] sm:$0xff]  ;;  %978 = vmatpush.msra.mxu0 %v411_v17 }
 0x14a   :  { %1094 = vmatpush.msrb.mxu3 %v376_v57  ;;  %1021 = vmatpush.msra.mxu1 %v467_v38  ;;  %v564_v57 = vld [vmem:[%s11785_s1 + $0x738] sm:$0xff] }
 0x14b   :  { %1217 = vmatpush.msrb.mxu2 %v568_v59  ;;  %v560_v17 = vld [vmem:[%s11785_s1 + $0x718] sm:$0xff] }
 0x14c   :  { %862 = vmatmul.f32.gmra.mxu1 %v6409_v55  ;;  %1095 = vmatpush.msrb.mxu3 %v372_v6  ;;  %v448_v6 = vld [vmem:[%s11785_s1 + $0x398] sm:$0xff]  ;;  %v6909_v12 = vpop.f32.mrf.mxu3 }
 0x14d   :  { %1022 = vmatpush.msra.mxu1 %v463_v50  ;;  %1218 = vmatpush.msrb.mxu2 %v564_v57  ;;  %11807 = vst [vmem:[#allocation10_spill] sm:$0xff] %v6909_v12  ;;  %v500_v38 = vld [vmem:[%s11785_s1 + $0x538] sm:$0xff] }
 0x14e   :  { %1096 = vmatpush.msrb.mxu3 %v368_v16  ;;  %v512_v16 = vld [vmem:[%s11785_s1 + $0x598] sm:$0xff] }
 0x14f   :  { %1171 = vmatpush.msrb.mxu1 %v524_v53  ;;  %1219 = vmatpush.msrb.mxu2 %v560_v17  ;;  %v548_v53 = vld [vmem:[%s11785_s1 + $0x6b8] sm:$0xff] }
 0x150   :  { %824 = vmatmul.f32.gmra.mxu0 %v6514_v27  ;;  %947 = vmatmul.f32.gmra.mxu3 %v6508_v26  ;;  %v544_v59 = vld [vmem:[%s11785_s1 + $0x698] sm:$0xff] }
 0x151   :  { %5709 = vmatmul.msk.f32.gmra.mxu2 %vm11800_vm7, %v6097_v61  ;;  %1097 = vmatpush.msrb.mxu3 %v364_v18  ;;  %v407_v61 = vld [vmem:[%s11785_s1 + $0x250] sm:$0xff]  ;;  %v444_v18 = vld [vmem:[%s11785_s1 + $0x378] sm:$0xff] }
 0x152   :  { %979 = vmatpush.msra.mxu0 %v407_v61  ;;  %1172 = vmatpush.msrb.mxu1 %v520_v1  ;;  %v440_v61 = vld [vmem:[%s11785_s1 + $0x358] sm:$0xff] }
 0x153   :  { %1098 = vmatpush.msrb.mxu3 %v360_v20  ;;  %v556_v20 = vld [vmem:[%s11785_s1 + $0x6f8] sm:$0xff] }
 0x154   :  { %865 = vmatmul.f32.gmra.mxu1 %v6452_v7  ;;  %980 = vmatpush.msra.mxu0 %v403_v32  ;;  %v552_v32 = vld [vmem:[%s11785_s1 + $0x6d8] sm:$0xff]  ;;  %v6945_v33 = vpop.f32.mrf.mxu3 }
 0x155   :  { %1099 = vmatpush.msrb.mxu3 %v356_v22  ;;  %1173 = vmatpush.msrb.mxu1 %v516_v5  ;;  %11808 = vst [vmem:[#allocation11_spill] sm:$0xff] %v6945_v33  ;;  %v424_v1 = vld [vmem:[%s11785_s1 + $0x2d8] sm:$0xff] }
 0x156   :  { %981 = vmatpush.msra.mxu0 %v399_v44  ;;  %1220 = vmatpush.msrb.mxu2 %v556_v20 }
 0x157   :  { %1100 = vmatpush.msrb.mxu3 %v352_v31  ;;  %1174 = vmatpush.msrb.mxu1 %v512_v16  ;;  %v436_v31 = vld [vmem:[%s11785_s1 + $0x338] sm:$0xff] }
 0x158   :  { %827 = vmatmul.f32.gmra.mxu0 %v6566_v46  ;;  %950 = vmatmul.f32.gmra.mxu3 %v6554_v41 }
 0x159   :  { %5710 = vmatmul.msk.f32.gmra.mxu2 %vm11800_vm7, %v6828_v36  ;;  %1101 = vmatpush.msrb.mxu3 %v348_v37 }
 0x15a   :  { %1130 = vmatpush.msrb.mxu0 %v460_v52  ;;  %1175 = vmatpush.msrb.mxu1 %v508_v19  ;;  %v496_v52 = vld [vmem:[%s11785_s1 + $0x518] sm:$0xff] }
 0x15b   :  { %1102 = vmatpush.msrb.mxu3 %v344_v40  ;;  %v432_v40 = vld [vmem:[%s11785_s1 + $0x318] sm:$0xff]  ;;  %1221 = vmatpush.msrb.mxu2 %v552_v32  ;;  %v7010_v32 = vld [vmem:[#allocation4 + $0x78] sm:$0xff] }
 0x15c   :  { %868 = vmatmul.f32.gmra.mxu1 %v6501_v24  ;;  %1131 = vmatpush.msrb.mxu0 %v456_v54  ;;  %v420_v19 = vld [vmem:[%s11785_s1 + $0x2b8] sm:$0xff] }
 0x15d   :  { %1103 = vmatpush.msrb.mxu3 %v340_v42  ;;  %1176 = vmatpush.msrb.mxu1 %v504_v29 }
 0x15e   :  { %1132 = vmatpush.msrb.mxu0 %v452_v3  ;;  %1222 = vmatpush.msrb.mxu2 %v548_v53  ;;  %v6980_v3 = vpop.f32.mrf.mxu3  ;;  %v408_v53 = vld [vmem:[%s11785_s1 + $0x258] sm:$0xff] }
 0x15f   :  { %1104 = vmatpush.msrb.mxu3 %v336_v49  ;;  %1177 = vmatpush.msrb.mxu1 %v500_v38  ;;  %v6955_v49 = vld [vmem:[#allocation4 + $0x38] sm:$0xff] }
 0x160   :  { %830 = vmatmul.f32.gmra.mxu0 %v6610_v2  ;;  %953 = vmatmul.f32.gmra.mxu3 %v6600_v0 }
 0x161   :  { %5711 = vmatmul.msk.f32.gmra.mxu2 %vm11800_vm7, %v6852_v48  ;;  %1133 = vmatpush.msrb.mxu0 %v448_v6  ;;  %v6984_v6 = vld [vmem:[#allocation4 + $0x58] sm:$0xff] }
 0x162   :  { %1178 = vmatpush.msrb.mxu1 %v496_v52  ;;  %1223 = vmatpush.msrb.mxu2 %v544_v59  ;;  %v532_v52 = vld [vmem:[%s11785_s1 + $0x638] sm:$0xff] }
 0x163   :  { %1134 = vmatpush.msrb.mxu0 %v444_v18  ;;  %v488_v18 = vld [vmem:[%s11785_s1 + $0x4d8] sm:$0xff] }
 0x164   :  { %871 = vmatmul.f32.gmra.mxu1 %v6547_v39 }
 0x165   :  { %1135 = vmatpush.msrb.mxu0 %v440_v61  ;;  %v416_v61 = vld [vmem:[%s11785_s1 + $0x298] sm:$0xff] }
 0x167   :  { %1136 = vmatpush.msrb.mxu0 %v436_v31 }
 0x168   :  { %833 = vmatmul.f32.gmra.mxu0 %v6635_v15  ;;  %956 = vmatmul.f32.gmra.mxu3 %v6627_v13 }
 0x169   :  { %5712 = vmatmul.msk.f32.gmra.mxu2 %vm11800_vm7, %v6882_v63  ;;  %1137 = vmatpush.msrb.mxu0 %v432_v40  ;;  %v480_v40 = vld [vmem:[%s11785_s1 + $0x498] sm:$0xff] }
 0x16c   :  { %874 = vmatmul.f32.gmra.mxu1 %v6594_v62 }
 0x170   :  { %836 = vmatmul.f32.gmra.mxu0 %v6667_v28  ;;  %959 = vmatmul.f32.gmra.mxu3 %v6659_v23 }
 0x171   :  { %5713 = vmatmul.msk.f32.gmra.mxu2 %vm11800_vm7, %v6904_v9 }
 0x174   :  { %877 = vmatmul.f32.gmra.mxu1 %v6629_v14 }
 0x178   :  { %839 = vmatmul.f32.gmra.mxu0 %v6692_v35  ;;  %962 = vmatmul.f32.gmra.mxu3 %v6688_v34 }
 0x179   :  { %5714 = vmatmul.msk.f32.vlgmr.msra.gmra.mxu2 %vm11800_vm7, %v6931_v21 }
 0x17c   :  { %880 = vmatmul.f32.gmra.mxu1 %v6661_v25  ;;  %v696_v22 = vpop.f32.mrf.mxu2 }
 0x17d   :  { %v614_v37 = vpop.f32.mrf.mxu0 }
 0x180   :  { %982 = vmatmul.f32.vlgmr.msra.gmra.mxu0 %v6419_v58  ;;  %1105 = vmatmul.f32.vlgmr.msrb.gmra.mxu3 %v6413_v56  ;;  %v428_v56 = vld [vmem:[%s11785_s1 + $0x2f8] sm:$0xff] }
 0x181   :  { %v655_v44 = vpop.f32.mrf.mxu1  ;;  %5715 = vmatmul.msk.f32.gmra.mxu2 %vm11800_vm7, %v6955_v49  ;;  %1138 = vmatpush.msrb.mxu0 %v428_v56 }
 0x182   :  { %v656_v42 = vadd.f32 %v655_v44, %v614_v37  ;;  %v536_v44 = vld [vmem:[%s11785_s1 + $0x658] sm:$0xff] }
 0x183   :  { %1139 = vmatpush.msrb.mxu0 %v424_v1  ;;  %v528_v1 = vld [vmem:[%s11785_s1 + $0x618] sm:$0xff] }
 0x184   :  { %v6959_v50 = vadd.f32 %v696_v22, %v656_v42  ;;  %1023 = vmatmul.f32.vlgmr.msra.gmra.mxu1 %v6382_v43  ;;  %v699_v51 = vpop.f32.mrf.mxu2  ;;  %v492_v43 = vld [vmem:[%s11785_s1 + $0x4f8] sm:$0xff]  ;;  %v7006_v22 = vpop.f32.mrf.mxu3 }
 0x185   :  { %v617_v54 = vpop.f32.mrf.mxu0  ;;  %1179 = vmatpush.msrb.mxu1 %v492_v43  ;;  %1140 = vmatpush.msrb.mxu0 %v420_v19  ;;  %v400_v19 = vld [vmem:[%s11785_s1 + $0x218] sm:$0xff] }
 0x187   :  { %1180 = vmatpush.msrb.mxu1 %v488_v18  ;;  %1141 = vmatpush.msrb.mxu0 %v416_v61  ;;  %v464_v61 = vld [vmem:[%s11785_s1 + $0x418] sm:$0xff] }
 0x188   :  { %985 = vmatmul.f32.gmra.mxu0 %v6465_v11  ;;  %1108 = vmatmul.f32.gmra.mxu3 %v6459_v10  ;;  %v540_v10 = vld [vmem:[%s11785_s1 + $0x678] sm:$0xff] }
 0x189   :  { %v658_v57 = vpop.f32.mrf.mxu1  ;;  %5716 = vmatmul.msk.f32.gmra.mxu2 %vm11800_vm7, %v6984_v6 }
 0x18a   :  { %v659_v5 = vadd.f32 %v658_v57, %v617_v54  ;;  %1224 = vmatpush.msrb.mxu2 %v540_v10 }
 0x18c   :  { %v6988_v16 = vadd.f32 %v699_v51, %v659_v5  ;;  %1026 = vmatmul.f32.gmra.mxu1 %v6409_v55  ;;  %v702_v17 = vpop.f32.mrf.mxu2  ;;  %v484_v55 = vld [vmem:[%s11785_s1 + $0x4b8] sm:$0xff]  ;;  %1225 = vmatpush.msrb.mxu2 %v536_v44  ;;  %v7037_v43 = vpop.f32.mrf.mxu3 }
 0x18d   :  { %v620_v20 = vpop.f32.mrf.mxu0  ;;  %1181 = vmatpush.msrb.mxu1 %v484_v55  ;;  %v476_v51 = vld [vmem:[%s11785_s1 + $0x478] sm:$0xff] }
 0x18e   :  { %1226 = vmatpush.msrb.mxu2 %v532_v52  ;;  %v404_v5 = vld [vmem:[%s11785_s1 + $0x238] sm:$0xff] }
 0x18f   :  { %1182 = vmatpush.msrb.mxu1 %v480_v40 }
 0x190   :  { %988 = vmatmul.f32.gmra.mxu0 %v6514_v27  ;;  %1111 = vmatmul.f32.gmra.mxu3 %v6508_v26  ;;  %v412_v26 = vld [vmem:[%s11785_s1 + $0x278] sm:$0xff] }
 0x191   :  { %v661_v29 = vpop.f32.mrf.mxu1  ;;  %5717 = vmatmul.msk.f32.gmra.mxu2 %vm11800_vm7, %v7010_v32  ;;  %1142 = vmatpush.msrb.mxu0 %v412_v26 }
 0x192   :  { %v662_v31 = vadd.f32 %v661_v29, %v620_v20  ;;  %1183 = vmatpush.msrb.mxu1 %v476_v51  ;;  %1227 = vmatpush.msrb.mxu2 %v528_v1 }
 0x193   :  { %1143 = vmatpush.msrb.mxu0 %v408_v53 }
 0x194   :  { %v7014_v37 = vadd.f32 %v702_v17, %v662_v31  ;;  %1029 = vmatmul.f32.gmra.mxu1 %v6452_v7  ;;  %v705_v38 = vpop.f32.mrf.mxu2  ;;  %v468_v17 = vld [vmem:[%s11785_s1 + $0x438] sm:$0xff]  ;;  %v7069_v29 = vpop.f32.mrf.mxu3 }
 0x195   :  { %v623_v42 = vpop.f32.mrf.mxu0  ;;  %1144 = vmatpush.msrb.mxu0 %v404_v5 }
 0x197   :  { %1145 = vmatpush.msrb.mxu0 %v400_v19 }
 0x198   :  { %991 = vmatmul.f32.gmra.mxu0 %v6566_v46  ;;  %1114 = vmatmul.f32.gmra.mxu3 %v6554_v41  ;;  %v472_v41 = vld [vmem:[%s11785_s1 + $0x458] sm:$0xff] }
 0x199   :  { %v664_v56 = vpop.f32.mrf.mxu1  ;;  %5718 = vmatmul.msk.f32.gmra.mxu2 %vm11800_vm7, %v6828_v36  ;;  %1184 = vmatpush.msrb.mxu1 %v472_v41 }
 0x19a   :  { %v665_v54 = vadd.f32 %v664_v56, %v623_v42 }
 0x19b   :  { %1185 = vmatpush.msrb.mxu1 %v468_v17 }
 0x19c   :  { %v7041_v59 = vadd.f32 %v705_v38, %v665_v54  ;;  %1032 = vmatmul.f32.gmra.mxu1 %v6501_v24  ;;  %v708_v57 = vpop.f32.mrf.mxu2  ;;  %v7078_v42 = vpop.f32.mrf.mxu3 }
 0x19d   :  { %v626_v18 = vpop.f32.mrf.mxu0  ;;  %1186 = vmatpush.msrb.mxu1 %v464_v61  ;;  %v5808_v61 = vld [vmem:[#allocation4 + $0x30] sm:$0xff] }
 0x1a0   :  { %994 = vmatmul.f32.gmra.mxu0 %v6610_v2  ;;  %1117 = vmatmul.f32.gmra.mxu3 %v6600_v0 }
 0x1a1   :  { %v667_v10 = vpop.f32.mrf.mxu1  ;;  %5719 = vmatmul.msk.f32.gmra.mxu2 %vm11800_vm7, %v6852_v48 }
 0x1a2   :  { %v668_v20 = vadd.f32 %v667_v10, %v626_v18 }
 0x1a4   :  { %v7063_v55 = vadd.f32 %v708_v57, %v668_v20  ;;  %1035 = vmatmul.f32.gmra.mxu1 %v6547_v39  ;;  %v711_v31 = vpop.f32.mrf.mxu2  ;;  %v7087_v1 = vpop.f32.mrf.mxu3 }
 0x1a5   :  { %v629_v38 = vpop.f32.mrf.mxu0 }
 0x1a8   :  { %997 = vmatmul.f32.gmra.mxu0 %v6635_v15  ;;  %1120 = vmatmul.f32.gmra.mxu3 %v6627_v13 }
 0x1a9   :  { %v670_v40 = vpop.f32.mrf.mxu1  ;;  %5720 = vmatmul.msk.f32.gmra.mxu2 %vm11800_vm7, %v6882_v63 }
 0x1aa   :  { %v671_v44 = vadd.f32 %v670_v40, %v629_v38 }
 0x1ac   :  { %v7075_v0 = vadd.f32 %v711_v31, %v671_v44  ;;  %1038 = vmatmul.f32.gmra.mxu1 %v6594_v62  ;;  %v714_v26 = vpop.f32.mrf.mxu2  ;;  %v7104_v10 = vpop.f32.mrf.mxu3 }
 0x1ad   :  { %v632_v51 = vpop.f32.mrf.mxu0  ;;  %11812 = vst [vmem:[#allocation15_spill] sm:$0xff] %v7104_v10 }
 0x1ae   :  { %11809 = vst [vmem:[#allocation12_spill] sm:$0xff] %v7075_v0 }
 0x1b0   :  { %1000 = vmatmul.f32.gmra.mxu0 %v6667_v28  ;;  %1123 = vmatmul.f32.gmra.mxu3 %v6659_v23 }
 0x1b1   :  { %v673_v52 = vpop.f32.mrf.mxu1  ;;  %5721 = vmatmul.msk.f32.gmra.mxu2 %vm11800_vm7, %v6904_v9 }
 0x1b2   :  { %v674_v53 = vadd.f32 %v673_v52, %v632_v51 }
 0x1b4   :  { %v7084_v13 = vadd.f32 %v714_v26, %v674_v53  ;;  %1041 = vmatmul.f32.gmra.mxu1 %v6629_v14  ;;  %v717_v56 = vpop.f32.mrf.mxu2 }
 0x1b5   :  { %v635_v54 = vpop.f32.mrf.mxu0 }
 0x1b6   :  { %11810 = vst [vmem:[#allocation13_spill] sm:$0xff] %v7084_v13 }
 0x1b8   :  { %1003 = vmatmul.f32.gmra.mxu0 %v6692_v35  ;;  %1126 = vmatmul.f32.gmra.mxu3 %v6688_v34  ;;  %v5807_v34 = vld [vmem:[#allocation4 + $0x10] sm:$0xff] }
 0x1b9   :  { %v676_v57 = vpop.f32.mrf.mxu1  ;;  %5722 = vmatmul.msk.f32.vlgmr.msrb.gmra.mxu2 %vm11800_vm7, %v6931_v21 }
 0x1ba   :  { %v677_v41 = vadd.f32 %v676_v57, %v635_v54 }
 0x1bc   :  { %v718_v23 = vadd.f32 %v717_v56, %v677_v41  ;;  %1044 = vmatmul.f32.gmra.mxu1 %v6661_v25  ;;  %v7097_v17 = vpop.f32.mrf.mxu2 }
 0x1bd   :  { %v7099_v18 = vpop.f32.mrf.mxu0 }
 0x1be   :  { %v7095_v5 = vadd.f32 %v6980_v3, %v718_v23 }
 0x1c0   :  { %11811 = vst [vmem:[#allocation14_spill] sm:$0xff] %v7095_v5  ;;  %1146 = vmatmul.f32.vlgmr.msrb.gmra.mxu0 %v6419_v58  ;;  %v7117_v58 = vpop.f32.mrf.mxu3 }
 0x1c1   :  { %v7101_v19 = vpop.f32.mrf.mxu1  ;;  %5723 = vmatmul.msk.f32.gmra.mxu2 %vm11800_vm7, %v6955_v49  ;;  %11813 = vst [vmem:[#allocation16_spill] sm:$0xff] %v7117_v58 }
 0x1c4   :  { %1187 = vmatmul.f32.vlgmr.msrb.gmra.mxu1 %v5807_v34  ;;  %v7108_v21 = vpop.f32.mrf.mxu2 }
 0x1c5   :  { %v7110_v20 = vpop.f32.mrf.mxu0 }
 0x1c8   :  { %1149 = vmatmul.f32.gmra.mxu0 %v6465_v11 }
 0x1c9   :  { %v7112_v3 = vpop.f32.mrf.mxu1  ;;  %5724 = vmatmul.msk.f32.gmra.mxu2 %vm11800_vm7, %v6984_v6  ;;  %v7131_v6 = vpop.f32.mrf.mxu3 }
 0x1ca   :  { %11814 = vst [vmem:[#allocation17_spill] sm:$0xff] %v7131_v6 }
 0x1cc   :  { %1190 = vmatmul.f32.gmra.mxu1 %v5808_v61  ;;  %v7119_v31 = vpop.f32.mrf.mxu2 }
 0x1cd   :  { %v7121_v49 = vpop.f32.mrf.mxu0 }
 0x1d0   :  { %1152 = vmatmul.f32.gmra.mxu0 %v6514_v27 }
 0x1d1   :  { %v7123_v38 = vpop.f32.mrf.mxu1  ;;  %5725 = vmatmul.msk.f32.gmra.mxu2 %vm11800_vm7, %v7010_v32 }
 0x1d4   :  { %1193 = vmatmul.f32.gmra.mxu1 %v6452_v7  ;;  %v7129_v11 = vpop.f32.mrf.mxu2  ;;  %v942_v7 = vpop.f32.mrf.mxu3 }
 0x1d5   :  { %v7133_v40 = vpop.f32.mrf.mxu0 }
 0x1d8   :  { %1155 = vmatmul.f32.gmra.mxu0 %v6566_v46 }
 0x1d9   :  { %v7135_v44 = vpop.f32.mrf.mxu1  ;;  %5726 = vmatmul.msk.f32.gmra.mxu2 %vm11800_vm7, %v6828_v36 }
 0x1dc   :  { %1196 = vmatmul.f32.gmra.mxu1 %v6501_v24  ;;  %v7141_v27 = vpop.f32.mrf.mxu2  ;;  %v945_v24 = vpop.f32.mrf.mxu3 }
 0x1dd   :  { %v7143_v32 = vpop.f32.mrf.mxu0 }
 0x1e0   :  { %1158 = vmatmul.f32.gmra.mxu0 %v6610_v2 }
 0x1e1   :  { %v7145_v26 = vpop.f32.mrf.mxu1  ;;  %5727 = vmatmul.msk.f32.gmra.mxu2 %vm11800_vm7, %v6852_v48 }
 0x1e4   :  { %1199 = vmatmul.f32.gmra.mxu1 %v6547_v39  ;;  %v7151_v46 = vpop.f32.mrf.mxu2  ;;  %v7171_v39 = vpop.f32.mrf.mxu3 }
 0x1e5   :  { %11815 = vst [vmem:[#allocation18_spill] sm:$0xff] %v7151_v46  ;;  %v7153_v51 = vpop.f32.mrf.mxu0 }
 0x1e6   :  { %11816 = vst [vmem:[#allocation19_spill] sm:$0xff] %v7153_v51 }
 0x1e8   :  { %1161 = vmatmul.f32.gmra.mxu0 %v6635_v15 }
 0x1e9   :  { %v7155_v36 = vpop.f32.mrf.mxu1  ;;  %5728 = vmatmul.msk.f32.gmra.mxu2 %vm11800_vm7, %v6882_v63 }
 0x1ea   :  { %11817 = vst [vmem:[#allocation20_spill] sm:$0xff] %v7155_v36 }
 0x1ec   :  { %1202 = vmatmul.f32.gmra.mxu1 %v6594_v62  ;;  %v7161_v2 = vpop.f32.mrf.mxu2  ;;  %v7181_v56 = vpop.f32.mrf.mxu3 }
 0x1ed   :  { %11818 = vst [vmem:[#allocation21_spill] sm:$0xff] %v7161_v2  ;;  %v7163_v52 = vpop.f32.mrf.mxu0 }
 0x1ee   :  { %11819 = vst [vmem:[#allocation22_spill] sm:$0xff] %v7163_v52  ;;  %v820_v52 = vadd.f32 %v7099_v18, %v7006_v22 }
 0x1f0   :  { %1164 = vmatmul.f32.gmra.mxu0 %v6667_v28 }
 0x1f1   :  { %v7165_v48 = vpop.f32.mrf.mxu1  ;;  %5729 = vmatmul.msk.f32.gmra.mxu2 %vm11800_vm7, %v6904_v9  ;;  %vm1991_vm7 = vcmask 1042434  }
 0x1f2   :  { %11820 = vst [vmem:[#allocation23_spill] sm:$0xff] %v7165_v48 }
 0x1f4   :  { %1205 = vmatmul.f32.gmra.mxu1 %v6629_v14  ;;  %v7173_v15 = vpop.f32.mrf.mxu2  ;;  %v7183_v14 = vpop.f32.mrf.mxu3 }
 0x1f5   :  { %11821 = vst [vmem:[#allocation24_spill] sm:$0xff] %v7173_v15  ;;  %v7175_v63 = vpop.f32.mrf.mxu0 }
 0x1f6   :  { %11822 = vst [vmem:[#allocation25_spill] sm:$0xff] %v7175_v63 }
 0x1f8   :  { %1167 = vmatmul.f32.gmra.mxu0 %v6692_v35 }
 0x1f9   :  { %v7177_v62 = vpop.f32.mrf.mxu1 }
 0x1fa   :  { %11823 = vst [vmem:[#allocation26_spill] sm:$0xff] %v7177_v62 }
 0x1fc   :  { %1208 = vmatmul.f32.gmra.mxu1 %v6661_v25  ;;  %v1065_v53 = vpop.f32.mrf.mxu2  ;;  %v7189_v8 = vpop.f32.mrf.mxu3 }
 0x1fd   :  { %v983_v28 = vpop.f32.mrf.mxu0  ;;  %11824 = vst [vmem:[#allocation27_spill] sm:$0xff] %v7189_v8 }
 0x201   :  { %v1024_v54 = vpop.f32.mrf.mxu1 }
 0x204   :  { %v1068_v9 = vpop.f32.mrf.mxu2  ;;  %v7197_v15 = vpop.f32.mrf.mxu3 }
 0x205   :  { %v986_v57 = vpop.f32.mrf.mxu0  ;;  %11825 = vst [vmem:[#allocation28_spill] sm:$0xff] %v7197_v15 }
 0x206   :  { %v987_v51 = vadd.f32 %v986_v57, %v945_v24 }
 0x209   :  { %v1027_v41 = vpop.f32.mrf.mxu1 }
 0x20c   :  { %v7185_v23 = vpop.f32.mrf.mxu2  ;;  %v7207_v13 = vpop.f32.mrf.mxu3 }
 0x20d   :  { %v989_v34 = vpop.f32.mrf.mxu0  ;;  %11827 = vst [vmem:[#allocation30_spill] sm:$0xff] %v7207_v13  ;;  %v861_v13 = vadd.f32 %v7101_v19, %v820_v52 }
 0x211   :  { %v7187_v61 = vpop.f32.mrf.mxu1 }
 0x214   :  { %v7191_v35 = vpop.f32.mrf.mxu2  ;;  %v1106_v46 = vpop.f32.mrf.mxu3 }
 0x215   :  { %v7193_v25 = vpop.f32.mrf.mxu0 }
 0x219   :  { %v7195_v5 = vpop.f32.mrf.mxu1 }
 0x21c   :  { %v7199_v62 = vpop.f32.mrf.mxu2 }
 0x21d   :  { %v7201_v63 = vpop.f32.mrf.mxu0 }
 0x221   :  { %v7203_v6 = vpop.f32.mrf.mxu1 }
 0x224   :  { %v7205_v33 = vpop.f32.mrf.mxu2 }
 0x225   :  { %11826 = vst [vmem:[#allocation29_spill] sm:$0xff] %v7205_v33  ;;  %v7209_v12 = vpop.f32.mrf.mxu0 }
 0x226   :  { %11828 = vst [vmem:[#allocation31_spill] sm:$0xff] %v7209_v12  ;;  %v984_v12 = vadd.f32 %v983_v28, %v942_v7  ;;  %v738_v7 = vadd.f32 %v6720_v47, %v6959_v50 }
 0x228   :  { %v1025_v8 = vadd.f32 %v1024_v54, %v984_v12 }
 0x229   :  { %v7211_v0 = vpop.f32.mrf.mxu1 }
 0x22a   :  { %11829 = vst [vmem:[#allocation32_spill] sm:$0xff] %v7211_v0  ;;  %v1109_v0 = vpop.f32.mrf.mxu3 }
 0x22c   :  { %v7213_v2 = vpop.f32.mrf.mxu2 }
 0x22d   :  { %11830 = vst [vmem:[#allocation33_spill] sm:$0xff] %v7213_v2  ;;  %v7215_v48 = vpop.f32.mrf.mxu0  ;;  %v902_v2 = vadd.f32 %v7097_v17, %v861_v13  ;;  %v826_v13 = vadd.f32 %v7121_v49, %v7069_v29 }
 0x22e   :  { %11831 = vst [vmem:[#allocation34_spill] sm:$0xff] %v7215_v48 }
 0x22f   :  { %v1285_v18 = vrot.slane %v902_v2, 6  ;;  %v867_v50 = vadd.f32 %v7123_v38, %v826_v13  ;;  %v741_v13 = vadd.f32 %v6766_v4, %v6988_v16 }
 0x231   :  { %v7217_v15 = vpop.f32.mrf.mxu1 }
 0x232   :  { %11832 = vst [vmem:[#allocation35_spill] sm:$0xff] %v7217_v15  ;;  %v823_v15 = vadd.f32 %v7110_v20, %v7037_v43  ;;  %v1028_v43 = vadd.f32 %v1027_v41, %v987_v51  ;;  %v1112_v20 = vpop.f32.mrf.mxu3 }
 0x234   :  { %v7221_v58 = vpop.f32.mrf.mxu2  ;;  %v864_v12 = vadd.f32 %v7112_v3, %v823_v15  ;;  %v1069_v29 = vadd.f32 %v1068_v9, %v1028_v43  ;;  %v990_v3 = vadd.f32 %v989_v34, %v7171_v39  ;;  %v908_v34 = vadd.f32 %v7119_v31, %v867_v50 }
 0x235   :  { %11833 = vst [vmem:[#allocation36_spill] sm:$0xff] %v7221_v58  ;;  %v7223_v36 = vpop.f32.mrf.mxu0 }
 0x236   :  { %11834 = vst [vmem:[#allocation37_spill] sm:$0xff] %v7223_v36  ;;  %v1066_v36 = vadd.f32 %v1065_v53, %v1025_v8  ;;  %v1316_v8 = vsel %vm11797_vm0, %v738_v7, %v1285_v18  ;;  %v905_v47 = vadd.f32 %v7108_v21, %v864_v12  ;;  %v1289_v43 = vrot.slane %v1069_v29, 4 }
 0x238   :  { %v1286_v24 = vrot.slane %v1066_v36, 4 }
 0x239   :  { %v7226_v33 = vpop.f32.mrf.mxu1 }
 0x23c   :  { %v1229_v48 = vpop.f32.mrf.mxu2 }
 0x23d   :  { %v1147_v10 = vpop.f32.mrf.mxu0 }
 0x23e   :  { %v1148_v22 = vadd.f32 %v1147_v10, %v1106_v46  ;;  %v1310_v10 = vsel %vm11798_vm14, %v738_v7, %v1285_v18  ;;  %v1326_v46 = vsel %vm1317_vm1, %v1285_v18, %v738_v7 }
 0x241   :  { %v1188_v58 = vpop.f32.mrf.mxu1 }
 0x242   :  { %v1189_v19 = vadd.f32 %v1188_v58, %v1148_v22  ;;  %v1322_v58 = vsel %vm11795_vm15, %v738_v7, %v1285_v18 }
 0x244   :  { %v1230_v17 = vadd.f32 %v1229_v48, %v1189_v19  ;;  %v1232_v52 = vpop.f32.mrf.mxu2 }
 0x245   :  { %v1150_v49 = vpop.f32.mrf.mxu0 }
 0x246   :  { %v1287_v2 = vrot.slane %v1230_v17, 2  ;;  %v1151_v51 = vadd.f32 %v1150_v49, %v1109_v0  ;;  %v1288_v0 = vrot.slane %v905_v47, 6 }
 0x248   :  { %v1312_v48 = vsel %vm11795_vm15, %v1286_v24, %v1287_v2  ;;  %v1327_v15 = vsel %vm11797_vm0, %v1286_v24, %v1287_v2  ;;  %v1318_v53 = vsel %vm1317_vm1, %v1287_v2, %v1286_v24  ;;  %v1323_v38 = vsel %vm11798_vm14, %v1286_v24, %v1287_v2 }
 0x249   :  { %v1191_v36 = vpop.f32.mrf.mxu1  ;;  %v1314_v28 = vsel %vm1313_vm2, %v1310_v10, %v1312_v48  ;;  %v1328_v54 = vsel %vm11796_vm3, %v1327_v15, %v1326_v46  ;;  %v1320_v21 = vsel %vm11796_vm3, %v1316_v8, %v1318_v53  ;;  %v1324_v22 = vsel %vm1313_vm2, %v1323_v38, %v1322_v58 }
 0x24a   :  { %v1192_v9 = vadd.f32 %v1191_v36, %v1151_v51  ;;  %v5730_v57 = vrot.slane %v1314_v28, 9  ;;  %v1329_v39 = vrot.slane %v1328_v54, 6  ;;  %v1321_v41 = vrot.slane %v1320_v21, 2 }
 0x24b   :  { %v1325_v17 = vrot.slane %v1324_v22, 4  ;;  %v1031_v10 = vadd.f32 %v7187_v61, %v990_v3  ;;  %v7263_v24 = vrot.slane %v908_v34, 6  ;;  %v829_v2 = vadd.f32 %v7133_v40, %v7078_v42 }
 0x24c   :  { %v1233_v18 = vadd.f32 %v1232_v52, %v1192_v9  ;;  %v7252_v19 = vmax.f32 %v1314_v28, %v5730_v57  ;;  %v5733_v7 = vrot.slane %v1329_v39, 9  ;;  %v5731_v12 = vrot.slane %v1321_v41, 9  ;;  %v1235_v8 = vpop.f32.mrf.mxu2  ;;  %v1115_v52 = vpop.f32.mrf.mxu3 }
 0x24d   :  { %v1153_v4 = vpop.f32.mrf.mxu0  ;;  %v1330_v16 = vsel %vm11798_vm14, %v741_v13, %v1288_v0  ;;  %v1337_v61 = vsel %vm11795_vm15, %v741_v13, %v1288_v0  ;;  %v5732_v50 = vrot.slane %v1325_v17, 9  ;;  %v993_v42 = vadd.f32 %v7193_v25, %v7181_v56 }
 0x24e   :  { %v1290_v46 = vrot.slane %v1233_v18, 2  ;;  %1587 = vrot.lane.b32.xlu2 %v7252_v19, %s5911_s19  ;;  %v7259_v31 = vmax.f32 %v1329_v39, %v5733_v7  ;;  %v7261_v58 = vmax.f32 %v1321_v41, %v5731_v12  ;;  %v1154_v47 = vadd.f32 %v1153_v4, %v1112_v20 }
 0x24f   :  { %v1072_v48 = vadd.f32 %v7185_v23, %v1031_v10  ;;  %v1341_v36 = vsel %vm1317_vm1, %v1288_v0, %v741_v13  ;;  %v744_v28 = vadd.f32 %v6815_v30, %v7014_v37  ;;  %v870_v54 = vadd.f32 %v7135_v44, %v829_v2 }
 0x250   :  { %1593 = vrot.lane.b32.xlu1 %v7259_v31, %s5911_s19  ;;  %1589 = vrot.lane.b32.xlu0 %v7261_v58, %s5911_s19  ;;  %v1331_v29 = vsel %vm11795_vm15, %v1289_v43, %v1290_v46  ;;  %v1338_v3 = vsel %vm11798_vm14, %v1289_v43, %v1290_v46  ;;  %v1342_v20 = vsel %vm11797_vm0, %v1289_v43, %v1290_v46 }
 0x251   :  { %v1194_v40 = vpop.f32.mrf.mxu1  ;;  %v1332_v49 = vsel %vm1313_vm2, %v1330_v16, %v1331_v29  ;;  %v1339_v51 = vsel %vm1313_vm2, %v1338_v3, %v1337_v61  ;;  %v1343_v56 = vsel %vm11796_vm3, %v1342_v20, %v1341_v36  ;;  %v7286_v38 = vmax.f32 %v1325_v17, %v5732_v50 }
 0x252   :  { %v1195_v15 = vadd.f32 %v1194_v40, %v1154_v47  ;;  %v5734_v53 = vrot.slane %v1332_v49, 9  ;;  %v1340_v21 = vrot.slane %v1339_v51, 4  ;;  %v1333_v9 = vsel %vm11797_vm0, %v741_v13, %v1288_v0 }
 0x253   :  { %v1334_v57 = vsel %vm1317_vm1, %v1290_v46, %v1289_v43  ;;  %v832_v23 = vadd.f32 %v7143_v32, %v7087_v1  ;;  %v1034_v39 = vadd.f32 %v7195_v5, %v993_v42  ;;  %v1345_v30 = vsel %vm11798_vm14, %v744_v28, %v7263_v24 }
 0x254   :  { %v1236_v25 = vadd.f32 %v1235_v8, %v1195_v15  ;;  %v1348_v37 = vsel %vm11797_vm0, %v744_v28, %v7263_v24  ;;  %v1292_v44 = vrot.slane %v1072_v48, 4  ;;  %v1238_v34 = vpop.f32.mrf.mxu2  ;;  %v7299_v0 = vmax.f32 %v1332_v49, %v5734_v53  ;;  %v1118_v46 = vpop.f32.mrf.mxu3 }
 0x255   :  { %v1344_v22 = vrot.slane %v1343_v56, 6  ;;  %v7302_v18 = vadd.f32 %v7129_v11, %v870_v54  ;;  %v1156_v1 = vpop.f32.mrf.mxu0  ;;  %v5736_v5 = vrot.slane %v1340_v21, 9  ;;  %v1335_v32 = vsel %vm11796_vm3, %v1333_v9, %v1334_v57 }
 0x256   :  { %v1293_v41 = vrot.slane %v1236_v25, 2  ;;  %1591 = vrot.lane.b32.xlu2 %v7286_v38, %s5911_s19  ;;  %v1352_v7 = vsel %vm11795_vm15, %v744_v28, %v7263_v24  ;;  %v1157_v12 = vadd.f32 %v1156_v1, %v1115_v52  ;;  %v873_v11 = vadd.f32 %v7145_v26, %v832_v23 }
 0x257   :  { %v1075_v10 = vadd.f32 %v7191_v35, %v1034_v39  ;;  %v996_v52 = vadd.f32 %v7201_v63, %v7183_v14  ;;  %v5737_v47 = vrot.slane %v1344_v22, 9  ;;  %v1336_v50 = vrot.slane %v1335_v32, 2 }
 0x258   :  { %1595 = vrot.lane.b32.xlu0 %v7299_v0, %s5911_s19  ;;  %v1346_v13 = vsel %vm11795_vm15, %v1292_v44, %v1293_v41  ;;  %v1349_v43 = vsel %vm1317_vm1, %v1293_v41, %v1292_v44  ;;  %v1353_v17 = vsel %vm11798_vm14, %v1292_v44, %v1293_v41  ;;  %v7321_v26 = vmax.f32 %v1340_v21, %v5736_v5 }
 0x259   :  { %v1197_v8 = vpop.f32.mrf.mxu1  ;;  %v1347_v2 = vsel %vm1313_vm2, %v1345_v30, %v1346_v13  ;;  %v1350_v4 = vsel %vm11796_vm3, %v1348_v37, %v1349_v43  ;;  %v1354_v29 = vsel %vm1313_vm2, %v1353_v17, %v1352_v7  ;;  %v1294_v40 = vrot.slane %v7302_v18, 6  ;;  %v11835_v37 = vld [vmem:[#allocation15_spill] sm:$0xff] }
 0x25a   :  { %v1198_v16 = vadd.f32 %v1197_v8, %v1157_v12  ;;  %v5738_v61 = vrot.slane %v1347_v2, 9  ;;  %v1351_v35 = vrot.slane %v1350_v4, 2  ;;  %v914_v49 = vadd.f32 %v7141_v27, %v873_v11  ;;  %v11841_v4 = vld [vmem:[#allocation22_spill] sm:$0xff] }
 0x25b   :  { %v1295_v51 = vrot.slane %v1075_v10, 4  ;;  %v1357_v20 = vsel %vm11797_vm0, %v1292_v44, %v1293_v41  ;;  %v1037_v63 = vadd.f32 %v7203_v6, %v996_v52  ;;  %v7331_v15 = vmax.f32 %v1344_v22, %v5737_v47  ;;  %v11836_v44 = vld [vmem:[#allocation19_spill] sm:$0xff] }
 0x25c   :  { %v1239_v3 = vadd.f32 %v1238_v34, %v1198_v16  ;;  %v7319_v42 = vmax.f32 %v1347_v2, %v5738_v61  ;;  %v1241_v48 = vpop.f32.mrf.mxu2  ;;  %v1355_v53 = vrot.slane %v1354_v29, 4  ;;  %v747_v36 = vadd.f32 %v6848_v45, %v7041_v59  ;;  %v11837_v34 = vld [vmem:[#allocation27_spill] sm:$0xff]  ;;  %v1121_v1 = vpop.f32.mrf.mxu3  ;;  %v11840_v2 = vld [vmem:[#allocation16_spill] sm:$0xff] }
 0x25d   :  { %v1159_v27 = vpop.f32.mrf.mxu0  ;;  %v5735_v54 = vrot.slane %v1336_v50, 9  ;;  %v1356_v21 = vsel %vm1317_vm1, %v7263_v24, %v744_v28  ;;  %v5739_v56 = vrot.slane %v1351_v35, 9  ;;  %v7343_v57 = vadd.f32 %v6880_v60, %v7063_v55  ;;  %v11838_v22 = vld [vmem:[#allocation31_spill] sm:$0xff]  ;;  %v11842_v16 = vld [vmem:[#allocation32_spill] sm:$0xff] }
 0x25e   :  { %v1296_v14 = vrot.slane %v1239_v3, 2  ;;  %1603 = vrot.lane.b32.xlu1 %v7319_v42, %s5911_s19  ;;  %1599 = vrot.lane.b32.xlu2 %v7321_v26, %s5911_s19  ;;  %v1160_v6 = vadd.f32 %v1159_v27, %v1118_v46  ;;  %v1358_v25 = vsel %vm11796_vm3, %v1357_v20, %v1356_v21  ;;  %v7345_v23 = vrot.slane %v914_v49, 6  ;;  %v11839_v46 = vld [vmem:[#allocation20_spill] sm:$0xff] }
 0x25f   :  { %v1363_v59 = vsel %vm11797_vm0, %v747_v36, %v1294_v40  ;;  %v1078_v24 = vadd.f32 %v7199_v62, %v1037_v63  ;;  %v5740_v39 = vrot.slane %v1355_v53, 9  ;;  %v835_v41 = vadd.f32 %v11836_v44, %v11835_v37 }
 0x260   :  { %1601 = vrot.lane.b32.xlu0 %v7331_v15, %s5911_s19  ;;  %v1364_v9 = vsel %vm1317_vm1, %v1296_v14, %v1295_v51  ;;  %v1361_v30 = vsel %vm11795_vm15, %v1295_v51, %v1296_v14  ;;  %v999_v18 = vadd.f32 %v11838_v22, %v11837_v34  ;;  %v1359_v60 = vrot.slane %v1358_v25, 6  ;;  %v11846_v25 = vld [vmem:[#allocation23_spill] sm:$0xff] }
 0x261   :  { %v1200_v45 = vpop.f32.mrf.mxu1  ;;  %v1365_v55 = vsel %vm11796_vm3, %v1363_v59, %v1364_v9  ;;  %v7355_v32 = vmax.f32 %v1351_v35, %v5739_v56  ;;  %v7357_v7 = vmax.f32 %v1336_v50, %v5735_v54  ;;  %v1360_v62 = vsel %vm11798_vm14, %v747_v36, %v1294_v40  ;;  %v11848_v22 = vld [vmem:[#allocation35_spill] sm:$0xff] }
 0x262   :  { %v1201_v28 = vadd.f32 %v1200_v45, %v1160_v6  ;;  %v1362_v12 = vsel %vm1313_vm2, %v1360_v62, %v1361_v30  ;;  %v1370_v13 = vsel %vm11797_vm0, %v7343_v57, %v7345_v23  ;;  %v1298_v43 = vrot.slane %v1078_v24, 4  ;;  %v11845_v6 = vld [vmem:[#allocation18_spill] sm:$0xff]  ;;  %v11847_v45 = vld [vmem:[#allocation29_spill] sm:$0xff] }
 0x263   :  { %v7368_v11 = vmax.f32 %v1355_v53, %v5740_v39  ;;  %v1366_v10 = vrot.slane %v1365_v55, 2  ;;  %v876_v8 = vadd.f32 %v11839_v46, %v835_v41  ;;  %v838_v52 = vadd.f32 %v11841_v4, %v11840_v2  ;;  %v11844_v53 = vld [vmem:[#allocation34_spill] sm:$0xff]  ;;  %v11849_v62 = vld [vmem:[#allocation21_spill] sm:$0xff]  ;;  %v11850_v4 = vld [vmem:[#allocation12_spill] sm:$0xff] }
 0x264   :  { %v1242_v5 = vadd.f32 %v1241_v48, %v1201_v28  ;;  %v1040_v61 = vadd.f32 %v11842_v16, %v999_v18  ;;  %v1244_v47 = vpop.f32.mrf.mxu2  ;;  %v5741_v29 = vrot.slane %v1359_v60, 9  ;;  %v5742_v35 = vrot.slane %v1362_v12, 9  ;;  %v11843_v48 = vld [vmem:[#allocation28_spill] sm:$0xff]  ;;  %v1124_v44 = vpop.f32.mrf.mxu3 }
 0x265   :  { %v1162_v50 = vpop.f32.mrf.mxu0  ;;  %v1367_v20 = vsel %vm11798_vm14, %v7343_v57, %v7345_v23  ;;  %v1378_v14 = vsel %vm1317_vm1, %v7345_v23, %v7343_v57  ;;  %v1002_v36 = vadd.f32 %v11844_v53, %v11843_v48  ;;  %v5743_v54 = vrot.slane %v1366_v10, 9 }
 0x266   :  { %v1299_v17 = vrot.slane %v1242_v5, 2  ;;  %1605 = vrot.lane.b32.xlu1 %v7355_v32, %s5911_s19  ;;  %1597 = vrot.lane.b32.xlu2 %v7357_v7, %s5911_s19  ;;  %v1163_v3 = vadd.f32 %v1162_v50, %v1121_v1  ;;  %v917_v56 = vadd.f32 %v11845_v6, %v876_v8  ;;  %v879_v9 = vadd.f32 %v11846_v25, %v838_v52  ;;  %v11851_v52 = vld [vmem:[#allocation10_spill] sm:$0xff]  ;;  %v11852_v50 = vld [vmem:[#allocation33_spill] sm:$0xff] }
 0x267   :  { %v1081_v59 = vadd.f32 %v11847_v45, %v1040_v61  ;;  %v7392_v39 = vmax.f32 %v1362_v12, %v5742_v35  ;;  %v7394_v30 = vmax.f32 %v1359_v60, %v5741_v29  ;;  %v1043_v18 = vadd.f32 %v11848_v22, %v1002_v36  ;;  %v11857_v6 = vld [vmem:[#allocation30_spill] sm:$0xff] }
 0x268   :  { %1607 = vrot.lane.b32.xlu0 %v7368_v11, %s5911_s19  ;;  %v1371_v40 = vsel %vm1317_vm1, %v1299_v17, %v1298_v43  ;;  %v1379_v49 = vsel %vm11797_vm0, %v1298_v43, %v1299_v17  ;;  %v1368_v21 = vsel %vm11795_vm15, %v1298_v43, %v1299_v17  ;;  %v1375_v34 = vsel %vm11798_vm14, %v1298_v43, %v1299_v17 }
 0x269   :  { %v1203_v51 = vpop.f32.mrf.mxu1  ;;  %v1372_v63 = vsel %vm11796_vm3, %v1370_v13, %v1371_v40  ;;  %v1380_v24 = vsel %vm11796_vm3, %v1379_v49, %v1378_v14  ;;  %v1369_v41 = vsel %vm1313_vm2, %v1367_v20, %v1368_v21  ;;  %v7405_v55 = vmax.f32 %v1366_v10, %v5743_v54  ;;  %v11854_v40 = vld [vmem:[#allocation11_spill] sm:$0xff]  ;;  %v11856_v54 = vld [vmem:[#allocation25_spill] sm:$0xff] }
 0x26a   :  { %v1204_v27 = vadd.f32 %v1203_v51, %v1163_v3  ;;  %v1373_v37 = vrot.slane %v1372_v63, 2  ;;  %v1381_v60 = vrot.slane %v1380_v24, 6  ;;  %v7407_v5 = vrot.slane %v917_v56, 6  ;;  %v11858_v56 = vld [vmem:[#allocation37_spill] sm:$0xff] }
 0x26b   :  { %v920_v12 = vadd.f32 %v11849_v62, %v879_v9  ;;  %v7410_v13 = vrot.slane %v1081_v59, 4  ;;  %v1374_v17 = vsel %vm11795_vm15, %v7343_v57, %v7345_v23  ;;  %v5744_v8 = vrot.slane %v1369_v41, 9  ;;  %v11853_v23 = vld [vmem:[#allocation13_spill] sm:$0xff] }
 0x26c   :  { %v1245_v28 = vadd.f32 %v1244_v47, %v1204_v27  ;;  %v5745_v2 = vrot.slane %v1373_v37, 9  ;;  %v1376_v10 = vsel %vm1313_vm2, %v1375_v34, %v1374_v17  ;;  %v7420_v16 = vadd.f32 %v11851_v52, %v11850_v4  ;;  %v1247_v61 = vpop.f32.mrf.mxu2  ;;  %v11855_v27 = vld [vmem:[#allocation17_spill] sm:$0xff] }
 0x26d   :  { %v1165_v43 = vpop.f32.mrf.mxu0  ;;  %v1084_v29 = vadd.f32 %v11852_v50, %v1043_v18  ;;  %v5747_v35 = vrot.slane %v1381_v60, 9  ;;  %v756_v49 = vadd.f32 %v11854_v40, %v11853_v23  ;;  %v1303_v51 = vrot.slane %v920_v12, 6 }
 0x26e   :  { %v7399_v1 = vrot.slane %v1245_v28, 2  ;;  %1611 = vrot.lane.b32.xlu1 %v7392_v39, %s5911_s19  ;;  %1609 = vrot.lane.b32.xlu2 %v7394_v30, %s5911_s19  ;;  %v1166_v46 = vadd.f32 %v1165_v43, %v1124_v44  ;;  %v1377_v20 = vrot.slane %v1376_v10, 4  ;;  %v1382_v63 = vsel %vm11798_vm14, %v7420_v16, %v7407_v5  ;;  %v1127_v44 = vpop.f32.mrf.mxu3 }
 0x26f   :  { %v7431_v48 = vmax.f32 %v1369_v41, %v5744_v8  ;;  %v7433_v53 = vmax.f32 %v1373_v37, %v5745_v2  ;;  %v841_v21 = vadd.f32 %v11856_v54, %v11855_v27  ;;  %v1005_v25 = vadd.f32 %v11858_v56, %v11857_v6 }
 0x270   :  { %1613 = vrot.lane.b32.xlu0 %v7405_v55, %s5911_s19  ;;  %v1383_v57 = vsel %vm11795_vm15, %v7410_v13, %v7399_v1  ;;  %v1390_v36 = vsel %vm11798_vm14, %v7410_v13, %v7399_v1  ;;  %v1389_v45 = vsel %vm11795_vm15, %v7420_v16, %v7407_v5  ;;  %v1304_v59 = vrot.slane %v1084_v29, 4 }
 0x271   :  { %v1206_v47 = vpop.f32.mrf.mxu1  ;;  %v1384_v9 = vsel %vm1313_vm2, %v1382_v63, %v1383_v57  ;;  %v7450_v28 = vmax.f32 %v1381_v60, %v5747_v35  ;;  %v1394_v37 = vsel %vm11797_vm0, %v7410_v13, %v7399_v1  ;;  %v5746_v34 = vrot.slane %v1377_v20, 9 }
 0x272   :  { %v1207_v3 = vadd.f32 %v1206_v47, %v1166_v46  ;;  %v1397_v22 = vsel %vm11798_vm14, %v756_v49, %v1303_v51  ;;  %v1391_v18 = vsel %vm1313_vm2, %v1390_v36, %v1389_v45  ;;  %v1393_v62 = vsel %vm1317_vm1, %v7407_v5, %v7420_v16  ;;  %v11859_v46 = vld [vmem:[#allocation26_spill] sm:$0xff]  ;;  %v11861_v36 = vld [vmem:[#allocation36_spill] sm:$0xff] }
 0x273   :  { %v5748_v60 = vrot.slane %v1384_v9, 9  ;;  %v882_v8 = vadd.f32 %v11859_v46, %v841_v21  ;;  %v1046_v2 = vadd.f32 %v7226_v33, %v1005_v25  ;;  %v1395_v52 = vsel %vm11796_vm3, %v1394_v37, %v1393_v62  ;;  %v11860_v33 = vld [vmem:[#allocation24_spill] sm:$0xff] }
 0x274   :  { %v1248_v14 = vadd.f32 %v1247_v61, %v1207_v3  ;;  %v1400_v50 = vsel %vm11797_vm0, %v756_v49, %v1303_v51  ;;  %v1250_v29 = vpop.f32.mrf.mxu2  ;;  %v1392_v3 = vrot.slane %v1391_v18, 4  ;;  %v7470_v23 = vmax.f32 %v1377_v20, %v5746_v34 }
 0x275   :  { %v1168_v41 = vpop.f32.mrf.mxu0  ;;  %v7472_v40 = vmax.f32 %v1384_v9, %v5748_v60  ;;  %v1396_v63 = vrot.slane %v1395_v52, 6  ;;  %v1087_v27 = vadd.f32 %v11861_v36, %v1046_v2  ;;  %v1408_v45 = vsel %vm1317_vm1, %v1303_v51, %v756_v49 }
 0x276   :  { %v1305_v24 = vrot.slane %v1248_v14, 2  ;;  %1615 = vrot.lane.b32.xlu1 %v7431_v48, %s5911_s19  ;;  %1617 = vrot.lane.b32.xlu2 %v7433_v53, %s5911_s19  ;;  %v1169_v12 = vadd.f32 %v1168_v41, %v1127_v44  ;;  %v923_v14 = vadd.f32 %v11860_v33, %v882_v8  ;;  %v5750_v56 = vrot.slane %v1392_v3, 9 }
 0x277   :  { %v5751_v9 = vrot.slane %v1396_v63, 9  ;;  %v1404_v37 = vsel %vm11795_vm15, %v756_v49, %v1303_v51  ;;  %v1386_v51 = vsel %vm1317_vm1, %v7399_v1, %v7410_v13 }
 0x278   :  { %1621 = vrot.lane.b32.xlu0 %v7450_v28, %s5911_s19  ;;  %v1398_v43 = vsel %vm11795_vm15, %v1304_v59, %v1305_v24  ;;  %v1401_v17 = vsel %vm1317_vm1, %v1305_v24, %v1304_v59  ;;  %v1409_v6 = vsel %vm11797_vm0, %v1304_v59, %v1305_v24  ;;  %v1405_v20 = vsel %vm11798_vm14, %v1304_v59, %v1305_v24 }
 0x279   :  { %v1209_v10 = vpop.f32.mrf.mxu1  ;;  %v1399_v4 = vsel %vm1313_vm2, %v1397_v22, %v1398_v43  ;;  %v1402_v35 = vsel %vm11796_vm3, %v1400_v50, %v1401_v17  ;;  %v1306_v44 = vrot.slane %v923_v14, 6  ;;  %v1410_v41 = vsel %vm11796_vm3, %v1409_v6, %v1408_v45  ;;  %v11862_v43 = vld [vmem:[#allocation14_spill] sm:$0xff] }
 0x27a   :  { %v1210_v61 = vadd.f32 %v1209_v10, %v1169_v12  ;;  %v5752_v47 = vrot.slane %v1399_v4, 9  ;;  %v1403_v21 = vrot.slane %v1402_v35, 2  ;;  %v1406_v34 = vsel %vm1313_vm2, %v1405_v20, %v1404_v37 }
 0x27b   :  { %v1307_v22 = vrot.slane %v1087_v27, 4  ;;  %v7490_v62 = vmax.f32 %v1392_v3, %v5750_v56  ;;  %v7492_v59 = vmax.f32 %v1396_v63, %v5751_v9  ;;  %v1411_v24 = vrot.slane %v1410_v41, 6 }
 0x27c   :  { %v1251_v57 = vadd.f32 %v1250_v29, %v1210_v61  ;;  %v7480_v54 = vmax.f32 %v1399_v4, %v5752_v47  ;;  %v5753_v18 = vrot.slane %v1403_v21, 9  ;;  %v1407_v12 = vrot.slane %v1406_v34, 4 }
 0x27d   :  { %v1412_v17 = vsel %vm11798_vm14, %v11862_v43, %v1306_v44  ;;  %v5755_v2 = vrot.slane %v1411_v24, 9  ;;  %v1385_v4 = vsel %vm11797_vm0, %v7420_v16, %v7407_v5  ;;  %v1415_v52 = vsel %vm11797_vm0, %v11862_v43, %v1306_v44 }
 0x27e   :  { %1619 = vrot.lane.b32.xlu1 %v7470_v23, %s5911_s19  ;;  %1623 = vrot.lane.b32.xlu2 %v7472_v40, %s5911_s19  ;;  %v1308_v25 = vrot.slane %v1251_v57, 2  ;;  %v7501_v49 = vmax.f32 %v1403_v21, %v5753_v18  ;;  %v5754_v10 = vrot.slane %v1407_v12, 9  ;;  %v1387_v61 = vsel %vm11796_vm3, %v1385_v4, %v1386_v51 }
 0x27f   :  { %v7517_v47 = vmax.f32 %v1411_v24, %v5755_v2  ;;  %v1388_v29 = vrot.slane %v1387_v61, 2  ;;  %vm1980_vm0 = vcmask 1046534  }
 0x280   :  { %1631 = vrot.lane.b32.xlu0 %v7480_v54, %s5911_s19  ;;  %v1413_v60 = vsel %vm11795_vm15, %v1307_v22, %v1308_v25  ;;  %v1416_v46 = vsel %vm1317_vm1, %v1308_v25, %v1307_v22  ;;  %v7519_v50 = vmax.f32 %v1407_v12, %v5754_v10  ;;  %vm1978_vm15 = vcmask 1045509  }
 0x281   :  { %v1414_v8 = vsel %vm1313_vm2, %v1412_v17, %v1413_v60  ;;  %v1417_v1 = vsel %vm11796_vm3, %v1415_v52, %v1416_v46  ;;  %v5749_v16 = vrot.slane %v1388_v29, 9 }
 0x282   :  { %v5756_v13 = vrot.slane %v1414_v8, 9  ;;  %v1418_v3 = vrot.slane %v1417_v1, 2 }
 0x283   :  { %v7529_v57 = vmax.f32 %v1388_v29, %v5749_v16 }
 0x284   :  { %v7525_v5 = vmax.f32 %v1414_v8, %v5756_v13  ;;  %v5757_v35 = vrot.slane %v1418_v3, 9 }
 0x286   :  { %1627 = vrot.lane.b32.xlu1 %v7490_v62, %s5911_s19  ;;  %1629 = vrot.lane.b32.xlu2 %v7492_v59, %s5911_s19  ;;  %v7531_v63 = vmax.f32 %v1418_v3, %v5757_v35 }
 0x288   :  { %1633 = vrot.lane.b32.xlu0 %v7501_v49, %s5911_s19 }
 0x28e   :  { %1637 = vrot.lane.b32.xlu1 %v7517_v47, %s5911_s19  ;;  %1635 = vrot.lane.b32.xlu2 %v7519_v50, %s5911_s19 }
 0x290   :  { %1639 = vrot.lane.b32.xlu0 %v7525_v5, %s5911_s19 }
 0x296   :  { %1625 = vrot.lane.b32.xlu1 %v7529_v57, %s5911_s19  ;;  %1641 = vrot.lane.b32.xlu2 %v7531_v63, %s5911_s19 }
 0x2a8   :  { %v1588_v33 = vpop.permute.xlu2 %1587 }
 0x2a9   :  { %v1643_v36 = vrot.slane %v1588_v33, 2  ;;  %v1671_v27 = vrot.slane %v1588_v33, 4 }
 0x2ab   :  { %v1699_v6 = vsel %vm220_vm9, %v1643_v36, %v1671_v27 }
 0x2ac   :  { %v1755_v25 = vmax.f32 %v7252_v19, %v1699_v6 }
 0x2ae   :  { %v1811_v37 = vmul.f32 0.0001, %v1755_v25  ;;  %vm1783_vm4 = vcmp.gt.f32.partialorder %v1755_v25, 0.0 }
 0x2b0   :  { %v1592_v14 = vpop.permute.xlu2 %1591  ;;  %v1839_v17 = vsel %vm1783_vm4, %v1755_v25, %v1811_v37  ;;  %vm1976_vm4 = vcmask 1044484  }
 0x2b1   :  { %v1645_v20 = vrot.slane %v1592_v14, 2  ;;  %v1673_v56 = vrot.slane %v1592_v14, 4  ;;  %v1918_v52 = vperm.slane %v1839_v17, 0  ;;  %v1919_v13 = vperm.slane %v1839_v17, 2 }
 0x2b3   :  { %v1701_v9 = vsel %vm220_vm9, %v1645_v20, %v1673_v56 }
 0x2b4   :  { %v1757_v44 = vmax.f32 %v7286_v38, %v1701_v9 }
 0x2b6   :  { %vm1785_vm5 = vcmp.gt.f32.partialorder %v1757_v44, 0.0  ;;  %v1813_v51 = vmul.f32 0.0001, %v1757_v44 }
 0x2b8   :  { %v1600_v21 = vpop.permute.xlu2 %1599  ;;  %v1841_v29 = vsel %vm1785_vm5, %v1757_v44, %v1813_v51 }
 0x2b9   :  { %v1649_v8 = vrot.slane %v1600_v21, 2  ;;  %v1677_v2 = vrot.slane %v1600_v21, 4  ;;  %v1923_v6 = vperm.slane %v1841_v29, 2 }
 0x2bb   :  { %v1705_v35 = vsel %vm220_vm9, %v1649_v8, %v1677_v2 }
 0x2bc   :  { %v1761_v56 = vmax.f32 %v7321_v26, %v1705_v35 }
 0x2be   :  { %vm1789_vm11 = vcmp.gt.f32.partialorder %v1761_v56, 0.0 }
 0x2c0   :  { %v1598_v45 = vpop.permute.xlu2 %1597 }
 0x2c1   :  { %v1648_v41 = vrot.slane %v1598_v45, 2  ;;  %v1676_v18 = vrot.slane %v1598_v45, 4 }
 0x2c2   :  { %v1594_v34 = vpop.permute.xlu1 %1593  ;;  %v1590_v22 = vpop.permute.xlu0 %1589 }
 0x2c3   :  { %v1646_v24 = vrot.slane %v1594_v34, 2  ;;  %v1674_v12 = vrot.slane %v1594_v34, 4  ;;  %v1644_v60 = vrot.slane %v1590_v22, 2  ;;  %v1672_v43 = vrot.slane %v1590_v22, 4 }
 0x2c4   :  { %v1704_v10 = vsel %vm220_vm9, %v1648_v41, %v1676_v18 }
 0x2c5   :  { %v1702_v19 = vsel %vm220_vm9, %v1646_v24, %v1674_v12  ;;  %v1700_v46 = vsel %vm220_vm9, %v1644_v60, %v1672_v43  ;;  %v1760_v3 = vmax.f32 %v7357_v7, %v1704_v10  ;;  %v1817_v12 = vmul.f32 0.0001, %v1761_v56 }
 0x2c6   :  { %v1756_v38 = vmax.f32 %v7261_v58, %v1700_v46  ;;  %v1758_v61 = vmax.f32 %v7259_v31, %v1702_v19  ;;  %v1922_v58 = vperm.slane %v1841_v29, 0 }
 0x2c7   :  { %v1816_v25 = vmul.f32 0.0001, %v1760_v3  ;;  %vm1788_vm3 = vcmp.gt.f32.partialorder %v1760_v3, 0.0 }
 0x2c8   :  { %v1610_v4 = vpop.permute.xlu2 %1609  ;;  %vm1784_vm6 = vcmp.gt.f32.partialorder %v1756_v38, 0.0  ;;  %v1812_v1 = vmul.f32 0.0001, %v1756_v38  ;;  %v1814_v31 = vmul.f32 0.0001, %v1758_v61  ;;  %vm1786_vm5 = vcmp.gt.f32.partialorder %v1758_v61, 0.0 }
 0x2c9   :  { %v1654_v45 = vrot.slane %v1610_v4, 2  ;;  %v1682_v22 = vrot.slane %v1610_v4, 4  ;;  %v1844_v43 = vsel %vm1788_vm3, %v1760_v3, %v1816_v25 }
 0x2ca   :  { %v1596_v16 = vpop.permute.xlu0 %1595  ;;  %v1840_v33 = vsel %vm1784_vm6, %v1756_v38, %v1812_v1  ;;  %vm1982_vm6 = vcmask 1047559   ;;  %v1842_v26 = vsel %vm1786_vm5, %v1758_v61, %v1814_v31  ;;  %v1928_v3 = vperm.slane %v1844_v43, 0 }
 0x2cb   :  { %v1647_v14 = vrot.slane %v1596_v16, 2  ;;  %v1675_v36 = vrot.slane %v1596_v16, 4  ;;  %v1920_v27 = vperm.slane %v1840_v33, 0  ;;  %v1921_v21 = vperm.slane %v1840_v33, 2 }
 0x2cc   :  { %v1925_v2 = vperm.slane %v1842_v26, 2  ;;  %v1924_v38 = vperm.slane %v1842_v26, 0 }
 0x2cd   :  { %v1703_v20 = vsel %vm220_vm9, %v1647_v14, %v1675_v36  ;;  %v1984_v9 = vsel %vm1974_vm8, %v1921_v21, %v1919_v13  ;;  %v1975_v34 = vsel %vm1974_vm8, %v1920_v27, %v1918_v52  ;;  %v1710_v52 = vsel %vm220_vm9, %v1654_v45, %v1682_v22 }
 0x2ce   :  { %v1759_v7 = vmax.f32 %v7299_v0, %v1703_v20  ;;  %v1985_v17 = vsel %vm1976_vm4, %v1923_v6, %v1984_v9  ;;  %v1977_v8 = vsel %vm1976_vm4, %v1922_v58, %v1975_v34  ;;  %v1929_v13 = vperm.slane %v1844_v43, 2 }
 0x2cf   :  { %v1986_v29 = vsel %vm1978_vm15, %v1925_v2, %v1985_v17  ;;  %v1979_v16 = vsel %vm1978_vm15, %v1924_v38, %v1977_v8  ;;  %v1845_v36 = vsel %vm1789_vm11, %v1761_v56, %v1817_v12  ;;  %v1766_v27 = vmax.f32 %v7394_v30, %v1710_v52 }
 0x2d0   :  { %v1815_v37 = vmul.f32 0.0001, %v1759_v7  ;;  %v1604_v44 = vpop.permute.xlu1 %1603  ;;  %v1618_v41 = vpop.permute.xlu2 %1617  ;;  %vm1787_vm14 = vcmp.gt.f32.partialorder %v1759_v7, 0.0  ;;  %v1930_v9 = vperm.slane %v1845_v36, 0  ;;  %vm1989_vm11 = vcmask 1041409  }
 0x2d1   :  { %v1651_v18 = vrot.slane %v1604_v44, 2  ;;  %v1679_v24 = vrot.slane %v1604_v44, 4  ;;  %v1658_v20 = vrot.slane %v1618_v41, 2  ;;  %vm1794_vm5 = vcmp.gt.f32.partialorder %v1766_v27, 0.0 }
 0x2d2   :  { %v1602_v0 = vpop.permute.xlu0 %1601  ;;  %v1843_v60 = vsel %vm1787_vm14, %v1759_v7, %v1815_v37  ;;  %v1686_v7 = vrot.slane %v1618_v41, 4  ;;  %v1822_v44 = vmul.f32 0.0001, %v1766_v27  ;;  %v1931_v12 = vperm.slane %v1845_v36, 2 }
 0x2d3   :  { %v1707_v51 = vsel %vm220_vm9, %v1651_v18, %v1679_v24  ;;  %v1650_v19 = vrot.slane %v1602_v0, 2  ;;  %v1678_v46 = vrot.slane %v1602_v0, 4  ;;  %v1927_v10 = vperm.slane %v1843_v60, 2 }
 0x2d4   :  { %v1926_v4 = vperm.slane %v1843_v60, 0  ;;  %v1763_v61 = vmax.f32 %v7319_v42, %v1707_v51  ;;  %v1714_v18 = vsel %vm220_vm9, %v1658_v20, %v1686_v7 }
 0x2d5   :  { %v1706_v1 = vsel %vm220_vm9, %v1650_v19, %v1678_v46  ;;  %v1987_v33 = vsel %vm1980_vm0, %v1927_v10, %v1986_v29  ;;  %v7581_v19 = vmax.f32 %v7433_v53, %v1714_v18  ;;  %v1850_v10 = vsel %vm1794_vm5, %v1766_v27, %v1822_v44 }
 0x2d6   :  { %v1762_v35 = vmax.f32 %v7331_v15, %v1706_v1  ;;  %v1981_v14 = vsel %vm1980_vm0, %v1926_v4, %v1979_v16  ;;  %v1988_v21 = vsel %vm1982_vm6, %v1929_v13, %v1987_v33  ;;  %vm1791_vm14 = vcmp.gt.f32.partialorder %v1763_v61, 0.0 }
 0x2d7   :  { %v1983_v42 = vsel %vm1982_vm6, %v1928_v3, %v1981_v14  ;;  %v1819_v31 = vmul.f32 0.0001, %v1763_v61  ;;  %2031 = vrot.lane.b32.xlu1 %v1988_v21, %s5911_s19  ;;  %vm1798_vm5 = vcmp.gt.f32.partialorder %v7581_v19, 0.0 }
 0x2d8   :  { %v1606_v58 = vpop.permute.xlu1 %1605  ;;  %v7569_v6 = vpop.permute.xlu2 %1623  ;;  %2029 = vrot.lane.b32.xlu0 %v1983_v42, %s5911_s19  ;;  %vm1790_vm3 = vcmp.gt.f32.partialorder %v1762_v35, 0.0  ;;  %v1818_v15 = vmul.f32 0.0001, %v1762_v35 }
 0x2d9   :  { %v1652_v56 = vrot.slane %v1606_v58, 2  ;;  %v1680_v25 = vrot.slane %v1606_v58, 4  ;;  %v1847_v41 = vsel %vm1791_vm14, %v1763_v61, %v1819_v31  ;;  %v1661_v31 = vrot.slane %v7569_v6, 2 }
 0x2da   :  { %v1608_v30 = vpop.permute.xlu0 %1607  ;;  %v1846_v34 = vsel %vm1790_vm3, %v1762_v35, %v1818_v15  ;;  %v1934_v51 = vperm.slane %v1847_v41, 0  ;;  %v1935_v27 = vperm.slane %v1847_v41, 2  ;;  %v1689_v20 = vrot.slane %v7569_v6, 4 }
 0x2db   :  { %v1653_v45 = vrot.slane %v1608_v30, 2  ;;  %v1681_v37 = vrot.slane %v1608_v30, 4  ;;  %v1708_v22 = vsel %vm220_vm9, %v1652_v56, %v1680_v25  ;;  %v1932_v24 = vperm.slane %v1846_v34, 0 }
 0x2dc   :  { %v1764_v26 = vmax.f32 %v7355_v32, %v1708_v22  ;;  %v1933_v46 = vperm.slane %v1846_v34, 2 }
 0x2dd   :  { %v1709_v0 = vsel %vm220_vm9, %v1653_v45, %v1681_v37  ;;  %v1990_v17 = vsel %vm1989_vm11, %v1932_v24, %v1930_v9 }
 0x2de   :  { %vm1792_vm13 = vcmp.gt.f32.partialorder %v1764_v26, 0.0  ;;  %v1820_v60 = vmul.f32 0.0001, %v1764_v26  ;;  %v1765_v43 = vmax.f32 %v7368_v11, %v1709_v0  ;;  %v1992_v11 = vsel %vm1991_vm7, %v1934_v51, %v1990_v17 }
 0x2df   :  { %v1998_v36 = vsel %vm1989_vm11, %v1933_v46, %v1931_v12  ;;  %v1826_v12 = vmul.f32 0.0001, %v7581_v19  ;;  %v1941_v0 = vperm.slane %v1850_v10, 2 }
 0x2e0   :  { %v1612_v8 = vpop.permute.xlu1 %1611  ;;  %v1630_v2 = vpop.permute.xlu2 %1629  ;;  %v1848_v32 = vsel %vm1792_vm13, %v1764_v26, %v1820_v60  ;;  %vm1793_vm14 = vcmp.gt.f32.partialorder %v1765_v43, 0.0  ;;  %v1821_v38 = vmul.f32 0.0001, %v1765_v43  ;;  %v1999_v30 = vsel %vm1991_vm7, %v1935_v27, %v1998_v36 }
 0x2e1   :  { %v1655_v4 = vrot.slane %v1612_v8, 2  ;;  %v1936_v52 = vperm.slane %v1848_v32, 0  ;;  %v1683_v61 = vrot.slane %v1612_v8, 4  ;;  %v1664_v1 = vrot.slane %v1630_v2, 2 }
 0x2e2   :  { %v1614_v13 = vpop.permute.xlu0 %1613  ;;  %v1849_v29 = vsel %vm1793_vm14, %v1765_v43, %v1821_v38  ;;  %v1692_v3 = vrot.slane %v1630_v2, 4  ;;  %v1937_v35 = vperm.slane %v1848_v32, 2  ;;  %v1940_v26 = vperm.slane %v1850_v10, 0 }
 0x2e3   :  { %v1656_v16 = vrot.slane %v1614_v13, 2  ;;  %v1684_v53 = vrot.slane %v1614_v13, 4  ;;  %v1938_v33 = vperm.slane %v1849_v29, 0  ;;  %v1711_v14 = vsel %vm220_vm9, %v1655_v4, %v1683_v61 }
 0x2e4   :  { %v1767_v21 = vmax.f32 %v7392_v39, %v1711_v14  ;;  %v1993_v58 = vsel %vm1974_vm8, %v1936_v52, %v1992_v11  ;;  %v1939_v7 = vperm.slane %v1849_v29, 2  ;;  %v1720_v25 = vsel %vm220_vm9, %v1664_v1, %v1692_v3 }
 0x2e5   :  { %v1712_v42 = vsel %vm220_vm9, %v1656_v16, %v1684_v53  ;;  %v1994_v37 = vsel %vm1976_vm4, %v1938_v33, %v1993_v58  ;;  %v2000_v44 = vsel %vm1974_vm8, %v1937_v35, %v1999_v30  ;;  %v1717_v43 = vsel %vm220_vm9, %v1661_v31, %v1689_v20 }
 0x2e6   :  { %v1768_v15 = vmax.f32 %v7405_v55, %v1712_v42  ;;  %v1823_v56 = vmul.f32 0.0001, %v1767_v21  ;;  %vm1795_vm13 = vcmp.gt.f32.partialorder %v1767_v21, 0.0  ;;  %v2001_v60 = vsel %vm1976_vm4, %v1939_v7, %v2000_v44 }
 0x2e7   :  { %v1776_v17 = vmax.f32 %v7492_v59, %v1720_v25  ;;  %v1995_v46 = vsel %vm1978_vm15, %v1940_v26, %v1994_v37  ;;  %v2002_v10 = vsel %vm1978_vm15, %v1941_v0, %v2001_v60  ;;  %v7614_v53 = vsel %vm1798_vm5, %v7581_v19, %v1826_v12 }
 0x2e8   :  { %v1616_v9 = vpop.permute.xlu1 %1615  ;;  %v1636_v45 = vpop.permute.xlu2 %1635  ;;  %vm1796_vm3 = vcmp.gt.f32.partialorder %v1768_v15, 0.0  ;;  %v1824_v39 = vmul.f32 0.0001, %v1768_v15  ;;  %v1851_v55 = vsel %vm1795_vm13, %v1767_v21, %v1823_v56  ;;  %v1773_v35 = vmax.f32 %v7472_v40, %v1717_v43 }
 0x2e9   :  { %v1657_v34 = vrot.slane %v1616_v9, 2  ;;  %v1685_v22 = vrot.slane %v1616_v9, 4  ;;  %v1667_v6 = vrot.slane %v1636_v45, 2  ;;  %v1695_v41 = vrot.slane %v1636_v45, 4 }
 0x2ea   :  { %v1622_v18 = vpop.permute.xlu0 %1621  ;;  %v1852_v24 = vsel %vm1796_vm3, %v1768_v15, %v1824_v39  ;;  %v1942_v2 = vperm.slane %v1851_v55, 0  ;;  %v1943_v38 = vperm.slane %v1851_v55, 2  ;;  %v1832_v33 = vmul.f32 0.0001, %v1776_v17 }
 0x2eb   :  { %v1713_v51 = vsel %vm220_vm9, %v1657_v34, %v1685_v22  ;;  %v1723_v8 = vsel %vm220_vm9, %v1667_v6, %v1695_v41  ;;  %v1944_v32 = vperm.slane %v1852_v24, 0  ;;  %v1660_v4 = vrot.slane %v1622_v18, 2 }
 0x2ec   :  { %v1688_v52 = vrot.slane %v1622_v18, 4  ;;  %v1945_v61 = vperm.slane %v1852_v24, 2  ;;  %v1996_v1 = vsel %vm1980_vm0, %v1942_v2, %v1995_v46  ;;  %v2003_v13 = vsel %vm1980_vm0, %v1943_v38, %v2002_v10  ;;  %v2652_v2 = vld [vmem:[%s11786_s2 + $0x1c0] sm:$0xff] }
 0x2ed   :  { %v1769_v59 = vmax.f32 %v7431_v48, %v1713_v51  ;;  %v1779_v11 = vmax.f32 %v7519_v50, %v1723_v8  ;;  %v1997_v29 = vsel %vm1982_vm6, %v1944_v32, %v1996_v1  ;;  %vm1804_vm14 = vcmp.gt.f32.partialorder %v1776_v17, 0.0  ;;  %v2720_v8 = vld [vmem:[%s11786_s2 + $0x3e0] sm:$0xff] }
 0x2ee   :  { %2033 = vrot.lane.b32.xlu2 %v1997_v29, %s5911_s19  ;;  %v1716_v14 = vsel %vm220_vm9, %v1660_v4, %v1688_v52  ;;  %v2004_v48 = vsel %vm1982_vm6, %v1945_v61, %v2003_v13  ;;  %v7621_v40 = vsel %vm1804_vm14, %v1776_v17, %v1832_v33  ;;  %v1948_v15 = vperm.slane %v7614_v53, 0  ;;  %3357 = vmatpush.msra.mxu0 %v2720_v8  ;;  %v2648_v10 = vld [vmem:[%s11786_s2 + $0x1a0] sm:$0xff] }
 0x2ef   :  { %2035 = vrot.lane.b32.xlu0 %v2004_v48, %s5911_s19  ;;  %v1825_v19 = vmul.f32 0.0001, %v1769_v59  ;;  %v1835_v31 = vmul.f32 0.0001, %v1779_v11  ;;  %vm1797_vm13 = vcmp.gt.f32.partialorder %v1769_v59, 0.0  ;;  %vm1807_vm3 = vcmp.gt.f32.partialorder %v1779_v11, 0.0 }
 0x2f0   :  { %v1620_v3 = vpop.permute.xlu1 %1619  ;;  %v1642_v16 = vpop.permute.xlu2 %1641  ;;  %v1829_v56 = vmul.f32 0.0001, %v1773_v35  ;;  %v1772_v25 = vmax.f32 %v7450_v28, %v1716_v14  ;;  %v1949_v9 = vperm.slane %v7614_v53, 2  ;;  %vm1801_vm5 = vcmp.gt.f32.partialorder %v1773_v35, 0.0  ;;  %v2712_v1 = vld [vmem:[%s11786_s2 + $0x3a0] sm:$0xff] }
 0x2f1   :  { %v1659_v50 = vrot.slane %v1620_v3, 2  ;;  %v1687_v27 = vrot.slane %v1620_v3, 4  ;;  %v1670_v21 = vrot.slane %v1642_v16, 2  ;;  %v1698_v42 = vrot.slane %v1642_v16, 4  ;;  %v7676_v3 = vld [vmem:[#allocation3 + $0x28] sm:$0xff] }
 0x2f2   :  { %v1632_v36 = vpop.permute.xlu0 %1631  ;;  %v1960_v37 = vperm.slane %v7621_v40, 0  ;;  %v7631_v44 = vsel %vm1797_vm13, %v1769_v59, %v1825_v19  ;;  %v7633_v34 = vsel %vm1807_vm3, %v1779_v11, %v1835_v31  ;;  %v1961_v55 = vperm.slane %v7621_v40, 2  ;;  %v2644_v14 = vld [vmem:[%s11786_s2 + $0x180] sm:$0xff]  ;;  %2083 = vst.msk [vmem:[#allocation5 + $0x70] sm:$0xff] %vm220_vm9, %v7676_v3 }
 0x2f3   :  { %v1665_v58 = vrot.slane %v1632_v36, 2  ;;  %v1693_v20 = vrot.slane %v1632_v36, 4  ;;  %v1715_v7 = vsel %vm220_vm9, %v1659_v50, %v1687_v27  ;;  %v1726_v45 = vsel %vm220_vm9, %v1670_v21, %v1698_v42  ;;  %v2708_v48 = vld [vmem:[%s11786_s2 + $0x380] sm:$0xff] }
 0x2f4   :  { %v1771_v22 = vmax.f32 %v7470_v23, %v1715_v7  ;;  %v1828_v24 = vmul.f32 0.0001, %v1772_v25  ;;  %v7638_v26 = vmax.f32 %v7531_v63, %v1726_v45  ;;  %v7640_v12 = vsel %vm1801_vm5, %v1773_v35, %v1829_v56  ;;  %v2656_v63 = vld [vmem:[%s11786_s2 + $0x1e0] sm:$0xff] }
 0x2f5   :  { %v1721_v30 = vsel %vm220_vm9, %v1665_v58, %v1693_v20  ;;  %v1946_v0 = vperm.slane %v7631_v44, 0  ;;  %v1947_v60 = vperm.slane %v7631_v44, 2  ;;  %vm1800_vm13 = vcmp.gt.f32.partialorder %v1772_v25, 0.0  ;;  %3328 = vmatpush.msra.mxu3 %v2656_v63  ;;  %v2640_v50 = vld [vmem:[%s11786_s2 + $0x160] sm:$0xff] }
 0x2f6   :  { %v1777_v39 = vmax.f32 %v7480_v54, %v1721_v30  ;;  %v1966_v43 = vperm.slane %v7633_v34, 0  ;;  %v1967_v32 = vperm.slane %v7633_v34, 2  ;;  %vm1799_vm3 = vcmp.gt.f32.partialorder %v1771_v22, 0.0  ;;  %v2704_v7 = vld [vmem:[%s11786_s2 + $0x360] sm:$0xff] }
 0x2f7   :  { %v1827_v38 = vmul.f32 0.0001, %v1771_v22  ;;  %v7664_v61 = vsel %vm1800_vm13, %v1772_v25, %v1828_v24  ;;  %v1838_v29 = vmul.f32 0.0001, %v7638_v26  ;;  %3329 = vmatpush.msra.mxu3 %v2652_v2  ;;  %vm1869_vm13 = vcmask 254976   ;;  %v2632_v40 = vld [vmem:[%s11786_s2 + $0x120] sm:$0xff] }
 0x2f8   :  { %v1628_v6 = vpop.permute.xlu1 %1627  ;;  %vm1805_vm14 = vcmp.gt.f32.partialorder %v1777_v39, 0.0  ;;  %v1833_v28 = vmul.f32 0.0001, %v1777_v39  ;;  %v11863_v42 = vmov 0.0   ;;  %v2005_v20 = vsel %vm1974_vm8, %v1948_v15, %v1946_v0 }
 0x2f9   :  { %v1663_v41 = vrot.slane %v1628_v6, 2  ;;  %v1691_v18 = vrot.slane %v1628_v6, 4  ;;  %3330 = vmatpush.msra.mxu3 %v2648_v10  ;;  %1870 = vst.msk [vmem:[#allocation3 + $0x10] sm:$0x3] %vm1869_vm13, %v11863_v42  ;;  %v7693_v58 = vsel %vm1799_vm3, %v1771_v22, %v1827_v38  ;;  %v2010_v0 = vsel %vm1974_vm8, %v1949_v9, %v1947_v60 }
 0x2fa   :  { %v1634_v54 = vpop.permute.xlu0 %1633  ;;  %v7646_v17 = vsel %vm1805_vm14, %v1777_v39, %v1833_v28  ;;  %vm1810_vm14 = vcmp.gt.f32.partialorder %v7638_v26, 0.0  ;;  %1886 = vst.msk [vmem:[#allocation3 + $0x10] sm:$0xfc] %vm1881_vm12, %v11863_v42  ;;  %v2700_v28 = vld [vmem:[%s11786_s2 + $0x340] sm:$0xff]  ;;  %v1951_v53 = vperm.slane %v7693_v58, 2  ;;  %v1952_v34 = vperm.slane %v7664_v61, 0 }
 0x2fb   :  { %v1719_v23 = vsel %vm220_vm9, %v1663_v41, %v1691_v18  ;;  %v1666_v46 = vrot.slane %v1634_v54, 2  ;;  %v1694_v4 = vrot.slane %v1634_v54, 4  ;;  %v1962_v13 = vperm.slane %v7646_v17, 0  ;;  %3331 = vmatpush.msra.mxu3 %v2644_v14  ;;  %1873 = vst.msk [vmem:[#allocation3 + $0x58] sm:$0x3] %vm1869_vm13, %v11863_v42 }
 0x2fc   :  { %v1775_v51 = vmax.f32 %v7490_v62, %v1719_v23  ;;  %v2716_v62 = vld [vmem:[%s11786_s2 + $0x3c0] sm:$0xff]  ;;  %v1963_v59 = vperm.slane %v7646_v17, 2  ;;  %1882 = vst.msk [vmem:[#allocation3] sm:$0xfc] %vm1881_vm12, %v11863_v42  ;;  %v1950_v17 = vperm.slane %v7693_v58, 0  ;;  %vm2371_vm13 = vcmask 1044480  }
 0x2fd   :  { %v1722_v11 = vsel %vm220_vm9, %v1666_v46, %v1694_v4  ;;  %3358 = vmatpush.msra.mxu0 %v2716_v62  ;;  %3332 = vmatpush.msra.mxu3 %v2640_v50  ;;  %1884 = vst.msk [vmem:[#allocation3 + $0x48] sm:$0xfc] %vm1881_vm12, %v11863_v42  ;;  %v2696_v23 = vld [vmem:[%s11786_s2 + $0x320] sm:$0xff] }
 0x2fe   :  { %vm1803_vm5 = vcmp.gt.f32.partialorder %v1775_v51, 0.0  ;;  %v1831_v52 = vmul.f32 0.0001, %v1775_v51  ;;  %v1778_v35 = vmax.f32 %v7501_v49, %v1722_v11  ;;  %1888 = vst.msk [vmem:[#allocation3 + $0x58] sm:$0xfc] %vm1881_vm12, %v11863_v42 }
 0x2ff   :  { %3359 = vmatpush.msra.mxu0 %v2712_v1 }
 0x300   :  { %v1859_v16 = vsel %vm1803_vm5, %v1775_v51, %v1831_v52  ;;  %v1638_v33 = vpop.permute.xlu1 %1637  ;;  %vm1806_vm5 = vcmp.gt.f32.partialorder %v1778_v35, 0.0  ;;  %v1834_v19 = vmul.f32 0.0001, %v1778_v35  ;;  %v1866_v51 = vsel %vm1810_vm14, %v7638_v26, %v1838_v29 }
 0x301   :  { %v1958_v36 = vperm.slane %v1859_v16, 0  ;;  %v1959_v49 = vperm.slane %v1859_v16, 2  ;;  %v1668_v27 = vrot.slane %v1638_v33, 2  ;;  %v1696_v21 = vrot.slane %v1638_v33, 4  ;;  %3360 = vmatpush.msra.mxu0 %v2708_v48 }
 0x302   :  { %v1640_v31 = vpop.permute.xlu0 %1639  ;;  %v1862_v15 = vsel %vm1806_vm5, %v1778_v35, %v1834_v19  ;;  %v1972_v4 = vperm.slane %v1866_v51, 0  ;;  %v2006_v29 = vsel %vm1976_vm4, %v1950_v17, %v2005_v20  ;;  %v2011_v16 = vsel %vm1976_vm4, %v1951_v53, %v2010_v0  ;;  %v2608_v0 = vld [vmem:[%s11786_s2 + $0x60] sm:$0xff] }
 0x303   :  { %v1724_v56 = vsel %vm220_vm9, %v1668_v27, %v1696_v21  ;;  %v1669_v25 = vrot.slane %v1640_v31, 2  ;;  %v1697_v30 = vrot.slane %v1640_v31, 4  ;;  %v2015_v45 = vsel %vm1989_vm11, %v1960_v37, %v1958_v36  ;;  %v2636_v37 = vld [vmem:[%s11786_s2 + $0x140] sm:$0xff]  ;;  %3361 = vmatpush.msra.mxu0 %v2704_v7 }
 0x304   :  { %v1780_v39 = vmax.f32 %v7517_v47, %v1724_v56  ;;  %v2016_v22 = vsel %vm1991_vm7, %v1962_v13, %v2015_v45  ;;  %v2022_v6 = vsel %vm1989_vm11, %v1961_v55, %v1959_v49  ;;  %v1964_v41 = vperm.slane %v1862_v15, 0  ;;  %3333 = vmatpush.msra.mxu3 %v2636_v37  ;;  %v2092_v56 = vld [vmem:[#allocation3 + $0x10] sm:$0xfe]  ;;  %v2672_v17 = vld [vmem:[%s11786_s2 + $0x260] sm:$0xff] }
 0x305   :  { %v1965_v18 = vperm.slane %v1862_v15, 2  ;;  %v1725_v47 = vsel %vm220_vm9, %v1669_v25, %v1697_v30  ;;  %v2023_v24 = vsel %vm1991_vm7, %v1963_v59, %v2022_v6  ;;  %3362 = vmatpush.msra.mxu0 %v2700_v28  ;;  %v1954_v49 = vperm.slane %v7640_v12, 0  ;;  %v2628_v15 = vld [vmem:[%s11786_s2 + $0x100] sm:$0xff]  ;;  %v2215_v28 = vld [vmem:[#allocation3 + $0x10] sm:$0xfc] }
 0x306   :  { %vm1808_vm3 = vcmp.gt.f32.partialorder %v1780_v39, 0.0  ;;  %v1836_v55 = vmul.f32 0.0001, %v1780_v39  ;;  %v1781_v54 = vmax.f32 %v7525_v5, %v1725_v47  ;;  %v2017_v5 = vsel %vm1974_vm8, %v1964_v41, %v2016_v22  ;;  %3334 = vmatpush.msra.mxu3 %v2632_v40  ;;  %v2624_v22 = vld [vmem:[%s11786_s2 + $0xe0] sm:$0xff] }
 0x307   :  { %v2024_v44 = vsel %vm1974_vm8, %v1965_v18, %v2023_v24  ;;  %3363 = vmatpush.msra.mxu0 %v2696_v23  ;;  %v2018_v62 = vsel %vm1976_vm4, %v1966_v43, %v2017_v5  ;;  %v1955_v27 = vperm.slane %v7640_v12, 2  ;;  %v1973_v7 = vperm.slane %v1866_v51, 2  ;;  %v2688_v6 = vld [vmem:[%s11786_s2 + $0x2e0] sm:$0xff] }
 0x308   :  { %v1837_v9 = vmul.f32 0.0001, %v1781_v54  ;;  %v1626_v60 = vpop.permute.xlu1 %1625  ;;  %vm1809_vm7 = vcmp.gt.f32.partialorder %v1781_v54, 0.0  ;;  %v1864_v46 = vsel %vm1808_vm3, %v1780_v39, %v1836_v55  ;;  %v2025_v52 = vsel %vm1976_vm4, %v1967_v32, %v2024_v44  ;;  %3335 = vmatpush.msra.mxu3 %v2628_v15  ;;  %v2692_v39 = vld [vmem:[%s11786_s2 + $0x300] sm:$0xff] }
 0x309   :  { %v1662_v63 = vrot.slane %v1626_v60, 2  ;;  %v1690_v8 = vrot.slane %v1626_v60, 4  ;;  %v1968_v2 = vperm.slane %v1864_v46, 0  ;;  %v1969_v38 = vperm.slane %v1864_v46, 2  ;;  %3364 = vmatpush.msra.mxu0 %v2692_v39  ;;  %v2620_v41 = vld [vmem:[%s11786_s2 + $0xc0] sm:$0xff] }
 0x30a   :  { %v1865_v26 = vsel %vm1809_vm7, %v1781_v54, %v1837_v9  ;;  %v1953_v32 = vperm.slane %v7664_v61, 2  ;;  %v2133_v12 = vrot.slane %v2092_v56, 1  ;;  %v2134_v30 = vrot.slane %v7676_v3, 1  ;;  %3336 = vmatpush.msra.mxu3 %v2624_v22  ;;  %v2684_v47 = vld [vmem:[%s11786_s2 + $0x2c0] sm:$0xff] }
 0x30b   :  { %v1718_v10 = vsel %vm220_vm9, %v1662_v63, %v1690_v8  ;;  %v1970_v1 = vperm.slane %v1865_v26, 0  ;;  %v2019_v13 = vsel %vm1978_vm15, %v1968_v2, %v2018_v62  ;;  %v1971_v59 = vperm.slane %v1865_v26, 2  ;;  %3365 = vmatpush.msra.mxu0 %v2688_v6  ;;  %v2616_v24 = vld [vmem:[%s11786_s2 + $0xa0] sm:$0xff]  ;;  %v2464_v62 = vld [vmem:[#allocation3 + $0x30] sm:$0xf] }
 0x30c   :  { %v1774_v11 = vmax.f32 %v7529_v57, %v1718_v10  ;;  %v2026_v35 = vsel %vm1978_vm15, %v1969_v38, %v2025_v52  ;;  %v2007_v57 = vsel %vm1978_vm15, %v1952_v34, %v2006_v29  ;;  %v2012_v50 = vsel %vm1978_vm15, %v1953_v32, %v2011_v16  ;;  %3337 = vmatpush.msra.mxu3 %v2620_v41  ;;  %v2680_v55 = vld [vmem:[%s11786_s2 + $0x2a0] sm:$0xff] }
 0x30d   :  { %v2020_v43 = vsel %vm1980_vm0, %v1970_v1, %v2019_v13  ;;  %v2027_v33 = vsel %vm1980_vm0, %v1971_v59, %v2026_v35  ;;  %v2008_v61 = vsel %vm1980_vm0, %v1954_v49, %v2007_v57  ;;  %v2013_v19 = vsel %vm1980_vm0, %v1955_v27, %v2012_v50  ;;  %3366 = vmatpush.msra.mxu0 %v2684_v47  ;;  %v2676_v54 = vld [vmem:[%s11786_s2 + $0x280] sm:$0xff] }
 0x30e   :  { %v2021_v14 = vsel %vm1982_vm6, %v1972_v4, %v2020_v43  ;;  %vm1802_vm12 = vcmp.gt.f32.partialorder %v1774_v11, 0.0  ;;  %v1830_v48 = vmul.f32 0.0001, %v1774_v11  ;;  %v2028_v25 = vsel %vm1982_vm6, %v1973_v7, %v2027_v33  ;;  %3338 = vmatpush.msra.mxu3 %v2616_v24  ;;  %v2604_v5 = vld [vmem:[%s11786_s2 + $0x40] sm:$0xff]  ;;  %v2096_v4 = vld [vmem:[#allocation3 + $0x30] sm:$0x1] }
 0x30f   :  { %2041 = vrot.lane.b32.xlu0 %v2021_v14, %s5911_s19  ;;  %vm2126_vm4 = vcmask 1046528   ;;  %v2256_v37 = vrot.slane %v7676_v3, 2  ;;  %vm1876_vm0 = vcmask 257024   ;;  %v2255_v18 = vrot.slane %v2215_v28, 2  ;;  %3367 = vmatpush.msra.mxu0 %v2680_v55  ;;  %v2668_v44 = vld [vmem:[%s11786_s2 + $0x240] sm:$0xff] }
 0x310   :  { %v1858_v36 = vsel %vm1802_vm12, %v1774_v11, %v1830_v48  ;;  %v2135_v45 = vsel %vm2126_vm4, %v2133_v12, %v2134_v30  ;;  %1877 = vst.msk [vmem:[#allocation3 + $0x40] sm:$0xf] %vm1876_vm0, %v11863_v42  ;;  %v2600_v9 = vld [vmem:[%s11786_s2 + $0x20] sm:$0xff]  ;;  %vm2057_vm14 = vcmask 1047810   ;;  %v2136_v52 = vrot.slane %v2096_v4, 1 }
 0x311   :  { %v1956_v21 = vperm.slane %v1858_v36, 0  ;;  %v1957_v58 = vperm.slane %v1858_v36, 2  ;;  %1880 = vst.msk [vmem:[#allocation3 + $0x88] sm:$0xf] %vm1876_vm0, %v11863_v42  ;;  %v2257_v40 = vsel %vm1317_vm1, %v2255_v18, %v2256_v37  ;;  %v2612_v42 = vld [vmem:[%s11786_s2 + $0x80] sm:$0xff]  ;;  %3368 = vmatpush.msra.mxu0 %v2676_v54  ;;  %v2503_v10 = vrot.slane %v2464_v62, 4 }
 0x312   :  { %3339 = vmatpush.msra.mxu3 %v2612_v42  ;;  %v2664_v60 = vld [vmem:[%s11786_s2 + $0x220] sm:$0xff]  ;;  %v2465_v7 = vld [vmem:[#allocation3 + $0x38] sm:$0xf]  ;;  %v2341_v42 = vld [vmem:[#allocation3 + $0x30] sm:$0x7]  ;;  %vm11864_vm5 = vcmask 523264  }
 0x313   :  { %v2009_v31 = vsel %vm1982_vm6, %v1956_v21, %v2008_v61  ;;  %v2014_v20 = vsel %vm1982_vm6, %v1957_v58, %v2013_v19  ;;  %3369 = vmatpush.msra.mxu0 %v2672_v17  ;;  %v2596_v46 = vld [vmem:[%s11786_s2] sm:$0xff]  ;;  %v2097_v19 = vld [vmem:[#allocation3 + $0x38] sm:$0x1]  ;;  %v2505_v28 = vrot.slane %v2465_v7, 4  ;;  %vm11865_vm3 = vcmask 1048064   ;;  %vm11867_vm12 = vmmov %vm11864_vm5 }
 0x314   :  { %2037 = vrot.lane.b32.xlu1 %v2009_v31, %s5911_s19  ;;  %2039 = vrot.lane.b32.xlu2 %v2014_v20, %s5911_s19  ;;  %v2660_v63 = vld [vmem:[%s11786_s2 + $0x200] sm:$0xff]  ;;  %v2138_v12 = vrot.slane %v2097_v19, 1  ;;  %vm11866_vm7 = vcmask 785408   ;;  %vm11869_vm0 = vmmov %vm11864_vm5 }
 0x315   :  { %3340 = vmatpush.msra.mxu3 %v2608_v0  ;;  %3370 = vmatpush.msra.mxu0 %v2668_v44  ;;  %v2760_v62 = vld [vmem:[%s11786_s2 + $0x520] sm:$0xff] }
 0x317   :  { %v2098_v23 = vld [vmem:[#allocation3 + $0x40] sm:$0x1]  ;;  %3341 = vmatpush.msra.mxu3 %v2604_v5  ;;  %3371 = vmatpush.msra.mxu0 %v2664_v60  ;;  %v7886_v5 = vld [vmem:[#allocation3 + $0x70] sm:$0xff] }
 0x318   :  { %v2140_v51 = vrot.slane %v2098_v23, 1  ;;  %v2381_v23 = vrot.slane %v2341_v42, 3  ;;  %2089 = vst.msk [vmem:[#allocation5 + $0x130] sm:$0xff] %vm220_vm9, %v7886_v5 }
 0x319   :  { %3342 = vmatpush.msra.mxu3 %v2600_v9  ;;  %3372 = vmatpush.msra.mxu0 %v2660_v63  ;;  %v2780_v9 = vld [vmem:[%s11786_s2 + $0x5c0] sm:$0xff] }
 0x31a   :  { %v2141_v53 = vsel %vm2126_vm4, %v2134_v30, %v2140_v51 }
 0x31b   :  { %3343 = vmatpush.msra.mxu3 %v2596_v46 }
 0x31c   :  { %2043 = vrot.lane.b32.xlu1 %v2028_v25, %s5911_s19  ;;  %2167 = vrot.lane.b32.xlu2 %v2141_v53, %s5911_s19  ;;  %v2784_v53 = vld [vmem:[%s11786_s2 + $0x5e0] sm:$0xff] }
 0x31d   :  { %3386 = vmatpush.msra.mxu1 %v2784_v53 }
 0x31f   :  { %3387 = vmatpush.msra.mxu1 %v2780_v9 }
 0x324   :  { %2161 = vrot.lane.b32.xlu1 %v2135_v45, %s5911_s19 }
 0x32c   :  { %2283 = vrot.lane.b32.xlu1 %v2257_v40, %s5910_s18  ;;  %v2219_v40 = vld [vmem:[#allocation3 + $0x30] sm:$0x3] }
 0x32d   :  { %v2258_v0 = vrot.slane %v2219_v40, 2 }
 0x348   :  { %v2034_v8 = vpop.permute.xlu2 %2033 }
 0x349   :  { %v2032_v2 = vpop.permute.xlu1 %2031  ;;  %2060 = vst.msk [vmem:[#allocation3 + $0x18] sm:$0xff] %vm276_vm10, %v2034_v8 }
 0x34a   :  { %v2030_v38 = vpop.permute.xlu0 %2029 }
 0x34b   :  { %v2045_v26 = vsel %vm220_vm9, %v2030_v38, %v2032_v2  ;;  %2058 = vst.msk [vmem:[#allocation3] sm:$0xfc] %vm2057_vm14, %v2030_v38  ;;  %v2772_v2 = vld [vmem:[%s11786_s2 + $0x580] sm:$0xff] }
 0x34c   :  { %2059 = vst [vmem:[#allocation3 + $0x8] sm:$0xfc] %v2045_v26  ;;  %v2768_v38 = vld [vmem:[%s11786_s2 + $0x560] sm:$0xff] }
 0x34d   :  { %v2764_v26 = vld [vmem:[%s11786_s2 + $0x540] sm:$0xff] }
 0x350   :  { %v7847_v1 = vld [vmem:[#allocation3 + $0x18] sm:$0xff] }
 0x351   :  { %2081 = vst [vmem:[#allocation5 + $0x60] sm:$0xff] %v7847_v1  ;;  %v2495_v13 = vrot.slane %v7847_v1, 4  ;;  %v2128_v29 = vrot.slane %v7847_v1, 1  ;;  %v2373_v43 = vrot.slane %v7847_v1, 3  ;;  %v2250_v58 = vrot.slane %v7847_v1, 2 }
 0x352   :  { %v2066_v59 = vld [vmem:[#allocation3] sm:$0xff] }
 0x353   :  { %v2458_v11 = vld [vmem:[#allocation3] sm:$0xf0]  ;;  %v2067_v16 = vld [vmem:[#allocation3 + $0x8] sm:$0xff]  ;;  %2078 = vst [vmem:[#allocation5] sm:$0xff] %v2066_v59  ;;  %3344 = vmatmul.f32.vlgmr.msra.gmra.mxu3 %v2066_v59  ;;  %v2137_v34 = vsel %vm2126_vm4, %v2128_v29, %v2136_v52  ;;  %v2504_v14 = vsel %vm1313_vm2, %v2495_v13, %v2503_v10  ;;  %v2259_v17 = vsel %vm1317_vm1, %v2250_v58, %v2258_v0  ;;  %v2105_v52 = vld [vmem:[#allocation3 + $0x78] sm:$0x1] }
 0x354   :  { %v2494_v35 = vrot.slane %v2458_v11, 4  ;;  %2079 = vst [vmem:[#allocation5 + $0x8] sm:$0xff] %v2067_v16  ;;  %v2335_v32 = vld [vmem:[#allocation3] sm:$0xf8]  ;;  %3373 = vmatmul.f32.vlgmr.msra.gmra.mxu0 %v2067_v16  ;;  %2163 = vrot.lane.b32.xlu1 %v2137_v34, %s5911_s19  ;;  %v2336_v31 = vld [vmem:[#allocation3 + $0x8] sm:$0xf8]  ;;  %v2382_v51 = vsel %vm2371_vm13, %v2373_v43, %v2381_v23 }
 0x355   :  { %v2090_v33 = vld [vmem:[#allocation3] sm:$0xfe]  ;;  %v2372_v48 = vrot.slane %v2335_v32, 3  ;;  %2539 = vst [vmem:[#allocation5 + $0xa8] sm:$0xff] %v2504_v14  ;;  %v2091_v20 = vld [vmem:[#allocation3 + $0x8] sm:$0xfe] }
 0x356   :  { %v2127_v57 = vrot.slane %v2090_v33, 1  ;;  %v2496_v50 = vsel %vm1313_vm2, %v2494_v35, %v2495_v13  ;;  %v2213_v27 = vld [vmem:[#allocation3] sm:$0xfc]  ;;  %v2459_v56 = vld [vmem:[#allocation3 + $0x8] sm:$0xf0]  ;;  %v2375_v45 = vrot.slane %v2336_v31, 3 }
 0x357   :  { %v2374_v36 = vsel %vm2371_vm13, %v2372_v48, %v2373_v43  ;;  %2536 = vst [vmem:[#allocation5 + $0x48] sm:$0xff] %v2496_v50  ;;  %v2249_v21 = vrot.slane %v2213_v27, 2  ;;  %v2130_v15 = vrot.slane %v2091_v20, 1  ;;  %v2497_v41 = vrot.slane %v2459_v56, 4  ;;  %v2214_v44 = vld [vmem:[#allocation3 + $0x8] sm:$0xfc] }
 0x358   :  { %v2129_v49 = vsel %vm2126_vm4, %v2127_v57, %v2128_v29  ;;  %2402 = vrot.lane.b32.xlu0 %v2374_v36, %s5912_s20  ;;  %v2252_v46 = vrot.slane %v2214_v44, 2  ;;  %v2756_v10 = vld [vmem:[%s11786_s2 + $0x500] sm:$0xff]  ;;  %v2151_v16 = vrot.slane %v2105_v52, 1  ;;  %v2101_v43 = vld [vmem:[#allocation3 + $0x58] sm:$0xfe]  ;;  %v2149_v36 = vrot.slane %v7886_v5, 1 }
 0x359   :  { %2157 = vrot.lane.b32.xlu2 %v2129_v49, %s5911_s19  ;;  %v2251_v61 = vsel %vm1317_vm1, %v2249_v21, %v2250_v58  ;;  %v2748_v29 = vld [vmem:[%s11786_s2 + $0x4c0] sm:$0xff]  ;;  %v2473_v34 = vld [vmem:[#allocation3 + $0x78] sm:$0xf]  ;;  %v2474_v14 = vld [vmem:[#allocation3 + $0x80] sm:$0xf]  ;;  %v2148_v57 = vrot.slane %v2101_v43, 1 }
 0x35a   :  { %v2744_v33 = vld [vmem:[%s11786_s2 + $0x4a0] sm:$0xff]  ;;  %v2068_v27 = vld [vmem:[#allocation3 + $0x10] sm:$0xff]  ;;  %v2518_v21 = vrot.slane %v2473_v34, 4  ;;  %v2520_v58 = vrot.slane %v2474_v14, 4  ;;  %v2342_v0 = vld [vmem:[#allocation3 + $0x38] sm:$0x7] }
 0x35b   :  { %3347 = vmatmul.f32.gmra.mxu3 %v7847_v1  ;;  %v2752_v1 = vld [vmem:[%s11786_s2 + $0x4e0] sm:$0xff]  ;;  %2080 = vst.msk [vmem:[#allocation5 + $0x10] sm:$0xff] %vm220_vm9, %v2068_v27  ;;  %v2150_v40 = vsel %vm2126_vm4, %v2148_v57, %v2149_v36  ;;  %v2383_v9 = vrot.slane %v2342_v0, 3  ;;  %v2224_v43 = vld [vmem:[#allocation3 + $0x58] sm:$0xfc] }
 0x35c   :  { %v2740_v49 = vld [vmem:[%s11786_s2 + $0x480] sm:$0xff] }
 0x35d   :  { %v2732_v44 = vld [vmem:[%s11786_s2 + $0x440] sm:$0xff] }
 0x35e   :  { %v2107_v52 = vld [vmem:[#allocation3 + $0x88] sm:$0x1] }
 0x35f   :  { %v2912_v27 = vld [vmem:[%s11786_s2 + $0x9e0] sm:$0xff] }
 0x360   :  { %3444 = vmatpush.msrb.mxu3 %v2912_v27  ;;  %v2828_v0 = vld [vmem:[%s11786_s2 + $0x740] sm:$0xff] }
 0x361   :  { %2279 = vrot.lane.b32.xlu2 %v2251_v61, %s5910_s18  ;;  %v2036_v25 = vpop.permute.xlu0 %2035 }
 0x362   :  { %v7866_v30 = vsel %vm220_vm9, %v2034_v8, %v2036_v25  ;;  %v2776_v8 = vld [vmem:[%s11786_s2 + $0x5a0] sm:$0xff] }
 0x363   :  { %2061 = vst [vmem:[#allocation3 + $0x20] sm:$0xff] %v7866_v30  ;;  %v2498_v39 = vrot.slane %v7866_v30, 4  ;;  %v2376_v22 = vrot.slane %v7866_v30, 3  ;;  %v2131_v6 = vrot.slane %v7866_v30, 1  ;;  %3376 = vmatmul.f32.gmra.mxu0 %v7866_v30  ;;  %v2253_v60 = vrot.slane %v7866_v30, 2  ;;  %3388 = vmatpush.msra.mxu1 %v2776_v8 }
 0x364   :  { %v2228_v30 = vld [vmem:[#allocation3 + $0x78] sm:$0x3] }
 0x365   :  { %v2377_v18 = vsel %vm2371_vm13, %v2375_v45, %v2376_v22  ;;  %v2139_v47 = vsel %vm2126_vm4, %v2131_v6, %v2138_v12  ;;  %v2132_v24 = vsel %vm2126_vm4, %v2130_v15, %v2131_v6  ;;  %v2499_v55 = vsel %vm1313_vm2, %v2497_v41, %v2498_v39  ;;  %3389 = vmatpush.msra.mxu1 %v2772_v2  ;;  %v2724_v2 = vld [vmem:[%s11786_s2 + $0x400] sm:$0xff] }
 0x366   :  { %2404 = vrot.lane.b32.xlu1 %v2377_v18, %s5912_s20  ;;  %2159 = vrot.lane.b32.xlu0 %v2132_v24, %s5911_s19  ;;  %2537 = vst [vmem:[#allocation5 + $0x50] sm:$0xff] %v2499_v55  ;;  %v2506_v54 = vsel %vm1313_vm2, %v2498_v39, %v2505_v28  ;;  %v2254_v63 = vsel %vm1317_vm1, %v2252_v46, %v2253_v60  ;;  %v2106_v55 = vld [vmem:[#allocation3 + $0x80] sm:$0x1]  ;;  %v2728_v46 = vld [vmem:[%s11786_s2 + $0x420] sm:$0xff] }
 0x367   :  { %2540 = vst [vmem:[#allocation5 + $0xb0] sm:$0xff] %v2506_v54  ;;  %3390 = vmatpush.msra.mxu1 %v2768_v38  ;;  %v2153_v23 = vrot.slane %v2106_v55, 1  ;;  %v2896_v55 = vld [vmem:[%s11786_s2 + $0x960] sm:$0xff] }
 0x369   :  { %2165 = vrot.lane.b32.xlu2 %v2139_v47, %s5911_s19  ;;  %3391 = vmatpush.msra.mxu1 %v2764_v26  ;;  %v2220_v26 = vld [vmem:[#allocation3 + $0x38] sm:$0x3] }
 0x36b   :  { %3392 = vmatpush.msra.mxu1 %v2760_v62  ;;  %v2384_v62 = vsel %vm2371_vm13, %v2376_v22, %v2383_v9  ;;  %v2824_v9 = vld [vmem:[%s11786_s2 + $0x720] sm:$0xff] }
 0x36d   :  { %3393 = vmatpush.msra.mxu1 %v2756_v10 }
 0x36e   :  { %2408 = vrot.lane.b32.xlu0 %v2382_v51, %s5912_s20  ;;  %v2040_v13 = vpop.permute.xlu2 %2039  ;;  %v2736_v51 = vld [vmem:[%s11786_s2 + $0x460] sm:$0xff] }
 0x36f   :  { %3394 = vmatpush.msra.mxu1 %v2752_v1  ;;  %v2260_v1 = vrot.slane %v2220_v26, 2 }
 0x371   :  { %2285 = vrot.lane.b32.xlu2 %v2259_v17, %s5910_s18  ;;  %3395 = vmatpush.msra.mxu1 %v2748_v29 }
 0x373   :  { %3396 = vmatpush.msra.mxu1 %v2744_v33 }
 0x375   :  { %3397 = vmatpush.msra.mxu1 %v2740_v49 }
 0x376   :  { %2281 = vrot.lane.b32.xlu0 %v2254_v63, %s5910_s18  ;;  %v8003_v57 = vpop.permute.xlu2 %2167 }
 0x377   :  { %3398 = vmatpush.msra.mxu1 %v2736_v51  ;;  %v2892_v51 = vld [vmem:[%s11786_s2 + $0x940] sm:$0xff] }
 0x379   :  { %3399 = vmatpush.msra.mxu1 %v2732_v44  ;;  %v2976_v44 = vld [vmem:[%s11786_s2 + $0xbe0] sm:$0xff] }
 0x37a   :  { %3473 = vmatpush.msrb.mxu0 %v2976_v44  ;;  %v3040_v44 = vld [vmem:[%s11786_s2 + $0xde0] sm:$0xff] }
 0x37b   :  { %3400 = vmatpush.msra.mxu1 %v2728_v46  ;;  %v2337_v46 = vld [vmem:[#allocation3 + $0x10] sm:$0xf8] }
 0x37d   :  { %3401 = vmatpush.msra.mxu1 %v2724_v2  ;;  %v2820_v2 = vld [vmem:[%s11786_s2 + $0x700] sm:$0xff] }
 0x37f   :  { %3502 = vmatpush.msrb.mxu1 %v3040_v44  ;;  %v3144_v44 = vld [vmem:[%s11786_s2 + $0x1120] sm:$0xff] }
 0x381   :  { %v2042_v4 = vpop.permute.xlu0 %2041 }
 0x382   :  { %2064 = vst.msk [vmem:[#allocation3 + $0x60] sm:$0xff] %vm276_vm10, %v2042_v4 }
 0x386   :  { %v2038_v59 = vpop.permute.xlu1 %2037 }
 0x387   :  { %v2047_v11 = vsel %vm220_vm9, %v2038_v59, %v2040_v13  ;;  %2062 = vst.msk [vmem:[#allocation3 + $0x48] sm:$0xfc] %vm2057_vm14, %v2038_v59  ;;  %v2155_v59 = vrot.slane %v2107_v52, 1  ;;  %vm11870_vm14 = vmmov %vm11869_vm0 }
 0x388   :  { %2063 = vst [vmem:[#allocation3 + $0x50] sm:$0xfc] %v2047_v11  ;;  %v2261_v11 = vsel %vm1317_vm1, %v2253_v60, %v2260_v1  ;;  %v2271_v60 = vrot.slane %v7886_v5, 2  ;;  %v2816_v1 = vld [vmem:[%s11786_s2 + $0x6e0] sm:$0xff] }
 0x389   :  { %v7929_v35 = vld [vmem:[#allocation3 + $0x60] sm:$0xff]  ;;  %v2156_v22 = vsel %vm2126_vm4, %v2149_v36, %v2155_v59 }
 0x38a   :  { %2087 = vst [vmem:[#allocation5 + $0x120] sm:$0xff] %v7929_v35  ;;  %v2143_v32 = vrot.slane %v7929_v35, 1  ;;  %v2510_v50 = vrot.slane %v7929_v35, 4  ;;  %v2265_v38 = vrot.slane %v7929_v35, 2  ;;  %v2388_v33 = vrot.slane %v7929_v35, 3 }
 0x38c   :  { %v2152_v48 = vsel %vm2126_vm4, %v2143_v32, %v2151_v16  ;;  %v2519_v24 = vsel %vm1313_vm2, %v2510_v50, %v2518_v21 }
 0x38d   :  { %2175 = vrot.lane.b32.xlu2 %v2152_v48, %s5911_s19  ;;  %2545 = vst [vmem:[#allocation5 + $0x168] sm:$0xff] %v2519_v24 }
 0x38e   :  { %v2072_v61 = vld [vmem:[#allocation3 + $0x48] sm:$0xff]  ;;  %v2044_v31 = vpop.permute.xlu1 %2043 }
 0x38f   :  { %v2467_v19 = vld [vmem:[#allocation3 + $0x48] sm:$0xf0]  ;;  %v2073_v7 = vld [vmem:[#allocation3 + $0x50] sm:$0xff]  ;;  %2084 = vst [vmem:[#allocation5 + $0xc0] sm:$0xff] %v2072_v61  ;;  %v7945_v12 = vsel %vm220_vm9, %v2042_v4, %v2044_v31  ;;  %3350 = vmatmul.f32.gmra.mxu3 %v2072_v61  ;;  %v2221_v4 = vld [vmem:[#allocation3 + $0x40] sm:$0x3] }
 0x390   :  { %v2099_v20 = vld [vmem:[#allocation3 + $0x48] sm:$0xfe]  ;;  %v2468_v56 = vld [vmem:[#allocation3 + $0x50] sm:$0xf0]  ;;  %v2509_v25 = vrot.slane %v2467_v19, 4  ;;  %2085 = vst [vmem:[#allocation5 + $0xc8] sm:$0xff] %v2073_v7  ;;  %3379 = vmatmul.f32.gmra.mxu0 %v2073_v7 }
 0x391   :  { %v2142_v45 = vrot.slane %v2099_v20, 1  ;;  %v2512_v15 = vrot.slane %v2468_v56, 4  ;;  %v2513_v39 = vrot.slane %v7945_v12, 4  ;;  %v2146_v6 = vrot.slane %v7945_v12, 1  ;;  %v2100_v28 = vld [vmem:[#allocation3 + $0x50] sm:$0xfe] }
 0x392   :  { %2065 = vst [vmem:[#allocation3 + $0x68] sm:$0xff] %v7945_v12  ;;  %v2145_v18 = vrot.slane %v2100_v28, 1  ;;  %v2511_v47 = vsel %vm1313_vm2, %v2509_v25, %v2510_v50  ;;  %v2222_v17 = vld [vmem:[#allocation3 + $0x48] sm:$0xfc]  ;;  %v2262_v13 = vrot.slane %v2221_v4, 2  ;;  %v2391_v7 = vrot.slane %v7945_v12, 3 }
 0x393   :  { %v2144_v41 = vsel %vm2126_vm4, %v2142_v45, %v2143_v32  ;;  %2542 = vst [vmem:[#allocation5 + $0x108] sm:$0xff] %v2511_v47  ;;  %v2514_v54 = vsel %vm1313_vm2, %v2512_v15, %v2513_v39  ;;  %v2521_v53 = vsel %vm1313_vm2, %v2513_v39, %v2520_v58  ;;  %v2264_v63 = vrot.slane %v2222_v17, 2  ;;  %v2344_v16 = vld [vmem:[#allocation3 + $0x48] sm:$0xf8]  ;;  %v2350_v50 = vld [vmem:[#allocation3 + $0x78] sm:$0x7] }
 0x394   :  { %2169 = vrot.lane.b32.xlu0 %v2144_v41, %s5911_s19  ;;  %v2147_v42 = vsel %vm2126_vm4, %v2145_v18, %v2146_v6  ;;  %2543 = vst [vmem:[#allocation5 + $0x110] sm:$0xff] %v2514_v54  ;;  %v2154_v8 = vsel %vm2126_vm4, %v2146_v6, %v2153_v23  ;;  %v2263_v29 = vsel %vm1317_vm1, %v2256_v37, %v2262_v13  ;;  %v2387_v34 = vrot.slane %v2344_v16, 3  ;;  %v2345_v49 = vld [vmem:[#allocation3 + $0x50] sm:$0xf8]  ;;  %v2229_v58 = vld [vmem:[#allocation3 + $0x80] sm:$0x3]  ;;  %vm11868_vm4 = vmmov %vm11865_vm3 }
 0x395   :  { %2171 = vrot.lane.b32.xlu1 %v2147_v42, %s5911_s19  ;;  %2173 = vrot.lane.b32.xlu2 %v2150_v40, %s5911_s19  ;;  %2546 = vst [vmem:[#allocation5 + $0x170] sm:$0xff] %v2521_v53  ;;  %v2266_v10 = vsel %vm1317_vm1, %v2264_v63, %v2265_v38  ;;  %v2270_v32 = vrot.slane %v2224_v43, 2  ;;  %v2273_v37 = vrot.slane %v2228_v30, 2  ;;  %v2396_v21 = vrot.slane %v2350_v50, 3  ;;  %v2844_v61 = vld [vmem:[%s11786_s2 + $0x7c0] sm:$0xff] }
 0x396   :  { %v2389_v14 = vsel %vm2371_vm13, %v2387_v34, %v2388_v33  ;;  %v2908_v19 = vld [vmem:[%s11786_s2 + $0x9c0] sm:$0xff]  ;;  %v2390_v20 = vrot.slane %v2345_v49, 3  ;;  %v2268_v56 = vrot.slane %v7945_v12, 2  ;;  %v2275_v25 = vrot.slane %v2229_v58, 2  ;;  %v2223_v15 = vld [vmem:[#allocation3 + $0x50] sm:$0xfc]  ;;  %v8051_v42 = vpop.permute.xlu1 %2161 }
 0x397   :  { %3353 = vmatmul.f32.gmra.mxu3 %v7929_v35  ;;  %v2272_v48 = vsel %vm1317_vm1, %v2270_v32, %v2271_v60  ;;  %v2274_v36 = vsel %vm1317_vm1, %v2265_v38, %v2273_v37  ;;  %v2848_v35 = vld [vmem:[%s11786_s2 + $0x7e0] sm:$0xff]  ;;  %v2397_v45 = vsel %vm2371_vm13, %v2388_v33, %v2396_v21  ;;  %v2343_v41 = vld [vmem:[#allocation3 + $0x40] sm:$0x7]  ;;  %v2267_v54 = vrot.slane %v2223_v15, 2  ;;  %v2346_v30 = vld [vmem:[#allocation3 + $0x58] sm:$0xf8] }
 0x398   :  { %3382 = vmatmul.f32.gmra.mxu0 %v7945_v12  ;;  %3415 = vmatpush.msra.mxu2 %v2848_v35  ;;  %v2840_v31 = vld [vmem:[%s11786_s2 + $0x7a0] sm:$0xff]  ;;  %v2392_v28 = vsel %vm2371_vm13, %v2390_v20, %v2391_v7  ;;  %v2276_v24 = vsel %vm1317_vm1, %v2268_v56, %v2275_v25  ;;  %v2351_v40 = vld [vmem:[#allocation3 + $0x80] sm:$0x7]  ;;  %v2379_v23 = vrot.slane %v7676_v3, 3  ;;  %v2385_v17 = vrot.slane %v2343_v41, 3 }
 0x399   :  { %3445 = vmatpush.msrb.mxu3 %v2908_v19  ;;  %v2904_v39 = vld [vmem:[%s11786_s2 + $0x9a0] sm:$0xff]  ;;  %v2398_v53 = vrot.slane %v2351_v40, 3  ;;  %v2394_v49 = vrot.slane %v7886_v5, 3 }
 0x39a   :  { %3416 = vmatpush.msra.mxu2 %v2844_v61  ;;  %v2836_v6 = vld [vmem:[%s11786_s2 + $0x780] sm:$0xff]  ;;  %v2386_v26 = vsel %vm2371_vm13, %v2379_v23, %v2385_v17 }
 0x39b   :  { %v2900_v12 = vld [vmem:[%s11786_s2 + $0x980] sm:$0xff]  ;;  %3446 = vmatpush.msrb.mxu3 %v2904_v39  ;;  %v2399_v52 = vsel %vm2371_vm13, %v2391_v7, %v2398_v53 }
 0x39c   :  { %2177 = vrot.lane.b32.xlu0 %v2154_v8, %s5911_s19  ;;  %3417 = vmatpush.msra.mxu2 %v2840_v31  ;;  %v2832_v18 = vld [vmem:[%s11786_s2 + $0x760] sm:$0xff]  ;;  %v2269_v8 = vsel %vm1317_vm1, %v2267_v54, %v2268_v56 }
 0x39d   :  { %2410 = vrot.lane.b32.xlu1 %v2384_v62, %s5912_s20  ;;  %2291 = vrot.lane.b32.xlu2 %v2266_v10, %s5910_s18  ;;  %v2972_v3 = vld [vmem:[%s11786_s2 + $0xbc0] sm:$0xff]  ;;  %v2378_v62 = vrot.slane %v2337_v46, 3 }
 0x39e   :  { %3418 = vmatpush.msra.mxu2 %v2836_v6  ;;  %3447 = vmatpush.msrb.mxu3 %v2900_v12  ;;  %v2888_v63 = vld [vmem:[%s11786_s2 + $0x920] sm:$0xff]  ;;  %v8098_v16 = vpop.permute.xlu1 %2283 }
 0x39f   :  { %3474 = vmatpush.msrb.mxu0 %v2972_v3  ;;  %v2968_v38 = vld [vmem:[%s11786_s2 + $0xba0] sm:$0xff]  ;;  %v2380_v43 = vsel %vm2371_vm13, %v2378_v62, %v2379_v23 }
 0x3a0   :  { %3419 = vmatpush.msra.mxu2 %v2832_v18  ;;  %3448 = vmatpush.msrb.mxu3 %v2896_v55  ;;  %v2230_v4 = vld [vmem:[#allocation3 + $0x88] sm:$0x3] }
 0x3a1   :  { %v2884_v10 = vld [vmem:[%s11786_s2 + $0x900] sm:$0xff]  ;;  %3475 = vmatpush.msrb.mxu0 %v2968_v38 }
 0x3a2   :  { %3420 = vmatpush.msra.mxu2 %v2828_v0  ;;  %3449 = vmatpush.msrb.mxu3 %v2892_v51  ;;  %v2876_v34 = vld [vmem:[%s11786_s2 + $0x8c0] sm:$0xff] }
 0x3a3   :  { %v2808_v32 = vld [vmem:[%s11786_s2 + $0x6a0] sm:$0xff] }
 0x3a4   :  { %2287 = vrot.lane.b32.xlu0 %v2261_v11, %s5910_s18  ;;  %3421 = vmatpush.msra.mxu2 %v2824_v9  ;;  %v2277_v11 = vrot.slane %v2230_v4, 2  ;;  %v2872_v37 = vld [vmem:[%s11786_s2 + $0x8a0] sm:$0xff] }
 0x3a5   :  { %2289 = vrot.lane.b32.xlu1 %v2263_v29, %s5910_s18  ;;  %2179 = vrot.lane.b32.xlu2 %v2156_v22, %s5911_s19  ;;  %v2880_v29 = vld [vmem:[%s11786_s2 + $0x8e0] sm:$0xff] }
 0x3a6   :  { %3450 = vmatpush.msrb.mxu3 %v2888_v63  ;;  %3422 = vmatpush.msra.mxu2 %v2820_v2  ;;  %v2812_v22 = vld [vmem:[%s11786_s2 + $0x6c0] sm:$0xff]  ;;  %v2278_v33 = vsel %vm1317_vm1, %v2271_v60, %v2277_v11 }
 0x3a7   :  { %v2804_v50 = vld [vmem:[%s11786_s2 + $0x680] sm:$0xff] }
 0x3a8   :  { %3451 = vmatpush.msrb.mxu3 %v2884_v10  ;;  %3423 = vmatpush.msra.mxu2 %v2816_v1  ;;  %v2960_v60 = vld [vmem:[%s11786_s2 + $0xb60] sm:$0xff] }
 0x3a9   :  { %v2868_v35 = vld [vmem:[%s11786_s2 + $0x880] sm:$0xff] }
 0x3aa   :  { %3452 = vmatpush.msrb.mxu3 %v2880_v29  ;;  %3424 = vmatpush.msra.mxu2 %v2812_v22  ;;  %v2800_v21 = vld [vmem:[%s11786_s2 + $0x660] sm:$0xff] }
 0x3ab   :  { %v2956_v58 = vld [vmem:[%s11786_s2 + $0xb40] sm:$0xff] }
 0x3ac   :  { %2414 = vrot.lane.b32.xlu0 %v2389_v14, %s5912_s20  ;;  %v2964_v14 = vld [vmem:[%s11786_s2 + $0xb80] sm:$0xff]  ;;  %3453 = vmatpush.msrb.mxu3 %v2876_v34 }
 0x3ad   :  { %2295 = vrot.lane.b32.xlu1 %v2272_v48, %s5910_s18  ;;  %2297 = vrot.lane.b32.xlu2 %v2274_v36, %s5910_s18  ;;  %v2352_v48 = vld [vmem:[#allocation3 + $0x88] sm:$0x7]  ;;  %v2393_v36 = vrot.slane %v2346_v30, 3 }
 0x3ae   :  { %3425 = vmatpush.msra.mxu2 %v2808_v32  ;;  %3476 = vmatpush.msrb.mxu0 %v2964_v14  ;;  %v2400_v61 = vrot.slane %v2352_v48, 3  ;;  %v2864_v19 = vld [vmem:[%s11786_s2 + $0x860] sm:$0xff] }
 0x3af   :  { %3454 = vmatpush.msrb.mxu3 %v2872_v37  ;;  %v2796_v31 = vld [vmem:[%s11786_s2 + $0x640] sm:$0xff] }
 0x3b0   :  { %3426 = vmatpush.msra.mxu2 %v2804_v50  ;;  %3477 = vmatpush.msrb.mxu0 %v2960_v60  ;;  %v2952_v20 = vld [vmem:[%s11786_s2 + $0xb20] sm:$0xff]  ;;  %v2401_v15 = vsel %vm2371_vm13, %v2394_v49, %v2400_v61 }
 0x3b1   :  { %3455 = vmatpush.msrb.mxu3 %v2868_v35  ;;  %v2860_v7 = vld [vmem:[%s11786_s2 + $0x840] sm:$0xff] }
 0x3b2   :  { %3427 = vmatpush.msra.mxu2 %v2800_v21  ;;  %3478 = vmatpush.msrb.mxu0 %v2956_v58  ;;  %v2792_v56 = vld [vmem:[%s11786_s2 + $0x620] sm:$0xff] }
 0x3b3   :  { %v8041_v47 = vpop.permute.xlu2 %2157  ;;  %3456 = vmatpush.msrb.mxu3 %v2864_v19  ;;  %v2948_v25 = vld [vmem:[%s11786_s2 + $0xb00] sm:$0xff] }
 0x3b4   :  { %2420 = vrot.lane.b32.xlu0 %v2397_v45, %s5912_s20  ;;  %2201 = vst.msk [vmem:[#allocation5 + $0x10] sm:$0xff] %vm276_vm10, %v8041_v47  ;;  %3428 = vmatpush.msra.mxu2 %v2796_v31  ;;  %v2856_v39 = vld [vmem:[%s11786_s2 + $0x820] sm:$0xff] }
 0x3b5   :  { %2416 = vrot.lane.b32.xlu1 %v2392_v28, %s5912_s20  ;;  %2299 = vrot.lane.b32.xlu2 %v2276_v24, %s5910_s18  ;;  %v2788_v12 = vld [vmem:[%s11786_s2 + $0x600] sm:$0xff] }
 0x3b6   :  { %3479 = vmatpush.msrb.mxu0 %v2952_v20  ;;  %3457 = vmatpush.msrb.mxu3 %v2860_v7  ;;  %v2944_v28 = vld [vmem:[%s11786_s2 + $0xae0] sm:$0xff] }
 0x3b7   :  { %3429 = vmatpush.msra.mxu2 %v2792_v56  ;;  %v2852_v41 = vld [vmem:[%s11786_s2 + $0x800] sm:$0xff] }
 0x3b8   :  { %3480 = vmatpush.msrb.mxu0 %v2948_v25  ;;  %3458 = vmatpush.msrb.mxu3 %v2856_v39  ;;  %v2940_v24 = vld [vmem:[%s11786_s2 + $0xac0] sm:$0xff] }
 0x3b9   :  { %3430 = vmatpush.msra.mxu2 %v2788_v12  ;;  %v2936_v40 = vld [vmem:[%s11786_s2 + $0xaa0] sm:$0xff] }
 0x3ba   :  { %3481 = vmatpush.msrb.mxu0 %v2944_v28  ;;  %3459 = vmatpush.msrb.mxu3 %v2852_v41  ;;  %v2932_v54 = vld [vmem:[%s11786_s2 + $0xa80] sm:$0xff] }
 0x3bb   :  { %v8088_v13 = vpop.permute.xlu2 %2279  ;;  %v2550_v59 = vld [vmem:[#allocation5 + $0x10] sm:$0xff]  ;;  %v2928_v0 = vld [vmem:[%s11786_s2 + $0xa60] sm:$0xff] }
 0x3bc   :  { %2293 = vrot.lane.b32.xlu0 %v2269_v8, %s5910_s18  ;;  %3402 = vmatmul.f32.vlgmr.msra.gmra.mxu1 %v2550_v59  ;;  %v2924_v23 = vld [vmem:[%s11786_s2 + $0xa40] sm:$0xff] }
 0x3bd   :  { %2422 = vrot.lane.b32.xlu1 %v2399_v52, %s5912_s20  ;;  %2412 = vrot.lane.b32.xlu2 %v2386_v26, %s5912_s20  ;;  %v2920_v51 = vld [vmem:[%s11786_s2 + $0xa20] sm:$0xff] }
 0x3be   :  { %3482 = vmatpush.msrb.mxu0 %v2940_v24  ;;  %v2916_v53 = vld [vmem:[%s11786_s2 + $0xa00] sm:$0xff] }
 0x3bf   :  { %v3036_v2 = vld [vmem:[%s11786_s2 + $0xdc0] sm:$0xff] }
 0x3c0   :  { %3483 = vmatpush.msrb.mxu0 %v2936_v40  ;;  %v3032_v38 = vld [vmem:[%s11786_s2 + $0xda0] sm:$0xff]  ;;  %3503 = vmatpush.msrb.mxu1 %v3036_v2 }
 0x3c1   :  { %v3024_v4 = vld [vmem:[%s11786_s2 + $0xd60] sm:$0xff] }
 0x3c2   :  { %3484 = vmatpush.msrb.mxu0 %v2932_v54  ;;  %3504 = vmatpush.msrb.mxu1 %v3032_v38  ;;  %v3020_v52 = vld [vmem:[%s11786_s2 + $0xd40] sm:$0xff] }
 0x3c3   :  { %v2166_v27 = vpop.permute.xlu2 %2165  ;;  %v3104_v10 = vld [vmem:[%s11786_s2 + $0xfe0] sm:$0xff] }
 0x3c4   :  { %2406 = vrot.lane.b32.xlu0 %v2380_v43, %s5912_s20  ;;  %v2184_v5 = vsel %vm220_vm9, %v2166_v27, %v8003_v57  ;;  %v2395_v57 = vsel %vm2371_vm13, %v2393_v36, %v2394_v49  ;;  %3485 = vmatpush.msrb.mxu0 %v2928_v0  ;;  %v3016_v1 = vld [vmem:[%s11786_s2 + $0xd20] sm:$0xff]  ;;  %vm11871_vm13 = vmmov %vm11866_vm7 }
 0x3c5   :  { %2301 = vrot.lane.b32.xlu1 %v2278_v33, %s5910_s18  ;;  %2206 = vst.msk [vmem:[#allocation5 + $0x80] sm:$0xff] %vm11864_vm5, %v2184_v5  ;;  %3531 = vmatpush.msrb.mxu2 %v3104_v10  ;;  %v3100_v11 = vld [vmem:[%s11786_s2 + $0xfc0] sm:$0xff]  ;;  %vm11872_vm5 = vcmask 1048320  }
 0x3c6   :  { %v2164_v45 = vpop.permute.xlu1 %2163  ;;  %3486 = vmatpush.msrb.mxu0 %v2924_v23  ;;  %v3012_v29 = vld [vmem:[%s11786_s2 + $0xd00] sm:$0xff] }
 0x3c7   :  { %2204 = vst.msk [vmem:[#allocation5 + $0x70] sm:$0xff] %vm276_vm10, %v2164_v45  ;;  %v2183_v6 = vsel %vm220_vm9, %v2164_v45, %v2166_v27  ;;  %v3096_v22 = vld [vmem:[%s11786_s2 + $0xfa0] sm:$0xff]  ;;  %3532 = vmatpush.msrb.mxu2 %v3100_v11 }
 0x3c8   :  { %2205 = vst [vmem:[#allocation5 + $0x78] sm:$0xff] %v2183_v6  ;;  %3487 = vmatpush.msrb.mxu0 %v2920_v51  ;;  %v3008_v37 = vld [vmem:[%s11786_s2 + $0xce0] sm:$0xff] }
 0x3c9   :  { %3533 = vmatpush.msrb.mxu2 %v3096_v22  ;;  %v3092_v14 = vld [vmem:[%s11786_s2 + $0xf80] sm:$0xff] }
 0x3ca   :  { %v2403_v17 = vpop.permute.xlu0 %2402  ;;  %3488 = vmatpush.msrb.mxu0 %v2916_v53  ;;  %v3000_v48 = vld [vmem:[%s11786_s2 + $0xca0] sm:$0xff] }
 0x3cb   :  { %v8172_v18 = vpop.permute.xlu2 %2285  ;;  %3534 = vmatpush.msrb.mxu2 %v3092_v14  ;;  %v3084_v50 = vld [vmem:[%s11786_s2 + $0xf40] sm:$0xff] }
 0x3cc   :  { %2418 = vrot.lane.b32.xlu0 %v2395_v57, %s5912_s20  ;;  %2326 = vst.msk [vmem:[#allocation5 + $0x80] sm:$0xff] %vm11865_vm3, %v8172_v18  ;;  %v2996_v60 = vld [vmem:[%s11786_s2 + $0xc80] sm:$0xff] }
 0x3cd   :  { %2424 = vrot.lane.b32.xlu1 %v2401_v15, %s5912_s20  ;;  %v3080_v36 = vld [vmem:[%s11786_s2 + $0xf20] sm:$0xff] }
 0x3ce   :  { %v2562_v55 = vld [vmem:[#allocation5 + $0x70] sm:$0xff]  ;;  %v2992_v49 = vld [vmem:[%s11786_s2 + $0xc60] sm:$0xff] }
 0x3cf   :  { %3405 = vmatmul.f32.gmra.mxu1 %v2562_v55  ;;  %v3076_v27 = vld [vmem:[%s11786_s2 + $0xf00] sm:$0xff] }
 0x3d0   :  { %v2988_v21 = vld [vmem:[%s11786_s2 + $0xc40] sm:$0xff] }
 0x3d1   :  { %v3072_v58 = vld [vmem:[%s11786_s2 + $0xee0] sm:$0xff] }
 0x3d2   :  { %v2984_v5 = vld [vmem:[%s11786_s2 + $0xc20] sm:$0xff] }
 0x3d3   :  { %v2564_v33 = vld [vmem:[#allocation5 + $0x80] sm:$0xff]  ;;  %v3068_v61 = vld [vmem:[%s11786_s2 + $0xec0] sm:$0xff] }
 0x3d4   :  { %v2980_v19 = vld [vmem:[%s11786_s2 + $0xc00] sm:$0xff] }
 0x3d5   :  { %v3064_v31 = vld [vmem:[%s11786_s2 + $0xea0] sm:$0xff] }
 0x3d6   :  { %v3168_v20 = vld [vmem:[%s11786_s2 + $0x11e0] sm:$0xff] }
 0x3d7   :  { %3560 = vmatpush.msra.mxu3 %v3168_v20  ;;  %v3164_v57 = vld [vmem:[%s11786_s2 + $0x11c0] sm:$0xff] }
 0x3d8   :  { %v8201_v9 = vpop.permute.xlu1 %2404  ;;  %v2160_v46 = vpop.permute.xlu0 %2159  ;;  %v3060_v56 = vld [vmem:[%s11786_s2 + $0xe80] sm:$0xff] }
 0x3d9   :  { %v8205_v3 = vsel %vm11866_vm7, %v2403_v17, %v8201_v9  ;;  %v8210_v63 = vsel %vm220_vm9, %v8041_v47, %v2160_v46  ;;  %v2182_v8 = vsel %vm220_vm9, %v2160_v46, %v8051_v42  ;;  %v2074_v47 = vld [vmem:[#allocation3 + $0x58] sm:$0xff]  ;;  %v3028_v42 = vld [vmem:[%s11786_s2 + $0xd80] sm:$0xff]  ;;  %3561 = vmatpush.msra.mxu3 %v3164_v57  ;;  %vm11874_vm7 = vmmov %vm11869_vm0 }
 0x3da   :  { %2447 = vst [vmem:[#allocation5 + $0x38] sm:$0xff] %v8205_v3  ;;  %3431 = vmatmul.f32.vlgmr.msra.gmra.mxu2 %v8210_v63  ;;  %3505 = vmatpush.msrb.mxu1 %v3028_v42  ;;  %v3160_v25 = vld [vmem:[%s11786_s2 + $0x11a0] sm:$0xff] }
 0x3db   :  { %2202 = vst [vmem:[#allocation5 + $0x18] sm:$0xff] %v8210_v63  ;;  %v3056_v45 = vld [vmem:[%s11786_s2 + $0xe60] sm:$0xff]  ;;  %3562 = vmatpush.msra.mxu3 %v3160_v25 }
 0x3dc   :  { %2203 = vst.msk [vmem:[#allocation5 + $0x20] sm:$0xff] %vm11867_vm12, %v2182_v8  ;;  %3506 = vmatpush.msrb.mxu1 %v3024_v4  ;;  %v3052_v15 = vld [vmem:[%s11786_s2 + $0xe40] sm:$0xff]  ;;  %vm11875_vm12 = vmmov %vm11871_vm13 }
 0x3dd   :  { %2323 = vst.msk [vmem:[#allocation5 + $0x20] sm:$0xff] %vm11868_vm4, %v8088_v13  ;;  %v3152_v12 = vld [vmem:[%s11786_s2 + $0x1160] sm:$0xff]  ;;  %vm11876_vm4 = vmmov %vm11865_vm3 }
 0x3de   :  { %2086 = vst.msk [vmem:[#allocation5 + $0xd0] sm:$0xff] %vm220_vm9, %v2074_v47  ;;  %3507 = vmatpush.msrb.mxu1 %v3020_v52  ;;  %v3232_v28 = vld [vmem:[%s11786_s2 + $0x13e0] sm:$0xff] }
 0x3df   :  { %v3048_v24 = vld [vmem:[%s11786_s2 + $0xe20] sm:$0xff]  ;;  %3589 = vmatpush.msra.mxu0 %v3232_v28 }
 0x3e0   :  { %v8229_v26 = vpop.permute.xlu0 %2408  ;;  %3508 = vmatpush.msrb.mxu1 %v3016_v1  ;;  %v3148_v40 = vld [vmem:[%s11786_s2 + $0x1140] sm:$0xff] }
 0x3e1   :  { %v3228_v55 = vld [vmem:[%s11786_s2 + $0x13c0] sm:$0xff] }
 0x3e2   :  { %3434 = vmatmul.f32.gmra.mxu2 %v2183_v6  ;;  %3509 = vmatpush.msrb.mxu1 %v3012_v29  ;;  %v3156_v6 = vld [vmem:[%s11786_s2 + $0x1180] sm:$0xff] }
 0x3e3   :  { %3563 = vmatpush.msra.mxu3 %v3156_v6  ;;  %v3044_v51 = vld [vmem:[%s11786_s2 + $0xe00] sm:$0xff]  ;;  %3590 = vmatpush.msra.mxu0 %v3228_v55  ;;  %v2460_v55 = vld [vmem:[#allocation3 + $0x10] sm:$0xf0] }
 0x3e4   :  { %v2552_v59 = vld [vmem:[#allocation5 + $0x20] sm:$0xff]  ;;  %3510 = vmatpush.msrb.mxu1 %v3008_v37  ;;  %v3312_v53 = vld [vmem:[%s11786_s2 + $0x1660] sm:$0xff] }
 0x3e5   :  { %3460 = vmatmul.f32.vlgmr.msrb.gmra.mxu3 %v2552_v59  ;;  %v3220_v10 = vld [vmem:[%s11786_s2 + $0x1380] sm:$0xff] }
 0x3e6   :  { %3564 = vmatpush.msra.mxu3 %v3152_v12  ;;  %v3136_v1 = vld [vmem:[%s11786_s2 + $0x10e0] sm:$0xff] }
 0x3e7   :  { %v8234_v62 = vpop.permute.xlu2 %2175  ;;  %v3216_v11 = vld [vmem:[%s11786_s2 + $0x1360] sm:$0xff] }
 0x3e8   :  { %2210 = vst.msk [vmem:[#allocation5 + $0x130] sm:$0xff] %vm276_vm10, %v8234_v62  ;;  %v2282_v43 = vpop.permute.xlu0 %2281  ;;  %3565 = vmatpush.msra.mxu3 %v3148_v40  ;;  %v3296_v29 = vld [vmem:[%s11786_s2 + $0x15e0] sm:$0xff] }
 0x3e9   :  { %v2303_v34 = vsel %vm11869_vm0, %v8088_v13, %v2282_v43  ;;  %v2304_v30 = vsel %vm11870_vm14, %v2282_v43, %v8098_v16  ;;  %v3004_v13 = vld [vmem:[%s11786_s2 + $0xcc0] sm:$0xff]  ;;  %vm11877_vm14 = vmmov %vm11869_vm0 }
 0x3ea   :  { %2324 = vst [vmem:[#allocation5 + $0x28] sm:$0xff] %v2303_v34  ;;  %3489 = vmatmul.f32.vlgmr.msrb.gmra.mxu0 %v2303_v34  ;;  %v3088_v16 = vld [vmem:[%s11786_s2 + $0xf60] sm:$0xff]  ;;  %3511 = vmatpush.msrb.mxu1 %v3004_v13 }
 0x3eb   :  { %2325 = vst.msk [vmem:[#allocation5 + $0x30] sm:$0xff] %vm11871_vm13, %v2304_v30  ;;  %3535 = vmatpush.msrb.mxu2 %v3088_v16  ;;  %3566 = vmatpush.msra.mxu3 %v3144_v44  ;;  %v3132_v22 = vld [vmem:[%s11786_s2 + $0x10c0] sm:$0xff]  ;;  %vm11878_vm13 = vmmov %vm11869_vm0  ;;  %v2500_v44 = vrot.slane %v2460_v55, 4  ;;  %v2621_v55 = vld [vmem:[%s11786_s2 + $0xc8] sm:$0xff] }
 0x3ec   :  { %2446 = vst.msk [vmem:[#allocation5 + $0x30] sm:$0xff] %vm11872_vm5, %v2403_v17  ;;  %3512 = vmatpush.msrb.mxu1 %v3000_v48  ;;  %v3224_v17 = vld [vmem:[%s11786_s2 + $0x13a0] sm:$0xff]  ;;  %vm11879_vm5 = vmmov %vm11875_vm12 }
 0x3ed   :  { %3463 = vmatmul.f32.gmra.mxu3 %v2564_v33  ;;  %3536 = vmatpush.msrb.mxu2 %v3084_v50  ;;  %v3292_v43 = vld [vmem:[%s11786_s2 + $0x15c0] sm:$0xff] }
 0x3ee   :  { %3513 = vmatpush.msrb.mxu1 %v2996_v60  ;;  %3591 = vmatpush.msra.mxu0 %v3224_v17  ;;  %v3288_v34 = vld [vmem:[%s11786_s2 + $0x15a0] sm:$0xff] }
 0x3ef   :  { %v8260_v32 = vpop.permute.xlu2 %2173  ;;  %3537 = vmatpush.msrb.mxu2 %v3080_v36  ;;  %v8424_v30 = vld [vmem:[#allocation5 + $0x130] sm:$0xff]  ;;  %v3212_v33 = vld [vmem:[%s11786_s2 + $0x1340] sm:$0xff] }
 0x3f0   :  { %3514 = vmatpush.msrb.mxu1 %v2992_v49  ;;  %3592 = vmatpush.msra.mxu0 %v3220_v10  ;;  %v3128_v37 = vld [vmem:[%s11786_s2 + $0x10a0] sm:$0xff]  ;;  %v2649_v10 = vld [vmem:[%s11786_s2 + $0x1a8] sm:$0xff] }
 0x3f1   :  { %3538 = vmatpush.msrb.mxu2 %v3076_v27  ;;  %v3208_v16 = vld [vmem:[%s11786_s2 + $0x1320] sm:$0xff] }
 0x3f2   :  { %3515 = vmatpush.msrb.mxu1 %v2988_v21  ;;  %3593 = vmatpush.msra.mxu0 %v3216_v11  ;;  %v3308_v48 = vld [vmem:[%s11786_s2 + $0x1640] sm:$0xff]  ;;  %v2845_v11 = vld [vmem:[%s11786_s2 + $0x7c8] sm:$0xff] }
 0x3f3   :  { %3539 = vmatpush.msrb.mxu2 %v3072_v58  ;;  %v3124_v49 = vld [vmem:[%s11786_s2 + $0x1080] sm:$0xff]  ;;  %v8466_v21 = vld [vmem:[#allocation5 + $0x30] sm:$0xff] }
 0x3f4   :  { %3516 = vmatpush.msrb.mxu1 %v2984_v5  ;;  %3594 = vmatpush.msra.mxu0 %v3212_v33  ;;  %v3204_v27 = vld [vmem:[%s11786_s2 + $0x1300] sm:$0xff] }
 0x3f5   :  { %3540 = vmatpush.msrb.mxu2 %v3068_v61  ;;  %v3200_v5 = vld [vmem:[%s11786_s2 + $0x12e0] sm:$0xff] }
 0x3f6   :  { %3517 = vmatpush.msrb.mxu1 %v2980_v19  ;;  %3595 = vmatpush.msra.mxu0 %v3208_v16  ;;  %v3280_v61 = vld [vmem:[%s11786_s2 + $0x1560] sm:$0xff] }
 0x3f7   :  { %v8291_v35 = vpop.permute.xlu2 %2291  ;;  %3541 = vmatpush.msrb.mxu2 %v3064_v31  ;;  %v3116_v31 = vld [vmem:[%s11786_s2 + $0x1040] sm:$0xff] }
 0x3f8   :  { %3618 = vmatpush.msra.mxu1 %v3296_v29  ;;  %3596 = vmatpush.msra.mxu0 %v3204_v27  ;;  %v3196_v20 = vld [vmem:[%s11786_s2 + $0x12c0] sm:$0xff]  ;;  %v2466_v29 = vld [vmem:[#allocation3 + $0x40] sm:$0xf]  ;;  %v2721_v27 = vld [vmem:[%s11786_s2 + $0x3e8] sm:$0xff] }
 0x3f9   :  { %3542 = vmatpush.msrb.mxu2 %v3060_v56  ;;  %v3276_v57 = vld [vmem:[%s11786_s2 + $0x1540] sm:$0xff] }
 0x3fa   :  { %3619 = vmatpush.msra.mxu1 %v3292_v43  ;;  %3597 = vmatpush.msra.mxu0 %v3200_v5  ;;  %v3112_v56 = vld [vmem:[%s11786_s2 + $0x1020] sm:$0xff]  ;;  %v2507_v43 = vrot.slane %v2466_v29, 4 }
 0x3fb   :  { %3543 = vmatpush.msrb.mxu2 %v3056_v45  ;;  %v3192_v25 = vld [vmem:[%s11786_s2 + $0x12a0] sm:$0xff] }
 0x3fc   :  { %3620 = vmatpush.msra.mxu1 %v3288_v34  ;;  %3598 = vmatpush.msra.mxu0 %v3196_v20  ;;  %v3272_v45 = vld [vmem:[%s11786_s2 + $0x1520] sm:$0xff]  ;;  %v2713_v20 = vld [vmem:[%s11786_s2 + $0x3a8] sm:$0xff] }
 0x3fd   :  { %3544 = vmatpush.msrb.mxu2 %v3052_v15  ;;  %v3108_v15 = vld [vmem:[%s11786_s2 + $0x1000] sm:$0xff] }
 0x3fe   :  { %3599 = vmatpush.msra.mxu0 %v3192_v25  ;;  %v3268_v6 = vld [vmem:[%s11786_s2 + $0x1500] sm:$0xff]  ;;  %v2629_v25 = vld [vmem:[%s11786_s2 + $0x108] sm:$0xff] }
 0x3ff   :  { %v2180_v7 = vpop.permute.xlu2 %2179  ;;  %3545 = vmatpush.msrb.mxu2 %v3048_v24  ;;  %v3300_v12 = vld [vmem:[%s11786_s2 + $0x1600] sm:$0xff]  ;;  %v2657_v24 = vld [vmem:[%s11786_s2 + $0x1e8] sm:$0xff] }
 0x400   :  { %v3184_v40 = vld [vmem:[%s11786_s2 + $0x1260] sm:$0xff] }
 0x401   :  { %3546 = vmatpush.msrb.mxu2 %v3044_v51  ;;  %v3264_v17 = vld [vmem:[%s11786_s2 + $0x14e0] sm:$0xff]  ;;  %v2653_v51 = vld [vmem:[%s11786_s2 + $0x1c8] sm:$0xff] }
 0x402   :  { %v3256_v34 = vld [vmem:[%s11786_s2 + $0x14a0] sm:$0xff] }
 0x403   :  { %3659 = vmatpush.msra.mxu2 %v3312_v53  ;;  %v3252_v16 = vld [vmem:[%s11786_s2 + $0x1480] sm:$0xff] }
 0x404   :  { %v3244_v5 = vld [vmem:[%s11786_s2 + $0x1440] sm:$0xff] }
 0x405   :  { %3660 = vmatpush.msra.mxu2 %v3308_v48 }
 0x406   :  { %v2170_v39 = vpop.permute.xlu0 %2169 }
 0x407   :  { %2207 = vst.msk [vmem:[#allocation5 + $0xd0] sm:$0xff] %vm276_vm10, %v2170_v39  ;;  %v2172_v41 = vpop.permute.xlu1 %2171  ;;  %v2298_v54 = vpop.permute.xlu2 %2297  ;;  %vm11873_vm10 = vmmov %vm11869_vm0 }
 0x408   :  { %v8352_v0 = vsel %vm220_vm9, %v2170_v39, %v2172_v41  ;;  %v2186_v23 = vsel %vm220_vm9, %v2172_v41, %v8260_v32  ;;  %v3188_v39 = vld [vmem:[%s11786_s2 + $0x1280] sm:$0xff] }
 0x409   :  { %2208 = vst [vmem:[#allocation5 + $0xd8] sm:$0xff] %v8352_v0  ;;  %3437 = vmatmul.f32.gmra.mxu2 %v8352_v0  ;;  %3600 = vmatpush.msra.mxu0 %v3188_v39 }
 0x40a   :  { %2209 = vst.msk [vmem:[#allocation5 + $0xe0] sm:$0xff] %vm11873_vm10, %v2186_v23  ;;  %vm11880_vm10 = vmmov %vm11879_vm5 }
 0x40b   :  { %2329 = vst.msk [vmem:[#allocation5 + $0xe0] sm:$0xff] %vm11865_vm3, %v8291_v35  ;;  %vm11881_vm3 = vcmask 1048320   ;;  %3601 = vmatpush.msra.mxu0 %v3184_v40  ;;  %v2833_v40 = vld [vmem:[%s11786_s2 + $0x768] sm:$0xff] }
 0x40e   :  { %v8373_v46 = vld [vmem:[#allocation5 + $0xd0] sm:$0xff]  ;;  %v2178_v8 = vpop.permute.xlu0 %2177 }
 0x40f   :  { %3408 = vmatmul.f32.gmra.mxu1 %v8373_v46  ;;  %v8378_v2 = vsel %vm220_vm9, %v8234_v62, %v2178_v8  ;;  %v2188_v38 = vsel %vm220_vm9, %v2178_v8, %v2180_v7  ;;  %v2411_v47 = vpop.permute.xlu1 %2410  ;;  %v8383_v42 = vpop.permute.xlu2 %2299  ;;  %v3140_v62 = vld [vmem:[%s11786_s2 + $0x1100] sm:$0xff]  ;;  %v2849_v8 = vld [vmem:[%s11786_s2 + $0x7e8] sm:$0xff] }
 0x410   :  { %2211 = vst [vmem:[#allocation5 + $0x138] sm:$0xff] %v8378_v2  ;;  %v8387_v4 = vsel %vm11875_vm12, %v8229_v26, %v2411_v47  ;;  %v8392_v52 = vsel %vm11869_vm0, %v2298_v54, %v8383_v42  ;;  %3567 = vmatpush.msra.mxu3 %v3140_v62  ;;  %v3304_v7 = vld [vmem:[%s11786_s2 + $0x1620] sm:$0xff]  ;;  %vm11883_vm12 = vmmov %vm11869_vm0 }
 0x411   :  { %2212 = vst.msk [vmem:[#allocation5 + $0x140] sm:$0xff] %vm11874_vm7, %v2188_v38  ;;  %3440 = vmatmul.f32.gmra.mxu2 %v8378_v2  ;;  %vm11882_vm7 = vmmov %vm11879_vm5  ;;  %v3260_v62 = vld [vmem:[%s11786_s2 + $0x14c0] sm:$0xff] }
 0x412   :  { %2332 = vst.msk [vmem:[#allocation5 + $0x140] sm:$0xff] %vm11876_vm4, %v2298_v54  ;;  %v8405_v59 = vld [vmem:[#allocation5 + $0xe0] sm:$0xff]  ;;  %3568 = vmatpush.msra.mxu3 %v3136_v1  ;;  %3661 = vmatpush.msra.mxu2 %v3304_v7  ;;  %v2463_v54 = vld [vmem:[#allocation3 + $0x28] sm:$0xff]  ;;  %vm11884_vm4 = vmmov %vm11869_vm0 }
 0x413   :  { %2333 = vst [vmem:[#allocation5 + $0x148] sm:$0xff] %v8392_v52  ;;  %3466 = vmatmul.f32.gmra.mxu3 %v8405_v59  ;;  %v2501_v53 = vrot.slane %v2463_v54, 4  ;;  %vm11885_vm0 = vmmov %vm11879_vm5  ;;  %v2781_v54 = vld [vmem:[%s11786_s2 + $0x5c8] sm:$0xff] }
 0x414   :  { %2450 = vst [vmem:[#allocation5 + $0x98] sm:$0xff] %v8387_v4  ;;  %3569 = vmatpush.msra.mxu3 %v3132_v22  ;;  %3662 = vmatpush.msra.mxu2 %v3300_v12  ;;  %v3176_v22 = vld [vmem:[%s11786_s2 + $0x1220] sm:$0xff] }
 0x415   :  { %v2502_v1 = vsel %vm1313_vm2, %v2500_v44, %v2501_v53  ;;  %v2508_v33 = vsel %vm1313_vm2, %v2501_v53, %v2507_v43  ;;  %v2472_v44 = vld [vmem:[#allocation3 + $0x70] sm:$0xff] }
 0x416   :  { %v2288_v32 = vpop.permute.xlu0 %2287  ;;  %3570 = vmatpush.msra.mxu3 %v3128_v37  ;;  %2538 = vst.msk [vmem:[#allocation5 + $0x58] sm:$0xff] %vm220_vm9, %v2502_v1  ;;  %v2701_v53 = vld [vmem:[%s11786_s2 + $0x348] sm:$0xff] }
 0x417   :  { %3411 = vmatmul.f32.gmra.mxu1 %v8424_v30  ;;  %v8435_v14 = vsel %vm11877_vm14, %v8172_v18, %v2288_v32  ;;  %v2290_v13 = vpop.permute.xlu1 %2289  ;;  %v2413_v50 = vpop.permute.xlu2 %2412  ;;  %2541 = vst.msk [vmem:[#allocation5 + $0xb8] sm:$0xff] %vm220_vm9, %v2508_v33  ;;  %vm11886_vm14 = vmmov %vm11885_vm0  ;;  %v2777_v1 = vld [vmem:[%s11786_s2 + $0x5a8] sm:$0xff] }
 0x418   :  { %2327 = vst [vmem:[#allocation5 + $0x88] sm:$0xff] %v8435_v14  ;;  %3492 = vmatmul.f32.gmra.mxu0 %v8435_v14  ;;  %v2306_v60 = vsel %vm11878_vm13, %v2288_v32, %v2290_v13  ;;  %v8449_v36 = vsel %vm11879_vm5, %v2411_v47, %v2413_v50  ;;  %3571 = vmatpush.msra.mxu3 %v3124_v49  ;;  %v3180_v47 = vld [vmem:[%s11786_s2 + $0x1240] sm:$0xff]  ;;  %v2645_v32 = vld [vmem:[%s11786_s2 + $0x188] sm:$0xff]  ;;  %vm11887_vm13 = vmmov %vm11881_vm3 }
 0x419   :  { %v8446_v18 = vld [vmem:[#allocation5 + $0x140] sm:$0xff]  ;;  %2328 = vst.msk [vmem:[#allocation5 + $0x90] sm:$0xff] %vm11880_vm10, %v2306_v60  ;;  %3547 = vmatmul.f32.vlgmr.msrb.gmra.mxu2 %v8205_v3  ;;  %v3284_v3 = vld [vmem:[%s11786_s2 + $0x1580] sm:$0xff]  ;;  %3602 = vmatpush.msra.mxu0 %v3180_v47  ;;  %vm11888_vm5 = vmmov %vm11885_vm0 }
 0x41a   :  { %2451 = vst [vmem:[#allocation5 + $0xa0] sm:$0xff] %v8449_v36  ;;  %3621 = vmatpush.msra.mxu1 %v3284_v3  ;;  %3763 = vmatpush.msrb.mxu2 %v2849_v8  ;;  %v3172_v13 = vld [vmem:[%s11786_s2 + $0x1200] sm:$0xff]  ;;  %v2641_v60 = vld [vmem:[%s11786_s2 + $0x168] sm:$0xff]  ;;  %vm11889_vm10 = vmmov %vm11884_vm4 }
 0x41b   :  { %2449 = vst.msk [vmem:[#allocation5 + $0x90] sm:$0xff] %vm11881_vm3, %v8229_v26  ;;  %3469 = vmatmul.f32.gmra.mxu3 %v8446_v18  ;;  %v3120_v26 = vld [vmem:[%s11786_s2 + $0x1060] sm:$0xff]  ;;  %3603 = vmatpush.msra.mxu0 %v3176_v22  ;;  %vm11890_vm3 = vmmov %vm11885_vm0  ;;  %v2617_v8 = vld [vmem:[%s11786_s2 + $0xa8] sm:$0xff] }
 0x41c   :  { %3572 = vmatpush.msra.mxu3 %v3120_v26  ;;  %3622 = vmatpush.msra.mxu1 %v3280_v61  ;;  %v2637_v26 = vld [vmem:[%s11786_s2 + $0x148] sm:$0xff] }
 0x41d   :  { %3764 = vmatpush.msrb.mxu2 %v2845_v11  ;;  %3604 = vmatpush.msra.mxu0 %v3172_v13  ;;  %v2717_v61 = vld [vmem:[%s11786_s2 + $0x3c8] sm:$0xff]  ;;  %v2475_v13 = vld [vmem:[#allocation3 + $0x88] sm:$0xf] }
 0x41e   :  { %v8468_v58 = vpop.permute.xlu0 %2414  ;;  %3573 = vmatpush.msra.mxu3 %v3116_v31  ;;  %3623 = vmatpush.msra.mxu1 %v3276_v57  ;;  %v3240_v31 = vld [vmem:[%s11786_s2 + $0x1420] sm:$0xff]  ;;  %v2837_v57 = vld [vmem:[%s11786_s2 + $0x788] sm:$0xff] }
 0x41f   :  { %3518 = vmatmul.f32.vlgmr.msrb.gmra.mxu1 %v8466_v21  ;;  %v8480_v19 = vpop.permute.xlu1 %2295  ;;  %3705 = vmatpush.msrb.mxu0 %v2721_v27  ;;  %v8695_v22 = vld [vmem:[#allocation5 + $0xb8] sm:$0xff]  ;;  %v2613_v43 = vld [vmem:[%s11786_s2 + $0x88] sm:$0xff] }
 0x420   :  { %3574 = vmatpush.msra.mxu3 %v3112_v56  ;;  %3624 = vmatpush.msra.mxu1 %v3272_v45  ;;  %v3236_v56 = vld [vmem:[%s11786_s2 + $0x1400] sm:$0xff]  ;;  %v2769_v27 = vld [vmem:[%s11786_s2 + $0x568] sm:$0xff] }
 0x421   :  { %3550 = vmatmul.f32.gmra.mxu2 %v8387_v4  ;;  %3706 = vmatpush.msrb.mxu0 %v2717_v61 }
 0x422   :  { %v8518_v41 = vld [vmem:[#allocation5 + $0x90] sm:$0xff]  ;;  %3575 = vmatpush.msra.mxu3 %v3108_v15  ;;  %3625 = vmatpush.msra.mxu1 %v3268_v6  ;;  %v8639_v15 = vld [vmem:[#allocation5 + $0x58] sm:$0xff]  ;;  %v2709_v6 = vld [vmem:[%s11786_s2 + $0x388] sm:$0xff] }
 0x423   :  { %3707 = vmatpush.msrb.mxu0 %v2713_v20  ;;  %v2601_v20 = vld [vmem:[%s11786_s2 + $0x28] sm:$0xff] }
 0x424   :  { %3676 = vmatpush.msrb.mxu3 %v2657_v24  ;;  %3626 = vmatpush.msra.mxu1 %v3264_v17  ;;  %v2829_v17 = vld [vmem:[%s11786_s2 + $0x748] sm:$0xff] }
 0x425   :  { %3708 = vmatpush.msrb.mxu0 %v2709_v6  ;;  %v2597_v6 = vld [vmem:[%s11786_s2 + $0x8] sm:$0xff] }
 0x426   :  { %v8516_v28 = vpop.permute.xlu0 %2420  ;;  %3677 = vmatpush.msrb.mxu3 %v2653_v51  ;;  %3627 = vmatpush.msra.mxu1 %v3260_v62  ;;  %v2469_v51 = vld [vmem:[#allocation3 + $0x58] sm:$0xf0] }
 0x427   :  { %3521 = vmatmul.f32.gmra.mxu1 %v8518_v41  ;;  %v8527_v23 = vpop.permute.xlu1 %2416  ;;  %v2515_v47 = vrot.slane %v2469_v51, 4  ;;  %v2909_v51 = vld [vmem:[%s11786_s2 + $0x9c8] sm:$0xff] }
 0x428   :  { %v8541_v38 = vsel %vm11882_vm7, %v8468_v58, %v8527_v23  ;;  %3678 = vmatpush.msrb.mxu3 %v2649_v10  ;;  %3628 = vmatpush.msra.mxu1 %v3256_v34  ;;  %vm11891_vm7 = vmmov %vm11887_vm13  ;;  %v2697_v10 = vld [vmem:[%s11786_s2 + $0x328] sm:$0xff] }
 0x429   :  { %2453 = vst [vmem:[#allocation5 + $0xf8] sm:$0xff] %v8541_v38  ;;  %3553 = vmatmul.f32.gmra.mxu2 %v8541_v38 }
 0x42a   :  { %3679 = vmatpush.msrb.mxu3 %v2645_v32  ;;  %3629 = vmatpush.msra.mxu1 %v3252_v16  ;;  %v8703_v32 = vld [vmem:[#allocation5 + $0x48] sm:$0xff] }
 0x42c   :  { %3680 = vmatpush.msrb.mxu3 %v2641_v60  ;;  %v2609_v60 = vld [vmem:[%s11786_s2 + $0x68] sm:$0xff] }
 0x42e   :  { %v2294_v37 = vpop.permute.xlu0 %2293  ;;  %3681 = vmatpush.msrb.mxu3 %v2637_v26  ;;  %v2817_v26 = vld [vmem:[%s11786_s2 + $0x6e8] sm:$0xff] }
 0x42f   :  { %v8578_v48 = vsel %vm11883_vm12, %v8291_v35, %v2294_v37  ;;  %v2308_v50 = vsel %vm11884_vm4, %v2294_v37, %v8480_v19  ;;  %v8586_v49 = vpop.permute.xlu1 %2422  ;;  %v3248_v35 = vld [vmem:[%s11786_s2 + $0x1460] sm:$0xff]  ;;  %v2633_v19 = vld [vmem:[%s11786_s2 + $0x128] sm:$0xff]  ;;  %vm11892_vm12 = vmmov %vm11885_vm0 }
 0x430   :  { %2330 = vst [vmem:[#allocation5 + $0xe8] sm:$0xff] %v8578_v48  ;;  %3495 = vmatmul.f32.gmra.mxu0 %v8578_v48  ;;  %v8599_v3 = vsel %vm11886_vm14, %v8516_v28, %v8586_v49  ;;  %3630 = vmatpush.msra.mxu1 %v3248_v35  ;;  %vm11893_vm4 = vmmov %vm11885_vm0  ;;  %v2693_v37 = vld [vmem:[%s11786_s2 + $0x308] sm:$0xff]  ;;  %vm11996_vm14 = vcmask 1043458  }
 0x431   :  { %2331 = vst.msk [vmem:[#allocation5 + $0xf0] sm:$0xff] %vm11885_vm0, %v2308_v50  ;;  %3556 = vmatmul.f32.gmra.mxu2 %v8599_v3  ;;  %3682 = vmatpush.msrb.mxu3 %v2633_v19  ;;  %v2821_v50 = vld [vmem:[%s11786_s2 + $0x708] sm:$0xff]  ;;  %vm11953_vm0 = vcmask 1041408  }
 0x432   :  { %2452 = vst.msk [vmem:[#allocation5 + $0xf0] sm:$0xff] %vm11887_vm13, %v8468_v58  ;;  %v2841_v58 = vld [vmem:[%s11786_s2 + $0x7a8] sm:$0xff]  ;;  %3631 = vmatpush.msra.mxu1 %v3244_v5  ;;  %vm11997_vm13 = vmmov %vm11996_vm14 }
 0x433   :  { %2456 = vst [vmem:[#allocation5 + $0x158] sm:$0xff] %v8599_v3  ;;  %3765 = vmatpush.msrb.mxu2 %v2841_v58  ;;  %3683 = vmatpush.msrb.mxu3 %v2629_v25  ;;  %v2689_v35 = vld [vmem:[%s11786_s2 + $0x2e8] sm:$0xff] }
 0x434   :  { %3632 = vmatpush.msra.mxu1 %v3240_v31  ;;  %v2605_v5 = vld [vmem:[%s11786_s2 + $0x48] sm:$0xff] }
 0x435   :  { %3766 = vmatpush.msrb.mxu2 %v2837_v57  ;;  %v2685_v19 = vld [vmem:[%s11786_s2 + $0x2c8] sm:$0xff]  ;;  %v8757_v57 = vld [vmem:[#allocation5 + $0xa8] sm:$0xff] }
 0x436   :  { %v2407_v7 = vpop.permute.xlu0 %2406  ;;  %3633 = vmatpush.msra.mxu1 %v3236_v56  ;;  %v2765_v58 = vld [vmem:[%s11786_s2 + $0x548] sm:$0xff] }
 0x437   :  { %v8637_v45 = vsel %vm11888_vm5, %v8201_v9, %v2407_v7  ;;  %v2302_v39 = vpop.permute.xlu1 %2301  ;;  %v2625_v9 = vld [vmem:[%s11786_s2 + $0xe8] sm:$0xff]  ;;  %3767 = vmatpush.msrb.mxu2 %v2833_v40  ;;  %vm12001_vm5 = vcmask 1045506  }
 0x438   :  { %2448 = vst [vmem:[#allocation5 + $0x40] sm:$0xff] %v8637_v45  ;;  %3498 = vmatmul.f32.gmra.mxu0 %v8392_v52  ;;  %3576 = vmatmul.f32.vlgmr.msra.gmra.mxu3 %v8637_v45  ;;  %v2310_v24 = vsel %vm11889_vm10, %v8383_v42, %v2302_v39  ;;  %v2785_v52 = vld [vmem:[%s11786_s2 + $0x5e8] sm:$0xff]  ;;  %vm12004_vm10 = vmmov %vm12001_vm5 }
 0x439   :  { %v8650_v12 = vld [vmem:[#allocation5 + $0xf0] sm:$0xff]  ;;  %2334 = vst.msk [vmem:[#allocation5 + $0x150] sm:$0xff] %vm11890_vm3, %v2310_v24  ;;  %5758 = vmatmul.msk.f32.vlgmr.msra.gmra.mxu2 %vm220_vm9, %v8639_v15  ;;  %v2705_v42 = vld [vmem:[%s11786_s2 + $0x368] sm:$0xff]  ;;  %3684 = vmatpush.msrb.mxu3 %v2625_v9  ;;  %vm12009_vm3 = vcmask 1045508  }
 0x43a   :  { %3524 = vmatmul.f32.gmra.mxu1 %v8650_v12  ;;  %2455 = vst.msk [vmem:[#allocation5 + $0x150] sm:$0xff] %vm11891_vm7, %v8516_v28  ;;  %v2516_v28 = vrot.slane %v2472_v44, 4  ;;  %3709 = vmatpush.msrb.mxu0 %v2705_v42  ;;  %v2813_v7 = vld [vmem:[%s11786_s2 + $0x6c8] sm:$0xff]  ;;  %v8777_v9 = vld [vmem:[#allocation5 + $0x50] sm:$0xff]  ;;  %v8804_v44 = vld [vmem:[#allocation5 + $0x108] sm:$0xff] }
 0x43b   :  { %3734 = vmatpush.msrb.mxu1 %v2785_v52  ;;  %3685 = vmatpush.msrb.mxu3 %v2621_v55  ;;  %v2681_v56 = vld [vmem:[%s11786_s2 + $0x2a8] sm:$0xff]  ;;  %vm12014_vm7 = vmmov %vm11997_vm13 }
 0x43c   :  { %3768 = vmatpush.msrb.mxu2 %v2829_v17  ;;  %v2517_v11 = vsel %vm1313_vm2, %v2515_v47, %v2516_v28  ;;  %3710 = vmatpush.msrb.mxu0 %v2701_v53  ;;  %v2761_v25 = vld [vmem:[%s11786_s2 + $0x528] sm:$0xff] }
 0x43d   :  { %3735 = vmatpush.msrb.mxu1 %v2781_v54  ;;  %3686 = vmatpush.msrb.mxu3 %v2617_v8  ;;  %2544 = vst.msk [vmem:[#allocation5 + $0x118] sm:$0xff] %vm220_vm9, %v2517_v11  ;;  %v2809_v39 = vld [vmem:[%s11786_s2 + $0x6a8] sm:$0xff] }
 0x43e   :  { %v2419_v62 = vpop.permute.xlu0 %2418  ;;  %3711 = vmatpush.msrb.mxu0 %v2697_v10  ;;  %v2677_v24 = vld [vmem:[%s11786_s2 + $0x288] sm:$0xff]  ;;  %v8824_v10 = vld [vmem:[#allocation5 + $0xb0] sm:$0xff] }
 0x43f   :  { %v8693_v29 = vsel %vm11892_vm12, %v8527_v23, %v2419_v62  ;;  %v2425_v34 = vpop.permute.xlu1 %2424  ;;  %v2825_v23 = vld [vmem:[%s11786_s2 + $0x728] sm:$0xff]  ;;  %3736 = vmatpush.msrb.mxu1 %v2777_v1  ;;  %3687 = vmatpush.msrb.mxu3 %v2613_v43  ;;  %vm12016_vm12 = vmmov %vm12001_vm5 }
 0x440   :  { %2454 = vst [vmem:[#allocation5 + $0x100] sm:$0xff] %v8693_v29  ;;  %3579 = vmatmul.f32.gmra.mxu3 %v8449_v36  ;;  %3605 = vmatmul.f32.vlgmr.msra.gmra.mxu0 %v8703_v32  ;;  %v8711_v33 = vsel %vm11893_vm4, %v8586_v49, %v2425_v34  ;;  %v2773_v36 = vld [vmem:[%s11786_s2 + $0x588] sm:$0xff]  ;;  %v2522_v49 = vrot.slane %v2475_v13, 4  ;;  %vm12022_vm4 = vmmov %vm12009_vm3 }
 0x441   :  { %2457 = vst [vmem:[#allocation5 + $0x160] sm:$0xff] %v8711_v33  ;;  %v8720_v16 = vld [vmem:[#allocation5 + $0x150] sm:$0xff]  ;;  %5759 = vmatmul.msk.f32.gmra.mxu2 %vm220_vm9, %v8695_v22  ;;  %3712 = vmatpush.msrb.mxu0 %v2693_v37  ;;  %v2757_v52 = vld [vmem:[%s11786_s2 + $0x508] sm:$0xff] }
 0x442   :  { %3527 = vmatmul.f32.gmra.mxu1 %v8720_v16  ;;  %3769 = vmatpush.msrb.mxu2 %v2825_v23  ;;  %v2523_v61 = vsel %vm1313_vm2, %v2516_v28, %v2522_v49  ;;  %v2805_v40 = vld [vmem:[%s11786_s2 + $0x688] sm:$0xff] }
 0x443   :  { %3737 = vmatpush.msrb.mxu1 %v2773_v36  ;;  %3688 = vmatpush.msrb.mxu3 %v2609_v60  ;;  %2547 = vst.msk [vmem:[#allocation5 + $0x178] sm:$0xff] %vm220_vm9, %v2523_v61  ;;  %v2913_v42 = vld [vmem:[%s11786_s2 + $0x9e8] sm:$0xff] }
 0x444   :  { %3770 = vmatpush.msrb.mxu2 %v2821_v50  ;;  %3713 = vmatpush.msrb.mxu0 %v2689_v35  ;;  %v8751_v31 = vld [vmem:[#allocation5 + $0x118] sm:$0xff]  ;;  %v2673_v55 = vld [vmem:[%s11786_s2 + $0x268] sm:$0xff]  ;;  %v8851_v50 = vld [vmem:[#allocation5 + $0x168] sm:$0xff] }
 0x445   :  { %3738 = vmatpush.msrb.mxu1 %v2769_v27  ;;  %3689 = vmatpush.msrb.mxu3 %v2605_v5  ;;  %v2753_v54 = vld [vmem:[%s11786_s2 + $0x4e8] sm:$0xff]  ;;  %v8869_v5 = vld [vmem:[#allocation5 + $0x110] sm:$0xff] }
 0x446   :  { %3771 = vmatpush.msrb.mxu2 %v2817_v26  ;;  %3714 = vmatpush.msrb.mxu0 %v2685_v19  ;;  %v2801_v53 = vld [vmem:[%s11786_s2 + $0x668] sm:$0xff] }
 0x447   :  { %3739 = vmatpush.msrb.mxu1 %v2765_v58  ;;  %3690 = vmatpush.msrb.mxu3 %v2601_v20  ;;  %v2669_v8 = vld [vmem:[%s11786_s2 + $0x248] sm:$0xff] }
 0x448   :  { %3582 = vmatmul.f32.gmra.mxu3 %v8693_v29  ;;  %3608 = vmatmul.f32.gmra.mxu0 %v8757_v57  ;;  %v2749_v47 = vld [vmem:[%s11786_s2 + $0x4c8] sm:$0xff] }
 0x449   :  { %5760 = vmatmul.msk.f32.gmra.mxu2 %vm220_vm9, %v8751_v31  ;;  %3715 = vmatpush.msrb.mxu0 %v2681_v56  ;;  %v2797_v28 = vld [vmem:[%s11786_s2 + $0x648] sm:$0xff] }
 0x44a   :  { %3634 = vmatmul.f32.vlgmr.msra.gmra.mxu1 %v8777_v9  ;;  %3772 = vmatpush.msrb.mxu2 %v2813_v7  ;;  %v8798_v17 = vld [vmem:[#allocation5 + $0x178] sm:$0xff]  ;;  %v2905_v62 = vld [vmem:[%s11786_s2 + $0x9a8] sm:$0xff] }
 0x44b   :  { %3740 = vmatpush.msrb.mxu1 %v2761_v25  ;;  %3691 = vmatpush.msrb.mxu3 %v2597_v6  ;;  %v2665_v1 = vld [vmem:[%s11786_s2 + $0x228] sm:$0xff]  ;;  %v8900_v6 = vld [vmem:[#allocation5 + $0x8] sm:$0xff] }
 0x44c   :  { %3773 = vmatpush.msrb.mxu2 %v2809_v39  ;;  %3716 = vmatpush.msrb.mxu0 %v2677_v24  ;;  %v2745_v11 = vld [vmem:[%s11786_s2 + $0x4a8] sm:$0xff] }
 0x44d   :  { %3741 = vmatpush.msrb.mxu1 %v2757_v52  ;;  %3792 = vmatpush.msra.mxu3 %v2913_v42  ;;  %v2793_v43 = vld [vmem:[%s11786_s2 + $0x628] sm:$0xff] }
 0x44e   :  { %3774 = vmatpush.msrb.mxu2 %v2805_v40  ;;  %3717 = vmatpush.msrb.mxu0 %v2673_v55  ;;  %v2901_v34 = vld [vmem:[%s11786_s2 + $0x988] sm:$0xff]  ;;  %v8915_v55 = vld [vmem:[#allocation5 + $0x170] sm:$0xff] }
 0x44f   :  { %3742 = vmatpush.msrb.mxu1 %v2753_v54  ;;  %3793 = vmatpush.msra.mxu3 %v2909_v51  ;;  %v2661_v23 = vld [vmem:[%s11786_s2 + $0x208] sm:$0xff] }
 0x450   :  { %3585 = vmatmul.f32.gmra.mxu3 %v8711_v33  ;;  %3611 = vmatmul.f32.gmra.mxu0 %v8804_v44  ;;  %v2741_v37 = vld [vmem:[%s11786_s2 + $0x488] sm:$0xff] }
 0x451   :  { %5761 = vmatmul.msk.f32.gmra.mxu2 %vm220_vm9, %v8798_v17  ;;  %3718 = vmatpush.msrb.mxu0 %v2669_v8  ;;  %v2789_v36 = vld [vmem:[%s11786_s2 + $0x608] sm:$0xff] }
 0x452   :  { %3637 = vmatmul.f32.gmra.mxu1 %v8824_v10  ;;  %3775 = vmatpush.msrb.mxu2 %v2801_v53  ;;  %v2897_v13 = vld [vmem:[%s11786_s2 + $0x968] sm:$0xff] }
 0x453   :  { %3743 = vmatpush.msrb.mxu1 %v2749_v47  ;;  %3794 = vmatpush.msra.mxu3 %v2905_v62  ;;  %v8854_v60 = vld [vmem:[#allocation5] sm:$0xff]  ;;  %v8930_v47 = vld [vmem:[#allocation5 + $0x78] sm:$0xff] }
 0x454   :  { %3776 = vmatpush.msrb.mxu2 %v2797_v28  ;;  %3719 = vmatpush.msrb.mxu0 %v2665_v1  ;;  %v2737_v49 = vld [vmem:[%s11786_s2 + $0x468] sm:$0xff] }
 0x455   :  { %3744 = vmatpush.msrb.mxu1 %v2745_v11  ;;  %3795 = vmatpush.msra.mxu3 %v2901_v34  ;;  %v2977_v35 = vld [vmem:[%s11786_s2 + $0xbe8] sm:$0xff]  ;;  %v8948_v34 = vld [vmem:[#allocation3 + $0x20] sm:$0xff] }
 0x456   :  { %3777 = vmatpush.msrb.mxu2 %v2793_v43  ;;  %3720 = vmatpush.msrb.mxu0 %v2661_v23  ;;  %v3105_v27 = vld [vmem:[%s11786_s2 + $0xfe8] sm:$0xff] }
 0x457   :  { %3745 = vmatpush.msrb.mxu1 %v2741_v37  ;;  %3796 = vmatpush.msra.mxu3 %v2897_v13  ;;  %v2893_v26 = vld [vmem:[%s11786_s2 + $0x948] sm:$0xff] }
 0x458   :  { %3614 = vmatmul.f32.gmra.mxu0 %v8851_v50  ;;  %3692 = vmatmul.f32.vlgmr.msrb.gmra.mxu3 %v8854_v60  ;;  %v2733_v61 = vld [vmem:[%s11786_s2 + $0x448] sm:$0xff] }
 0x459   :  { %3778 = vmatpush.msrb.mxu2 %v2789_v36  ;;  %v2973_v19 = vld [vmem:[%s11786_s2 + $0xbc8] sm:$0xff]  ;;  %3746 = vmatpush.msrb.mxu1 %v2737_v49 }
 0x45a   :  { %3640 = vmatmul.f32.gmra.mxu1 %v8869_v5  ;;  %3779 = vmatmul.f32.vlgmr.msrb.gmra.mxu2 %v8210_v63  ;;  %v3101_v58 = vld [vmem:[%s11786_s2 + $0xfc8] sm:$0xff] }
 0x45b   :  { %3821 = vmatpush.msra.mxu0 %v2977_v35  ;;  %v2889_v20 = vld [vmem:[%s11786_s2 + $0x928] sm:$0xff]  ;;  %3879 = vmatpush.msra.mxu2 %v3105_v27  ;;  %v8966_v35 = vld [vmem:[#allocation5 + $0x10] sm:$0xff] }
 0x45c   :  { %3797 = vmatpush.msra.mxu3 %v2893_v26  ;;  %3747 = vmatpush.msrb.mxu1 %v2733_v61  ;;  %v2729_v63 = vld [vmem:[%s11786_s2 + $0x428] sm:$0xff] }
 0x45d   :  { %3822 = vmatpush.msra.mxu0 %v2973_v19  ;;  %v2969_v7 = vld [vmem:[%s11786_s2 + $0xba8] sm:$0xff]  ;;  %3880 = vmatpush.msra.mxu2 %v3101_v58 }
 0x45e   :  { %3798 = vmatpush.msra.mxu3 %v2889_v20  ;;  %v3097_v56 = vld [vmem:[%s11786_s2 + $0xfa8] sm:$0xff]  ;;  %3748 = vmatpush.msrb.mxu1 %v2729_v63 }
 0x45f   :  { %v2885_v25 = vld [vmem:[%s11786_s2 + $0x908] sm:$0xff]  ;;  %3823 = vmatpush.msra.mxu0 %v2969_v7  ;;  %3881 = vmatpush.msra.mxu2 %v3097_v56  ;;  %v8994_v56 = vld [vmem:[#allocation5 + $0xc8] sm:$0xff] }
 0x460   :  { %v8897_v39 = vld [vmem:[#allocation5 + $0x60] sm:$0xff]  ;;  %3721 = vmatmul.f32.vlgmr.msrb.gmra.mxu0 %v8900_v6  ;;  %3799 = vmatpush.msra.mxu3 %v2885_v25 }
 0x461   :  { %3695 = vmatmul.f32.gmra.mxu3 %v8897_v39  ;;  %v2965_v24 = vld [vmem:[%s11786_s2 + $0xb88] sm:$0xff] }
 0x462   :  { %v2725_v52 = vld [vmem:[%s11786_s2 + $0x408] sm:$0xff]  ;;  %3643 = vmatmul.f32.gmra.mxu1 %v8915_v55  ;;  %3824 = vmatpush.msra.mxu0 %v2965_v24 }
 0x463   :  { %v3093_v40 = vld [vmem:[%s11786_s2 + $0xf88] sm:$0xff]  ;;  %3749 = vmatpush.msrb.mxu1 %v2725_v52  ;;  %3782 = vmatmul.f32.gmra.mxu2 %v8930_v47 }
 0x464   :  { %v2881_v42 = vld [vmem:[%s11786_s2 + $0x8e8] sm:$0xff]  ;;  %3882 = vmatpush.msra.mxu2 %v3093_v40 }
 0x465   :  { %v2961_v54 = vld [vmem:[%s11786_s2 + $0xb68] sm:$0xff]  ;;  %3800 = vmatpush.msra.mxu3 %v2881_v42  ;;  %v9012_v42 = vpop.f32.mrf.mxu3 }
 0x466   :  { %v3041_v51 = vld [vmem:[%s11786_s2 + $0xde8] sm:$0xff]  ;;  %3825 = vmatpush.msra.mxu0 %v2961_v54  ;;  %v9014_v54 = vld [vmem:[#allocation5 + $0x70] sm:$0xff] }
 0x467   :  { %v3089_v53 = vld [vmem:[%s11786_s2 + $0xf68] sm:$0xff]  ;;  %3850 = vmatpush.msra.mxu1 %v3041_v51 }
 0x468   :  { %v2877_v8 = vld [vmem:[%s11786_s2 + $0x8c8] sm:$0xff]  ;;  %3883 = vmatpush.msra.mxu2 %v3089_v53  ;;  %3724 = vmatmul.f32.gmra.mxu0 %v8948_v34 }
 0x469   :  { %v2957_v28 = vld [vmem:[%s11786_s2 + $0xb48] sm:$0xff]  ;;  %3801 = vmatpush.msra.mxu3 %v2877_v8 }
 0x46a   :  { %v3037_v62 = vld [vmem:[%s11786_s2 + $0xdc8] sm:$0xff]  ;;  %3826 = vmatpush.msra.mxu0 %v2957_v28  ;;  %3750 = vmatmul.f32.vlgmr.msrb.gmra.mxu1 %v8966_v35 }
 0x46b   :  { %v3085_v1 = vld [vmem:[%s11786_s2 + $0xf48] sm:$0xff]  ;;  %3851 = vmatpush.msra.mxu1 %v3037_v62  ;;  %3785 = vmatmul.f32.gmra.mxu2 %v8352_v0 }
 0x46c   :  { %v2873_v11 = vld [vmem:[%s11786_s2 + $0x8a8] sm:$0xff]  ;;  %3884 = vmatpush.msra.mxu2 %v3085_v1 }
 0x46d   :  { %v8945_v43 = vld [vmem:[#allocation5 + $0xc0] sm:$0xff]  ;;  %3802 = vmatpush.msra.mxu3 %v2873_v11 }
 0x46e   :  { %3698 = vmatmul.f32.gmra.mxu3 %v8945_v43  ;;  %v2953_v23 = vld [vmem:[%s11786_s2 + $0xb28] sm:$0xff] }
 0x46f   :  { %v3033_v37 = vld [vmem:[%s11786_s2 + $0xda8] sm:$0xff]  ;;  %3827 = vmatpush.msra.mxu0 %v2953_v23 }
 0x470   :  { %v3081_v36 = vld [vmem:[%s11786_s2 + $0xf28] sm:$0xff]  ;;  %3852 = vmatpush.msra.mxu1 %v3033_v37  ;;  %3727 = vmatmul.f32.gmra.mxu0 %v8994_v56  ;;  %v9041_v37 = vld [vmem:[#allocation3 + $0x68] sm:$0xff] }
 0x471   :  { %v2869_v13 = vld [vmem:[%s11786_s2 + $0x888] sm:$0xff]  ;;  %3885 = vmatpush.msra.mxu2 %v3081_v36 }
 0x472   :  { %v2949_v49 = vld [vmem:[%s11786_s2 + $0xb08] sm:$0xff]  ;;  %3803 = vmatpush.msra.mxu3 %v2869_v13  ;;  %3753 = vmatmul.f32.gmra.mxu1 %v9014_v54 }
 0x473   :  { %v3029_v27 = vld [vmem:[%s11786_s2 + $0xd88] sm:$0xff]  ;;  %3828 = vmatpush.msra.mxu0 %v2949_v49  ;;  %3788 = vmatmul.f32.gmra.mxu2 %v8378_v2  ;;  %v9051_v49 = vpop.f32.mrf.mxu0 }
 0x474   :  { %v3077_v26 = vld [vmem:[%s11786_s2 + $0xf08] sm:$0xff]  ;;  %3853 = vmatpush.msra.mxu1 %v3029_v27 }
 0x475   :  { %v2865_v61 = vld [vmem:[%s11786_s2 + $0x868] sm:$0xff]  ;;  %3886 = vmatpush.msra.mxu2 %v3077_v26 }
 0x476   :  { %v2945_v19 = vld [vmem:[%s11786_s2 + $0xae8] sm:$0xff]  ;;  %3804 = vmatpush.msra.mxu3 %v2865_v61  ;;  %v9062_v61 = vpop.f32.mrf.mxu2 }
 0x477   :  { %v3025_v58 = vld [vmem:[%s11786_s2 + $0xd68] sm:$0xff]  ;;  %3829 = vmatpush.msra.mxu0 %v2945_v19 }
 0x478   :  { %v3073_v20 = vld [vmem:[%s11786_s2 + $0xee8] sm:$0xff]  ;;  %3854 = vmatpush.msra.mxu1 %v3025_v58  ;;  %3730 = vmatmul.f32.gmra.mxu0 %v9041_v37 }
 0x479   :  { %v2861_v63 = vld [vmem:[%s11786_s2 + $0x848] sm:$0xff]  ;;  %3887 = vmatpush.msra.mxu2 %v3073_v20 }
 0x47a   :  { %v8991_v7 = vld [vmem:[#allocation5 + $0x120] sm:$0xff]  ;;  %3805 = vmatpush.msra.mxu3 %v2861_v63  ;;  %3756 = vmatmul.f32.gmra.mxu1 %v8373_v46  ;;  %v9077_v46 = vpop.f32.mrf.mxu3 }
 0x47b   :  { %3701 = vmatmul.f32.gmra.mxu3 %v8991_v7  ;;  %v2941_v0 = vld [vmem:[%s11786_s2 + $0xac8] sm:$0xff] }
 0x47c   :  { %v3021_v25 = vld [vmem:[%s11786_s2 + $0xd48] sm:$0xff]  ;;  %3830 = vmatpush.msra.mxu0 %v2941_v0 }
 0x47d   :  { %v3069_v24 = vld [vmem:[%s11786_s2 + $0xec8] sm:$0xff]  ;;  %3855 = vmatpush.msra.mxu1 %v3021_v25 }
 0x47e   :  { %v2857_v52 = vld [vmem:[%s11786_s2 + $0x828] sm:$0xff]  ;;  %3888 = vmatpush.msra.mxu2 %v3069_v24 }
 0x47f   :  { %v2937_v40 = vld [vmem:[%s11786_s2 + $0xaa8] sm:$0xff]  ;;  %3806 = vmatpush.msra.mxu3 %v2857_v52 }
 0x480   :  { %v3017_v51 = vld [vmem:[%s11786_s2 + $0xd28] sm:$0xff]  ;;  %3831 = vmatpush.msra.mxu0 %v2937_v40 }
 0x481   :  { %v3065_v53 = vld [vmem:[%s11786_s2 + $0xea8] sm:$0xff]  ;;  %3856 = vmatpush.msra.mxu1 %v3017_v51 }
 0x482   :  { %v2853_v8 = vld [vmem:[%s11786_s2 + $0x808] sm:$0xff]  ;;  %3889 = vmatpush.msra.mxu2 %v3065_v53  ;;  %v9097_v53 = vpop.f32.mrf.mxu1  ;;  %3759 = vmatmul.f32.gmra.mxu1 %v8424_v30 }
 0x483   :  { %v2933_v28 = vld [vmem:[%s11786_s2 + $0xa88] sm:$0xff]  ;;  %3807 = vmatpush.msra.mxu3 %v2853_v8  ;;  %v9099_v8 = vpop.f32.mrf.mxu0 }
 0x484   :  { %v3013_v62 = vld [vmem:[%s11786_s2 + $0xd08] sm:$0xff]  ;;  %3832 = vmatpush.msra.mxu0 %v2933_v28 }
 0x485   :  { %v3061_v1 = vld [vmem:[%s11786_s2 + $0xe88] sm:$0xff]  ;;  %3857 = vmatpush.msra.mxu1 %v3013_v62 }
 0x486   :  { %v2929_v11 = vld [vmem:[%s11786_s2 + $0xa68] sm:$0xff]  ;;  %3890 = vmatpush.msra.mxu2 %v3061_v1 }
 0x487   :  { %v3057_v23 = vld [vmem:[%s11786_s2 + $0xe68] sm:$0xff]  ;;  %3833 = vmatpush.msra.mxu0 %v2929_v11  ;;  %v9110_v11 = vld [vmem:[#allocation5 + $0x28] sm:$0xff] }
 0x488   :  { %v3009_v36 = vld [vmem:[%s11786_s2 + $0xce8] sm:$0xff]  ;;  %3891 = vmatpush.msra.mxu2 %v3057_v23 }
 0x489   :  { %v3169_v13 = vld [vmem:[%s11786_s2 + $0x11e8] sm:$0xff]  ;;  %3858 = vmatpush.msra.mxu1 %v3009_v36 }
 0x48a   :  { %v9053_v27 = vld [vmem:[#allocation5 + $0x20] sm:$0xff]  ;;  %3908 = vmatpush.msrb.mxu3 %v3169_v13  ;;  %v9119_v13 = vld [vmem:[#allocation5 + $0x38] sm:$0xff] }
 0x48b   :  { %3808 = vmatmul.f32.vlgmr.msra.gmra.mxu3 %v9053_v27  ;;  %v2925_v26 = vld [vmem:[%s11786_s2 + $0xa48] sm:$0xff] }
 0x48c   :  { %v3053_v2 = vld [vmem:[%s11786_s2 + $0xe48] sm:$0xff]  ;;  %3834 = vmatpush.msra.mxu0 %v2925_v26 }
 0x48d   :  { %v3005_v19 = vld [vmem:[%s11786_s2 + $0xcc8] sm:$0xff]  ;;  %3892 = vmatpush.msra.mxu2 %v3053_v2 }
 0x48e   :  { %v3165_v58 = vld [vmem:[%s11786_s2 + $0x11c8] sm:$0xff]  ;;  %3859 = vmatpush.msra.mxu1 %v3005_v19  ;;  %v9129_v19 = vpop.f32.mrf.mxu3 }
 0x48f   :  { %v2921_v20 = vld [vmem:[%s11786_s2 + $0xa28] sm:$0xff]  ;;  %3909 = vmatpush.msrb.mxu3 %v3165_v58  ;;  %11894 = vst [vmem:[#allocation15_spill] sm:$0xff] %v9129_v19  ;;  %v9131_v58 = vpop.f32.mrf.mxu2  ;;  %v3178_v19 = vld [vmem:[%s11786_s2 + $0x1230] sm:$0xff] }
 0x490   :  { %v3049_v63 = vld [vmem:[%s11786_s2 + $0xe28] sm:$0xff]  ;;  %3835 = vmatpush.msra.mxu0 %v2921_v20 }
 0x491   :  { %v3001_v0 = vld [vmem:[%s11786_s2 + $0xca8] sm:$0xff]  ;;  %3893 = vmatpush.msra.mxu2 %v3049_v63 }
 0x492   :  { %v3161_v25 = vld [vmem:[%s11786_s2 + $0x11a8] sm:$0xff]  ;;  %3860 = vmatpush.msra.mxu1 %v3001_v0 }
 0x493   :  { %v2917_v24 = vld [vmem:[%s11786_s2 + $0xa08] sm:$0xff]  ;;  %3910 = vmatpush.msrb.mxu3 %v3161_v25 }
 0x494   :  { %v3045_v52 = vld [vmem:[%s11786_s2 + $0xe08] sm:$0xff]  ;;  %3836 = vmatpush.msra.mxu0 %v2917_v24 }
 0x495   :  { %v2997_v40 = vld [vmem:[%s11786_s2 + $0xc88] sm:$0xff]  ;;  %3894 = vmatpush.msra.mxu2 %v3045_v52  ;;  %3837 = vmatmul.f32.vlgmr.msra.gmra.mxu0 %v9110_v11 }
 0x496   :  { %v3157_v51 = vld [vmem:[%s11786_s2 + $0x1188] sm:$0xff]  ;;  %3861 = vmatpush.msra.mxu1 %v2997_v40  ;;  %3895 = vmatmul.f32.vlgmr.msra.gmra.mxu2 %v9119_v13 }
 0x497   :  { %3911 = vmatpush.msrb.mxu3 %v3157_v51  ;;  %v2993_v28 = vld [vmem:[%s11786_s2 + $0xc68] sm:$0xff]  ;;  %v9157_v51 = vpop.f32.mrf.mxu1 }
 0x498   :  { %v3153_v62 = vld [vmem:[%s11786_s2 + $0x1168] sm:$0xff]  ;;  %3862 = vmatpush.msra.mxu1 %v2993_v28 }
 0x499   :  { %v9107_v1 = vld [vmem:[#allocation5 + $0x80] sm:$0xff]  ;;  %3912 = vmatpush.msrb.mxu3 %v3153_v62  ;;  %v9162_v62 = vpop.f32.mrf.mxu0 }
 0x49a   :  { %3811 = vmatmul.f32.gmra.mxu3 %v9107_v1  ;;  %v3233_v23 = vld [vmem:[%s11786_s2 + $0x13e8] sm:$0xff]  ;;  %11895 = vst [vmem:[#allocation19_spill] sm:$0xff] %v9162_v62 }
 0x49b   :  { %v3313_v36 = vld [vmem:[%s11786_s2 + $0x1668] sm:$0xff]  ;;  %3937 = vmatpush.msrb.mxu0 %v3233_v23 }
 0x49c   :  { %v2989_v26 = vld [vmem:[%s11786_s2 + $0xc48] sm:$0xff]  ;;  %4007 = vmatpush.msrb.mxu2 %v3313_v36 }
 0x49d   :  { %v3149_v2 = vld [vmem:[%s11786_s2 + $0x1148] sm:$0xff]  ;;  %3863 = vmatpush.msra.mxu1 %v2989_v26  ;;  %3840 = vmatmul.f32.gmra.mxu0 %v8435_v14  ;;  %v9191_v14 = vpop.f32.mrf.mxu3 }
 0x49e   :  { %v3229_v20 = vld [vmem:[%s11786_s2 + $0x13c8] sm:$0xff]  ;;  %3913 = vmatpush.msrb.mxu3 %v3149_v2  ;;  %3898 = vmatmul.f32.gmra.mxu2 %v8387_v4  ;;  %11897 = vst [vmem:[#allocation31_spill] sm:$0xff] %v9191_v14 }
 0x49f   :  { %v3309_v30 = vld [vmem:[%s11786_s2 + $0x1648] sm:$0xff]  ;;  %3938 = vmatpush.msrb.mxu0 %v3229_v20  ;;  %v9179_v20 = vpop.f32.mrf.mxu2 }
 0x4a0   :  { %v2985_v63 = vld [vmem:[%s11786_s2 + $0xc28] sm:$0xff]  ;;  %4008 = vmatpush.msrb.mxu2 %v3309_v30  ;;  %11896 = vst [vmem:[#allocation27_spill] sm:$0xff] %v9179_v20  ;;  %v3210_v20 = vld [vmem:[%s11786_s2 + $0x1330] sm:$0xff] }
 0x4a1   :  { %v3145_v0 = vld [vmem:[%s11786_s2 + $0x1128] sm:$0xff]  ;;  %3864 = vmatpush.msra.mxu1 %v2985_v63 }
 0x4a2   :  { %v3225_v25 = vld [vmem:[%s11786_s2 + $0x13a8] sm:$0xff]  ;;  %3914 = vmatpush.msrb.mxu3 %v3145_v0 }
 0x4a3   :  { %v3305_v24 = vld [vmem:[%s11786_s2 + $0x1628] sm:$0xff]  ;;  %3939 = vmatpush.msrb.mxu0 %v3225_v25  ;;  %3814 = vmatmul.f32.gmra.mxu3 %v8405_v59 }
 0x4a4   :  { %v2981_v52 = vld [vmem:[%s11786_s2 + $0xc08] sm:$0xff]  ;;  %4009 = vmatpush.msrb.mxu2 %v3305_v24  ;;  %v9205_v24 = vpop.f32.mrf.mxu1 }
 0x4a5   :  { %v3141_v40 = vld [vmem:[%s11786_s2 + $0x1108] sm:$0xff]  ;;  %3865 = vmatpush.msra.mxu1 %v2981_v52  ;;  %11898 = vst [vmem:[#allocation20_spill] sm:$0xff] %v9205_v24  ;;  %3843 = vmatmul.f32.gmra.mxu0 %v8578_v48  ;;  %v2839_v24 = vld [vmem:[%s11786_s2 + $0x798] sm:$0xff] }
 0x4a6   :  { %v3221_v28 = vld [vmem:[%s11786_s2 + $0x1388] sm:$0xff]  ;;  %3915 = vmatpush.msrb.mxu3 %v3141_v40  ;;  %3866 = vmatmul.f32.vlgmr.msra.gmra.mxu1 %v8466_v21  ;;  %v2850_v21 = vld [vmem:[%s11786_s2 + $0x7f0] sm:$0xff] }
 0x4a7   :  { %v3137_v23 = vld [vmem:[%s11786_s2 + $0x10e8] sm:$0xff]  ;;  %3940 = vmatpush.msrb.mxu0 %v3221_v28  ;;  %v2846_v40 = vld [vmem:[%s11786_s2 + $0x7d0] sm:$0xff]  ;;  %3901 = vmatmul.f32.gmra.mxu2 %v8541_v38 }
 0x4a8   :  { %v3217_v36 = vld [vmem:[%s11786_s2 + $0x1368] sm:$0xff]  ;;  %3916 = vmatpush.msrb.mxu3 %v3137_v23  ;;  %v2838_v38 = vld [vmem:[%s11786_s2 + $0x790] sm:$0xff] }
 0x4a9   :  { %v3297_v26 = vld [vmem:[%s11786_s2 + $0x15e8] sm:$0xff]  ;;  %3941 = vmatpush.msrb.mxu0 %v3217_v36  ;;  %v9219_v36 = vpop.f32.mrf.mxu0 }
 0x4aa   :  { %v3133_v2 = vld [vmem:[%s11786_s2 + $0x10c8] sm:$0xff]  ;;  %3966 = vmatpush.msrb.mxu1 %v3297_v26  ;;  %11899 = vst [vmem:[#allocation16_spill] sm:$0xff] %v9219_v36  ;;  %v3286_v36 = vld [vmem:[%s11786_s2 + $0x1590] sm:$0xff] }
 0x4ab   :  { %v3301_v59 = vld [vmem:[%s11786_s2 + $0x1608] sm:$0xff]  ;;  %3917 = vmatpush.msrb.mxu3 %v3133_v2 }
 0x4ac   :  { %v3213_v30 = vld [vmem:[%s11786_s2 + $0x1348] sm:$0xff]  ;;  %4010 = vmatpush.msrb.mxu2 %v3301_v59  ;;  %v9227_v59 = vpop.f32.mrf.mxu2  ;;  %3817 = vmatmul.f32.gmra.mxu3 %v8446_v18 }
 0x4ad   :  { %v3293_v4 = vld [vmem:[%s11786_s2 + $0x15c8] sm:$0xff]  ;;  %3942 = vmatpush.msrb.mxu0 %v3213_v30  ;;  %11900 = vst [vmem:[#allocation22_spill] sm:$0xff] %v9227_v59 }
 0x4ae   :  { %v3129_v63 = vld [vmem:[%s11786_s2 + $0x10a8] sm:$0xff]  ;;  %3967 = vmatpush.msrb.mxu1 %v3293_v4  ;;  %4111 = vmatpush.msra.mxu2 %v2850_v21  ;;  %v2842_v4 = vld [vmem:[%s11786_s2 + $0x7b0] sm:$0xff] }
 0x4af   :  { %v3209_v0 = vld [vmem:[%s11786_s2 + $0x1328] sm:$0xff]  ;;  %3918 = vmatpush.msrb.mxu3 %v3129_v63  ;;  %v9237_v63 = vpop.f32.mrf.mxu3  ;;  %3869 = vmatmul.f32.gmra.mxu1 %v8518_v41 }
 0x4b0   :  { %v3289_v25 = vld [vmem:[%s11786_s2 + $0x15a8] sm:$0xff]  ;;  %3943 = vmatpush.msrb.mxu0 %v3209_v0  ;;  %4112 = vmatpush.msra.mxu2 %v2846_v40  ;;  %v9265_v40 = vpop.f32.mrf.mxu1 }
 0x4b1   :  { %v3125_v52 = vld [vmem:[%s11786_s2 + $0x1088] sm:$0xff]  ;;  %3968 = vmatpush.msrb.mxu1 %v3289_v25  ;;  %11901 = vst [vmem:[#allocation32_spill] sm:$0xff] %v9265_v40  ;;  %3904 = vmatmul.f32.gmra.mxu2 %v8599_v3  ;;  %v2654_v3 = vld [vmem:[%s11786_s2 + $0x1d0] sm:$0xff]  ;;  %v2847_v40 = vld [vmem:[%s11786_s2 + $0x7d8] sm:$0xff] }
 0x4b2   :  { %v3205_v28 = vld [vmem:[%s11786_s2 + $0x1308] sm:$0xff]  ;;  %3919 = vmatpush.msrb.mxu3 %v3125_v52  ;;  %4113 = vmatpush.msra.mxu2 %v2842_v4  ;;  %v2834_v52 = vld [vmem:[%s11786_s2 + $0x770] sm:$0xff] }
 0x4b3   :  { %v3285_v23 = vld [vmem:[%s11786_s2 + $0x1588] sm:$0xff]  ;;  %3944 = vmatpush.msrb.mxu0 %v3205_v28 }
 0x4b4   :  { %3969 = vmatpush.msrb.mxu1 %v3285_v23  ;;  %v3121_v26 = vld [vmem:[%s11786_s2 + $0x1068] sm:$0xff]  ;;  %4114 = vmatpush.msra.mxu2 %v2838_v38 }
 0x4b5   :  { %v3201_v2 = vld [vmem:[%s11786_s2 + $0x12e8] sm:$0xff]  ;;  %3920 = vmatpush.msrb.mxu3 %v3121_v26  ;;  %v9273_v26 = vpop.f32.mrf.mxu0 }
 0x4b6   :  { %v3281_v30 = vld [vmem:[%s11786_s2 + $0x1568] sm:$0xff]  ;;  %3945 = vmatpush.msrb.mxu0 %v3201_v2  ;;  %11902 = vst [vmem:[#allocation28_spill] sm:$0xff] %v9273_v26  ;;  %4115 = vmatpush.msra.mxu2 %v2834_v52  ;;  %v2826_v52 = vld [vmem:[%s11786_s2 + $0x730] sm:$0xff]  ;;  %v2635_v26 = vld [vmem:[%s11786_s2 + $0x138] sm:$0xff] }
 0x4b7   :  { %v3117_v18 = vld [vmem:[%s11786_s2 + $0x1048] sm:$0xff]  ;;  %3970 = vmatpush.msrb.mxu1 %v3281_v30  ;;  %v9278_v30 = vpop.f32.mrf.mxu2 }
 0x4b8   :  { %v3197_v48 = vld [vmem:[%s11786_s2 + $0x12c8] sm:$0xff]  ;;  %3921 = vmatpush.msrb.mxu3 %v3117_v18  ;;  %11903 = vst [vmem:[#allocation34_spill] sm:$0xff] %v9278_v30  ;;  %v9283_v18 = vld [vmem:[#allocation5 + $0x148] sm:$0xff]  ;;  %3872 = vmatmul.f32.gmra.mxu1 %v8650_v12 }
 0x4b9   :  { %v3277_v21 = vld [vmem:[%s11786_s2 + $0x1548] sm:$0xff]  ;;  %3946 = vmatpush.msrb.mxu0 %v3197_v48  ;;  %5762 = vmatmul.msk.f32.vlgmr.msrb.gmra.mxu2 %vm220_vm9, %v8639_v15  ;;  %v2814_v15 = vld [vmem:[%s11786_s2 + $0x6d0] sm:$0xff] }
 0x4ba   :  { %v3113_v41 = vld [vmem:[%s11786_s2 + $0x1028] sm:$0xff]  ;;  %3971 = vmatpush.msrb.mxu1 %v3277_v21  ;;  %3846 = vmatmul.f32.gmra.mxu0 %v9283_v18  ;;  %v2658_v21 = vld [vmem:[%s11786_s2 + $0x1f0] sm:$0xff] }
 0x4bb   :  { %v3193_v0 = vld [vmem:[%s11786_s2 + $0x12a8] sm:$0xff]  ;;  %3922 = vmatpush.msrb.mxu3 %v3113_v41  ;;  %v2830_v41 = vld [vmem:[%s11786_s2 + $0x750] sm:$0xff] }
 0x4bc   :  { %v3273_v25 = vld [vmem:[%s11786_s2 + $0x1528] sm:$0xff]  ;;  %3947 = vmatpush.msrb.mxu0 %v3193_v0  ;;  %v9300_v0 = vpop.f32.mrf.mxu3  ;;  %4116 = vmatpush.msra.mxu2 %v2830_v41  ;;  %v3110_v30 = vld [vmem:[%s11786_s2 + $0x1010] sm:$0xff] }
 0x4bd   :  { %v3109_v28 = vld [vmem:[%s11786_s2 + $0x1008] sm:$0xff]  ;;  %3972 = vmatpush.msrb.mxu1 %v3273_v25 }
 0x4be   :  { %v3189_v23 = vld [vmem:[%s11786_s2 + $0x1288] sm:$0xff]  ;;  %3923 = vmatpush.msrb.mxu3 %v3109_v28  ;;  %v2650_v28 = vld [vmem:[%s11786_s2 + $0x1b0] sm:$0xff]  ;;  %4117 = vmatpush.msra.mxu2 %v2826_v52 }
 0x4bf   :  { %v3269_v2 = vld [vmem:[%s11786_s2 + $0x1508] sm:$0xff]  ;;  %3948 = vmatpush.msrb.mxu0 %v3189_v23  ;;  %3924 = vmatmul.f32.vlgmr.msrb.gmra.mxu3 %v8637_v45  ;;  %v9321_v23 = vpop.f32.mrf.mxu0  ;;  %v9337_v41 = vpop.f32.mrf.mxu2  ;;  %v2722_v52 = vld [vmem:[%s11786_s2 + $0x3f0] sm:$0xff] }
 0x4c0   :  { %v3185_v4 = vld [vmem:[%s11786_s2 + $0x1268] sm:$0xff]  ;;  %3973 = vmatpush.msrb.mxu1 %v3269_v2  ;;  %4024 = vmatpush.msra.mxu3 %v2658_v21 }
 0x4c1   :  { %v3265_v48 = vld [vmem:[%s11786_s2 + $0x14e8] sm:$0xff]  ;;  %3949 = vmatpush.msrb.mxu0 %v3185_v4  ;;  %v2822_v4 = vld [vmem:[%s11786_s2 + $0x710] sm:$0xff]  ;;  %3875 = vmatmul.f32.gmra.mxu1 %v8720_v16 }
 0x4c2   :  { %v3181_v38 = vld [vmem:[%s11786_s2 + $0x1248] sm:$0xff]  ;;  %3974 = vmatpush.msrb.mxu1 %v3265_v48  ;;  %4025 = vmatpush.msra.mxu3 %v2654_v3  ;;  %v9329_v48 = vpop.f32.mrf.mxu1  ;;  %v2642_v3 = vld [vmem:[%s11786_s2 + $0x170] sm:$0xff] }
 0x4c3   :  { %v3261_v25 = vld [vmem:[%s11786_s2 + $0x14c8] sm:$0xff]  ;;  %3950 = vmatpush.msrb.mxu0 %v3181_v38  ;;  %11904 = vst [vmem:[#allocation18_spill] sm:$0xff] %v9329_v48  ;;  %v2646_v38 = vld [vmem:[%s11786_s2 + $0x190] sm:$0xff]  ;;  %4118 = vmatpush.msra.mxu2 %v2822_v4 }
 0x4c4   :  { %v3177_v45 = vld [vmem:[%s11786_s2 + $0x1228] sm:$0xff]  ;;  %3975 = vmatpush.msrb.mxu1 %v3261_v25  ;;  %4026 = vmatpush.msra.mxu3 %v2650_v28  ;;  %v2634_v4 = vld [vmem:[%s11786_s2 + $0x130] sm:$0xff] }
 0x4c5   :  { %v3257_v12 = vld [vmem:[%s11786_s2 + $0x14a8] sm:$0xff]  ;;  %3951 = vmatpush.msrb.mxu0 %v3177_v45  ;;  %v9345_v45 = vpop.f32.mrf.mxu3  ;;  %5763 = vmatmul.msk.f32.gmra.mxu2 %vm220_vm9, %v8695_v22  ;;  %v2618_v22 = vld [vmem:[%s11786_s2 + $0xb0] sm:$0xff] }
 0x4c6   :  { %v3173_v2 = vld [vmem:[%s11786_s2 + $0x1208] sm:$0xff]  ;;  %3976 = vmatpush.msrb.mxu1 %v3257_v12  ;;  %4027 = vmatpush.msra.mxu3 %v2646_v38  ;;  %11905 = vst [vmem:[#allocation23_spill] sm:$0xff] %v9345_v45  ;;  %v2818_v12 = vld [vmem:[%s11786_s2 + $0x6f0] sm:$0xff] }
 0x4c7   :  { %v3253_v21 = vld [vmem:[%s11786_s2 + $0x1488] sm:$0xff]  ;;  %3952 = vmatpush.msrb.mxu0 %v3173_v2  ;;  %v2718_v2 = vld [vmem:[%s11786_s2 + $0x3d0] sm:$0xff]  ;;  %4119 = vmatpush.msra.mxu2 %v2818_v12  ;;  %v9381_v38 = vpop.f32.mrf.mxu0 }
 0x4c8   :  { %3977 = vmatpush.msrb.mxu1 %v3253_v21  ;;  %v3249_v25 = vld [vmem:[%s11786_s2 + $0x1468] sm:$0xff]  ;;  %3953 = vmatmul.f32.vlgmr.msrb.gmra.mxu0 %v8703_v32  ;;  %v2638_v32 = vld [vmem:[%s11786_s2 + $0x150] sm:$0xff]  ;;  %11906 = vst [vmem:[#allocation29_spill] sm:$0xff] %v9381_v38 }
 0x4c9   :  { %v9347_v59 = vld [vmem:[#allocation5 + $0xa0] sm:$0xff]  ;;  %4028 = vmatpush.msra.mxu3 %v2642_v3  ;;  %4053 = vmatpush.msra.mxu0 %v2722_v52  ;;  %v2714_v21 = vld [vmem:[%s11786_s2 + $0x3b0] sm:$0xff] }
 0x4ca   :  { %3927 = vmatmul.f32.gmra.mxu3 %v9347_v59  ;;  %v3245_v28 = vld [vmem:[%s11786_s2 + $0x1448] sm:$0xff]  ;;  %3978 = vmatpush.msrb.mxu1 %v3249_v25  ;;  %v9383_v25 = vpop.f32.mrf.mxu2  ;;  %v2810_v3 = vld [vmem:[%s11786_s2 + $0x6b0] sm:$0xff] }
 0x4cb   :  { %v3241_v16 = vld [vmem:[%s11786_s2 + $0x1428] sm:$0xff]  ;;  %4029 = vmatpush.msra.mxu3 %v2638_v32  ;;  %11907 = vst [vmem:[#allocation35_spill] sm:$0xff] %v9383_v25  ;;  %4054 = vmatpush.msra.mxu0 %v2718_v2  ;;  %v2630_v12 = vld [vmem:[%s11786_s2 + $0x110] sm:$0xff] }
 0x4cc   :  { %3979 = vmatpush.msrb.mxu1 %v3245_v28  ;;  %v3237_v52 = vld [vmem:[%s11786_s2 + $0x1408] sm:$0xff]  ;;  %4120 = vmatpush.msra.mxu2 %v2814_v15  ;;  %v9394_v28 = vpop.f32.mrf.mxu1  ;;  %v2710_v32 = vld [vmem:[%s11786_s2 + $0x390] sm:$0xff] }
 0x4cd   :  { %4030 = vmatpush.msra.mxu3 %v2634_v4  ;;  %4055 = vmatpush.msra.mxu0 %v2714_v21  ;;  %v2626_v2 = vld [vmem:[%s11786_s2 + $0xf0] sm:$0xff]  ;;  %v9409_v4 = vpop.f32.mrf.mxu3  ;;  %v9949_v14 = vld [vmem:[#allocation5 + $0x140] sm:$0xff] }
 0x4ce   :  { %3980 = vmatpush.msrb.mxu1 %v3241_v16  ;;  %4121 = vmatpush.msra.mxu2 %v2810_v3  ;;  %v2706_v15 = vld [vmem:[%s11786_s2 + $0x370] sm:$0xff]  ;;  %11908 = vst [vmem:[#allocation21_spill] sm:$0xff] %v9409_v4 }
 0x4cf   :  { %4031 = vmatpush.msra.mxu3 %v2630_v12  ;;  %4056 = vmatpush.msra.mxu0 %v2710_v32  ;;  %v2786_v16 = vld [vmem:[%s11786_s2 + $0x5f0] sm:$0xff] }
 0x4d0   :  { %3981 = vmatpush.msrb.mxu1 %v3237_v52  ;;  %3956 = vmatmul.f32.gmra.mxu0 %v8757_v57  ;;  %v2622_v21 = vld [vmem:[%s11786_s2 + $0xd0] sm:$0xff]  ;;  %v9430_v52 = vpop.f32.mrf.mxu0 }
 0x4d1   :  { %3982 = vmatmul.f32.vlgmr.msrb.gmra.mxu1 %v8777_v9  ;;  %4032 = vmatpush.msra.mxu3 %v2626_v2  ;;  %v2702_v3 = vld [vmem:[%s11786_s2 + $0x350] sm:$0xff]  ;;  %11909 = vst [vmem:[#allocation12_spill] sm:$0xff] %v9430_v52 }
 0x4d2   :  { %3930 = vmatmul.f32.gmra.mxu3 %v8693_v29  ;;  %v2806_v29 = vld [vmem:[%s11786_s2 + $0x690] sm:$0xff]  ;;  %4057 = vmatpush.msra.mxu0 %v2706_v15  ;;  %v9435_v12 = vpop.f32.mrf.mxu2 }
 0x4d3   :  { %v2782_v57 = vld [vmem:[%s11786_s2 + $0x5d0] sm:$0xff]  ;;  %4082 = vmatpush.msra.mxu1 %v2786_v16  ;;  %11910 = vst [vmem:[#allocation10_spill] sm:$0xff] %v9435_v12  ;;  %4033 = vmatpush.msra.mxu3 %v2622_v21 }
 0x4d4   :  { %v2802_v9 = vld [vmem:[%s11786_s2 + $0x670] sm:$0xff]  ;;  %4122 = vmatpush.msra.mxu2 %v2806_v29  ;;  %4058 = vmatpush.msra.mxu0 %v2702_v3  ;;  %v9443_v15 = vpop.f32.mrf.mxu1 }
 0x4d5   :  { %v2698_v32 = vld [vmem:[%s11786_s2 + $0x330] sm:$0xff]  ;;  %4083 = vmatpush.msra.mxu1 %v2782_v57  ;;  %11911 = vst [vmem:[#allocation33_spill] sm:$0xff] %v9443_v15  ;;  %4034 = vmatpush.msra.mxu3 %v2618_v22  ;;  %v9463_v22 = vpop.f32.mrf.mxu3 }
 0x4d6   :  { %v2778_v2 = vld [vmem:[%s11786_s2 + $0x5b0] sm:$0xff]  ;;  %4123 = vmatpush.msra.mxu2 %v2802_v9  ;;  %4059 = vmatpush.msra.mxu0 %v2698_v32  ;;  %11912 = vst [vmem:[#allocation13_spill] sm:$0xff] %v9463_v22 }
 0x4d7   :  { %v2614_v16 = vld [vmem:[%s11786_s2 + $0x90] sm:$0xff]  ;;  %4084 = vmatpush.msra.mxu1 %v2778_v2  ;;  %5764 = vmatmul.msk.f32.gmra.mxu2 %vm220_vm9, %v8751_v31 }
 0x4d8   :  { %v2798_v21 = vld [vmem:[%s11786_s2 + $0x650] sm:$0xff]  ;;  %4035 = vmatpush.msra.mxu3 %v2614_v16  ;;  %3959 = vmatmul.f32.gmra.mxu0 %v8804_v44  ;;  %v9482_v44 = vpop.f32.mrf.mxu0 }
 0x4d9   :  { %v2694_v12 = vld [vmem:[%s11786_s2 + $0x310] sm:$0xff]  ;;  %4124 = vmatpush.msra.mxu2 %v2798_v21  ;;  %3985 = vmatmul.f32.gmra.mxu1 %v8824_v10  ;;  %11913 = vst [vmem:[#allocation11_spill] sm:$0xff] %v9482_v44 }
 0x4da   :  { %v2774_v29 = vld [vmem:[%s11786_s2 + $0x590] sm:$0xff]  ;;  %4060 = vmatpush.msra.mxu0 %v2694_v12  ;;  %3933 = vmatmul.f32.gmra.mxu3 %v8711_v33  ;;  %v9484_v2 = vpop.f32.mrf.mxu2 }
 0x4db   :  { %4085 = vmatpush.msra.mxu1 %v2774_v29  ;;  %v2610_v3 = vld [vmem:[%s11786_s2 + $0x70] sm:$0xff]  ;;  %11914 = vst [vmem:[#allocation17_spill] sm:$0xff] %v9484_v2 }
 0x4dc   :  { %v2690_v57 = vld [vmem:[%s11786_s2 + $0x2f0] sm:$0xff]  ;;  %4036 = vmatpush.msra.mxu3 %v2610_v3  ;;  %v9501_v3 = vpop.f32.mrf.mxu1 }
 0x4dd   :  { %v2770_v9 = vld [vmem:[%s11786_s2 + $0x570] sm:$0xff]  ;;  %4061 = vmatpush.msra.mxu0 %v2690_v57  ;;  %11915 = vst [vmem:[#allocation25_spill] sm:$0xff] %v9501_v3 }
 0x4de   :  { %v2794_v12 = vld [vmem:[%s11786_s2 + $0x630] sm:$0xff]  ;;  %4086 = vmatpush.msra.mxu1 %v2770_v9 }
 0x4df   :  { %v2606_v32 = vld [vmem:[%s11786_s2 + $0x50] sm:$0xff]  ;;  %4125 = vmatpush.msra.mxu2 %v2794_v12 }
 0x4e0   :  { %v2686_v33 = vld [vmem:[%s11786_s2 + $0x2d0] sm:$0xff]  ;;  %4037 = vmatpush.msra.mxu3 %v2606_v32  ;;  %3962 = vmatmul.f32.gmra.mxu0 %v8851_v50 }
 0x4e1   :  { %v2766_v31 = vld [vmem:[%s11786_s2 + $0x550] sm:$0xff]  ;;  %4062 = vmatpush.msra.mxu0 %v2686_v33  ;;  %v9515_v33 = vpop.f32.mrf.mxu3  ;;  %5765 = vmatmul.msk.f32.gmra.mxu2 %vm220_vm9, %v8798_v17 }
 0x4e2   :  { %v2790_v10 = vld [vmem:[%s11786_s2 + $0x610] sm:$0xff]  ;;  %4087 = vmatpush.msra.mxu1 %v2766_v31 }
 0x4e3   :  { %v2602_v16 = vld [vmem:[%s11786_s2 + $0x30] sm:$0xff]  ;;  %4126 = vmatpush.msra.mxu2 %v2790_v10  ;;  %3988 = vmatmul.f32.gmra.mxu1 %v8869_v5 }
 0x4e4   :  { %v2682_v21 = vld [vmem:[%s11786_s2 + $0x2b0] sm:$0xff]  ;;  %4038 = vmatpush.msra.mxu3 %v2602_v16  ;;  %v9553_v5 = vpop.f32.mrf.mxu1 }
 0x4e5   :  { %v2762_v29 = vld [vmem:[%s11786_s2 + $0x530] sm:$0xff]  ;;  %4063 = vmatpush.msra.mxu0 %v2682_v21  ;;  %v9527_v21 = vpop.f32.mrf.mxu0  ;;  %11916 = vst [vmem:[#allocation30_spill] sm:$0xff] %v9553_v5 }
 0x4e6   :  { %v3106_v57 = vld [vmem:[%s11786_s2 + $0xff0] sm:$0xff]  ;;  %4088 = vmatpush.msra.mxu1 %v2762_v29  ;;  %v9529_v29 = vpop.f32.mrf.mxu2 }
 0x4e7   :  { %v2598_v9 = vld [vmem:[%s11786_s2 + $0x10] sm:$0xff]  ;;  %4227 = vmatpush.msrb.mxu2 %v3106_v57 }
 0x4e8   :  { %v2678_v12 = vld [vmem:[%s11786_s2 + $0x290] sm:$0xff]  ;;  %4039 = vmatpush.msra.mxu3 %v2598_v9 }
 0x4e9   :  { %v2758_v32 = vld [vmem:[%s11786_s2 + $0x510] sm:$0xff]  ;;  %4064 = vmatpush.msra.mxu0 %v2678_v12  ;;  %4040 = vmatmul.f32.vlgmr.msra.gmra.mxu3 %v8854_v60 }
 0x4ea   :  { %v2674_v31 = vld [vmem:[%s11786_s2 + $0x270] sm:$0xff]  ;;  %4089 = vmatpush.msra.mxu1 %v2758_v32 }
 0x4eb   :  { %v2754_v10 = vld [vmem:[%s11786_s2 + $0x4f0] sm:$0xff]  ;;  %4065 = vmatpush.msra.mxu0 %v2674_v31  ;;  %3991 = vmatmul.f32.gmra.mxu1 %v8915_v55 }
 0x4ec   :  { %v2914_v16 = vld [vmem:[%s11786_s2 + $0x9f0] sm:$0xff]  ;;  %4090 = vmatpush.msra.mxu1 %v2754_v10 }
 0x4ed   :  { %v2670_v50 = vld [vmem:[%s11786_s2 + $0x250] sm:$0xff]  ;;  %4140 = vmatpush.msrb.mxu3 %v2914_v16 }
 0x4ee   :  { %v3102_v57 = vld [vmem:[%s11786_s2 + $0xfd0] sm:$0xff]  ;;  %4066 = vmatpush.msra.mxu0 %v2670_v50 }
 0x4ef   :  { %v2750_v9 = vld [vmem:[%s11786_s2 + $0x4d0] sm:$0xff]  ;;  %4228 = vmatpush.msrb.mxu2 %v3102_v57  ;;  %v9573_v57 = vpop.f32.mrf.mxu3 }
 0x4f0   :  { %v2910_v17 = vld [vmem:[%s11786_s2 + $0x9d0] sm:$0xff]  ;;  %4091 = vmatpush.msra.mxu1 %v2750_v9  ;;  %11917 = vst [vmem:[#allocation37_spill] sm:$0xff] %v9573_v57  ;;  %v9575_v9 = vpop.f32.mrf.mxu0 }
 0x4f1   :  { %v2666_v60 = vld [vmem:[%s11786_s2 + $0x230] sm:$0xff]  ;;  %4141 = vmatpush.msrb.mxu3 %v2910_v17  ;;  %11918 = vst [vmem:[#allocation26_spill] sm:$0xff] %v9575_v9  ;;  %v9577_v17 = vpop.f32.mrf.mxu2 }
 0x4f2   :  { %v3098_v12 = vld [vmem:[%s11786_s2 + $0xfb0] sm:$0xff]  ;;  %4067 = vmatpush.msra.mxu0 %v2666_v60  ;;  %11919 = vst [vmem:[#allocation24_spill] sm:$0xff] %v9577_v17  ;;  %4043 = vmatmul.f32.gmra.mxu3 %v8897_v39 }
 0x4f3   :  { %v2746_v32 = vld [vmem:[%s11786_s2 + $0x4b0] sm:$0xff]  ;;  %4229 = vmatpush.msrb.mxu2 %v3098_v12 }
 0x4f4   :  { %v2906_v31 = vld [vmem:[%s11786_s2 + $0x9b0] sm:$0xff]  ;;  %4092 = vmatpush.msra.mxu1 %v2746_v32 }
 0x4f5   :  { %v2662_v10 = vld [vmem:[%s11786_s2 + $0x210] sm:$0xff]  ;;  %4142 = vmatpush.msrb.mxu3 %v2906_v31  ;;  %v9593_v31 = vld [vmem:[#allocation5 + $0x18] sm:$0xff] }
 0x4f6   :  { %v3094_v16 = vld [vmem:[%s11786_s2 + $0xf90] sm:$0xff]  ;;  %4068 = vmatpush.msra.mxu0 %v2662_v10  ;;  %4127 = vmatmul.f32.vlgmr.msra.gmra.mxu2 %v9593_v31  ;;  %v9603_v10 = vpop.f32.mrf.mxu1 }
 0x4f7   :  { %v2742_v50 = vld [vmem:[%s11786_s2 + $0x490] sm:$0xff]  ;;  %4230 = vmatpush.msrb.mxu2 %v3094_v16  ;;  %4069 = vmatmul.f32.vlgmr.msra.gmra.mxu0 %v8900_v6 }
 0x4f8   :  { %v2902_v3 = vld [vmem:[%s11786_s2 + $0x990] sm:$0xff]  ;;  %4093 = vmatpush.msra.mxu1 %v2742_v50 }
 0x4f9   :  { %4143 = vmatpush.msrb.mxu3 %v2902_v3  ;;  %v2738_v60 = vld [vmem:[%s11786_s2 + $0x470] sm:$0xff]  ;;  %v9636_v57 = vpop.f32.mrf.mxu2 }
 0x4fa   :  { %v2898_v12 = vld [vmem:[%s11786_s2 + $0x970] sm:$0xff]  ;;  %4094 = vmatpush.msra.mxu1 %v2738_v60  ;;  %11922 = vst [vmem:[#allocation38_spill] sm:$0xff] %v9636_v57  ;;  %4046 = vmatmul.f32.gmra.mxu3 %v8945_v43 }
 0x4fb   :  { %v2978_v32 = vld [vmem:[%s11786_s2 + $0xbf0] sm:$0xff]  ;;  %4144 = vmatpush.msrb.mxu3 %v2898_v12 }
 0x4fc   :  { %v3090_v3 = vld [vmem:[%s11786_s2 + $0xf70] sm:$0xff]  ;;  %4169 = vmatpush.msrb.mxu0 %v2978_v32  ;;  %v9623_v32 = vpop.f32.mrf.mxu3 }
 0x4fd   :  { %v2734_v39 = vld [vmem:[%s11786_s2 + $0x450] sm:$0xff]  ;;  %4231 = vmatpush.msrb.mxu2 %v3090_v3  ;;  %11920 = vst [vmem:[#allocation36_spill] sm:$0xff] %v9623_v32 }
 0x4fe   :  { %v2894_v6 = vld [vmem:[%s11786_s2 + $0x950] sm:$0xff]  ;;  %4095 = vmatpush.msra.mxu1 %v2734_v39  ;;  %4130 = vmatmul.f32.gmra.mxu2 %v8930_v47 }
 0x4ff   :  { %v2974_v16 = vld [vmem:[%s11786_s2 + $0xbd0] sm:$0xff]  ;;  %4145 = vmatpush.msrb.mxu3 %v2894_v6  ;;  %v9634_v6 = vpop.f32.mrf.mxu0  ;;  %4072 = vmatmul.f32.gmra.mxu0 %v8948_v34 }
 0x500   :  { %v3086_v55 = vld [vmem:[%s11786_s2 + $0xf50] sm:$0xff]  ;;  %4170 = vmatpush.msrb.mxu0 %v2974_v16  ;;  %11921 = vst [vmem:[#allocation14_spill] sm:$0xff] %v9634_v6 }
 0x501   :  { %v2730_v50 = vld [vmem:[%s11786_s2 + $0x430] sm:$0xff]  ;;  %4232 = vmatpush.msrb.mxu2 %v3086_v55 }
 0x502   :  { %v2890_v17 = vld [vmem:[%s11786_s2 + $0x930] sm:$0xff]  ;;  %4096 = vmatpush.msra.mxu1 %v2730_v50  ;;  %v9648_v50 = vpop.f32.mrf.mxu1  ;;  %4049 = vmatmul.f32.gmra.mxu3 %v8991_v7 }
 0x503   :  { %v2970_v60 = vld [vmem:[%s11786_s2 + $0xbb0] sm:$0xff]  ;;  %4146 = vmatpush.msrb.mxu3 %v2890_v17  ;;  %11923 = vst [vmem:[#allocation39_spill] sm:$0xff] %v9648_v50 }
 0x504   :  { %v3082_v12 = vld [vmem:[%s11786_s2 + $0xf30] sm:$0xff]  ;;  %4171 = vmatpush.msrb.mxu0 %v2970_v60 }
 0x505   :  { %v2726_v9 = vld [vmem:[%s11786_s2 + $0x410] sm:$0xff]  ;;  %4233 = vmatpush.msrb.mxu2 %v3082_v12 }
 0x506   :  { %v2886_v3 = vld [vmem:[%s11786_s2 + $0x910] sm:$0xff]  ;;  %4097 = vmatpush.msra.mxu1 %v2726_v9 }
 0x507   :  { %v2966_v39 = vld [vmem:[%s11786_s2 + $0xb90] sm:$0xff]  ;;  %4147 = vmatpush.msrb.mxu3 %v2886_v3  ;;  %4098 = vmatmul.f32.vlgmr.msra.gmra.mxu1 %v8966_v35  ;;  %v9671_v35 = vpop.f32.mrf.mxu3 }
 0x508   :  { %v2882_v16 = vld [vmem:[%s11786_s2 + $0x8f0] sm:$0xff]  ;;  %4172 = vmatpush.msrb.mxu0 %v2966_v39 }
 0x509   :  { %v2962_v17 = vld [vmem:[%s11786_s2 + $0xb70] sm:$0xff]  ;;  %4148 = vmatpush.msrb.mxu3 %v2882_v16  ;;  %4075 = vmatmul.f32.gmra.mxu0 %v8994_v56 }
 0x50a   :  { %v3042_v55 = vld [vmem:[%s11786_s2 + $0xdf0] sm:$0xff]  ;;  %4173 = vmatpush.msrb.mxu0 %v2962_v17 }
 0x50b   :  { %v2878_v9 = vld [vmem:[%s11786_s2 + $0x8d0] sm:$0xff]  ;;  %4198 = vmatpush.msrb.mxu1 %v3042_v55  ;;  %v9685_v55 = vpop.f32.mrf.mxu0 }
 0x50c   :  { %v3078_v43 = vld [vmem:[%s11786_s2 + $0xf10] sm:$0xff]  ;;  %4149 = vmatpush.msrb.mxu3 %v2878_v9 }
 0x50d   :  { %v2958_v60 = vld [vmem:[%s11786_s2 + $0xb50] sm:$0xff]  ;;  %4234 = vmatpush.msrb.mxu2 %v3078_v43 }
 0x50e   :  { %v3038_v34 = vld [vmem:[%s11786_s2 + $0xdd0] sm:$0xff]  ;;  %4174 = vmatpush.msrb.mxu0 %v2958_v60  ;;  %v9693_v60 = vpop.f32.mrf.mxu2 }
 0x50f   :  { %v2874_v47 = vld [vmem:[%s11786_s2 + $0x8b0] sm:$0xff]  ;;  %4199 = vmatpush.msrb.mxu1 %v3038_v34  ;;  %v9695_v34 = vpop.f32.mrf.mxu1 }
 0x510   :  { %v3074_v12 = vld [vmem:[%s11786_s2 + $0xef0] sm:$0xff]  ;;  %4150 = vmatpush.msrb.mxu3 %v2874_v47  ;;  %11924 = vst [vmem:[#allocation40_spill] sm:$0xff] %v9695_v34  ;;  %4101 = vmatmul.f32.gmra.mxu1 %v9014_v54 }
 0x511   :  { %v2954_v3 = vld [vmem:[%s11786_s2 + $0xb30] sm:$0xff]  ;;  %4235 = vmatpush.msrb.mxu2 %v3074_v12  ;;  %4078 = vmatmul.f32.gmra.mxu0 %v9041_v37 }
 0x512   :  { %v3034_v39 = vld [vmem:[%s11786_s2 + $0xdb0] sm:$0xff]  ;;  %4175 = vmatpush.msrb.mxu0 %v2954_v3 }
 0x513   :  { %v2870_v16 = vld [vmem:[%s11786_s2 + $0x890] sm:$0xff]  ;;  %4200 = vmatpush.msrb.mxu1 %v3034_v39  ;;  %v9711_v39 = vld [vmem:[#allocation5 + $0xd8] sm:$0xff] }
 0x514   :  { %v3070_v17 = vld [vmem:[%s11786_s2 + $0xed0] sm:$0xff]  ;;  %4151 = vmatpush.msrb.mxu3 %v2870_v16  ;;  %4133 = vmatmul.f32.gmra.mxu2 %v9711_v39  ;;  %v9721_v16 = vpop.f32.mrf.mxu3 }
 0x515   :  { %v2950_v9 = vld [vmem:[%s11786_s2 + $0xb10] sm:$0xff]  ;;  %4236 = vmatpush.msrb.mxu2 %v3070_v17 }
 0x516   :  { %v3030_v43 = vld [vmem:[%s11786_s2 + $0xd90] sm:$0xff]  ;;  %4176 = vmatpush.msrb.mxu0 %v2950_v9 }
 0x517   :  { %4201 = vmatpush.msrb.mxu1 %v3030_v43  ;;  %v2866_v47 = vld [vmem:[%s11786_s2 + $0x870] sm:$0xff] }
 0x518   :  { %v2946_v57 = vld [vmem:[%s11786_s2 + $0xaf0] sm:$0xff]  ;;  %4152 = vmatpush.msrb.mxu3 %v2866_v47  ;;  %v9735_v47 = vpop.f32.mrf.mxu0 }
 0x519   :  { %v3026_v12 = vld [vmem:[%s11786_s2 + $0xd70] sm:$0xff]  ;;  %4177 = vmatpush.msrb.mxu0 %v2946_v57 }
 0x51a   :  { %v3066_v3 = vld [vmem:[%s11786_s2 + $0xeb0] sm:$0xff]  ;;  %4202 = vmatpush.msrb.mxu1 %v3026_v12 }
 0x51b   :  { %v2862_v7 = vld [vmem:[%s11786_s2 + $0x850] sm:$0xff]  ;;  %4237 = vmatpush.msrb.mxu2 %v3066_v3 }
 0x51c   :  { %v2942_v56 = vld [vmem:[%s11786_s2 + $0xad0] sm:$0xff]  ;;  %4153 = vmatpush.msrb.mxu3 %v2862_v7 }
 0x51d   :  { %v3022_v17 = vld [vmem:[%s11786_s2 + $0xd50] sm:$0xff]  ;;  %4178 = vmatpush.msrb.mxu0 %v2942_v56  ;;  %v9752_v56 = vpop.f32.mrf.mxu1 }
 0x51e   :  { %v3062_v54 = vld [vmem:[%s11786_s2 + $0xe90] sm:$0xff]  ;;  %4203 = vmatpush.msrb.mxu1 %v3022_v17  ;;  %v9754_v17 = vpop.f32.mrf.mxu2 }
 0x51f   :  { %v2858_v9 = vld [vmem:[%s11786_s2 + $0x830] sm:$0xff]  ;;  %4238 = vmatpush.msrb.mxu2 %v3062_v54 }
 0x520   :  { %v2938_v43 = vld [vmem:[%s11786_s2 + $0xab0] sm:$0xff]  ;;  %4154 = vmatpush.msrb.mxu3 %v2858_v9 }
 0x521   :  { %v3018_v57 = vld [vmem:[%s11786_s2 + $0xd30] sm:$0xff]  ;;  %4179 = vmatpush.msrb.mxu0 %v2938_v43  ;;  %v9766_v43 = vpop.f32.mrf.mxu3 }
 0x522   :  { %v3058_v12 = vld [vmem:[%s11786_s2 + $0xe70] sm:$0xff]  ;;  %4204 = vmatpush.msrb.mxu1 %v3018_v57  ;;  %11925 = vst [vmem:[#allocation41_spill] sm:$0xff] %v9766_v43  ;;  %v9768_v57 = vld [vmem:[#allocation5 + $0x138] sm:$0xff]  ;;  %v2699_v43 = vld [vmem:[%s11786_s2 + $0x338] sm:$0xff] }
 0x523   :  { %v2854_v34 = vld [vmem:[%s11786_s2 + $0x810] sm:$0xff]  ;;  %4239 = vmatpush.msrb.mxu2 %v3058_v12  ;;  %v9778_v12 = vld [vmem:[#allocation5 + $0xd0] sm:$0xff] }
 0x524   :  { %v2934_v3 = vld [vmem:[%s11786_s2 + $0xa90] sm:$0xff]  ;;  %4155 = vmatpush.msrb.mxu3 %v2854_v34  ;;  %4136 = vmatmul.f32.gmra.mxu2 %v9768_v57 }
 0x525   :  { %v3014_v7 = vld [vmem:[%s11786_s2 + $0xd10] sm:$0xff]  ;;  %4180 = vmatpush.msrb.mxu0 %v2934_v3  ;;  %4156 = vmatmul.f32.vlgmr.msrb.gmra.mxu3 %v9053_v27 }
 0x526   :  { %v2930_v6 = vld [vmem:[%s11786_s2 + $0xa70] sm:$0xff]  ;;  %4205 = vmatpush.msrb.mxu1 %v3014_v7  ;;  %v9787_v7 = vpop.f32.mrf.mxu0  ;;  %v9817_v52 = vpop.f32.mrf.mxu2 }
 0x527   :  { %v3010_v54 = vld [vmem:[%s11786_s2 + $0xcf0] sm:$0xff]  ;;  %4104 = vmatmul.f32.gmra.mxu1 %v9778_v12  ;;  %4181 = vmatpush.msrb.mxu0 %v2930_v6  ;;  %11926 = vst [vmem:[#allocation42_spill] sm:$0xff] %v9787_v7 }
 0x528   :  { %v3170_v9 = vld [vmem:[%s11786_s2 + $0x11f0] sm:$0xff]  ;;  %4206 = vmatpush.msrb.mxu1 %v3010_v54  ;;  %11928 = vst [vmem:[#allocation44_spill] sm:$0xff] %v9817_v52 }
 0x529   :  { %v2926_v37 = vld [vmem:[%s11786_s2 + $0xa50] sm:$0xff]  ;;  %4256 = vmatpush.msra.mxu3 %v3170_v9 }
 0x52a   :  { %v3054_v34 = vld [vmem:[%s11786_s2 + $0xe50] sm:$0xff]  ;;  %4182 = vmatpush.msrb.mxu0 %v2926_v37  ;;  %v9807_v37 = vpop.f32.mrf.mxu1 }
 0x52b   :  { %v3006_v3 = vld [vmem:[%s11786_s2 + $0xcd0] sm:$0xff]  ;;  %4240 = vmatpush.msrb.mxu2 %v3054_v34 }
 0x52c   :  { %v3166_v27 = vld [vmem:[%s11786_s2 + $0x11d0] sm:$0xff]  ;;  %4207 = vmatpush.msrb.mxu1 %v3006_v3 }
 0x52d   :  { %v2922_v32 = vld [vmem:[%s11786_s2 + $0xa30] sm:$0xff]  ;;  %4257 = vmatpush.msra.mxu3 %v3166_v27  ;;  %v9815_v27 = vpop.f32.mrf.mxu3 }
 0x52e   :  { %v3050_v6 = vld [vmem:[%s11786_s2 + $0xe30] sm:$0xff]  ;;  %4183 = vmatpush.msrb.mxu0 %v2922_v32  ;;  %11927 = vst [vmem:[#allocation43_spill] sm:$0xff] %v9815_v27  ;;  %4159 = vmatmul.f32.gmra.mxu3 %v9107_v1 }
 0x52f   :  { %v3002_v50 = vld [vmem:[%s11786_s2 + $0xcb0] sm:$0xff]  ;;  %4241 = vmatpush.msrb.mxu2 %v3050_v6 }
 0x530   :  { %v3162_v25 = vld [vmem:[%s11786_s2 + $0x11b0] sm:$0xff]  ;;  %4208 = vmatpush.msrb.mxu1 %v3002_v50 }
 0x531   :  { %v2918_v54 = vld [vmem:[%s11786_s2 + $0xa10] sm:$0xff]  ;;  %4258 = vmatpush.msra.mxu3 %v3162_v25 }
 0x532   :  { %v3046_v9 = vld [vmem:[%s11786_s2 + $0xe10] sm:$0xff]  ;;  %4184 = vmatpush.msrb.mxu0 %v2918_v54  ;;  %v9834_v54 = vld [vmem:[#allocation5 + $0x130] sm:$0xff] }
 0x533   :  { %v2998_v34 = vld [vmem:[%s11786_s2 + $0xc90] sm:$0xff]  ;;  %4242 = vmatpush.msrb.mxu2 %v3046_v9  ;;  %4185 = vmatmul.f32.vlgmr.msrb.gmra.mxu0 %v9110_v11  ;;  %v9843_v9 = vpop.f32.mrf.mxu0 }
 0x534   :  { %v3158_v3 = vld [vmem:[%s11786_s2 + $0x1190] sm:$0xff]  ;;  %4209 = vmatpush.msrb.mxu1 %v2998_v34  ;;  %4243 = vmatmul.f32.vlgmr.msrb.gmra.mxu2 %v9119_v13  ;;  %11929 = vst [vmem:[#allocation45_spill] sm:$0xff] %v9843_v9 }
 0x535   :  { %4259 = vmatpush.msra.mxu3 %v3158_v3  ;;  %v2994_v32 = vld [vmem:[%s11786_s2 + $0xc70] sm:$0xff]  ;;  %4107 = vmatmul.f32.gmra.mxu1 %v9834_v54  ;;  %v9879_v4 = vpop.f32.mrf.mxu3 }
 0x536   :  { %v3154_v6 = vld [vmem:[%s11786_s2 + $0x1170] sm:$0xff]  ;;  %4210 = vmatpush.msrb.mxu1 %v2994_v32  ;;  %v9857_v32 = vpop.f32.mrf.mxu1 }
 0x537   :  { %v3234_v25 = vld [vmem:[%s11786_s2 + $0x13f0] sm:$0xff]  ;;  %4260 = vmatpush.msra.mxu3 %v3154_v6  ;;  %11930 = vst [vmem:[#allocation46_spill] sm:$0xff] %v9857_v32 }
 0x538   :  { %v3314_v50 = vld [vmem:[%s11786_s2 + $0x1670] sm:$0xff]  ;;  %4285 = vmatpush.msra.mxu0 %v3234_v25 }
 0x539   :  { %v2990_v1 = vld [vmem:[%s11786_s2 + $0xc50] sm:$0xff]  ;;  %4355 = vmatpush.msra.mxu2 %v3314_v50 }
 0x53a   :  { %v3150_v11 = vld [vmem:[%s11786_s2 + $0x1150] sm:$0xff]  ;;  %4211 = vmatpush.msrb.mxu1 %v2990_v1 }
 0x53b   :  { %v3230_v13 = vld [vmem:[%s11786_s2 + $0x13d0] sm:$0xff]  ;;  %4261 = vmatpush.msra.mxu3 %v3150_v11  ;;  %v9911_v45 = vpop.f32.mrf.mxu0 }
 0x53c   :  { %v3310_v34 = vld [vmem:[%s11786_s2 + $0x1650] sm:$0xff]  ;;  %4286 = vmatpush.msra.mxu0 %v3230_v13  ;;  %v9877_v13 = vpop.f32.mrf.mxu2 }
 0x53d   :  { %v2986_v3 = vld [vmem:[%s11786_s2 + $0xc30] sm:$0xff]  ;;  %4356 = vmatpush.msra.mxu2 %v3310_v34  ;;  %11931 = vst [vmem:[#allocation47_spill] sm:$0xff] %v9877_v13  ;;  %v9881_v34 = vld [vmem:[#allocation5 + $0xe0] sm:$0xff] }
 0x53e   :  { %v3146_v2 = vld [vmem:[%s11786_s2 + $0x1130] sm:$0xff]  ;;  %4212 = vmatpush.msrb.mxu1 %v2986_v3  ;;  %4162 = vmatmul.f32.gmra.mxu3 %v9881_v34  ;;  %v9916_v44 = vpop.f32.mrf.mxu1 }
 0x53f   :  { %v3226_v6 = vld [vmem:[%s11786_s2 + $0x13b0] sm:$0xff]  ;;  %4262 = vmatpush.msra.mxu3 %v3146_v2  ;;  %11932 = vst [vmem:[#allocation48_spill] sm:$0xff] %v9916_v44 }
 0x540   :  { %v3306_v25 = vld [vmem:[%s11786_s2 + $0x1630] sm:$0xff]  ;;  %4287 = vmatpush.msra.mxu0 %v3226_v6  ;;  %v9893_v6 = vld [vmem:[#allocation5 + $0x98] sm:$0xff] }
 0x541   :  { %v2982_v15 = vld [vmem:[%s11786_s2 + $0xc10] sm:$0xff]  ;;  %4357 = vmatpush.msra.mxu2 %v3306_v25 }
 0x542   :  { %v3142_v50 = vld [vmem:[%s11786_s2 + $0x1110] sm:$0xff]  ;;  %4213 = vmatpush.msrb.mxu1 %v2982_v15  ;;  %4246 = vmatmul.f32.gmra.mxu2 %v9893_v6 }
 0x543   :  { %v3222_v1 = vld [vmem:[%s11786_s2 + $0x1390] sm:$0xff]  ;;  %4263 = vmatpush.msra.mxu3 %v3142_v50  ;;  %v9976_v22 = vpop.f32.mrf.mxu0 }
 0x544   :  { %v3138_v11 = vld [vmem:[%s11786_s2 + $0x10f0] sm:$0xff]  ;;  %4288 = vmatpush.msra.mxu0 %v3222_v1  ;;  %v9902_v1 = vld [vmem:[#allocation5 + $0x30] sm:$0xff] }
 0x545   :  { %v3218_v2 = vld [vmem:[%s11786_s2 + $0x1370] sm:$0xff]  ;;  %4214 = vmatmul.f32.vlgmr.msrb.gmra.mxu1 %v9902_v1  ;;  %4264 = vmatpush.msra.mxu3 %v3138_v11  ;;  %v2851_v11 = vld [vmem:[%s11786_s2 + $0x7f8] sm:$0xff] }
 0x546   :  { %v3298_v15 = vld [vmem:[%s11786_s2 + $0x15f0] sm:$0xff]  ;;  %4289 = vmatpush.msra.mxu0 %v3218_v2  ;;  %4165 = vmatmul.f32.gmra.mxu3 %v9949_v14 }
 0x547   :  { %v9890_v3 = vld [vmem:[#allocation5 + $0x88] sm:$0xff]  ;;  %4314 = vmatpush.msra.mxu1 %v3298_v15 }
 0x548   :  { %4188 = vmatmul.f32.gmra.mxu0 %v9890_v3  ;;  %v3134_v25 = vld [vmem:[%s11786_s2 + $0x10d0] sm:$0xff] }
 0x549   :  { %v3302_v50 = vld [vmem:[%s11786_s2 + $0x1610] sm:$0xff]  ;;  %4265 = vmatpush.msra.mxu3 %v3134_v25 }
 0x54a   :  { %v3214_v38 = vld [vmem:[%s11786_s2 + $0x1350] sm:$0xff]  ;;  %4358 = vmatpush.msra.mxu2 %v3302_v50  ;;  %v9947_v50 = vpop.f32.mrf.mxu2 }
 0x54b   :  { %v3294_v5 = vld [vmem:[%s11786_s2 + $0x15d0] sm:$0xff]  ;;  %4290 = vmatpush.msra.mxu0 %v3214_v38  ;;  %v9939_v38 = vpop.f32.mrf.mxu3  ;;  %11933 = vst [vmem:[#allocation49_spill] sm:$0xff] %v9947_v50  ;;  %v2647_v50 = vld [vmem:[%s11786_s2 + $0x198] sm:$0xff] }
 0x54c   :  { %v3130_v13 = vld [vmem:[%s11786_s2 + $0x10b0] sm:$0xff]  ;;  %4315 = vmatpush.msra.mxu1 %v3294_v5  ;;  %4459 = vmatpush.msrb.mxu2 %v2851_v11  ;;  %v9961_v11 = vld [vmem:[#allocation5 + $0xf8] sm:$0xff] }
 0x54d   :  { %v3290_v2 = vld [vmem:[%s11786_s2 + $0x15b0] sm:$0xff]  ;;  %4266 = vmatpush.msra.mxu3 %v3130_v13  ;;  %4291 = vmatpush.msra.mxu0 %v3210_v20 }
 0x54e   :  { %v3126_v15 = vld [vmem:[%s11786_s2 + $0x1090] sm:$0xff]  ;;  %4316 = vmatpush.msra.mxu1 %v3290_v2  ;;  %4460 = vmatpush.msrb.mxu2 %v2847_v40  ;;  %v2843_v40 = vld [vmem:[%s11786_s2 + $0x7b8] sm:$0xff] }
 0x54f   :  { %v3206_v25 = vld [vmem:[%s11786_s2 + $0x1310] sm:$0xff]  ;;  %4267 = vmatpush.msra.mxu3 %v3126_v15  ;;  %4249 = vmatmul.f32.gmra.mxu2 %v9961_v11  ;;  %v9964_v2 = vld [vmem:[#allocation5 + $0x90] sm:$0xff] }
 0x550   :  { %4292 = vmatpush.msra.mxu0 %v3206_v25  ;;  %4317 = vmatpush.msra.mxu1 %v3286_v36  ;;  %v3122_v5 = vld [vmem:[%s11786_s2 + $0x1070] sm:$0xff] }
 0x551   :  { %v3202_v13 = vld [vmem:[%s11786_s2 + $0x12f0] sm:$0xff]  ;;  %4217 = vmatmul.f32.gmra.mxu1 %v9964_v2  ;;  %4268 = vmatpush.msra.mxu3 %v3122_v5 }
 0x552   :  { %v9952_v20 = vld [vmem:[#allocation5 + $0xe8] sm:$0xff]  ;;  %4293 = vmatpush.msra.mxu0 %v3202_v13  ;;  %4461 = vmatpush.msrb.mxu2 %v2843_v40  ;;  %v9987_v13 = vpop.f32.mrf.mxu1  ;;  %v10009_v62 = vpop.f32.mrf.mxu2 }
 0x553   :  { %4191 = vmatmul.f32.gmra.mxu0 %v9952_v20  ;;  %v3282_v36 = vld [vmem:[%s11786_s2 + $0x1570] sm:$0xff]  ;;  %11934 = vst [vmem:[#allocation50_spill] sm:$0xff] %v9987_v13  ;;  %v2603_v13 = vld [vmem:[%s11786_s2 + $0x38] sm:$0xff] }
 0x554   :  { %v3118_v15 = vld [vmem:[%s11786_s2 + $0x1050] sm:$0xff]  ;;  %4318 = vmatpush.msra.mxu1 %v3282_v36  ;;  %v2835_v36 = vld [vmem:[%s11786_s2 + $0x778] sm:$0xff]  ;;  %4462 = vmatpush.msrb.mxu2 %v2839_v24 }
 0x555   :  { %v3198_v25 = vld [vmem:[%s11786_s2 + $0x12d0] sm:$0xff]  ;;  %4269 = vmatpush.msra.mxu3 %v3118_v15 }
 0x556   :  { %v3278_v44 = vld [vmem:[%s11786_s2 + $0x1550] sm:$0xff]  ;;  %4294 = vmatpush.msra.mxu0 %v3198_v25  ;;  %4463 = vmatpush.msrb.mxu2 %v2835_v36  ;;  %v10004_v25 = vpop.f32.mrf.mxu3  ;;  %v10030_v36 = vld [vmem:[#allocation5 + $0xf0] sm:$0xff] }
 0x557   :  { %v3114_v9 = vld [vmem:[%s11786_s2 + $0x1030] sm:$0xff]  ;;  %4319 = vmatpush.msra.mxu1 %v3278_v44  ;;  %11935 = vst [vmem:[#allocation51_spill] sm:$0xff] %v10004_v25  ;;  %v10039_v25 = vpop.f32.mrf.mxu0 }
 0x558   :  { %v3194_v5 = vld [vmem:[%s11786_s2 + $0x12b0] sm:$0xff]  ;;  %4270 = vmatpush.msra.mxu3 %v3114_v9  ;;  %v10018_v9 = vld [vmem:[#allocation5 + $0x158] sm:$0xff]  ;;  %11936 = vst [vmem:[#allocation52_spill] sm:$0xff] %v10039_v25  ;;  %v2823_v25 = vld [vmem:[%s11786_s2 + $0x718] sm:$0xff] }
 0x559   :  { %v3274_v27 = vld [vmem:[%s11786_s2 + $0x1530] sm:$0xff]  ;;  %4295 = vmatpush.msra.mxu0 %v3194_v5  ;;  %4252 = vmatmul.f32.gmra.mxu2 %v10018_v9  ;;  %v2831_v5 = vld [vmem:[%s11786_s2 + $0x758] sm:$0xff] }
 0x55a   :  { %v3190_v40 = vld [vmem:[%s11786_s2 + $0x1290] sm:$0xff]  ;;  %4320 = vmatpush.msra.mxu1 %v3274_v27  ;;  %4271 = vmatpush.msra.mxu3 %v3110_v30  ;;  %v2659_v27 = vld [vmem:[%s11786_s2 + $0x1f8] sm:$0xff]  ;;  %v10021_v30 = vld [vmem:[#allocation5 + $0x40] sm:$0xff]  ;;  %v10047_v52 = vpop.f32.mrf.mxu1 }
 0x55b   :  { %v3270_v15 = vld [vmem:[%s11786_s2 + $0x1510] sm:$0xff]  ;;  %4296 = vmatpush.msra.mxu0 %v3190_v40  ;;  %4272 = vmatmul.f32.vlgmr.msra.gmra.mxu3 %v10021_v30 }
 0x55c   :  { %v3186_v44 = vld [vmem:[%s11786_s2 + $0x1270] sm:$0xff]  ;;  %4321 = vmatpush.msra.mxu1 %v3270_v15  ;;  %4194 = vmatmul.f32.gmra.mxu0 %v9283_v18  ;;  %v2655_v15 = vld [vmem:[%s11786_s2 + $0x1d8] sm:$0xff] }
 0x55d   :  { %v3266_v24 = vld [vmem:[%s11786_s2 + $0x14f0] sm:$0xff]  ;;  %4220 = vmatmul.f32.gmra.mxu1 %v10030_v36  ;;  %4297 = vmatpush.msra.mxu0 %v3186_v44  ;;  %v2827_v44 = vld [vmem:[%s11786_s2 + $0x738] sm:$0xff] }
 0x55e   :  { %v3182_v18 = vld [vmem:[%s11786_s2 + $0x1250] sm:$0xff]  ;;  %4322 = vmatpush.msra.mxu1 %v3266_v24  ;;  %4372 = vmatpush.msrb.mxu3 %v2659_v27  ;;  %v2651_v24 = vld [vmem:[%s11786_s2 + $0x1b8] sm:$0xff] }
 0x55f   :  { %v3262_v40 = vld [vmem:[%s11786_s2 + $0x14d0] sm:$0xff]  ;;  %4298 = vmatpush.msra.mxu0 %v3182_v18  ;;  %4464 = vmatpush.msrb.mxu2 %v2831_v5  ;;  %v10067_v5 = vpop.f32.mrf.mxu3 }
 0x560   :  { %v3258_v48 = vld [vmem:[%s11786_s2 + $0x14b0] sm:$0xff]  ;;  %4323 = vmatpush.msra.mxu1 %v3262_v40  ;;  %4373 = vmatpush.msrb.mxu3 %v2655_v15  ;;  %11937 = vst [vmem:[#allocation53_spill] sm:$0xff] %v10067_v5  ;;  %v2643_v40 = vld [vmem:[%s11786_s2 + $0x178] sm:$0xff]  ;;  %v10075_v15 = vpop.f32.mrf.mxu2 }
 0x561   :  { %v3174_v27 = vld [vmem:[%s11786_s2 + $0x1210] sm:$0xff]  ;;  %4299 = vmatpush.msra.mxu0 %v3178_v19  ;;  %4465 = vmatpush.msrb.mxu2 %v2827_v44  ;;  %11938 = vst [vmem:[#allocation54_spill] sm:$0xff] %v10075_v15  ;;  %v10087_v44 = vld [vmem:[#allocation5 + $0x58] sm:$0xff]  ;;  %v2719_v15 = vld [vmem:[%s11786_s2 + $0x3d8] sm:$0xff] }
 0x562   :  { %v3254_v18 = vld [vmem:[%s11786_s2 + $0x1490] sm:$0xff]  ;;  %4324 = vmatpush.msra.mxu1 %v3258_v48  ;;  %4374 = vmatpush.msrb.mxu3 %v2651_v24  ;;  %v10091_v24 = vld [vmem:[#allocation5 + $0x150] sm:$0xff] }
 0x563   :  { %4300 = vmatpush.msra.mxu0 %v3174_v27  ;;  %4466 = vmatpush.msrb.mxu2 %v2823_v25  ;;  %v3250_v19 = vld [vmem:[%s11786_s2 + $0x1470] sm:$0xff]  ;;  %v2819_v25 = vld [vmem:[%s11786_s2 + $0x6f8] sm:$0xff] }
 0x564   :  { %4325 = vmatpush.msra.mxu1 %v3254_v18  ;;  %4375 = vmatpush.msrb.mxu3 %v2647_v50  ;;  %v10078_v48 = vld [vmem:[#allocation5 + $0x48] sm:$0xff]  ;;  %v2723_v50 = vld [vmem:[%s11786_s2 + $0x3f8] sm:$0xff]  ;;  %v10100_v18 = vpop.f32.mrf.mxu0 }
 0x565   :  { %4275 = vmatmul.f32.gmra.mxu3 %v9347_v59  ;;  %4301 = vmatmul.f32.vlgmr.msra.gmra.mxu0 %v10078_v48  ;;  %v3246_v59 = vld [vmem:[%s11786_s2 + $0x1450] sm:$0xff]  ;;  %v2639_v27 = vld [vmem:[%s11786_s2 + $0x158] sm:$0xff]  ;;  %11939 = vst [vmem:[#allocation55_spill] sm:$0xff] %v10100_v18 }
 0x566   :  { %5766 = vmatmul.msk.f32.vlgmr.msra.gmra.mxu2 %vm220_vm9, %v10087_v44  ;;  %4223 = vmatmul.f32.gmra.mxu1 %v10091_v24  ;;  %v2815_v5 = vld [vmem:[%s11786_s2 + $0x6d8] sm:$0xff]  ;;  %v3242_v32 = vld [vmem:[%s11786_s2 + $0x1430] sm:$0xff] }
 0x567   :  { %4326 = vmatpush.msra.mxu1 %v3250_v19  ;;  %4376 = vmatpush.msrb.mxu3 %v2643_v40  ;;  %v10114_v19 = vpop.f32.mrf.mxu1  ;;  %v2715_v40 = vld [vmem:[%s11786_s2 + $0x3b8] sm:$0xff]  ;;  %v3238_v18 = vld [vmem:[%s11786_s2 + $0x1410] sm:$0xff] }
 0x568   :  { %4401 = vmatpush.msrb.mxu0 %v2723_v50  ;;  %4467 = vmatpush.msrb.mxu2 %v2819_v25  ;;  %11940 = vst [vmem:[#allocation56_spill] sm:$0xff] %v10114_v19  ;;  %v2811_v50 = vld [vmem:[%s11786_s2 + $0x6b8] sm:$0xff]  ;;  %v10136_v19 = vpop.f32.mrf.mxu2 }
 0x569   :  { %4327 = vmatpush.msra.mxu1 %v3246_v59  ;;  %4377 = vmatpush.msrb.mxu3 %v2639_v27  ;;  %v2631_v25 = vld [vmem:[%s11786_s2 + $0x118] sm:$0xff]  ;;  %11941 = vst [vmem:[#allocation57_spill] sm:$0xff] %v10136_v19 }
 0x56a   :  { %4402 = vmatpush.msrb.mxu0 %v2719_v15  ;;  %4468 = vmatpush.msrb.mxu2 %v2815_v5  ;;  %v2711_v59 = vld [vmem:[%s11786_s2 + $0x398] sm:$0xff]  ;;  %v3726_v15 = vadd.f32 %v9735_v47, %v9721_v16  ;;  %v10138_v5 = vpop.f32.mrf.mxu3 }
 0x56b   :  { %4328 = vmatpush.msra.mxu1 %v3242_v32  ;;  %4378 = vmatpush.msrb.mxu3 %v2635_v26  ;;  %v2627_v27 = vld [vmem:[%s11786_s2 + $0xf8] sm:$0xff]  ;;  %11942 = vst [vmem:[#allocation58_spill] sm:$0xff] %v10138_v5  ;;  %v10140_v26 = vld [vmem:[#allocation5 + $0x100] sm:$0xff] }
 0x56c   :  { %4403 = vmatpush.msrb.mxu0 %v2715_v40  ;;  %4469 = vmatpush.msrb.mxu2 %v2811_v50  ;;  %v2707_v32 = vld [vmem:[%s11786_s2 + $0x378] sm:$0xff]  ;;  %v3755_v47 = vadd.f32 %v9807_v37, %v3726_v15  ;;  %v10153_v40 = vld [vmem:[#allocation5 + $0xb8] sm:$0xff]  ;;  %v10172_v19 = vpop.f32.mrf.mxu0 }
 0x56d   :  { %4329 = vmatpush.msra.mxu1 %v3238_v18  ;;  %4379 = vmatpush.msrb.mxu3 %v2631_v25  ;;  %v2787_v16 = vld [vmem:[%s11786_s2 + $0x5f8] sm:$0xff]  ;;  %v10150_v18 = vld [vmem:[#allocation5 + $0xa8] sm:$0xff]  ;;  %11943 = vst [vmem:[#allocation59_spill] sm:$0xff] %v10172_v19 }
 0x56e   :  { %4404 = vmatpush.msrb.mxu0 %v2711_v59  ;;  %4278 = vmatmul.f32.gmra.mxu3 %v10140_v26  ;;  %v2623_v50 = vld [vmem:[%s11786_s2 + $0xd8] sm:$0xff] }
 0x56f   :  { %4304 = vmatmul.f32.gmra.mxu0 %v10150_v18  ;;  %5767 = vmatmul.msk.f32.gmra.mxu2 %vm220_vm9, %v10153_v40  ;;  %v2807_v25 = vld [vmem:[%s11786_s2 + $0x698] sm:$0xff]  ;;  %v10180_v7 = vpop.f32.mrf.mxu1 }
 0x570   :  { %v10163_v59 = vld [vmem:[#allocation5 + $0x50] sm:$0xff]  ;;  %4380 = vmatpush.msrb.mxu3 %v2627_v27  ;;  %4405 = vmatpush.msrb.mxu0 %v2707_v32  ;;  %11944 = vst [vmem:[#allocation60_spill] sm:$0xff] %v10180_v7 }
 0x571   :  { %4330 = vmatmul.f32.vlgmr.msra.gmra.mxu1 %v10163_v59  ;;  %v2703_v37 = vld [vmem:[%s11786_s2 + $0x358] sm:$0xff]  ;;  %4470 = vmatpush.msrb.mxu2 %v2807_v25 }
 0x572   :  { %v2783_v15 = vld [vmem:[%s11786_s2 + $0x5d8] sm:$0xff]  ;;  %4430 = vmatpush.msrb.mxu1 %v2787_v16  ;;  %4381 = vmatpush.msrb.mxu3 %v2623_v50  ;;  %v3784_v16 = vadd.f32 %v9754_v17, %v3755_v47  ;;  %v3928_v47 = vpop.f32.mrf.mxu3 }
 0x573   :  { %v2619_v5 = vld [vmem:[%s11786_s2 + $0xb8] sm:$0xff]  ;;  %4406 = vmatpush.msrb.mxu0 %v2703_v37  ;;  %v3378_v37 = vadd.f32 %v9099_v8, %v9077_v46 }
 0x574   :  { %v2803_v27 = vld [vmem:[%s11786_s2 + $0x678] sm:$0xff]  ;;  %4431 = vmatpush.msrb.mxu1 %v2783_v15  ;;  %4382 = vmatpush.msrb.mxu3 %v2619_v5  ;;  %v3813_v17 = vadd.f32 %v9939_v38, %v3784_v16  ;;  %v10215_v38 = vld [vmem:[#allocation5 + $0x108] sm:$0xff] }
 0x575   :  { %v2779_v32 = vld [vmem:[%s11786_s2 + $0x5b8] sm:$0xff]  ;;  %4471 = vmatpush.msrb.mxu2 %v2803_v27  ;;  %4407 = vmatpush.msrb.mxu0 %v2699_v43  ;;  %v10210_v27 = vpop.f32.mrf.mxu2  ;;  %v10212_v43 = vld [vmem:[#allocation5 + $0x160] sm:$0xff] }
 0x576   :  { %v2615_v19 = vld [vmem:[%s11786_s2 + $0x98] sm:$0xff]  ;;  %4432 = vmatpush.msrb.mxu1 %v2779_v32  ;;  %11945 = vst [vmem:[#allocation61_spill] sm:$0xff] %v10210_v27  ;;  %4281 = vmatmul.f32.gmra.mxu3 %v10212_v43  ;;  %v10226_v32 = vld [vmem:[#allocation5 + $0x118] sm:$0xff] }
 0x577   :  { %v2799_v50 = vld [vmem:[%s11786_s2 + $0x658] sm:$0xff]  ;;  %4383 = vmatpush.msrb.mxu3 %v2615_v19  ;;  %4307 = vmatmul.f32.gmra.mxu0 %v10215_v38  ;;  %v3842_v19 = vadd.f32 %v9976_v22, %v3813_v17  ;;  %v3957_v17 = vpop.f32.mrf.mxu0 }
 0x578   :  { %v2695_v7 = vld [vmem:[%s11786_s2 + $0x318] sm:$0xff]  ;;  %4472 = vmatpush.msrb.mxu2 %v2799_v50 }
 0x579   :  { %v2775_v25 = vld [vmem:[%s11786_s2 + $0x598] sm:$0xff]  ;;  %4408 = vmatpush.msrb.mxu0 %v2695_v7  ;;  %v3407_v7 = vadd.f32 %v9157_v51, %v3378_v37  ;;  %5768 = vmatmul.msk.f32.gmra.mxu2 %vm220_vm9, %v10226_v32  ;;  %v3871_v27 = vadd.f32 %v10047_v52, %v3842_v19 }
 0x57a   :  { %4433 = vmatpush.msrb.mxu1 %v2775_v25  ;;  %v2611_v5 = vld [vmem:[%s11786_s2 + $0x78] sm:$0xff] }
 0x57b   :  { %v2691_v15 = vld [vmem:[%s11786_s2 + $0x2f8] sm:$0xff]  ;;  %4384 = vmatpush.msrb.mxu3 %v2611_v5  ;;  %v3436_v37 = vadd.f32 %v9131_v58, %v3407_v7 }
 0x57c   :  { %v2771_v46 = vld [vmem:[%s11786_s2 + $0x578] sm:$0xff]  ;;  %4409 = vmatpush.msrb.mxu0 %v2691_v15  ;;  %v10253_v15 = vpop.f32.mrf.mxu1 }
 0x57d   :  { %v2795_v8 = vld [vmem:[%s11786_s2 + $0x638] sm:$0xff]  ;;  %4434 = vmatpush.msrb.mxu1 %v2771_v46  ;;  %v3465_v46 = vadd.f32 %v9300_v0, %v3436_v37  ;;  %v3900_v0 = vadd.f32 %v10009_v62, %v3871_v27  ;;  %v10279_v37 = vld [vmem:[#allocation5 + $0x168] sm:$0xff] }
 0x57e   :  { %v10230_v16 = vld [vmem:[#allocation5 + $0xb0] sm:$0xff]  ;;  %4473 = vmatpush.msrb.mxu2 %v2795_v8 }
 0x57f   :  { %4333 = vmatmul.f32.gmra.mxu1 %v10230_v16  ;;  %v2607_v50 = vld [vmem:[%s11786_s2 + $0x58] sm:$0xff]  ;;  %4310 = vmatmul.f32.gmra.mxu0 %v10279_v37  ;;  %v3929_v27 = vadd.f32 %v3928_v47, %v3900_v0 }
 0x580   :  { %v2687_v25 = vld [vmem:[%s11786_s2 + $0x2d8] sm:$0xff]  ;;  %4385 = vmatpush.msrb.mxu3 %v2607_v50  ;;  %v3494_v50 = vadd.f32 %v9321_v23, %v3465_v46 }
 0x581   :  { %v2767_v51 = vld [vmem:[%s11786_s2 + $0x558] sm:$0xff]  ;;  %4410 = vmatpush.msrb.mxu0 %v2687_v25  ;;  %v10273_v25 = vpop.f32.mrf.mxu3 }
 0x582   :  { %v2791_v22 = vld [vmem:[%s11786_s2 + $0x618] sm:$0xff]  ;;  %4435 = vmatpush.msrb.mxu1 %v2767_v51  ;;  %4386 = vmatpush.msrb.mxu3 %v2603_v13  ;;  %v4015_v13 = vpop.f32.mrf.mxu2 }
 0x583   :  { %v2683_v5 = vld [vmem:[%s11786_s2 + $0x2b8] sm:$0xff]  ;;  %4474 = vmatpush.msrb.mxu2 %v2791_v22  ;;  %v3523_v22 = vadd.f32 %v9394_v28, %v3494_v50  ;;  %v5863_v28 = vld [vmem:[#allocation5] sm:$0xff] }
 0x584   :  { %v2763_v58 = vld [vmem:[%s11786_s2 + $0x538] sm:$0xff]  ;;  %4411 = vmatpush.msrb.mxu0 %v2683_v5  ;;  %v10288_v5 = vld [vmem:[#allocation5 + $0x178] sm:$0xff]  ;;  %v3986_v0 = vpop.f32.mrf.mxu1 }
 0x585   :  { %v3107_v52 = vld [vmem:[%s11786_s2 + $0xff8] sm:$0xff]  ;;  %4436 = vmatpush.msrb.mxu1 %v2763_v58  ;;  %5769 = vmatmul.msk.f32.gmra.mxu2 %vm220_vm9, %v10288_v5 }
 0x586   :  { %v2599_v7 = vld [vmem:[%s11786_s2 + $0x18] sm:$0xff]  ;;  %4575 = vmatpush.msra.mxu2 %v3107_v52 }
 0x587   :  { %v2679_v8 = vld [vmem:[%s11786_s2 + $0x298] sm:$0xff]  ;;  %4387 = vmatpush.msrb.mxu3 %v2599_v7 }
 0x588   :  { %v2759_v19 = vld [vmem:[%s11786_s2 + $0x518] sm:$0xff]  ;;  %4412 = vmatpush.msrb.mxu0 %v2679_v8  ;;  %4388 = vmatmul.f32.vlgmr.msrb.gmra.mxu3 %v5863_v28  ;;  %v10307_v8 = vpop.f32.mrf.mxu0 }
 0x589   :  { %v2675_v51 = vld [vmem:[%s11786_s2 + $0x278] sm:$0xff]  ;;  %4437 = vmatpush.msrb.mxu1 %v2759_v19  ;;  %11946 = vst [vmem:[#allocation62_spill] sm:$0xff] %v10307_v8 }
 0x58a   :  { %v2755_v62 = vld [vmem:[%s11786_s2 + $0x4f8] sm:$0xff]  ;;  %4413 = vmatpush.msrb.mxu0 %v2675_v51  ;;  %v3552_v51 = vadd.f32 %v9337_v41, %v3523_v22 }
 0x58b   :  { %v2915_v23 = vld [vmem:[%s11786_s2 + $0x9f8] sm:$0xff]  ;;  %4438 = vmatpush.msrb.mxu1 %v2755_v62 }
 0x58c   :  { %v2671_v58 = vld [vmem:[%s11786_s2 + $0x258] sm:$0xff]  ;;  %4488 = vmatpush.msra.mxu3 %v2915_v23  ;;  %v3958_v23 = vadd.f32 %v3957_v17, %v3929_v27  ;;  %v3581_v22 = vadd.f32 %v9515_v33, %v3552_v51 }
 0x58d   :  { %v3103_v52 = vld [vmem:[%s11786_s2 + $0xfd8] sm:$0xff]  ;;  %4414 = vmatpush.msrb.mxu0 %v2671_v58  ;;  %4475 = vmatmul.f32.vlgmr.msrb.gmra.mxu2 %v9593_v31 }
 0x58e   :  { %v10298_v46 = vld [vmem:[#allocation5 + $0x110] sm:$0xff]  ;;  %4576 = vmatpush.msra.mxu2 %v3103_v52  ;;  %v3987_v27 = vadd.f32 %v3986_v0, %v3958_v23  ;;  %v10335_v52 = vpop.f32.mrf.mxu3 }
 0x58f   :  { %4336 = vmatmul.f32.gmra.mxu1 %v10298_v46  ;;  %v2751_v47 = vld [vmem:[%s11786_s2 + $0x4d8] sm:$0xff]  ;;  %11947 = vst [vmem:[#allocation63_spill] sm:$0xff] %v10335_v52 }
 0x590   :  { %v2911_v7 = vld [vmem:[%s11786_s2 + $0x9d8] sm:$0xff]  ;;  %4439 = vmatpush.msrb.mxu1 %v2751_v47 }
 0x591   :  { %v2667_v19 = vld [vmem:[%s11786_s2 + $0x238] sm:$0xff]  ;;  %4489 = vmatpush.msra.mxu3 %v2911_v7  ;;  %v10343_v7 = vpop.f32.mrf.mxu2 }
 0x592   :  { %v3099_v50 = vld [vmem:[%s11786_s2 + $0xfb8] sm:$0xff]  ;;  %4415 = vmatpush.msrb.mxu0 %v2667_v19  ;;  %11948 = vst [vmem:[#allocation64_spill] sm:$0xff] %v10343_v7  ;;  %v3610_v19 = vadd.f32 %v9527_v21, %v3581_v22  ;;  %v5878_v7 = vld [vmem:[#allocation5 + $0x28] sm:$0xff] }
 0x593   :  { %v2747_v28 = vld [vmem:[%s11786_s2 + $0x4b8] sm:$0xff]  ;;  %4577 = vmatpush.msra.mxu2 %v3099_v50  ;;  %v5865_v50 = vld [vmem:[#allocation5 + $0x60] sm:$0xff] }
 0x594   :  { %v2907_v62 = vld [vmem:[%s11786_s2 + $0x9b8] sm:$0xff]  ;;  %4440 = vmatpush.msrb.mxu1 %v2747_v28  ;;  %4391 = vmatmul.f32.gmra.mxu3 %v5865_v50  ;;  %v4016_v28 = vadd.f32 %v4015_v13, %v3987_v27  ;;  %v3639_v22 = vadd.f32 %v9603_v10, %v3610_v19  ;;  %v10377_v10 = vpop.f32.mrf.mxu1 }
 0x595   :  { %v2663_v8 = vld [vmem:[%s11786_s2 + $0x218] sm:$0xff]  ;;  %4490 = vmatpush.msra.mxu3 %v2907_v62 }
 0x596   :  { %v3095_v41 = vld [vmem:[%s11786_s2 + $0xf98] sm:$0xff]  ;;  %4416 = vmatpush.msrb.mxu0 %v2663_v8  ;;  %v5866_v8 = vld [vmem:[#allocation5 + $0x8] sm:$0xff] }
 0x597   :  { %v2743_v58 = vld [vmem:[%s11786_s2 + $0x498] sm:$0xff]  ;;  %4578 = vmatpush.msra.mxu2 %v3095_v41  ;;  %4417 = vmatmul.f32.vlgmr.msrb.gmra.mxu0 %v5866_v8  ;;  %v10362_v41 = vpop.f32.mrf.mxu0  ;;  %v10394_v8 = vadd.f32 %v9529_v29, %v3639_v22 }
 0x598   :  { %v2903_v17 = vld [vmem:[%s11786_s2 + $0x998] sm:$0xff]  ;;  %4441 = vmatpush.msrb.mxu1 %v2743_v58  ;;  %11949 = vst [vmem:[#allocation65_spill] sm:$0xff] %v10362_v41  ;;  %v5877_v41 = vld [vmem:[#allocation5 + $0x80] sm:$0xff] }
 0x599   :  { %4491 = vmatpush.msra.mxu3 %v2903_v17  ;;  %v2739_v33 = vld [vmem:[%s11786_s2 + $0x478] sm:$0xff]  ;;  %11951 = vst [vmem:[#allocation67_spill] sm:$0xff] %v10394_v8 }
 0x59a   :  { %v2899_v47 = vld [vmem:[%s11786_s2 + $0x978] sm:$0xff]  ;;  %4442 = vmatpush.msrb.mxu1 %v2739_v33 }
 0x59b   :  { %v2979_v0 = vld [vmem:[%s11786_s2 + $0xbf8] sm:$0xff]  ;;  %4492 = vmatpush.msra.mxu3 %v2899_v47  ;;  %v10385_v47 = vrot.slane %v4016_v28, 6  ;;  %v10402_v28 = vpop.f32.mrf.mxu2 }
 0x59c   :  { %v3091_v51 = vld [vmem:[%s11786_s2 + $0xf78] sm:$0xff]  ;;  %4517 = vmatpush.msra.mxu0 %v2979_v0  ;;  %11952 = vst [vmem:[#allocation68_spill] sm:$0xff] %v10402_v28 }
 0x59d   :  { %v10353_v62 = vld [vmem:[#allocation5 + $0x170] sm:$0xff]  ;;  %4579 = vmatpush.msra.mxu2 %v3091_v51  ;;  %11950 = vst [vmem:[#allocation66_spill] sm:$0xff] %v10385_v47  ;;  %v10409_v29 = vsel %vm11953_vm0, %v10394_v8, %v10385_v47  ;;  %vm12023_vm0 = vmmov %vm12014_vm7 }
 0x59e   :  { %4339 = vmatmul.f32.gmra.mxu1 %v10353_v62  ;;  %v2735_v21 = vld [vmem:[%s11786_s2 + $0x458] sm:$0xff]  ;;  %11954 = vst [vmem:[#allocation69_spill] sm:$0xff] %v10409_v29 }
 0x59f   :  { %v2895_v23 = vld [vmem:[%s11786_s2 + $0x958] sm:$0xff]  ;;  %4443 = vmatpush.msrb.mxu1 %v2735_v21  ;;  %v10404_v21 = vpop.f32.mrf.mxu3 }
 0x5a0   :  { %v2975_v31 = vld [vmem:[%s11786_s2 + $0xbd8] sm:$0xff]  ;;  %4493 = vmatpush.msra.mxu3 %v2895_v23  ;;  %v5868_v23 = vld [vmem:[#allocation5 + $0xc0] sm:$0xff] }
 0x5a1   :  { %v3087_v13 = vld [vmem:[%s11786_s2 + $0xf58] sm:$0xff]  ;;  %4518 = vmatpush.msra.mxu0 %v2975_v31  ;;  %4394 = vmatmul.f32.gmra.mxu3 %v5868_v23 }
 0x5a2   :  { %v2731_v58 = vld [vmem:[%s11786_s2 + $0x438] sm:$0xff]  ;;  %4580 = vmatpush.msra.mxu2 %v3087_v13 }
 0x5a3   :  { %v2891_v17 = vld [vmem:[%s11786_s2 + $0x938] sm:$0xff]  ;;  %4444 = vmatpush.msrb.mxu1 %v2731_v58  ;;  %v5870_v58 = vld [vmem:[#allocation5 + $0x78] sm:$0xff] }
 0x5a4   :  { %v2971_v27 = vld [vmem:[%s11786_s2 + $0xbb8] sm:$0xff]  ;;  %4494 = vmatpush.msra.mxu3 %v2891_v17  ;;  %4478 = vmatmul.f32.gmra.mxu2 %v5870_v58 }
 0x5a5   :  { %v3083_v33 = vld [vmem:[%s11786_s2 + $0xf38] sm:$0xff]  ;;  %4519 = vmatpush.msra.mxu0 %v2971_v27 }
 0x5a6   :  { %v2727_v19 = vld [vmem:[%s11786_s2 + $0x418] sm:$0xff]  ;;  %4581 = vmatpush.msra.mxu2 %v3083_v33 }
 0x5a7   :  { %v2887_v50 = vld [vmem:[%s11786_s2 + $0x918] sm:$0xff]  ;;  %4445 = vmatpush.msrb.mxu1 %v2727_v19 }
 0x5a8   :  { %v2967_v0 = vld [vmem:[%s11786_s2 + $0xb98] sm:$0xff]  ;;  %4495 = vmatpush.msra.mxu3 %v2887_v50 }
 0x5a9   :  { %v2883_v51 = vld [vmem:[%s11786_s2 + $0x8f8] sm:$0xff]  ;;  %4520 = vmatpush.msra.mxu0 %v2967_v0  ;;  %v10429_v0 = vpop.f32.mrf.mxu0 }
 0x5aa   :  { %v2963_v22 = vld [vmem:[%s11786_s2 + $0xb78] sm:$0xff]  ;;  %4496 = vmatpush.msra.mxu3 %v2883_v51 }
 0x5ab   :  { %v3043_v31 = vld [vmem:[%s11786_s2 + $0xdf8] sm:$0xff]  ;;  %4521 = vmatpush.msra.mxu0 %v2963_v22 }
 0x5ac   :  { %v5869_v13 = vld [vmem:[#allocation3 + $0x20] sm:$0xff]  ;;  %4546 = vmatpush.msra.mxu1 %v3043_v31  ;;  %4481 = vmatmul.f32.gmra.mxu2 %v9711_v39 }
 0x5ad   :  { %4420 = vmatmul.f32.gmra.mxu0 %v5869_v13  ;;  %v2879_v17 = vld [vmem:[%s11786_s2 + $0x8d8] sm:$0xff]  ;;  %v10437_v13 = vpop.f32.mrf.mxu1 }
 0x5ae   :  { %v3079_v27 = vld [vmem:[%s11786_s2 + $0xf18] sm:$0xff]  ;;  %11955 = vst [vmem:[#allocation70_spill] sm:$0xff] %v10437_v13  ;;  %4497 = vmatpush.msra.mxu3 %v2879_v17  ;;  %v5872_v13 = vld [vmem:[#allocation5 + $0x120] sm:$0xff] }
 0x5af   :  { %v5871_v33 = vld [vmem:[#allocation5 + $0x10] sm:$0xff]  ;;  %4582 = vmatpush.msra.mxu2 %v3079_v27  ;;  %v10457_v27 = vpop.f32.mrf.mxu3  ;;  %4397 = vmatmul.f32.gmra.mxu3 %v5872_v13 }
 0x5b0   :  { %4446 = vmatmul.f32.vlgmr.msrb.gmra.mxu1 %v5871_v33  ;;  %v2959_v19 = vld [vmem:[%s11786_s2 + $0xb58] sm:$0xff] }
 0x5b1   :  { %v3039_v50 = vld [vmem:[%s11786_s2 + $0xdd8] sm:$0xff]  ;;  %4522 = vmatpush.msra.mxu0 %v2959_v19 }
 0x5b2   :  { %v2875_v23 = vld [vmem:[%s11786_s2 + $0x8b8] sm:$0xff]  ;;  %4547 = vmatpush.msra.mxu1 %v3039_v50 }
 0x5b3   :  { %v3075_v51 = vld [vmem:[%s11786_s2 + $0xef8] sm:$0xff]  ;;  %4498 = vmatpush.msra.mxu3 %v2875_v23  ;;  %v10465_v23 = vpop.f32.mrf.mxu2 }
 0x5b4   :  { %v2955_v58 = vld [vmem:[%s11786_s2 + $0xb38] sm:$0xff]  ;;  %4583 = vmatpush.msra.mxu2 %v3075_v51  ;;  %v5873_v51 = vld [vmem:[#allocation5 + $0xc8] sm:$0xff] }
 0x5b5   :  { %v3035_v22 = vld [vmem:[%s11786_s2 + $0xdb8] sm:$0xff]  ;;  %4523 = vmatpush.msra.mxu0 %v2955_v58  ;;  %4484 = vmatmul.f32.gmra.mxu2 %v9768_v57 }
 0x5b6   :  { %v2871_v31 = vld [vmem:[%s11786_s2 + $0x898] sm:$0xff]  ;;  %4548 = vmatpush.msra.mxu1 %v3035_v22  ;;  %4423 = vmatmul.f32.gmra.mxu0 %v5873_v51 }
 0x5b7   :  { %v3071_v33 = vld [vmem:[%s11786_s2 + $0xed8] sm:$0xff]  ;;  %4499 = vmatpush.msra.mxu3 %v2871_v31 }
 0x5b8   :  { %v2951_v17 = vld [vmem:[%s11786_s2 + $0xb18] sm:$0xff]  ;;  %4584 = vmatpush.msra.mxu2 %v3071_v33 }
 0x5b9   :  { %v3031_v28 = vld [vmem:[%s11786_s2 + $0xd98] sm:$0xff]  ;;  %4524 = vmatpush.msra.mxu0 %v2951_v17  ;;  %v10486_v17 = vpop.f32.mrf.mxu0 }
 0x5ba   :  { %4549 = vmatpush.msra.mxu1 %v3031_v28  ;;  %v2867_v19 = vld [vmem:[%s11786_s2 + $0x878] sm:$0xff] }
 0x5bb   :  { %v2947_v50 = vld [vmem:[%s11786_s2 + $0xaf8] sm:$0xff]  ;;  %4500 = vmatpush.msra.mxu3 %v2867_v19  ;;  %v10516_v8 = vpop.f32.mrf.mxu2 }
 0x5bc   :  { %v3027_v58 = vld [vmem:[%s11786_s2 + $0xd78] sm:$0xff]  ;;  %4525 = vmatpush.msra.mxu0 %v2947_v50  ;;  %v10494_v50 = vpop.f32.mrf.mxu1 }
 0x5bd   :  { %v3067_v28 = vld [vmem:[%s11786_s2 + $0xeb8] sm:$0xff]  ;;  %4550 = vmatpush.msra.mxu1 %v3027_v58 }
 0x5be   :  { %v5874_v22 = vld [vmem:[#allocation5 + $0x70] sm:$0xff]  ;;  %4585 = vmatpush.msra.mxu2 %v3067_v28 }
 0x5bf   :  { %4449 = vmatmul.f32.gmra.mxu1 %v5874_v22  ;;  %v2863_v31 = vld [vmem:[%s11786_s2 + $0x858] sm:$0xff] }
 0x5c0   :  { %v2943_v13 = vld [vmem:[%s11786_s2 + $0xad8] sm:$0xff]  ;;  %4501 = vmatpush.msra.mxu3 %v2863_v31 }
 0x5c1   :  { %v3023_v33 = vld [vmem:[%s11786_s2 + $0xd58] sm:$0xff]  ;;  %4526 = vmatpush.msra.mxu0 %v2943_v13  ;;  %v10511_v13 = vpop.f32.mrf.mxu3 }
 0x5c2   :  { %v3063_v39 = vld [vmem:[%s11786_s2 + $0xe98] sm:$0xff]  ;;  %4551 = vmatpush.msra.mxu1 %v3023_v33 }
 0x5c3   :  { %v2859_v51 = vld [vmem:[%s11786_s2 + $0x838] sm:$0xff]  ;;  %4586 = vmatpush.msra.mxu2 %v3063_v39  ;;  %v5875_v39 = vld [vmem:[#allocation3 + $0x68] sm:$0xff] }
 0x5c4   :  { %v2939_v19 = vld [vmem:[%s11786_s2 + $0xab8] sm:$0xff]  ;;  %4502 = vmatpush.msra.mxu3 %v2859_v51  ;;  %4426 = vmatmul.f32.gmra.mxu0 %v5875_v39 }
 0x5c5   :  { %v3019_v22 = vld [vmem:[%s11786_s2 + $0xd38] sm:$0xff]  ;;  %4527 = vmatpush.msra.mxu0 %v2939_v19 }
 0x5c6   :  { %v3059_v58 = vld [vmem:[%s11786_s2 + $0xe78] sm:$0xff]  ;;  %4552 = vmatpush.msra.mxu1 %v3019_v22 }
 0x5c7   :  { %v2855_v29 = vld [vmem:[%s11786_s2 + $0x818] sm:$0xff]  ;;  %4587 = vmatpush.msra.mxu2 %v3059_v58  ;;  %4452 = vmatmul.f32.gmra.mxu1 %v9778_v12 }
 0x5c8   :  { %v2935_v28 = vld [vmem:[%s11786_s2 + $0xa98] sm:$0xff]  ;;  %4503 = vmatpush.msra.mxu3 %v2855_v29  ;;  %v5876_v29 = vld [vmem:[#allocation5 + $0x20] sm:$0xff] }
 0x5c9   :  { %v3015_v31 = vld [vmem:[%s11786_s2 + $0xd18] sm:$0xff]  ;;  %4528 = vmatpush.msra.mxu0 %v2935_v28  ;;  %4504 = vmatmul.f32.vlgmr.msra.gmra.mxu3 %v5876_v29 }
 0x5ca   :  { %v2931_v33 = vld [vmem:[%s11786_s2 + $0xa78] sm:$0xff]  ;;  %4553 = vmatpush.msra.mxu1 %v3015_v31  ;;  %v10538_v31 = vpop.f32.mrf.mxu0 }
 0x5cb   :  { %v3011_v51 = vld [vmem:[%s11786_s2 + $0xcf8] sm:$0xff]  ;;  %4529 = vmatpush.msra.mxu0 %v2931_v33  ;;  %v10546_v33 = vpop.f32.mrf.mxu1 }
 0x5cc   :  { %v3171_v19 = vld [vmem:[%s11786_s2 + $0x11f8] sm:$0xff]  ;;  %4554 = vmatpush.msra.mxu1 %v3011_v51 }
 0x5cd   :  { %v2927_v22 = vld [vmem:[%s11786_s2 + $0xa58] sm:$0xff]  ;;  %4604 = vmatpush.msrb.mxu3 %v3171_v19 }
 0x5ce   :  { %v3055_v58 = vld [vmem:[%s11786_s2 + $0xe58] sm:$0xff]  ;;  %4530 = vmatpush.msra.mxu0 %v2927_v22 }
 0x5cf   :  { %v3007_v28 = vld [vmem:[%s11786_s2 + $0xcd8] sm:$0xff]  ;;  %4588 = vmatpush.msra.mxu2 %v3055_v58  ;;  %4455 = vmatmul.f32.gmra.mxu1 %v9834_v54 }
 0x5d0   :  { %v3167_v57 = vld [vmem:[%s11786_s2 + $0x11d8] sm:$0xff]  ;;  %4555 = vmatpush.msra.mxu1 %v3007_v28  ;;  %v4050_v28 = vpop.f32.mrf.mxu3 }
 0x5d1   :  { %v2923_v39 = vld [vmem:[%s11786_s2 + $0xa38] sm:$0xff]  ;;  %4605 = vmatpush.msrb.mxu3 %v3167_v57 }
 0x5d2   :  { %v3051_v12 = vld [vmem:[%s11786_s2 + $0xe38] sm:$0xff]  ;;  %4531 = vmatpush.msra.mxu0 %v2923_v39  ;;  %4507 = vmatmul.f32.gmra.mxu3 %v5877_v41 }
 0x5d3   :  { %v3003_v29 = vld [vmem:[%s11786_s2 + $0xcb8] sm:$0xff]  ;;  %4589 = vmatpush.msra.mxu2 %v3051_v12  ;;  %v10572_v12 = vpop.f32.mrf.mxu2 }
 0x5d4   :  { %v3163_v51 = vld [vmem:[%s11786_s2 + $0x11b8] sm:$0xff]  ;;  %4556 = vmatpush.msra.mxu1 %v3003_v29 }
 0x5d5   :  { %v2919_v19 = vld [vmem:[%s11786_s2 + $0xa18] sm:$0xff]  ;;  %4606 = vmatpush.msrb.mxu3 %v3163_v51  ;;  %v4071_v51 = vadd.f32 %v10429_v0, %v10404_v21 }
 0x5d6   :  { %v3047_v47 = vld [vmem:[%s11786_s2 + $0xe18] sm:$0xff]  ;;  %4532 = vmatpush.msra.mxu0 %v2919_v19  ;;  %v5879_v19 = vld [vmem:[#allocation5 + $0x38] sm:$0xff] }
 0x5d7   :  { %v2999_v22 = vld [vmem:[%s11786_s2 + $0xc98] sm:$0xff]  ;;  %4590 = vmatpush.msra.mxu2 %v3047_v47  ;;  %4533 = vmatmul.f32.vlgmr.msra.gmra.mxu0 %v5878_v7 }
 0x5d8   :  { %v3159_v58 = vld [vmem:[%s11786_s2 + $0x1198] sm:$0xff]  ;;  %4557 = vmatpush.msra.mxu1 %v2999_v22  ;;  %4591 = vmatmul.f32.vlgmr.msra.gmra.mxu2 %v5879_v19  ;;  %v4079_v22 = vpop.f32.mrf.mxu0 }
 0x5d9   :  { %4607 = vmatpush.msrb.mxu3 %v3159_v58  ;;  %v2995_v57 = vld [vmem:[%s11786_s2 + $0xc78] sm:$0xff] }
 0x5da   :  { %v3155_v39 = vld [vmem:[%s11786_s2 + $0x1178] sm:$0xff]  ;;  %4558 = vmatpush.msra.mxu1 %v2995_v57  ;;  %v4100_v57 = vadd.f32 %v10494_v50, %v4071_v51  ;;  %4510 = vmatmul.f32.gmra.mxu3 %v9881_v34 }
 0x5db   :  { %v3235_v47 = vld [vmem:[%s11786_s2 + $0x13f8] sm:$0xff]  ;;  %4608 = vmatpush.msrb.mxu3 %v3155_v39  ;;  %v10602_v39 = vpop.f32.mrf.mxu1 }
 0x5dc   :  { %v3315_v29 = vld [vmem:[%s11786_s2 + $0x1678] sm:$0xff]  ;;  %4633 = vmatpush.msrb.mxu0 %v3235_v47  ;;  %v4129_v51 = vadd.f32 %v10465_v23, %v4100_v57 }
 0x5dd   :  { %v2991_v41 = vld [vmem:[%s11786_s2 + $0xc58] sm:$0xff]  ;;  %4703 = vmatpush.msrb.mxu2 %v3315_v29 }
 0x5de   :  { %v3151_v7 = vld [vmem:[%s11786_s2 + $0x1158] sm:$0xff]  ;;  %4559 = vmatpush.msra.mxu1 %v2991_v41 }
 0x5df   :  { %v3231_v58 = vld [vmem:[%s11786_s2 + $0x13d8] sm:$0xff]  ;;  %4609 = vmatpush.msrb.mxu3 %v3151_v7  ;;  %v4137_v7 = vpop.f32.mrf.mxu2  ;;  %4536 = vmatmul.f32.gmra.mxu0 %v9890_v3 }
 0x5e0   :  { %v3311_v21 = vld [vmem:[%s11786_s2 + $0x1658] sm:$0xff]  ;;  %4634 = vmatpush.msrb.mxu0 %v3231_v58  ;;  %v4157_v58 = vpop.f32.mrf.mxu3  ;;  %4594 = vmatmul.f32.gmra.mxu2 %v9893_v6  ;;  %v4080_v6 = vadd.f32 %v4079_v22, %v4050_v28 }
 0x5e1   :  { %v2987_v54 = vld [vmem:[%s11786_s2 + $0xc38] sm:$0xff]  ;;  %4704 = vmatpush.msrb.mxu2 %v3311_v21  ;;  %v4158_v23 = vadd.f32 %v4157_v58, %v4129_v51 }
 0x5e2   :  { %v3147_v0 = vld [vmem:[%s11786_s2 + $0x1138] sm:$0xff]  ;;  %4560 = vmatpush.msra.mxu1 %v2987_v54  ;;  %4513 = vmatmul.f32.gmra.mxu3 %v9949_v14 }
 0x5e3   :  { %v3227_v19 = vld [vmem:[%s11786_s2 + $0x13b8] sm:$0xff]  ;;  %4610 = vmatpush.msrb.mxu3 %v3147_v0 }
 0x5e4   :  { %v3307_v47 = vld [vmem:[%s11786_s2 + $0x1638] sm:$0xff]  ;;  %4635 = vmatpush.msrb.mxu0 %v3227_v19 }
 0x5e5   :  { %v2983_v52 = vld [vmem:[%s11786_s2 + $0xc18] sm:$0xff]  ;;  %4705 = vmatpush.msrb.mxu2 %v3307_v47  ;;  %v4108_v47 = vpop.f32.mrf.mxu1 }
 0x5e6   :  { %v3143_v50 = vld [vmem:[%s11786_s2 + $0x1118] sm:$0xff]  ;;  %4561 = vmatpush.msra.mxu1 %v2983_v52  ;;  %v4074_v52 = vadd.f32 %v10486_v17, %v10457_v27  ;;  %v4186_v27 = vpop.f32.mrf.mxu0  ;;  %v4109_v22 = vadd.f32 %v4108_v47, %v4080_v6 }
 0x5e7   :  { %v3223_v29 = vld [vmem:[%s11786_s2 + $0x1398] sm:$0xff]  ;;  %4611 = vmatpush.msrb.mxu3 %v3143_v50  ;;  %4562 = vmatmul.f32.vlgmr.msra.gmra.mxu1 %v9902_v1  ;;  %v4187_v1 = vadd.f32 %v4186_v27, %v4158_v23 }
 0x5e8   :  { %v3139_v41 = vld [vmem:[%s11786_s2 + $0x10f8] sm:$0xff]  ;;  %4636 = vmatpush.msrb.mxu0 %v3223_v29  ;;  %v4103_v19 = vadd.f32 %v10546_v33, %v4074_v52  ;;  %4597 = vmatmul.f32.gmra.mxu2 %v9961_v11 }
 0x5e9   :  { %v3219_v21 = vld [vmem:[%s11786_s2 + $0x1378] sm:$0xff]  ;;  %4612 = vmatpush.msrb.mxu3 %v3139_v41  ;;  %v10666_v41 = vadd.f32 %v4137_v7, %v4109_v22  ;;  %v4077_v7 = vadd.f32 %v10538_v31, %v10511_v13  ;;  %4539 = vmatmul.f32.gmra.mxu0 %v9952_v20 }
 0x5ea   :  { %v3299_v54 = vld [vmem:[%s11786_s2 + $0x15f8] sm:$0xff]  ;;  %4637 = vmatpush.msrb.mxu0 %v3219_v21  ;;  %v4132_v58 = vadd.f32 %v10516_v8, %v4103_v19  ;;  %v4160_v21 = vpop.f32.mrf.mxu3 }
 0x5eb   :  { %v3135_v34 = vld [vmem:[%s11786_s2 + $0x10d8] sm:$0xff]  ;;  %4662 = vmatpush.msrb.mxu1 %v3299_v54  ;;  %v4106_v20 = vadd.f32 %v10602_v39, %v4077_v7 }
 0x5ec   :  { %v3303_v0 = vld [vmem:[%s11786_s2 + $0x1618] sm:$0xff]  ;;  %4613 = vmatpush.msrb.mxu3 %v3135_v34  ;;  %v4161_v52 = vadd.f32 %v4160_v21, %v4132_v58  ;;  %v4244_v34 = vpop.f32.mrf.mxu2 }
 0x5ed   :  { %v3215_v57 = vld [vmem:[%s11786_s2 + $0x1358] sm:$0xff]  ;;  %4706 = vmatpush.msrb.mxu2 %v3303_v0  ;;  %v4135_v47 = vadd.f32 %v10572_v12, %v4106_v20 }
 0x5ee   :  { %v3295_v3 = vld [vmem:[%s11786_s2 + $0x15d8] sm:$0xff]  ;;  %4638 = vmatpush.msrb.mxu0 %v3215_v57  ;;  %v4189_v31 = vpop.f32.mrf.mxu0 }
 0x5ef   :  { %v3131_v17 = vld [vmem:[%s11786_s2 + $0x10b8] sm:$0xff]  ;;  %4663 = vmatpush.msrb.mxu1 %v3295_v3  ;;  %v4190_v57 = vadd.f32 %v4189_v31, %v4161_v52  ;;  %v4215_v3 = vpop.f32.mrf.mxu1 }
 0x5f0   :  { %v3211_v50 = vld [vmem:[%s11786_s2 + $0x1338] sm:$0xff]  ;;  %4614 = vmatpush.msrb.mxu3 %v3131_v17  ;;  %4565 = vmatmul.f32.gmra.mxu1 %v9964_v2  ;;  %v4216_v27 = vadd.f32 %v4215_v3, %v4187_v1 }
 0x5f1   :  { %v3291_v28 = vld [vmem:[%s11786_s2 + $0x15b8] sm:$0xff]  ;;  %4639 = vmatpush.msrb.mxu0 %v3211_v50  ;;  %4600 = vmatmul.f32.gmra.mxu2 %v10018_v9 }
 0x5f2   :  { %v3127_v29 = vld [vmem:[%s11786_s2 + $0x1098] sm:$0xff]  ;;  %4664 = vmatpush.msrb.mxu1 %v3291_v28  ;;  %v4245_v50 = vadd.f32 %v4244_v34, %v4216_v27  ;;  %v4163_v1 = vpop.f32.mrf.mxu3 }
 0x5f3   :  { %v3207_v33 = vld [vmem:[%s11786_s2 + $0x1318] sm:$0xff]  ;;  %4615 = vmatpush.msrb.mxu3 %v3127_v29  ;;  %v4164_v22 = vadd.f32 %v4163_v1, %v4135_v47 }
 0x5f4   :  { %v3287_v51 = vld [vmem:[%s11786_s2 + $0x1598] sm:$0xff]  ;;  %4640 = vmatpush.msrb.mxu0 %v3207_v33  ;;  %v4247_v29 = vpop.f32.mrf.mxu2  ;;  %v5880_v33 = vld [vmem:[#allocation5 + $0x148] sm:$0xff] }
 0x5f5   :  { %4665 = vmatpush.msrb.mxu1 %v3287_v51  ;;  %v3123_v54 = vld [vmem:[%s11786_s2 + $0x1078] sm:$0xff]  ;;  %4542 = vmatmul.f32.gmra.mxu0 %v5880_v33 }
 0x5f6   :  { %v3203_v23 = vld [vmem:[%s11786_s2 + $0x12f8] sm:$0xff]  ;;  %4616 = vmatpush.msrb.mxu3 %v3123_v54  ;;  %v4192_v21 = vpop.f32.mrf.mxu0 }
 0x5f7   :  { %v3283_v8 = vld [vmem:[%s11786_s2 + $0x1578] sm:$0xff]  ;;  %4641 = vmatpush.msrb.mxu0 %v3203_v23  ;;  %v4193_v9 = vadd.f32 %v4192_v21, %v4164_v22  ;;  %v4218_v23 = vpop.f32.mrf.mxu1 }
 0x5f8   :  { %v3119_v0 = vld [vmem:[%s11786_s2 + $0x1058] sm:$0xff]  ;;  %4666 = vmatpush.msrb.mxu1 %v3283_v8  ;;  %v4219_v52 = vadd.f32 %v4218_v23, %v4190_v57 }
 0x5f9   :  { %v3199_v13 = vld [vmem:[%s11786_s2 + $0x12d8] sm:$0xff]  ;;  %4617 = vmatpush.msrb.mxu3 %v3119_v0  ;;  %4568 = vmatmul.f32.gmra.mxu1 %v10030_v36 }
 0x5fa   :  { %v3279_v14 = vld [vmem:[%s11786_s2 + $0x1558] sm:$0xff]  ;;  %4642 = vmatpush.msrb.mxu0 %v3199_v13  ;;  %v4248_v7 = vadd.f32 %v4247_v29, %v4219_v52  ;;  %v4166_v0 = vpop.f32.mrf.mxu3  ;;  %v5881_v13 = vld [vmem:[#allocation5 + $0xa0] sm:$0xff]  ;;  %5770 = vmatmul.msk.f32.vlgmr.msrb.gmra.mxu2 %vm220_vm9, %v10087_v44 }
 0x5fb   :  { %v3115_v11 = vld [vmem:[%s11786_s2 + $0x1038] sm:$0xff]  ;;  %4667 = vmatpush.msrb.mxu1 %v3279_v14  ;;  %v4167_v14 = vadd.f32 %v4166_v0, %v10666_v41 }
 0x5fc   :  { %v3195_v2 = vld [vmem:[%s11786_s2 + $0x12b8] sm:$0xff]  ;;  %4618 = vmatpush.msrb.mxu3 %v3115_v11  ;;  %v4250_v20 = vpop.f32.mrf.mxu2 }
 0x5fd   :  { %v3275_v6 = vld [vmem:[%s11786_s2 + $0x1538] sm:$0xff]  ;;  %4643 = vmatpush.msrb.mxu0 %v3195_v2 }
 0x5fe   :  { %v3111_v39 = vld [vmem:[%s11786_s2 + $0x1018] sm:$0xff]  ;;  %4668 = vmatpush.msrb.mxu1 %v3275_v6  ;;  %v4195_v11 = vpop.f32.mrf.mxu0 }
 0x5ff   :  { %v3191_v17 = vld [vmem:[%s11786_s2 + $0x1298] sm:$0xff]  ;;  %4619 = vmatpush.msrb.mxu3 %v3111_v39  ;;  %v4196_v57 = vadd.f32 %v4195_v11, %v4167_v14  ;;  %v4221_v41 = vpop.f32.mrf.mxu1 }
 0x600   :  { %v3271_v19 = vld [vmem:[%s11786_s2 + $0x1518] sm:$0xff]  ;;  %4644 = vmatpush.msrb.mxu0 %v3191_v17  ;;  %4620 = vmatmul.f32.vlgmr.msrb.gmra.mxu3 %v10021_v30 }
 0x601   :  { %v3187_v28 = vld [vmem:[%s11786_s2 + $0x1278] sm:$0xff]  ;;  %4669 = vmatpush.msrb.mxu1 %v3271_v19 }
 0x602   :  { %v3267_v51 = vld [vmem:[%s11786_s2 + $0x14f8] sm:$0xff]  ;;  %4645 = vmatpush.msrb.mxu0 %v3187_v28  ;;  %4571 = vmatmul.f32.gmra.mxu1 %v10091_v24  ;;  %v4222_v24 = vadd.f32 %v4221_v41, %v4193_v9  ;;  %v4273_v6 = vpop.f32.mrf.mxu3 }
 0x603   :  { %v3183_v12 = vld [vmem:[%s11786_s2 + $0x1258] sm:$0xff]  ;;  %4670 = vmatpush.msrb.mxu1 %v3267_v51  ;;  %5771 = vmatmul.msk.f32.gmra.mxu2 %vm220_vm9, %v10153_v40  ;;  %v4274_v27 = vadd.f32 %v4273_v6, %v4245_v50 }
 0x604   :  { %v3263_v58 = vld [vmem:[%s11786_s2 + $0x14d8] sm:$0xff]  ;;  %4646 = vmatpush.msrb.mxu0 %v3183_v12  ;;  %v4251_v3 = vadd.f32 %v4250_v20, %v4222_v24  ;;  %v4253_v44 = vpop.f32.mrf.mxu2 }
 0x605   :  { %v3179_v54 = vld [vmem:[%s11786_s2 + $0x1238] sm:$0xff]  ;;  %4671 = vmatpush.msrb.mxu1 %v3263_v58 }
 0x606   :  { %v3259_v30 = vld [vmem:[%s11786_s2 + $0x14b8] sm:$0xff]  ;;  %4647 = vmatpush.msrb.mxu0 %v3179_v54  ;;  %v4302_v39 = vpop.f32.mrf.mxu0 }
 0x607   :  { %v3175_v36 = vld [vmem:[%s11786_s2 + $0x1218] sm:$0xff]  ;;  %4672 = vmatpush.msrb.mxu1 %v3259_v30  ;;  %v4303_v17 = vadd.f32 %v4302_v39, %v4274_v27  ;;  %v4224_v19 = vpop.f32.mrf.mxu1 }
 0x608   :  { %v3255_v34 = vld [vmem:[%s11786_s2 + $0x1498] sm:$0xff]  ;;  %4648 = vmatpush.msrb.mxu0 %v3175_v36  ;;  %4623 = vmatmul.f32.gmra.mxu3 %v5881_v13  ;;  %v4225_v47 = vadd.f32 %v4224_v19, %v4196_v57 }
 0x609   :  { %v3251_v8 = vld [vmem:[%s11786_s2 + $0x1478] sm:$0xff]  ;;  %4673 = vmatpush.msrb.mxu1 %v3255_v34  ;;  %4649 = vmatmul.f32.vlgmr.msrb.gmra.mxu0 %v10078_v48 }
 0x60a   :  { %v3247_v31 = vld [vmem:[%s11786_s2 + $0x1458] sm:$0xff]  ;;  %v4254_v1 = vadd.f32 %v4253_v44, %v4225_v47 }
 0x60b   :  { %4674 = vmatpush.msrb.mxu1 %v3251_v8  ;;  %v3243_v2 = vld [vmem:[%s11786_s2 + $0x1438] sm:$0xff]  ;;  %5772 = vmatmul.msk.f32.gmra.mxu2 %vm220_vm9, %v10226_v32 }
 0x60c   :  { %v3239_v48 = vld [vmem:[%s11786_s2 + $0x1418] sm:$0xff] }
 0x60d   :  { %4675 = vmatpush.msrb.mxu1 %v3247_v31 }
 0x60e   :  { %v4305_v28 = vpop.f32.mrf.mxu0 }
 0x60f   :  { %4676 = vmatpush.msrb.mxu1 %v3243_v2  ;;  %v4331_v50 = vpop.f32.mrf.mxu1 }
 0x610   :  { %4626 = vmatmul.f32.gmra.mxu3 %v10140_v26  ;;  %v4276_v26 = vpop.f32.mrf.mxu3  ;;  %v4332_v22 = vadd.f32 %v4331_v50, %v4303_v17 }
 0x611   :  { %4677 = vmatpush.msrb.mxu1 %v3239_v48  ;;  %4652 = vmatmul.f32.gmra.mxu0 %v10150_v18  ;;  %v4277_v18 = vadd.f32 %v4276_v26, %v4248_v7  ;;  %v3723_v26 = vadd.f32 %v9685_v55, %v9671_v35 }
 0x612   :  { %4678 = vmatmul.f32.vlgmr.msrb.gmra.mxu1 %v10163_v59  ;;  %v4360_v59 = vpop.f32.mrf.mxu2 }
 0x613   :  { %v4306_v40 = vadd.f32 %v4305_v28, %v4277_v18  ;;  %5773 = vmatmul.msk.f32.gmra.mxu2 %vm220_vm9, %v10288_v5 }
 0x616   :  { %v4308_v32 = vpop.f32.mrf.mxu0 }
 0x617   :  { %v4334_v51 = vpop.f32.mrf.mxu1 }
 0x618   :  { %4629 = vmatmul.f32.gmra.mxu3 %v10212_v43  ;;  %v10771_v43 = vadd.f32 %v4360_v59, %v4332_v22  ;;  %v4335_v12 = vadd.f32 %v4334_v51, %v4306_v40  ;;  %v3752_v59 = vadd.f32 %v9752_v56, %v3723_v26 }
 0x619   :  { %4655 = vmatmul.f32.gmra.mxu0 %v10215_v38  ;;  %v4279_v38 = vpop.f32.mrf.mxu3 }
 0x61a   :  { %4681 = vmatmul.f32.gmra.mxu1 %v10230_v16  ;;  %v4280_v16 = vadd.f32 %v4279_v38, %v4251_v3  ;;  %v4363_v29 = vpop.f32.mrf.mxu2  ;;  %v3781_v50 = vadd.f32 %v9693_v60, %v3752_v59 }
 0x61b   :  { %v10774_v58 = vadd.f32 %v4363_v29, %v4335_v12 }
 0x61c   :  { %v4309_v33 = vadd.f32 %v4308_v32, %v4280_v16  ;;  %v3375_v16 = vadd.f32 %v9051_v49, %v9012_v42  ;;  %v3810_v29 = vadd.f32 %v9879_v4, %v3781_v50  ;;  %v11957_v4 = vld [vmem:[#allocation41_spill] sm:$0xff]  ;;  %v11965_v50 = vld [vmem:[#allocation15_spill] sm:$0xff] }
 0x61e   :  { %v3404_v35 = vadd.f32 %v9097_v53, %v3375_v16 }
 0x61f   :  { %v4337_v23 = vpop.f32.mrf.mxu1 }
 0x620   :  { %v4338_v5 = vadd.f32 %v4337_v23, %v4309_v33  ;;  %v3433_v56 = vadd.f32 %v9062_v61, %v3404_v35  ;;  %v3839_v33 = vadd.f32 %v9911_v45, %v3810_v29  ;;  %v11959_v61 = vld [vmem:[#allocation28_spill] sm:$0xff]  ;;  %v11960_v45 = vld [vmem:[#allocation46_spill] sm:$0xff] }
 0x621   :  { %4658 = vmatmul.f32.gmra.mxu0 %v10279_v37  ;;  %v4282_v21 = vpop.f32.mrf.mxu3  ;;  %v11967_v35 = vld [vmem:[#allocation34_spill] sm:$0xff] }
 0x622   :  { %4684 = vmatmul.f32.gmra.mxu1 %v10298_v46  ;;  %v4283_v37 = vadd.f32 %v4282_v21, %v4254_v1  ;;  %v4366_v54 = vpop.f32.mrf.mxu2  ;;  %v4311_v46 = vpop.f32.mrf.mxu0  ;;  %v3462_v60 = vadd.f32 %v9237_v63, %v3433_v56  ;;  %v11956_v21 = vld [vmem:[#allocation50_spill] sm:$0xff] }
 0x623   :  { %v10776_v30 = vadd.f32 %v4366_v54, %v4338_v5  ;;  %v11962_v63 = vld [vmem:[#allocation18_spill] sm:$0xff] }
 0x624   :  { %v4312_v9 = vadd.f32 %v4311_v46, %v4283_v37  ;;  %v3868_v37 = vadd.f32 %v11956_v21, %v3839_v33  ;;  %v11958_v46 = vld [vmem:[#allocation42_spill] sm:$0xff]  ;;  %v3491_v5 = vadd.f32 %v11959_v61, %v3462_v60  ;;  %v11968_v33 = vld [vmem:[#allocation43_spill] sm:$0xff] }
 0x625   :  { %v3729_v53 = vadd.f32 %v11958_v46, %v11957_v4  ;;  %v11970_v60 = vld [vmem:[#allocation51_spill] sm:$0xff] }
 0x627   :  { %v4340_v7 = vpop.f32.mrf.mxu1 }
 0x628   :  { %v4341_v8 = vadd.f32 %v4340_v7, %v4312_v9 }
 0x629   :  { %v4389_v36 = vpop.f32.mrf.mxu3 }
 0x62a   :  { %4687 = vmatmul.f32.gmra.mxu1 %v10353_v62  ;;  %v4369_v52 = vpop.f32.mrf.mxu2  ;;  %v4418_v34 = vpop.f32.mrf.mxu0 }
 0x62b   :  { %v10778_v0 = vadd.f32 %v4369_v52, %v4341_v8  ;;  %v4419_v38 = vadd.f32 %v4418_v34, %v4389_v36  ;;  %v3758_v52 = vadd.f32 %v11960_v45, %v3729_v53  ;;  %v11961_v36 = vld [vmem:[#allocation49_spill] sm:$0xff]  ;;  %v3520_v8 = vadd.f32 %v11962_v63, %v3491_v5  ;;  %v11975_v5 = vld [vmem:[#allocation31_spill] sm:$0xff]  ;;  %v11976_v45 = vld [vmem:[#allocation16_spill] sm:$0xff] }
 0x62c   :  { %v3897_v34 = vadd.f32 %v11961_v36, %v3868_v37  ;;  %v11971_v37 = vld [vmem:[#allocation59_spill] sm:$0xff] }
 0x62d   :  { %v3549_v56 = vadd.f32 %v11967_v35, %v3520_v8  ;;  %v11978_v8 = vld [vmem:[#allocation32_spill] sm:$0xff] }
 0x62f   :  { %v4447_v20 = vpop.f32.mrf.mxu1 }
 0x630   :  { %v4448_v32 = vadd.f32 %v4447_v20, %v4419_v38  ;;  %v11966_v38 = vld [vmem:[#allocation19_spill] sm:$0xff] }
 0x631   :  { %v4392_v62 = vpop.f32.mrf.mxu3  ;;  %v3381_v16 = vadd.f32 %v11966_v38, %v11965_v50  ;;  %v11981_v50 = vld [vmem:[#allocation47_spill] sm:$0xff] }
 0x632   :  { %v4476_v13 = vpop.f32.mrf.mxu2  ;;  %v4421_v14 = vpop.f32.mrf.mxu0 }
 0x633   :  { %v4477_v51 = vadd.f32 %v4476_v13, %v4448_v32  ;;  %v4422_v42 = vadd.f32 %v4421_v14, %v4392_v62  ;;  %v11963_v13 = vld [vmem:[#allocation58_spill] sm:$0xff] }
 0x634   :  { %v3926_v20 = vadd.f32 %v11963_v13, %v3897_v34 }
 0x639   :  { %v4395_v31 = vpop.f32.mrf.mxu3 }
 0x63a   :  { %v4479_v11 = vpop.f32.mrf.mxu2  ;;  %v4424_v2 = vpop.f32.mrf.mxu0 }
 0x63c   :  { %v4450_v57 = vpop.f32.mrf.mxu1 }
 0x63d   :  { %v4451_v23 = vadd.f32 %v4450_v57, %v4422_v42  ;;  %v4425_v57 = vadd.f32 %v4424_v2, %v4395_v31  ;;  %v11973_v31 = vld [vmem:[#allocation13_spill] sm:$0xff] }
 0x63e   :  { %v3578_v2 = vadd.f32 %v11973_v31, %v3549_v56 }
 0x63f   :  { %v4480_v26 = vadd.f32 %v4479_v11, %v4451_v23  ;;  %v3955_v11 = vadd.f32 %v11971_v37, %v3926_v20  ;;  %v11979_v20 = vld [vmem:[#allocation27_spill] sm:$0xff] }
 0x641   :  { %v10780_v41 = vpop.f32.mrf.mxu3  ;;  %v3984_v61 = vadd.f32 %v10253_v15, %v3955_v11  ;;  %v11982_v15 = vld [vmem:[#allocation56_spill] sm:$0xff]  ;;  %v11987_v11 = vld [vmem:[#allocation22_spill] sm:$0xff] }
 0x642   :  { %v10782_v48 = vpop.f32.mrf.mxu2  ;;  %v10784_v24 = vpop.f32.mrf.mxu0 }
 0x644   :  { %v4453_v3 = vpop.f32.mrf.mxu1 }
 0x645   :  { %v4454_v46 = vadd.f32 %v4453_v3, %v4425_v57  ;;  %v11983_v57 = vld [vmem:[#allocation61_spill] sm:$0xff] }
 0x646   :  { %v4013_v35 = vadd.f32 %v11983_v57, %v3984_v61  ;;  %v12000_v57 = vld [vmem:[#allocation62_spill] sm:$0xff] }
 0x647   :  { %v4483_v3 = vadd.f32 %v10782_v48, %v4454_v46  ;;  %v11985_v48 = vld [vmem:[#allocation30_spill] sm:$0xff] }
 0x64a   :  { %v10786_v44 = vpop.f32.mrf.mxu2 }
 0x64c   :  { %v4505_v6 = vpop.f32.mrf.mxu3  ;;  %v10788_v39 = vpop.f32.mrf.mxu1 }
 0x64d   :  { %v4506_v49 = vadd.f32 %v4505_v6, %v4477_v51  ;;  %v11964_v6 = vld [vmem:[#allocation44_spill] sm:$0xff] }
 0x64e   :  { %v3787_v59 = vadd.f32 %v11964_v6, %v3758_v52  ;;  %v3384_v52 = vadd.f32 %v11976_v45, %v11975_v5  ;;  %v11980_v6 = vld [vmem:[#allocation11_spill] sm:$0xff]  ;;  %v11991_v45 = vld [vmem:[#allocation33_spill] sm:$0xff] }
 0x650   :  { %v3816_v21 = vadd.f32 %v11970_v60, %v3787_v59  ;;  %v3413_v13 = vadd.f32 %v11978_v8, %v3384_v52  ;;  %v3607_v59 = vadd.f32 %v11980_v6, %v3578_v2  ;;  %v11990_v2 = vld [vmem:[#allocation21_spill] sm:$0xff] }
 0x654   :  { %v4534_v27 = vpop.f32.mrf.mxu0 }
 0x655   :  { %v4508_v17 = vpop.f32.mrf.mxu3  ;;  %v4535_v7 = vadd.f32 %v4534_v27, %v4506_v49  ;;  %v11969_v27 = vld [vmem:[#allocation45_spill] sm:$0xff]  ;;  %v11972_v49 = vld [vmem:[#allocation20_spill] sm:$0xff] }
 0x656   :  { %v4509_v29 = vadd.f32 %v4508_v17, %v4480_v26  ;;  %v3732_v51 = vadd.f32 %v11969_v27, %v11968_v33  ;;  %v3410_v4 = vadd.f32 %v11972_v49, %v3381_v16  ;;  %v11974_v17 = vld [vmem:[#allocation48_spill] sm:$0xff]  ;;  %v11984_v33 = vld [vmem:[#allocation23_spill] sm:$0xff]  ;;  %v3442_v49 = vadd.f32 %v11987_v11, %v3413_v13 }
 0x658   :  { %v3761_v23 = vadd.f32 %v11974_v17, %v3732_v51  ;;  %v3439_v26 = vadd.f32 %v11979_v20, %v3410_v4  ;;  %v11986_v51 = vld [vmem:[#allocation53_spill] sm:$0xff]  ;;  %v3471_v17 = vadd.f32 %v11990_v2, %v3442_v49  ;;  %v12006_v2 = vld [vmem:[#allocation26_spill] sm:$0xff] }
 0x65a   :  { %v3790_v38 = vadd.f32 %v11981_v50, %v3761_v23  ;;  %v3468_v27 = vadd.f32 %v11984_v33, %v3439_v26  ;;  %v11998_v50 = vld [vmem:[#allocation35_spill] sm:$0xff] }
 0x65b   :  { %v4592_v19 = vpop.f32.mrf.mxu2 }
 0x65c   :  { %v4537_v47 = vpop.f32.mrf.mxu0  ;;  %v3819_v60 = vadd.f32 %v11986_v51, %v3790_v38 }
 0x65d   :  { %v10792_v18 = vpop.f32.mrf.mxu3  ;;  %v4538_v36 = vadd.f32 %v4537_v47, %v4509_v29  ;;  %v4428_v47 = vadd.f32 %v10784_v24, %v10780_v41  ;;  %v11988_v41 = vld [vmem:[#allocation29_spill] sm:$0xff] }
 0x65e   :  { %v3497_v24 = vadd.f32 %v11988_v41, %v3468_v27  ;;  %v12002_v27 = vld [vmem:[#allocation37_spill] sm:$0xff]  ;;  %v10904_v41 = vrot.slane %v10774_v58, 4 }
 0x65f   :  { %v4457_v4 = vadd.f32 %v10788_v39, %v4428_v47  ;;  %v11993_v39 = vld [vmem:[#allocation55_spill] sm:$0xff] }
 0x660   :  { %v3526_v52 = vadd.f32 %v11991_v45, %v3497_v24 }
 0x661   :  { %v4486_v8 = vadd.f32 %v10786_v44, %v4457_v4 }
 0x662   :  { %v3555_v38 = vadd.f32 %v11998_v50, %v3526_v52 }
 0x663   :  { %v10795_v28 = vpop.f32.mrf.mxu2 }
 0x664   :  { %v4563_v1 = vpop.f32.mrf.mxu1 }
 0x665   :  { %v10804_v55 = vpop.f32.mrf.mxu3  ;;  %v4564_v62 = vadd.f32 %v4563_v1, %v4535_v7  ;;  %v11977_v7 = vld [vmem:[#allocation52_spill] sm:$0xff] }
 0x666   :  { %v10797_v40 = vpop.f32.mrf.mxu0  ;;  %v3845_v63 = vadd.f32 %v11977_v7, %v3816_v21 }
 0x667   :  { %v4593_v53 = vadd.f32 %v4592_v19, %v4564_v62 }
 0x668   :  { %v3874_v16 = vadd.f32 %v11982_v15, %v3845_v63  ;;  %v10871_v63 = vrot.slane %v10771_v43, 4  ;;  %v11999_v15 = vld [vmem:[#allocation25_spill] sm:$0xff] }
 0x66b   :  { %v10808_v12 = vpop.f32.mrf.mxu2 }
 0x66d   :  { %v4566_v22 = vpop.f32.mrf.mxu1 }
 0x66e   :  { %v4567_v19 = vadd.f32 %v4566_v22, %v4538_v36  ;;  %v3636_v22 = vadd.f32 %v11985_v48, %v3607_v59  ;;  %v11992_v36 = vld [vmem:[#allocation17_spill] sm:$0xff]  ;;  %v3584_v48 = vadd.f32 %v12002_v27, %v3555_v38  ;;  %v12018_v38 = vld [vmem:[#allocation70_spill] sm:$0xff] }
 0x670   :  { %v4596_v46 = vadd.f32 %v10795_v28, %v4567_v19  ;;  %v3848_v28 = vadd.f32 %v11993_v39, %v3819_v60 }
 0x672   :  { %v10812_v54 = vpop.f32.mrf.mxu0 }
 0x674   :  { %v10826_v32 = vpop.f32.mrf.mxu2 }
 0x676   :  { %v10816_v9 = vpop.f32.mrf.mxu1 }
 0x67d   :  { %v4708_v56 = vpop.f32.mrf.mxu2 }
 0x67f   :  { %v10833_v42 = vpop.f32.mrf.mxu1 }
 0x683   :  { %v4621_v14 = vpop.f32.mrf.mxu3 }
 0x684   :  { %v4622_v34 = vadd.f32 %v4621_v14, %v4593_v53  ;;  %v4512_v14 = vadd.f32 %v10792_v18, %v4483_v3  ;;  %v10859_v18 = vrot.slane %v4013_v35, 6  ;;  %v11995_v3 = vld [vmem:[#allocation60_spill] sm:$0xff] }
 0x685   :  { %v3877_v19 = vadd.f32 %v11995_v3, %v3848_v28  ;;  %v12011_v28 = vld [vmem:[#allocation65_spill] sm:$0xff] }
 0x686   :  { %v4650_v1 = vpop.f32.mrf.mxu0  ;;  %v4541_v23 = vadd.f32 %v10797_v40, %v4512_v14  ;;  %v11994_v40 = vld [vmem:[#allocation12_spill] sm:$0xff]  ;;  %v4711_v43 = vpop.f32.mrf.mxu2 }
 0x687   :  { %v4651_v29 = vadd.f32 %v4650_v1, %v4622_v34  ;;  %v11989_v1 = vld [vmem:[#allocation54_spill] sm:$0xff]  ;;  %v10866_v34 = vadd.f32 %v11992_v36, %v3636_v22  ;;  %v3500_v26 = vadd.f32 %v11994_v40, %v3471_v17  ;;  %v12003_v22 = vld [vmem:[#allocation57_spill] sm:$0xff]  ;;  %v3613_v17 = vadd.f32 %v12006_v2, %v3584_v48  ;;  %v12010_v36 = vld [vmem:[#allocation39_spill] sm:$0xff] }
 0x688   :  { %v3903_v31 = vadd.f32 %v11989_v1, %v3874_v16  ;;  %v4570_v13 = vadd.f32 %v10816_v9, %v4541_v23  ;;  %v3906_v51 = vadd.f32 %v12003_v22, %v3877_v19  ;;  %v12007_v23 = vld [vmem:[#allocation64_spill] sm:$0xff]  ;;  %v12012_v40 = vld [vmem:[#allocation66_spill] sm:$0xff]  ;;  %v12015_v19 = vld [vmem:[#allocation69_spill] sm:$0xff] }
 0x689   :  { %v4751_v6 = vsel %vm11996_vm14, %v10866_v34, %v10859_v18  ;;  %v3529_v16 = vadd.f32 %v11999_v15, %v3500_v26  ;;  %v4759_v33 = vsel %vm1317_vm1, %v10859_v18, %v10866_v34  ;;  %v3642_v39 = vadd.f32 %v12010_v36, %v3613_v17  ;;  %v12013_v26 = vld [vmem:[#allocation67_spill] sm:$0xff]  ;;  %v12021_v48 = vld [vmem:[#allocation68_spill] sm:$0xff] }
 0x68a   :  { %v3932_v7 = vadd.f32 %v10273_v25, %v3903_v31  ;;  %v4515_v25 = vadd.f32 %v10804_v55, %v4486_v8  ;;  %v4599_v55 = vadd.f32 %v10808_v12, %v4570_v13  ;;  %v4766_v3 = vsel %vm12014_vm7, %v12013_v26, %v12012_v40  ;;  %vm12028_vm7 = vmmov %vm12001_vm5 }
 0x68b   :  { %v4624_v62 = vpop.f32.mrf.mxu3  ;;  %vm12024_vm14 = vcmask 1041408  }
 0x68c   :  { %v4625_v61 = vadd.f32 %v4624_v62, %v4596_v46  ;;  %v3961_v35 = vadd.f32 %v12000_v57, %v3932_v7  ;;  %v4544_v11 = vadd.f32 %v10812_v54, %v4515_v25  ;;  %v12005_v46 = vld [vmem:[#allocation63_spill] sm:$0xff]  ;;  %v12008_v54 = vld [vmem:[#allocation10_spill] sm:$0xff] }
 0x68e   :  { %v4653_v21 = vpop.f32.mrf.mxu0  ;;  %v3990_v60 = vadd.f32 %v10377_v10, %v3961_v35  ;;  %v4573_v24 = vadd.f32 %v10833_v42, %v4544_v11  ;;  %v4714_v42 = vpop.f32.mrf.mxu2  ;;  %v12019_v35 = vld [vmem:[#allocation24_spill] sm:$0xff] }
 0x68f   :  { %v4679_v37 = vpop.f32.mrf.mxu1  ;;  %v4654_v59 = vadd.f32 %v4653_v21, %v4625_v61 }
 0x690   :  { %v4680_v53 = vadd.f32 %v4679_v37, %v4651_v29  ;;  %v4019_v61 = vadd.f32 %v12007_v23, %v3990_v60 }
 0x692   :  { %v4709_v5 = vadd.f32 %v4708_v56, %v4680_v53  ;;  %v3935_v53 = vadd.f32 %v12005_v46, %v3906_v51  ;;  %v10934_v50 = vrot.slane %v4019_v61, 6  ;;  %v12027_v61 = vld [vmem:[#allocation40_spill] sm:$0xff] }
 0x693   :  { %v4627_v62 = vpop.f32.mrf.mxu3 }
 0x694   :  { %v10875_v20 = vrot.slane %v4709_v5, 2  ;;  %v4628_v49 = vadd.f32 %v4627_v62, %v4599_v55  ;;  %v3558_v5 = vadd.f32 %v12008_v54, %v3529_v16  ;;  %v3964_v7 = vadd.f32 %v12011_v28, %v3935_v53 }
 0x696   :  { %v4752_v44 = vsel %vm1317_vm1, %v10875_v20, %v10871_v63  ;;  %v4760_v9 = vsel %vm11997_vm13, %v10871_v63, %v10875_v20  ;;  %v4656_v21 = vpop.f32.mrf.mxu0  ;;  %v3993_v15 = vadd.f32 %v12018_v38, %v3964_v7  ;;  %vm12025_vm13 = vmmov %vm12023_vm0  ;;  %v4746_v7 = vrot.slane %v10778_v0, 4 }
 0x697   :  { %v4682_v47 = vpop.f32.mrf.mxu1  ;;  %v4753_v14 = vsel %vm12001_vm5, %v4751_v6, %v4752_v44  ;;  %v4761_v37 = vsel %vm12004_vm10, %v4760_v9, %v4759_v33  ;;  %v4657_v45 = vadd.f32 %v4656_v21, %v4628_v49  ;;  %v4602_v6 = vadd.f32 %v10826_v32, %v4573_v24  ;;  %v12017_v44 = vld [vmem:[#allocation36_spill] sm:$0xff]  ;;  %v12020_v33 = vld [vmem:[#allocation14_spill] sm:$0xff]  ;;  %vm12026_vm10 = vmmov %vm12024_vm14 }
 0x698   :  { %v4683_v29 = vadd.f32 %v4682_v47, %v4654_v59  ;;  %v4754_v56 = vrot.slane %v4753_v14, 2  ;;  %v4762_v10 = vrot.slane %v4761_v37, 6  ;;  %v3587_v9 = vadd.f32 %v12017_v44, %v3558_v5 }
 0x699   :  { %v10938_v47 = vadd.f32 %v12019_v35, %v3642_v39  ;;  %v4022_v22 = vadd.f32 %v12021_v48, %v3993_v15  ;;  %v4756_v24 = vsel %vm12026_vm10, %v10871_v63, %v10875_v20  ;;  %v4749_v5 = vsel %vm12009_vm3, %v10871_v63, %v10875_v20 }
 0x69a   :  { %v4712_v4 = vadd.f32 %v4711_v43, %v4683_v29  ;;  %v5775_v12 = vrot.slane %v4754_v56, 9  ;;  %v5777_v59 = vrot.slane %v4762_v10, 9  ;;  %v10941_v29 = vrot.slane %v10776_v30, 4 }
 0x69b   :  { %v4630_v8 = vpop.f32.mrf.mxu3  ;;  %v3616_v27 = vadd.f32 %v12020_v33, %v3587_v9  ;;  %v4781_v51 = vsel %vm12022_vm4, %v10938_v47, %v10934_v50  ;;  %v4777_v60 = vsel %vm12023_vm0, %v10938_v47, %v10934_v50  ;;  %v4785_v23 = vsel %vm1317_vm1, %v10934_v50, %v10938_v47  ;;  %vm12030_vm4 = vmmov %vm12026_vm10 }
 0x69c   :  { %v10907_v1 = vrot.slane %v4712_v4, 2  ;;  %v10909_v31 = vmax.f32 %v4754_v56, %v5775_v12  ;;  %v4631_v16 = vadd.f32 %v4630_v8, %v4602_v6  ;;  %v10945_v56 = vmax.f32 %v4762_v10, %v5777_v59  ;;  %v4717_v4 = vpop.f32.mrf.mxu2  ;;  %v12031_v59 = vld [vmem:[#allocation38_spill] sm:$0xff]  ;;  %vm12032_vm0 = vmmov %vm12030_vm4 }
 0x69d   :  { %v3645_v54 = vadd.f32 %v12027_v61, %v3616_v27  ;;  %v4745_v28 = vrot.slane %v4022_v22, 6  ;;  %v4748_v63 = vsel %vm12030_vm4, %v10866_v34, %v10859_v18  ;;  %vm12035_vm10 = vmmov %vm12028_vm7 }
 0x69e   :  { %v4764_v52 = vsel %vm12009_vm3, %v10904_v41, %v10907_v1  ;;  %v4767_v58 = vsel %vm1317_vm1, %v10907_v1, %v10904_v41  ;;  %4886 = vrot.lane.b32.xlu1 %v10909_v31, %s5911_s19  ;;  %v4659_v14 = vpop.f32.mrf.mxu0  ;;  %v4750_v6 = vsel %vm1313_vm2, %v4748_v63, %v4749_v5  ;;  %vm12040_vm4 = vmmov %vm12032_vm0 }
 0x69f   :  { %v4685_v13 = vpop.f32.mrf.mxu1  ;;  %v10929_v62 = vsel %vm1313_vm2, %v12015_v19, %v4764_v52  ;;  %v4768_v43 = vsel %vm12016_vm12, %v4766_v3, %v4767_v58  ;;  %v4660_v21 = vadd.f32 %v4659_v14, %v4631_v16  ;;  %vm12029_vm12 = vmmov %vm12009_vm3 }
 0x6a0   :  { %v4686_v25 = vadd.f32 %v4685_v13, %v4657_v45  ;;  %v4769_v55 = vrot.slane %v4768_v43, 2  ;;  %v4755_v52 = vsel %vm12029_vm12, %v10866_v34, %v10859_v18  ;;  %v3674_v43 = vadd.f32 %v12031_v59, %v3645_v54 }
 0x6a1   :  { %v4757_v39 = vsel %vm1313_vm2, %v4756_v24, %v4755_v52  ;;  %v5774_v18 = vrot.slane %v4750_v6, 9 }
 0x6a2   :  { %v4715_v57 = vadd.f32 %v4714_v42, %v4686_v25  ;;  %v5779_v12 = vrot.slane %v4769_v55, 9  ;;  %v4758_v25 = vrot.slane %v4757_v39, 4  ;;  %v4792_v16 = vsel %vm12025_vm13, %v3674_v43, %v4745_v28 }
 0x6a3   :  { %v11005_v14 = vmax.f32 %v4750_v6, %v5774_v18 }
 0x6a4   :  { %v10943_v32 = vrot.slane %v4715_v57, 2  ;;  %v10984_v8 = vmax.f32 %v4769_v55, %v5779_v12  ;;  %v5776_v38 = vrot.slane %v4758_v25, 9 }
 0x6a6   :  { %4890 = vrot.lane.b32.xlu1 %v10945_v56, %s5911_s19  ;;  %v4782_v30 = vsel %vm12024_vm14, %v10941_v29, %v10943_v32  ;;  %v4778_v37 = vsel %vm1317_vm1, %v10943_v32, %v10941_v29  ;;  %v4786_v11 = vsel %vm12025_vm13, %v10941_v29, %v10943_v32  ;;  %vm12033_vm14 = vmmov %vm12009_vm3  ;;  %v4858_v48 = vmax.f32 %v4758_v25, %v5776_v38 }
 0x6a7   :  { %v4688_v49 = vpop.f32.mrf.mxu1  ;;  %v4783_v46 = vsel %vm1313_vm2, %v4782_v30, %v4781_v51  ;;  %v4779_v53 = vsel %vm12001_vm5, %v4777_v60, %v4778_v37  ;;  %v4787_v45 = vsel %vm12028_vm7, %v4786_v11, %v4785_v23  ;;  %v4796_v9 = vsel %vm12033_vm14, %v3674_v43, %v4745_v28  ;;  %vm12034_vm5 = vmmov %vm12009_vm3 }
 0x6a8   :  { %v4689_v10 = vadd.f32 %v4688_v49, %v4660_v21  ;;  %v4784_v2 = vrot.slane %v4783_v46, 4  ;;  %v4780_v17 = vrot.slane %v4779_v53, 2  ;;  %v4788_v19 = vrot.slane %v4787_v45, 6  ;;  %vm12037_vm3 = vmmov %vm12032_vm0 }
 0x6a9   :  { %v4771_v60 = vsel %vm12037_vm3, %v10904_v41, %v10907_v1  ;;  %vm12038_vm7 = vmmov %vm12034_vm5  ;;  %v4774_v41 = vsel %vm12040_vm4, %v10938_v47, %v10934_v50 }
 0x6aa   :  { %v4718_v58 = vadd.f32 %v4717_v4, %v4689_v10  ;;  %v5783_v42 = vrot.slane %v4784_v2, 9  ;;  %v5782_v36 = vrot.slane %v4780_v17, 9  ;;  %v5784_v34 = vrot.slane %v4788_v19, 9  ;;  %vm12039_vm12 = vmmov %vm12034_vm5 }
 0x6ab   :  { %v4770_v11 = vsel %vm12038_vm7, %v12013_v26, %v12012_v40  ;;  %v4775_v4 = vsel %vm12039_vm12, %v10941_v29, %v10943_v32 }
 0x6ac   :  { %v4747_v20 = vrot.slane %v4718_v58, 2  ;;  %v10989_v13 = vmax.f32 %v4784_v2, %v5783_v42  ;;  %v4864_v3 = vmax.f32 %v4780_v17, %v5782_v36  ;;  %v11007_v55 = vmax.f32 %v4788_v19, %v5784_v34 }
 0x6ad   :  { %v4772_v49 = vsel %vm1313_vm2, %v4771_v60, %v4770_v11  ;;  %v4776_v24 = vsel %vm1313_vm2, %v4774_v41, %v4775_v4  ;;  %v5778_v34 = vrot.slane %v10929_v62, 9 }
 0x6ae   :  { %v4797_v44 = vsel %vm12032_vm0, %v4746_v7, %v4747_v20  ;;  %4894 = vrot.lane.b32.xlu1 %v10984_v8, %s5911_s19  ;;  %4902 = vrot.lane.b32.xlu0 %v10989_v13, %s5911_s19  ;;  %v4793_v0 = vsel %vm1317_vm1, %v4747_v20, %v4746_v7  ;;  %v4790_v57 = vsel %vm12034_vm5, %v4746_v7, %v4747_v20  ;;  %vm12036_vm1 = vmmov %vm12032_vm0  ;;  %v4773_v53 = vrot.slane %v4772_v49, 4 }
 0x6af   :  { %4900 = vrot.lane.b32.xlu2 %v4864_v3, %s5911_s19  ;;  %v4798_v15 = vsel %vm1313_vm2, %v4797_v44, %v4796_v9  ;;  %v4794_v35 = vsel %vm12035_vm10, %v4792_v16, %v4793_v0  ;;  %v4789_v33 = vsel %vm12036_vm1, %v3674_v43, %v4745_v28  ;;  %v5781_v40 = vrot.slane %v4776_v24, 9 }
 0x6b0   :  { %v4799_v27 = vrot.slane %v4798_v15, 4  ;;  %v4791_v22 = vsel %vm1313_vm2, %v4789_v33, %v4790_v57  ;;  %v4795_v51 = vrot.slane %v4794_v35, 2  ;;  %v5780_v26 = vrot.slane %v4773_v53, 9 }
 0x6b1   :  { %v5785_v21 = vrot.slane %v4791_v22, 9  ;;  %v11039_v29 = vmax.f32 %v4776_v24, %v5781_v40  ;;  %v11065_v60 = vmax.f32 %v10929_v62, %v5778_v34 }
 0x6b2   :  { %v5787_v30 = vrot.slane %v4799_v27, 9  ;;  %v5786_v37 = vrot.slane %v4795_v51, 9  ;;  %v11041_v32 = vmax.f32 %v4773_v53, %v5780_v26 }
 0x6b3   :  { %v11026_v12 = vmax.f32 %v4791_v22, %v5785_v21  ;;  %v5152_v22 = vld [vmem:[%s11787_s3 + $0x78] sm:$0xff] }
 0x6b4   :  { %v11028_v46 = vmax.f32 %v4799_v27, %v5787_v30  ;;  %v4868_v1 = vmax.f32 %v4795_v51, %v5786_v37  ;;  %v5168_v51 = vld [vmem:[%s11787_s3 + $0xf8] sm:$0xff]  ;;  %5373 = vmatpush.msra.mxu3 %v5152_v22 }
 0x6b5   :  { %5393 = vmatpush.msra.mxu0 %v5168_v51  ;;  %v5200_v21 = vld [vmem:[%s11787_s3 + $0x1f8] sm:$0xff] }
 0x6b6   :  { %4884 = vrot.lane.b32.xlu1 %v11005_v14, %s5911_s19  ;;  %4904 = vrot.lane.b32.xlu0 %v11007_v55, %s5911_s19 }
 0x6b7   :  { %4888 = vrot.lane.b32.xlu2 %v4858_v48, %s5911_s19  ;;  %5433 = vmatpush.msra.mxu2 %v5200_v21 }
 0x6be   :  { %4906 = vrot.lane.b32.xlu1 %v11026_v12, %s5911_s19  ;;  %4910 = vrot.lane.b32.xlu0 %v11028_v46, %s5911_s19 }
 0x6bf   :  { %4908 = vrot.lane.b32.xlu2 %v4868_v1, %s5911_s19 }
 0x6c6   :  { %4898 = vrot.lane.b32.xlu0 %v11039_v29, %s5911_s19 }
 0x6c7   :  { %4896 = vrot.lane.b32.xlu2 %v11041_v32, %s5911_s19 }
 0x709   :  { %v4901_v50 = vpop.permute.xlu2 %4900 }
 0x70a   :  { %v4920_v47 = vrot.slane %v4901_v50, 2  ;;  %v4934_v10 = vrot.slane %v4901_v50, 4 }
 0x70c   :  { %v4948_v2 = vsel %vm220_vm9, %v4920_v47, %v4934_v10 }
 0x70d   :  { %v4976_v17 = vmax.f32 %v4864_v3, %v4948_v2 }
 0x70f   :  { %v5004_v23 = vmul.f32 0.0001, %v4976_v17  ;;  %vm4990_vm0 = vcmp.gt.f32.partialorder %v4976_v17, 0.0 }
 0x710   :  { %v4887_v61 = vpop.permute.xlu1 %4886 }
 0x711   :  { %v4913_v54 = vrot.slane %v4887_v61, 2  ;;  %v4927_v5 = vrot.slane %v4887_v61, 4  ;;  %v4889_v45 = vpop.permute.xlu2 %4888  ;;  %v5018_v42 = vsel %vm4990_vm0, %v4976_v17, %v5004_v23 }
 0x712   :  { %v5041_v39 = vrot.slane %v5018_v42, 7  ;;  %v4914_v63 = vrot.slane %v4889_v45, 2  ;;  %v4928_v20 = vrot.slane %v4889_v45, 4 }
 0x713   :  { %v4941_v52 = vsel %vm220_vm9, %v4913_v54, %v4927_v5 }
 0x714   :  { %v4969_v58 = vmax.f32 %v10909_v31, %v4941_v52  ;;  %v4942_v0 = vsel %vm220_vm9, %v4914_v63, %v4928_v20 }
 0x715   :  { %v4970_v9 = vmax.f32 %v4858_v48, %v4942_v0  ;;  %v5184_v48 = vld [vmem:[%s11787_s3 + $0x178] sm:$0xff] }
 0x716   :  { %vm4983_vm14 = vcmp.gt.f32.partialorder %v4969_v58, 0.0  ;;  %v4997_v36 = vmul.f32 0.0001, %v4969_v58  ;;  %5413 = vmatpush.msra.mxu1 %v5184_v48 }
 0x717   :  { %v4998_v41 = vmul.f32 0.0001, %v4970_v9  ;;  %vm4984_vm1 = vcmp.gt.f32.partialorder %v4970_v9, 0.0 }
 0x718   :  { %v4891_v28 = vpop.permute.xlu1 %4890  ;;  %v5011_v7 = vsel %vm4983_vm14, %v4969_v58, %v4997_v36 }
 0x719   :  { %v4909_v19 = vpop.permute.xlu2 %4908  ;;  %v5042_v3 = vsel %vm1989_vm11, %v5041_v39, %v5011_v7  ;;  %v4915_v30 = vrot.slane %v4891_v28, 2  ;;  %v4929_v37 = vrot.slane %v4891_v28, 4  ;;  %v5012_v61 = vsel %vm4984_vm1, %v4970_v9, %v4998_v41 }
 0x71a   :  { %v4924_v6 = vrot.slane %v4909_v19, 2  ;;  %v4938_v25 = vrot.slane %v4909_v19, 4  ;;  %v5043_v59 = vsel %vm1974_vm8, %v5041_v39, %v5042_v3  ;;  %vm5051_vm1 = vcmask 1042176  }
 0x71b   :  { %v5044_v43 = vsel %vm1978_vm15, %v5041_v39, %v5043_v59  ;;  %v4943_v40 = vsel %vm220_vm9, %v4915_v30, %v4929_v37 }
 0x71c   :  { %v4952_v44 = vsel %vm220_vm9, %v4924_v6, %v4938_v25  ;;  %v5045_v31 = vsel %vm1982_vm6, %v5041_v39, %v5044_v43  ;;  %v4971_v17 = vmax.f32 %v10945_v56, %v4943_v40 }
 0x71d   :  { %v4980_v18 = vmax.f32 %v4868_v1, %v4952_v44  ;;  %5046 = vrot.lane.b32.xlu2 %v5045_v31, %s5912_s20 }
 0x71e   :  { %v4999_v63 = vmul.f32 0.0001, %v4971_v17  ;;  %vm4985_vm7 = vcmp.gt.f32.partialorder %v4971_v17, 0.0 }
 0x71f   :  { %v5008_v38 = vmul.f32 0.0001, %v4980_v18  ;;  %vm4994_vm13 = vcmp.gt.f32.partialorder %v4980_v18, 0.0 }
 0x720   :  { %v4895_v15 = vpop.permute.xlu1 %4894  ;;  %v4903_v16 = vpop.permute.xlu0 %4902  ;;  %v5013_v9 = vsel %vm4985_vm7, %v4971_v17, %v4999_v63  ;;  %v5183_v17 = vld [vmem:[%s11787_s3 + $0x170] sm:$0xff] }
 0x721   :  { %v4917_v57 = vrot.slane %v4895_v15, 2  ;;  %v4931_v35 = vrot.slane %v4895_v15, 4  ;;  %v4921_v33 = vrot.slane %v4903_v16, 2  ;;  %v4935_v27 = vrot.slane %v4903_v16, 4  ;;  %v4897_v26 = vpop.permute.xlu2 %4896  ;;  %5414 = vmatpush.msra.mxu1 %v5183_v17  ;;  %v5147_v63 = vld [vmem:[%s11787_s3 + $0x50] sm:$0xff]  ;;  %v5186_v17 = vld [vmem:[%s11787_s3 + $0x188] sm:$0xff] }
 0x722   :  { %v5022_v1 = vsel %vm4994_vm13, %v4980_v18, %v5008_v38  ;;  %v4918_v5 = vrot.slane %v4897_v26, 2  ;;  %v4932_v45 = vrot.slane %v4897_v26, 4  ;;  %vm5034_vm13 = vcmask 781314  }
 0x723   :  { %v4945_v11 = vsel %vm220_vm9, %v4917_v57, %v4931_v35  ;;  %v4949_v49 = vsel %vm220_vm9, %v4921_v33, %v4935_v27  ;;  %v5107_v10 = vrot.slane %v5022_v1, 7 }
 0x724   :  { %v4973_v62 = vmax.f32 %v10984_v8, %v4945_v11  ;;  %v4977_v4 = vmax.f32 %v10989_v13, %v4949_v49  ;;  %v4946_v20 = vsel %vm220_vm9, %v4918_v5, %v4932_v45  ;;  %v5182_v5 = vld [vmem:[%s11787_s3 + $0x168] sm:$0xff] }
 0x725   :  { %4892 = vrot.lane.b32.xlu2 %v11065_v60, %s5911_s19  ;;  %v4974_v44 = vmax.f32 %v11041_v32, %v4946_v20  ;;  %v5198_v45 = vld [vmem:[%s11787_s3 + $0x1e8] sm:$0xff]  ;;  %5415 = vmatpush.msra.mxu1 %v5182_v5  ;;  %v5163_v20 = vld [vmem:[%s11787_s3 + $0xd0] sm:$0xff]  ;;  %v5169_v5 = vld [vmem:[%s11787_s3 + $0x100] sm:$0xff] }
 0x726   :  { %vm4987_vm5 = vcmp.gt.f32.partialorder %v4973_v62, 0.0  ;;  %v5001_v53 = vmul.f32 0.0001, %v4973_v62  ;;  %vm4991_vm10 = vcmp.gt.f32.partialorder %v4977_v4, 0.0  ;;  %v5005_v24 = vmul.f32 0.0001, %v4977_v4 }
 0x727   :  { %v5002_v57 = vmul.f32 0.0001, %v4974_v44  ;;  %vm4988_vm4 = vcmp.gt.f32.partialorder %v4974_v44, 0.0 }
 0x728   :  { %v4905_v50 = vpop.permute.xlu0 %4904  ;;  %v5015_v47 = vsel %vm4987_vm5, %v4973_v62, %v5001_v53  ;;  %v5019_v8 = vsel %vm4991_vm10, %v4977_v4, %v5005_v24  ;;  %v4885_v3 = vpop.permute.xlu1 %4884  ;;  %vm12041_vm5 = vcmask 1041408  }
 0x729   :  { %v4922_v2 = vrot.slane %v4905_v50, 2  ;;  %v4936_v13 = vrot.slane %v4905_v50, 4  ;;  %v5108_v23 = vsel %vm1989_vm11, %v5107_v10, %v5015_v47  ;;  %v5060_v54 = vrot.slane %v5019_v8, 7  ;;  %vm11114_vm10 = vmor %vm5034_vm13, %vm12041_vm5 }
 0x72a   :  { %v5109_v58 = vsel %vm1974_vm8, %v5107_v10, %v5108_v23  ;;  %v4912_v0 = vrot.slane %v4885_v3, 2  ;;  %v4926_v18 = vrot.slane %v4885_v3, 4  ;;  %v5016_v37 = vsel %vm4988_vm4, %v4974_v44, %v5002_v57  ;;  %v5199_v23 = vld [vmem:[%s11787_s3 + $0x1f0] sm:$0xff]  ;;  %v5161_v44 = vld [vmem:[%s11787_s3 + $0xc0] sm:$0xff] }
 0x72b   :  { %v4950_v52 = vsel %vm220_vm9, %v4922_v2, %v4936_v13  ;;  %v5110_v36 = vsel %vm1978_vm15, %v5107_v10, %v5109_v58  ;;  %v5061_v39 = vsel %vm1989_vm11, %v5060_v54, %v5012_v61  ;;  %v5151_v2 = vld [vmem:[%s11787_s3 + $0x70] sm:$0xff]  ;;  %v5150_v61 = vld [vmem:[%s11787_s3 + $0x68] sm:$0xff]  ;;  %5434 = vmatpush.msra.mxu2 %v5199_v23  ;;  %v5165_v58 = vld [vmem:[%s11787_s3 + $0xe0] sm:$0xff] }
 0x72c   :  { %v4978_v42 = vmax.f32 %v11007_v55, %v4950_v52  ;;  %v5111_v28 = vsel %vm1982_vm6, %v5107_v10, %v5110_v36  ;;  %v5062_v56 = vsel %vm1974_vm8, %v5060_v54, %v5061_v39  ;;  %v4940_v33 = vsel %vm220_vm9, %v4912_v0, %v4926_v18  ;;  %v5167_v13 = vld [vmem:[%s11787_s3 + $0xf0] sm:$0xff]  ;;  %5374 = vmatpush.msra.mxu3 %v5151_v2  ;;  %v5149_v52 = vld [vmem:[%s11787_s3 + $0x60] sm:$0xff]  ;;  %v5148_v39 = vld [vmem:[%s11787_s3 + $0x58] sm:$0xff] }
 0x72d   :  { %5112 = vrot.lane.b32.xlu1 %v5111_v28, %s5912_s20  ;;  %v5063_v19 = vsel %vm1978_vm15, %v5060_v54, %v5062_v56  ;;  %v4968_v30 = vmax.f32 %v11005_v14, %v4940_v33  ;;  %5394 = vmatpush.msra.mxu0 %v5167_v13  ;;  %v5197_v36 = vld [vmem:[%s11787_s3 + $0x1e0] sm:$0xff]  ;;  %v5164_v28 = vld [vmem:[%s11787_s3 + $0xd8] sm:$0xff]  ;;  %v5195_v3 = vld [vmem:[%s11787_s3 + $0x1d0] sm:$0xff] }
 0x72e   :  { %vm4992_vm3 = vcmp.gt.f32.partialorder %v4978_v42, 0.0  ;;  %v5006_v7 = vmul.f32 0.0001, %v4978_v42  ;;  %v5064_v55 = vsel %vm1982_vm6, %v5060_v54, %v5063_v19  ;;  %v5166_v54 = vld [vmem:[%s11787_s3 + $0xe8] sm:$0xff]  ;;  %5375 = vmatpush.msra.mxu3 %v5150_v61  ;;  %5435 = vmatpush.msra.mxu2 %v5198_v45  ;;  %v5180_v56 = vld [vmem:[%s11787_s3 + $0x158] sm:$0xff]  ;;  %v5179_v19 = vld [vmem:[%s11787_s3 + $0x150] sm:$0xff] }
 0x72f   :  { %5065 = vrot.lane.b32.xlu0 %v5064_v55, %s5910_s18  ;;  %v4996_v1 = vmul.f32 0.0001, %v4968_v30  ;;  %vm4982_vm14 = vcmp.gt.f32.partialorder %v4968_v30, 0.0  ;;  %5395 = vmatpush.msra.mxu0 %v5166_v54  ;;  %v5146_v55 = vld [vmem:[%s11787_s3 + $0x48] sm:$0xff]  ;;  %v5193_v0 = vld [vmem:[%s11787_s3 + $0x1c0] sm:$0xff]  ;;  %v5144_v18 = vld [vmem:[%s11787_s3 + $0x38] sm:$0xff] }
 0x730   :  { %v4911_v6 = vpop.permute.xlu0 %4910  ;;  %v5020_v25 = vsel %vm4992_vm3, %v4978_v42, %v5006_v7  ;;  %v5181_v42 = vld [vmem:[%s11787_s3 + $0x160] sm:$0xff]  ;;  %5376 = vmatpush.msra.mxu3 %v5149_v52  ;;  %v5196_v7 = vld [vmem:[%s11787_s3 + $0x1d8] sm:$0xff]  ;;  %5436 = vmatpush.msra.mxu2 %v5197_v36  ;;  %v5175_v57 = vld [vmem:[%s11787_s3 + $0x130] sm:$0xff]  ;;  %vm12044_vm3 = vcmask 1043458  }
 0x731   :  { %v4925_v59 = vrot.slane %v4911_v6, 2  ;;  %v4939_v43 = vrot.slane %v4911_v6, 4  ;;  %v5079_v31 = vrot.slane %v5020_v25, 7  ;;  %v5010_v26 = vsel %vm4982_vm14, %v4968_v30, %v4996_v1  ;;  %5396 = vmatpush.msra.mxu0 %v5165_v58  ;;  %5416 = vmatpush.msra.mxu1 %v5181_v42  ;;  %v5162_v6 = vld [vmem:[%s11787_s3 + $0xc8] sm:$0xff]  ;;  %v5189_v30 = vld [vmem:[%s11787_s3 + $0x1a0] sm:$0xff]  ;;  %vm11269_vm7 = vmor %vm12044_vm3, %vm5051_vm1 }
 0x732   :  { %5377 = vmatpush.msra.mxu3 %v5148_v39  ;;  %5437 = vmatpush.msra.mxu2 %v5196_v7  ;;  %v5178_v25 = vld [vmem:[%s11787_s3 + $0x148] sm:$0xff]  ;;  %v5137_v23 = vld [vmem:[%s11787_s3] sm:$0xff]  ;;  %v5216_v58 = vld [vmem:[%s11787_s3 + $0x278] sm:$0xff]  ;;  %vm12052_vm1 = vcmask 523264  }
 0x733   :  { %v4953_v34 = vsel %vm220_vm9, %v4925_v59, %v4939_v43  ;;  %v5080_v15 = vsel %vm1989_vm11, %v5079_v31, %v5013_v9  ;;  %5397 = vmatpush.msra.mxu0 %v5164_v28  ;;  %5417 = vmatpush.msra.mxu1 %v5180_v56  ;;  %v5194_v59 = vld [vmem:[%s11787_s3 + $0x1c8] sm:$0xff]  ;;  %v5145_v43 = vld [vmem:[%s11787_s3 + $0x40] sm:$0xff]  ;;  %v5176_v9 = vld [vmem:[%s11787_s3 + $0x138] sm:$0xff] }
 0x734   :  { %v4981_v38 = vmax.f32 %v11028_v46, %v4953_v34  ;;  %v5081_v16 = vsel %vm1974_vm8, %v5079_v31, %v5080_v15  ;;  %5378 = vmatpush.msra.mxu3 %v5147_v63  ;;  %5438 = vmatpush.msra.mxu2 %v5195_v3  ;;  %v5160_v34 = vld [vmem:[%s11787_s3 + $0xb8] sm:$0xff]  ;;  %v5143_v15 = vld [vmem:[%s11787_s3 + $0x30] sm:$0xff]  ;;  %v5142_v33 = vld [vmem:[%s11787_s3 + $0x28] sm:$0xff] }
 0x735   :  { %v5082_v32 = vsel %vm1978_vm15, %v5079_v31, %v5081_v16  ;;  %5398 = vmatpush.msra.mxu0 %v5163_v20  ;;  %5418 = vmatpush.msra.mxu1 %v5179_v19  ;;  %v5159_v16 = vld [vmem:[%s11787_s3 + $0xb0] sm:$0xff]  ;;  %v5170_v13 = vld [vmem:[%s11787_s3 + $0x108] sm:$0xff]  ;;  %v5153_v61 = vld [vmem:[%s11787_s3 + $0x80] sm:$0xff] }
 0x736   :  { %vm4995_vm12 = vcmp.gt.f32.partialorder %v4981_v38, 0.0  ;;  %v5009_v35 = vmul.f32 0.0001, %v4981_v38  ;;  %v5083_v27 = vsel %vm1982_vm6, %v5079_v31, %v5082_v32  ;;  %5379 = vmatpush.msra.mxu3 %v5146_v55  ;;  %v5177_v31 = vld [vmem:[%s11787_s3 + $0x140] sm:$0xff]  ;;  %5439 = vmatpush.msra.mxu2 %v5194_v59  ;;  %v5158_v32 = vld [vmem:[%s11787_s3 + $0xa8] sm:$0xff]  ;;  %v5232_v42 = vld [vmem:[%s11787_s3 + $0x2f8] sm:$0xff] }
 0x737   :  { %5084 = vrot.lane.b32.xlu0 %v5083_v27, %s5911_s19  ;;  %5399 = vmatpush.msra.mxu0 %v5162_v6  ;;  %v5174_v27 = vld [vmem:[%s11787_s3 + $0x128] sm:$0xff]  ;;  %v5185_v45 = vld [vmem:[%s11787_s3 + $0x180] sm:$0xff]  ;;  %v5248_v36 = vld [vmem:[%s11787_s3 + $0x378] sm:$0xff] }
 0x738   :  { %v4899_v22 = vpop.permute.xlu0 %4898  ;;  %v5023_v51 = vsel %vm4995_vm12, %v4981_v38, %v5009_v35  ;;  %5419 = vmatpush.msra.mxu1 %v5178_v25  ;;  %5380 = vmatpush.msra.mxu3 %v5145_v43  ;;  %v5192_v38 = vld [vmem:[%s11787_s3 + $0x1b8] sm:$0xff]  ;;  %v5191_v35 = vld [vmem:[%s11787_s3 + $0x1b0] sm:$0xff]  ;;  %vm5053_vm12 = vcmask 521220   ;;  %v5214_v19 = vld [vmem:[%s11787_s3 + $0x268] sm:$0xff] }
 0x739   :  { %v4919_v48 = vrot.slane %v4899_v22, 2  ;;  %v4933_v46 = vrot.slane %v4899_v22, 4  ;;  %v5122_v21 = vrot.slane %v5023_v51, 7  ;;  %5400 = vmatpush.msra.mxu0 %v5161_v44  ;;  %5440 = vmatpush.msra.mxu2 %v5193_v0  ;;  %v5190_v22 = vld [vmem:[%s11787_s3 + $0x1a8] sm:$0xff]  ;;  %v4907_v51 = vpop.permute.xlu1 %4906  ;;  %vm11295_vm4 = vmor %vm5053_vm12, %vm11269_vm7  ;;  %v5215_v39 = vld [vmem:[%s11787_s3 + $0x270] sm:$0xff]  ;;  %vm5089_vm7 = vcmask 1041664  }
 0x73a   :  { %5420 = vmatpush.msra.mxu1 %v5177_v31  ;;  %5381 = vmatpush.msra.mxu3 %v5144_v18  ;;  %v5231_v28 = vld [vmem:[%s11787_s3 + $0x2f0] sm:$0xff]  ;;  %v5230_v3 = vld [vmem:[%s11787_s3 + $0x2e8] sm:$0xff]  ;;  %v5213_v43 = vld [vmem:[%s11787_s3 + $0x260] sm:$0xff] }
 0x73b   :  { %v4947_v11 = vsel %vm220_vm9, %v4919_v48, %v4933_v46  ;;  %v5123_v49 = vsel %vm1989_vm11, %v5122_v21, %v5016_v37  ;;  %5401 = vmatpush.msra.mxu0 %v5160_v34  ;;  %5441 = vmatpush.msra.mxu2 %v5192_v38  ;;  %v5141_v48 = vld [vmem:[%s11787_s3 + $0x20] sm:$0xff]  ;;  %v5140_v37 = vld [vmem:[%s11787_s3 + $0x18] sm:$0xff]  ;;  %v5247_v56 = vld [vmem:[%s11787_s3 + $0x370] sm:$0xff] }
 0x73c   :  { %v4975_v62 = vmax.f32 %v11039_v29, %v4947_v11  ;;  %v5124_v4 = vsel %vm1974_vm8, %v5122_v21, %v5123_v49  ;;  %5421 = vmatpush.msra.mxu1 %v5176_v9  ;;  %5382 = vmatpush.msra.mxu3 %v5143_v15  ;;  %v5157_v46 = vld [vmem:[%s11787_s3 + $0xa0] sm:$0xff]  ;;  %v5156_v11 = vld [vmem:[%s11787_s3 + $0x98] sm:$0xff]  ;;  %v4923_v49 = vrot.slane %v4907_v51, 2  ;;  %v5263_v7 = vld [vmem:[%s11787_s3 + $0x3f0] sm:$0xff] }
 0x73d   :  { %v5125_v41 = vsel %vm1978_vm15, %v5122_v21, %v5124_v4  ;;  %5402 = vmatpush.msra.mxu0 %v5159_v16  ;;  %5442 = vmatpush.msra.mxu2 %v5191_v35  ;;  %v5172_v4 = vld [vmem:[%s11787_s3 + $0x118] sm:$0xff]  ;;  %v5246_v25 = vld [vmem:[%s11787_s3 + $0x368] sm:$0xff]  ;;  %v5229_v44 = vld [vmem:[%s11787_s3 + $0x2e0] sm:$0xff] }
 0x73e   :  { %vm4989_vm0 = vcmp.gt.f32.partialorder %v4975_v62, 0.0  ;;  %v5003_v53 = vmul.f32 0.0001, %v4975_v62  ;;  %v5126_v24 = vsel %vm1982_vm6, %v5122_v21, %v5125_v41  ;;  %5422 = vmatpush.msra.mxu1 %v5175_v57  ;;  %5383 = vmatpush.msra.mxu3 %v5142_v33  ;;  %v5173_v21 = vld [vmem:[%s11787_s3 + $0x120] sm:$0xff]  ;;  %v5188_v41 = vld [vmem:[%s11787_s3 + $0x198] sm:$0xff]  ;;  %v5262_v59 = vld [vmem:[%s11787_s3 + $0x3e8] sm:$0xff] }
 0x73f   :  { %5127 = vrot.lane.b32.xlu2 %v5126_v24, %s5910_s18  ;;  %5403 = vmatpush.msra.mxu0 %v5158_v32  ;;  %v5155_v24 = vld [vmem:[%s11787_s3 + $0x90] sm:$0xff]  ;;  %v5245_v0 = vld [vmem:[%s11787_s3 + $0x360] sm:$0xff]  ;;  %v5212_v38 = vld [vmem:[%s11787_s3 + $0x258] sm:$0xff] }
 0x740   :  { %v5017_v14 = vsel %vm4989_vm0, %v4975_v62, %v5003_v53  ;;  %5423 = vmatpush.msra.mxu1 %v5174_v27  ;;  %5443 = vmatpush.msra.mxu2 %v5190_v22  ;;  %v4937_v62 = vrot.slane %v4907_v51, 4  ;;  %v5139_v53 = vld [vmem:[%s11787_s3 + $0x10] sm:$0xff]  ;;  %vm12049_vm0 = vcmask 785408   ;;  %v5261_v18 = vld [vmem:[%s11787_s3 + $0x3e0] sm:$0xff]  ;;  %v5228_v15 = vld [vmem:[%s11787_s3 + $0x2d8] sm:$0xff] }
 0x741   :  { %v5028_v40 = vrot.slane %v5017_v14, 7  ;;  %5384 = vmatpush.msra.mxu3 %v5141_v48  ;;  %5404 = vmatpush.msra.mxu0 %v5157_v46  ;;  %v5171_v14 = vld [vmem:[%s11787_s3 + $0x110] sm:$0xff]  ;;  %v5244_v16 = vld [vmem:[%s11787_s3 + $0x358] sm:$0xff]  ;;  %v5241_v1 = vld [vmem:[%s11787_s3 + $0x340] sm:$0xff] }
 0x742   :  { %5424 = vmatpush.msra.mxu1 %v5173_v21  ;;  %5444 = vmatpush.msra.mxu2 %v5189_v30  ;;  %v5211_v35 = vld [vmem:[%s11787_s3 + $0x250] sm:$0xff]  ;;  %v5210_v21 = vld [vmem:[%s11787_s3 + $0x248] sm:$0xff]  ;;  %v5240_v29 = vld [vmem:[%s11787_s3 + $0x338] sm:$0xff] }
 0x743   :  { %v5029_v50 = vsel %vm1989_vm11, %v5028_v40, %v5010_v26  ;;  %5385 = vmatpush.msra.mxu3 %v5140_v37  ;;  %5405 = vmatpush.msra.mxu0 %v5156_v11  ;;  %v5227_v33 = vld [vmem:[%s11787_s3 + $0x2d0] sm:$0xff]  ;;  %v5226_v30 = vld [vmem:[%s11787_s3 + $0x2c8] sm:$0xff] }
 0x744   :  { %v5030_v47 = vsel %vm1974_vm8, %v5028_v40, %v5029_v50  ;;  %5425 = vmatpush.msra.mxu1 %v5172_v4  ;;  %5445 = vmatpush.msra.mxu2 %v5188_v41  ;;  %v5138_v50 = vld [vmem:[%s11787_s3 + $0x8] sm:$0xff]  ;;  %v5243_v27 = vld [vmem:[%s11787_s3 + $0x350] sm:$0xff]  ;;  %v5209_v4 = vld [vmem:[%s11787_s3 + $0x240] sm:$0xff] }
 0x745   :  { %v5031_v10 = vsel %vm1978_vm15, %v5028_v40, %v5030_v47  ;;  %v5154_v47 = vld [vmem:[%s11787_s3 + $0x88] sm:$0xff]  ;;  %5386 = vmatpush.msra.mxu3 %v5139_v53  ;;  %5406 = vmatpush.msra.mxu0 %v5155_v24  ;;  %v5259_v22 = vld [vmem:[%s11787_s3 + $0x3d0] sm:$0xff]  ;;  %v5225_v41 = vld [vmem:[%s11787_s3 + $0x2c0] sm:$0xff] }
 0x746   :  { %v5032_v8 = vsel %vm1982_vm6, %v5028_v40, %v5031_v10  ;;  %v5187_v40 = vld [vmem:[%s11787_s3 + $0x190] sm:$0xff]  ;;  %v4951_v10 = vsel %vm220_vm9, %v4923_v49, %v4937_v62  ;;  %5426 = vmatpush.msra.mxu1 %v5171_v14  ;;  %v5242_v37 = vld [vmem:[%s11787_s3 + $0x348] sm:$0xff]  ;;  %v5257_v53 = vld [vmem:[%s11787_s3 + $0x3c0] sm:$0xff] }
 0x747   :  { %5036 = vst.msk [vmem:[#allocation6] sm:$0xf] %vm11114_vm10, %v5032_v8  ;;  %5446 = vmatpush.msra.mxu2 %v5187_v40  ;;  %5387 = vmatpush.msra.mxu3 %v5138_v50  ;;  %v4979_v52 = vmax.f32 %v11026_v12, %v4951_v10  ;;  %v5264_v12 = vld [vmem:[%s11787_s3 + $0x3f8] sm:$0xff]  ;;  %v5258_v49 = vld [vmem:[%s11787_s3 + $0x3c8] sm:$0xff]  ;;  %v5223_v50 = vld [vmem:[%s11787_s3 + $0x2b0] sm:$0xff] }
 0x748   :  { %5407 = vmatpush.msra.mxu0 %v5154_v47  ;;  %5427 = vmatpush.msra.mxu1 %v5170_v13  ;;  %v5208_v24 = vld [vmem:[%s11787_s3 + $0x238] sm:$0xff]  ;;  %v5239_v47 = vld [vmem:[%s11787_s3 + $0x330] sm:$0xff]  ;;  %v5222_v13 = vld [vmem:[%s11787_s3 + $0x2a8] sm:$0xff] }
 0x749   :  { %5447 = vmatpush.msra.mxu2 %v5186_v17  ;;  %5388 = vmatpush.msra.mxu3 %v5137_v23  ;;  %v5007_v63 = vmul.f32 0.0001, %v4979_v52  ;;  %vm4993_vm14 = vcmp.gt.f32.partialorder %v4979_v52, 0.0  ;;  %v5224_v14 = vld [vmem:[%s11787_s3 + $0x2b8] sm:$0xff]  ;;  %v5255_v10 = vld [vmem:[%s11787_s3 + $0x3b0] sm:$0xff]  ;;  %v5238_v17 = vld [vmem:[%s11787_s3 + $0x328] sm:$0xff] }
 0x74a   :  { %5408 = vmatpush.msra.mxu0 %v5153_v61  ;;  %5428 = vmatpush.msra.mxu1 %v5169_v5  ;;  %v5256_v40 = vld [vmem:[%s11787_s3 + $0x3b8] sm:$0xff]  ;;  %v5254_v23 = vld [vmem:[%s11787_s3 + $0x3a8] sm:$0xff]  ;;  %v5205_v61 = vld [vmem:[%s11787_s3 + $0x220] sm:$0xff] }
 0x74b   :  { %5448 = vmatpush.msra.mxu2 %v5185_v45  ;;  %5453 = vmatpush.msrb.mxu3 %v5216_v58  ;;  %v5021_v34 = vsel %vm4993_vm14, %v4979_v52, %v5007_v63  ;;  %v5237_v5 = vld [vmem:[%s11787_s3 + $0x320] sm:$0xff]  ;;  %v5204_v52 = vld [vmem:[%s11787_s3 + $0x218] sm:$0xff]  ;;  %v5218_v63 = vld [vmem:[%s11787_s3 + $0x288] sm:$0xff] }
 0x74c   :  { %5473 = vmatpush.msrb.mxu0 %v5232_v42  ;;  %5493 = vmatpush.msrb.mxu1 %v5248_v36  ;;  %v5096_v32 = vrot.slane %v5021_v34, 7  ;;  %v5253_v45 = vld [vmem:[%s11787_s3 + $0x3a0] sm:$0xff]  ;;  %v5220_v58 = vld [vmem:[%s11787_s3 + $0x298] sm:$0xff] }
 0x74d   :  { %5513 = vmatpush.msrb.mxu2 %v5264_v12  ;;  %5454 = vmatpush.msrb.mxu3 %v5215_v39  ;;  %v5236_v42 = vld [vmem:[%s11787_s3 + $0x318] sm:$0xff]  ;;  %v5203_v12 = vld [vmem:[%s11787_s3 + $0x210] sm:$0xff] }
 0x74e   :  { %5474 = vmatpush.msrb.mxu0 %v5231_v28  ;;  %5494 = vmatpush.msrb.mxu1 %v5247_v56  ;;  %v5252_v36 = vld [vmem:[%s11787_s3 + $0x398] sm:$0xff]  ;;  %v5219_v39 = vld [vmem:[%s11787_s3 + $0x290] sm:$0xff] }
 0x74f   :  { %5514 = vmatpush.msrb.mxu2 %v5263_v7  ;;  %5455 = vmatpush.msrb.mxu3 %v5214_v19  ;;  %v5235_v28 = vld [vmem:[%s11787_s3 + $0x310] sm:$0xff]  ;;  %v5202_v7 = vld [vmem:[%s11787_s3 + $0x208] sm:$0xff]  ;;  %v5280_v8 = vld [vmem:[%s11787_s3 + $0x478] sm:$0xff] }
 0x750   :  { %5475 = vmatpush.msrb.mxu0 %v5230_v3  ;;  %5495 = vmatpush.msrb.mxu1 %v5246_v25  ;;  %v5251_v56 = vld [vmem:[%s11787_s3 + $0x390] sm:$0xff]  ;;  %v5250_v19 = vld [vmem:[%s11787_s3 + $0x388] sm:$0xff]  ;;  %v5201_v3 = vld [vmem:[%s11787_s3 + $0x200] sm:$0xff] }
 0x751   :  { %5515 = vmatpush.msrb.mxu2 %v5262_v59  ;;  %5456 = vmatpush.msrb.mxu3 %v5213_v43  ;;  %v5249_v25 = vld [vmem:[%s11787_s3 + $0x380] sm:$0xff] }
 0x752   :  { %5476 = vmatpush.msrb.mxu0 %v5229_v44  ;;  %5496 = vmatpush.msrb.mxu1 %v5245_v0 }
 0x753   :  { %5516 = vmatpush.msrb.mxu2 %v5261_v18  ;;  %5457 = vmatpush.msrb.mxu3 %v5212_v38 }
 0x754   :  { %5477 = vmatpush.msrb.mxu0 %v5228_v15  ;;  %5497 = vmatpush.msrb.mxu1 %v5244_v16 }
 0x755   :  { %5458 = vmatpush.msrb.mxu3 %v5211_v35  ;;  %v5296_v35 = vld [vmem:[%s11787_s3 + $0x4f8] sm:$0xff] }
 0x756   :  { %5478 = vmatpush.msrb.mxu0 %v5227_v33  ;;  %5498 = vmatpush.msrb.mxu1 %v5243_v27  ;;  %v5312_v33 = vld [vmem:[%s11787_s3 + $0x578] sm:$0xff] }
 0x757   :  { %5459 = vmatpush.msrb.mxu3 %v5210_v21  ;;  %v5295_v21 = vld [vmem:[%s11787_s3 + $0x4f0] sm:$0xff] }
 0x758   :  { %5479 = vmatpush.msrb.mxu0 %v5226_v30  ;;  %5499 = vmatpush.msrb.mxu1 %v5242_v37 }
 0x759   :  { %5460 = vmatpush.msrb.mxu3 %v5209_v4  ;;  %v5294_v4 = vld [vmem:[%s11787_s3 + $0x4e8] sm:$0xff] }
 0x75a   :  { %5480 = vmatpush.msrb.mxu0 %v5225_v41  ;;  %5500 = vmatpush.msrb.mxu1 %v5241_v1  ;;  %v5310_v41 = vld [vmem:[%s11787_s3 + $0x568] sm:$0xff] }
 0x75b   :  { %5461 = vmatpush.msrb.mxu3 %v5208_v24  ;;  %v5326_v1 = vld [vmem:[%s11787_s3 + $0x5e8] sm:$0xff]  ;;  %v5293_v24 = vld [vmem:[%s11787_s3 + $0x4e0] sm:$0xff] }
 0x75c   :  { %5481 = vmatpush.msrb.mxu0 %v5224_v14  ;;  %5501 = vmatpush.msrb.mxu1 %v5240_v29  ;;  %v5309_v14 = vld [vmem:[%s11787_s3 + $0x560] sm:$0xff] }
 0x75d   :  { %v5325_v29 = vld [vmem:[%s11787_s3 + $0x5e0] sm:$0xff] }
 0x75e   :  { %5482 = vmatpush.msrb.mxu0 %v5223_v50  ;;  %5502 = vmatpush.msrb.mxu1 %v5239_v47  ;;  %v5292_v50 = vld [vmem:[%s11787_s3 + $0x4d8] sm:$0xff] }
 0x760   :  { %5483 = vmatpush.msrb.mxu0 %v5222_v13  ;;  %5503 = vmatpush.msrb.mxu1 %v5238_v17  ;;  %v5308_v17 = vld [vmem:[%s11787_s3 + $0x558] sm:$0xff] }
 0x762   :  { %5504 = vmatpush.msrb.mxu1 %v5237_v5  ;;  %v5307_v5 = vld [vmem:[%s11787_s3 + $0x550] sm:$0xff] }
 0x764   :  { %5505 = vmatpush.msrb.mxu1 %v5236_v42  ;;  %v5306_v42 = vld [vmem:[%s11787_s3 + $0x548] sm:$0xff] }
 0x766   :  { %5506 = vmatpush.msrb.mxu1 %v5235_v28  ;;  %v5305_v28 = vld [vmem:[%s11787_s3 + $0x540] sm:$0xff] }
 0x777   :  { %v5047_v26 = vpop.permute.xlu2 %5046 }
 0x778   :  { %v5048_v2 = vrot.slane %v5047_v26, 6 }
 0x77a   :  { %v5049_v54 = vsel %vm12049_vm0, %v5048_v2, %v5047_v26  ;;  %v5207_v26 = vld [vmem:[%s11787_s3 + $0x230] sm:$0xff]  ;;  %v5206_v2 = vld [vmem:[%s11787_s3 + $0x228] sm:$0xff] }
 0x77b   :  { %5055 = vst.msk [vmem:[#allocation6 + $0x2] sm:$0x3f] %vm11295_vm4, %v5049_v54  ;;  %5462 = vmatpush.msrb.mxu3 %v5207_v26  ;;  %v5221_v54 = vld [vmem:[%s11787_s3 + $0x2a0] sm:$0xff]  ;;  %v5276_v26 = vld [vmem:[%s11787_s3 + $0x458] sm:$0xff] }
 0x77c   :  { %5484 = vmatpush.msrb.mxu0 %v5221_v54  ;;  %v5291_v54 = vld [vmem:[%s11787_s3 + $0x4d0] sm:$0xff] }
 0x77d   :  { %5463 = vmatpush.msrb.mxu3 %v5206_v2 }
 0x77e   :  { %5485 = vmatpush.msrb.mxu0 %v5220_v58  ;;  %v5290_v58 = vld [vmem:[%s11787_s3 + $0x4c8] sm:$0xff] }
 0x77f   :  { %v4893_v20 = vpop.permute.xlu2 %4892  ;;  %5464 = vmatpush.msrb.mxu3 %v5205_v61  ;;  %v5275_v61 = vld [vmem:[%s11787_s3 + $0x450] sm:$0xff] }
 0x780   :  { %v4916_v55 = vrot.slane %v4893_v20, 2  ;;  %v4930_v6 = vrot.slane %v4893_v20, 4  ;;  %5486 = vmatpush.msrb.mxu0 %v5219_v39  ;;  %v5234_v20 = vld [vmem:[%s11787_s3 + $0x308] sm:$0xff]  ;;  %v5289_v39 = vld [vmem:[%s11787_s3 + $0x4c0] sm:$0xff] }
 0x781   :  { %5465 = vmatpush.msrb.mxu3 %v5204_v52  ;;  %5507 = vmatpush.msrb.mxu1 %v5234_v20  ;;  %v5274_v52 = vld [vmem:[%s11787_s3 + $0x448] sm:$0xff]  ;;  %v5304_v20 = vld [vmem:[%s11787_s3 + $0x538] sm:$0xff] }
 0x782   :  { %v4944_v31 = vsel %vm220_vm9, %v4916_v55, %v4930_v6  ;;  %5487 = vmatpush.msrb.mxu0 %v5218_v63  ;;  %v5217_v55 = vld [vmem:[%s11787_s3 + $0x280] sm:$0xff]  ;;  %v5288_v63 = vld [vmem:[%s11787_s3 + $0x4b8] sm:$0xff] }
 0x783   :  { %v4972_v9 = vmax.f32 %v11065_v60, %v4944_v31  ;;  %v5260_v60 = vld [vmem:[%s11787_s3 + $0x3d8] sm:$0xff]  ;;  %5466 = vmatpush.msrb.mxu3 %v5203_v12  ;;  %v5233_v6 = vld [vmem:[%s11787_s3 + $0x300] sm:$0xff] }
 0x784   :  { %5517 = vmatpush.msrb.mxu2 %v5260_v60  ;;  %5488 = vmatpush.msrb.mxu0 %v5217_v55  ;;  %v5273_v12 = vld [vmem:[%s11787_s3 + $0x440] sm:$0xff]  ;;  %v5287_v55 = vld [vmem:[%s11787_s3 + $0x4b0] sm:$0xff] }
 0x785   :  { %vm4986_vm13 = vcmp.gt.f32.partialorder %v4972_v9, 0.0  ;;  %v5000_v57 = vmul.f32 0.0001, %v4972_v9  ;;  %5467 = vmatpush.msrb.mxu3 %v5202_v7  ;;  %5508 = vmatpush.msrb.mxu1 %v5233_v6  ;;  %v5272_v7 = vld [vmem:[%s11787_s3 + $0x438] sm:$0xff]  ;;  %v5303_v6 = vld [vmem:[%s11787_s3 + $0x530] sm:$0xff] }
 0x786   :  { %5518 = vmatpush.msrb.mxu2 %v5259_v22 }
 0x787   :  { %v5014_v51 = vsel %vm4986_vm13, %v4972_v9, %v5000_v57  ;;  %5468 = vmatpush.msrb.mxu3 %v5201_v3  ;;  %v5271_v3 = vld [vmem:[%s11787_s3 + $0x430] sm:$0xff] }
 0x788   :  { %v5097_v48 = vsel %vm1989_vm11, %v5096_v32, %v5014_v51  ;;  %5519 = vmatpush.msrb.mxu2 %v5258_v49  ;;  %vm5072_vm11 = vcmask 259076   ;;  %v5279_v51 = vld [vmem:[%s11787_s3 + $0x470] sm:$0xff] }
 0x789   :  { %v5098_v46 = vsel %vm1974_vm8, %v5096_v32, %v5097_v48  ;;  %vm12050_vm8 = vmmov %vm12044_vm3  ;;  %v5327_v49 = vld [vmem:[%s11787_s3 + $0x5f0] sm:$0xff] }
 0x78a   :  { %v5099_v11 = vsel %vm1978_vm15, %v5096_v32, %v5098_v46  ;;  %5520 = vmatpush.msrb.mxu2 %v5257_v53  ;;  %vm5070_vm15 = vcmask 1041920   ;;  %vm12053_vm3 = vmmov %vm12052_vm1  ;;  %v5277_v53 = vld [vmem:[%s11787_s3 + $0x460] sm:$0xff] }
 0x78b   :  { %v5100_v62 = vsel %vm1982_vm6, %v5096_v32, %v5099_v11  ;;  %vm5071_vm6 = vmor %vm12050_vm8, %vm5070_vm15  ;;  %v5328_v32 = vld [vmem:[%s11787_s3 + $0x5f8] sm:$0xff]  ;;  %v5311_v11 = vld [vmem:[%s11787_s3 + $0x570] sm:$0xff] }
 0x78c   :  { %5102 = vst.msk [vmem:[#allocation6 + $0xe] sm:$0xf] %vm11114_vm10, %v5100_v62  ;;  %5521 = vmatpush.msrb.mxu2 %v5256_v40  ;;  %vm5073_vm5 = vmor %vm5072_vm11, %vm5071_vm6  ;;  %v5278_v62 = vld [vmem:[%s11787_s3 + $0x468] sm:$0xff] }
 0x78d   :  { %vm12051_vm10 = vmmov %vm12049_vm0 }
 0x78e   :  { %5522 = vmatpush.msrb.mxu2 %v5255_v10  ;;  %vm12054_vm12 = vmmov %vm12050_vm8 }
 0x78f   :  { %vm5090_vm0 = vmor %vm12054_vm12, %vm5089_vm7 }
 0x790   :  { %5523 = vmatpush.msrb.mxu2 %v5254_v23  ;;  %v5324_v23 = vld [vmem:[%s11787_s3 + $0x5d8] sm:$0xff] }
 0x792   :  { %5524 = vmatpush.msrb.mxu2 %v5253_v45  ;;  %v5323_v45 = vld [vmem:[%s11787_s3 + $0x5d0] sm:$0xff] }
 0x794   :  { %5525 = vmatpush.msrb.mxu2 %v5252_v36  ;;  %v5322_v36 = vld [vmem:[%s11787_s3 + $0x5c8] sm:$0xff] }
 0x796   :  { %5526 = vmatpush.msrb.mxu2 %v5251_v56  ;;  %v5321_v56 = vld [vmem:[%s11787_s3 + $0x5c0] sm:$0xff] }
 0x798   :  { %5527 = vmatpush.msrb.mxu2 %v5250_v19  ;;  %v5320_v19 = vld [vmem:[%s11787_s3 + $0x5b8] sm:$0xff] }
 0x799   :  { %v5128_v59 = vpop.permute.xlu2 %5127 }
 0x79a   :  { %5528 = vmatpush.msrb.mxu2 %v5249_v25  ;;  %v5129_v43 = vrot.slane %v5128_v59, 6  ;;  %v5319_v25 = vld [vmem:[%s11787_s3 + $0x5b0] sm:$0xff] }
 0x79c   :  { %v5130_v34 = vsel %vm12052_vm1, %v5129_v43, %v5128_v59  ;;  %v5270_v59 = vld [vmem:[%s11787_s3 + $0x428] sm:$0xff] }
 0x79d   :  { %v5286_v43 = vld [vmem:[%s11787_s3 + $0x4a8] sm:$0xff] }
 0x79f   :  { %v5113_v44 = vpop.permute.xlu1 %5112 }
 0x7a0   :  { %v5114_v31 = vrot.slane %v5113_v44, 6 }
 0x7a1   :  { %v5066_v18 = vpop.permute.xlu0 %5065 }
 0x7a2   :  { %v5115_v0 = vsel %vm12051_vm10, %v5114_v31, %v5113_v44  ;;  %v5067_v9 = vrot.slane %v5066_v18, 6  ;;  %v5302_v44 = vld [vmem:[%s11787_s3 + $0x528] sm:$0xff] }
 0x7a3   :  { %5117 = vst.msk [vmem:[#allocation6 + $0x10] sm:$0x3f] %vm11295_vm4, %v5115_v0  ;;  %v5318_v31 = vld [vmem:[%s11787_s3 + $0x5a8] sm:$0xff]  ;;  %v5269_v0 = vld [vmem:[%s11787_s3 + $0x420] sm:$0xff]  ;;  %vm5680_vm4 = vcmask 214016  }
 0x7a4   :  { %5132 = vst.msk [vmem:[#allocation6 + $0x14] sm:$0x3f] %vm5073_vm5, %v5130_v34  ;;  %v5068_v38 = vsel %vm12053_vm3, %v5067_v9, %v5066_v18  ;;  %v5285_v18 = vld [vmem:[%s11787_s3 + $0x4a0] sm:$0xff] }
 0x7a5   :  { %5074 = vst.msk [vmem:[#allocation6 + $0x6] sm:$0x3f] %vm5073_vm5, %v5068_v38  ;;  %v5301_v34 = vld [vmem:[%s11787_s3 + $0x520] sm:$0xff]  ;;  %v5268_v38 = vld [vmem:[%s11787_s3 + $0x418] sm:$0xff] }
 0x7a6   :  { %v5317_v9 = vld [vmem:[%s11787_s3 + $0x5a0] sm:$0xff] }
 0x7a9   :  { %v5085_v15 = vpop.permute.xlu0 %5084 }
 0x7aa   :  { %v5086_v16 = vrot.slane %v5085_v15, 6 }
 0x7ab   :  { %v5135_v30 = vld [vmem:[#allocation6 + $0x10] sm:$0xff]  ;;  %v5136_v40 = vld [vmem:[#allocation6 + $0x18] sm:$0x3] }
 0x7ac   :  { %v5133_v60 = vld [vmem:[#allocation6] sm:$0xff]  ;;  %v5087_v57 = vsel %vm220_vm9, %v5086_v16, %v5085_v15  ;;  %v5284_v15 = vld [vmem:[%s11787_s3 + $0x498] sm:$0xff] }
 0x7ad   :  { %5341 = vst [vmem:[#allocation1] ss:$4 sm:$0xff] %v5133_v60  ;;  %v5300_v16 = vld [vmem:[%s11787_s3 + $0x518] sm:$0xff] }
 0x7ae   :  { %5091 = vst.msk [vmem:[#allocation6 + $0xa] sm:$0xf] %vm5090_vm0, %v5087_v57  ;;  %v5316_v60 = vld [vmem:[%s11787_s3 + $0x598] sm:$0xff]  ;;  %v5267_v57 = vld [vmem:[%s11787_s3 + $0x410] sm:$0xff] }
 0x7b4   :  { %v5344_v27 = vld.sshfl [vmem:[#allocation1] sm:$0xff pattern:$0x73625140]  ;;  %v5345_v22 = vld.sshfl [vmem:[#allocation1 + $0x8] sm:$0xff pattern:$0x73625140] }
 0x7b5   :  { %v5134_v48 = vld [vmem:[#allocation6 + $0x8] sm:$0xff]  ;;  %5389 = vmatmul.f32.vlgmr.msra.gmra.mxu3 %v5344_v27  ;;  %5409 = vmatmul.f32.vlgmr.msra.gmra.mxu0 %v5345_v22  ;;  %v5347_v37 = vld.sshfl [vmem:[#allocation1 + $0x18] sm:$0xff pattern:$0x73625140]  ;;  %v5282_v27 = vld [vmem:[%s11787_s3 + $0x488] sm:$0xff] }
 0x7b6   :  { %v5346_v46 = vld.sshfl [vmem:[#allocation1 + $0x10] sm:$0xff pattern:$0x73625140]  ;;  %5343 = vst [vmem:[#allocation1 + $0x20] ss:$4 sm:$0xff] %v5134_v48  ;;  %5533 = vmatpush.msra.mxu3 %v5280_v8  ;;  %5449 = vmatmul.f32.vlgmr.msra.gmra.mxu2 %v5347_v37  ;;  %v5298_v22 = vld [vmem:[%s11787_s3 + $0x508] sm:$0xff] }
 0x7b7   :  { %5429 = vmatmul.f32.vlgmr.msra.gmra.mxu1 %v5346_v46  ;;  %5352 = vst [vmem:[#allocation1] ss:$4 sm:$0xff] %v5135_v30  ;;  %5553 = vmatpush.msra.mxu0 %v5296_v35  ;;  %v5283_v8 = vld [vmem:[%s11787_s3 + $0x490] sm:$0xff]  ;;  %v5265_v48 = vld [vmem:[%s11787_s3 + $0x400] sm:$0xff]  ;;  %v5332_v37 = vld [vmem:[%s11787_s3 + $0x618] sm:$0xff] }
 0x7b8   :  { %5573 = vmatpush.msra.mxu1 %v5312_v33  ;;  %5593 = vmatpush.msra.mxu2 %v5328_v32  ;;  %v5299_v35 = vld [vmem:[%s11787_s3 + $0x510] sm:$0xff]  ;;  %v5266_v32 = vld [vmem:[%s11787_s3 + $0x408] sm:$0xff]  ;;  %v5281_v46 = vld [vmem:[%s11787_s3 + $0x480] sm:$0xff] }
 0x7b9   :  { %5534 = vmatpush.msra.mxu3 %v5279_v51  ;;  %5554 = vmatpush.msra.mxu0 %v5295_v21  ;;  %v5315_v33 = vld [vmem:[%s11787_s3 + $0x590] sm:$0xff]  ;;  %v5314_v51 = vld [vmem:[%s11787_s3 + $0x588] sm:$0xff]  ;;  %v5297_v21 = vld [vmem:[%s11787_s3 + $0x500] sm:$0xff] }
 0x7ba   :  { %5574 = vmatpush.msra.mxu1 %v5311_v11  ;;  %5594 = vmatpush.msra.mxu2 %v5327_v49  ;;  %v5313_v30 = vld [vmem:[%s11787_s3 + $0x580] sm:$0xff] }
 0x7bb   :  { %5535 = vmatpush.msra.mxu3 %v5278_v62  ;;  %5555 = vmatpush.msra.mxu0 %v5294_v4 }
 0x7bc   :  { %5575 = vmatpush.msra.mxu1 %v5310_v41  ;;  %5595 = vmatpush.msra.mxu2 %v5326_v1  ;;  %v5331_v41 = vld [vmem:[%s11787_s3 + $0x610] sm:$0xff]  ;;  %v5330_v1 = vld [vmem:[%s11787_s3 + $0x608] sm:$0xff] }
 0x7bd   :  { %5536 = vmatpush.msra.mxu3 %v5277_v53  ;;  %5556 = vmatpush.msra.mxu0 %v5293_v24  ;;  %v5348_v47 = vld.sshfl [vmem:[#allocation1 + $0x20] sm:$0xff pattern:$0x73625140]  ;;  %v5349_v10 = vld.sshfl [vmem:[#allocation1 + $0x28] sm:$0xff pattern:$0x73625140] }
 0x7be   :  { %5576 = vmatpush.msra.mxu1 %v5309_v14  ;;  %5596 = vmatpush.msra.mxu2 %v5325_v29  ;;  %v5350_v2 = vld.sshfl [vmem:[#allocation1 + $0x30] sm:$0xff pattern:$0x73625140]  ;;  %v5351_v13 = vld.sshfl [vmem:[#allocation1 + $0x38] sm:$0xff pattern:$0x73625140] }
 0x7bf   :  { %5469 = vmatmul.f32.vlgmr.msrb.gmra.mxu3 %v5348_v47  ;;  %5489 = vmatmul.f32.vlgmr.msrb.gmra.mxu0 %v5349_v10  ;;  %5353 = vst [vmem:[#allocation1 + $0x20] ss:$4 sm:$0xff] %v5136_v40  ;;  %v5354_v11 = vld.sshfl [vmem:[#allocation1] sm:$0xff pattern:$0x73625140]  ;;  %v5647_v29 = vld [vmem:[%s11789_s5 + $0x58] sm:$0xff] }
 0x7c0   :  { %5509 = vmatmul.f32.vlgmr.msrb.gmra.mxu1 %v5350_v2  ;;  %5529 = vmatmul.f32.vlgmr.msrb.gmra.mxu2 %v5351_v13  ;;  %v5355_v49 = vld.sshfl [vmem:[#allocation1 + $0x8] sm:$0xff pattern:$0x73625140]  ;;  %v5356_v62 = vld.sshfl [vmem:[#allocation1 + $0x10] sm:$0xff pattern:$0x73625140] }
 0x7c1   :  { %5537 = vmatpush.msra.mxu3 %v5276_v26  ;;  %5557 = vmatpush.msra.mxu0 %v5292_v50  ;;  %v5357_v4 = vld.sshfl [vmem:[#allocation1 + $0x18] sm:$0xff pattern:$0x73625140]  ;;  %v5329_v53 = vld [vmem:[%s11787_s3 + $0x600] sm:$0xff]  ;;  %v5646_v40 = vld [vmem:[%s11789_s5 + $0x50] sm:$0xff] }
 0x7c2   :  { %5577 = vmatpush.msra.mxu1 %v5308_v17  ;;  %5597 = vmatpush.msra.mxu2 %v5324_v23  ;;  %v5648_v14 = vld [vmem:[%s11789_s5 + $0x60] sm:$0xf]  ;;  %v5645_v26 = vld [vmem:[%s11789_s5 + $0x48] sm:$0xff]  ;;  %v5643_v47 = vld [vmem:[%s11789_s5 + $0x38] sm:$0xff] }
 0x7c3   :  { %5538 = vmatpush.msra.mxu3 %v5275_v61  ;;  %5558 = vmatpush.msra.mxu0 %v5291_v54  ;;  %v5644_v50 = vld [vmem:[%s11789_s5 + $0x40] sm:$0xff]  ;;  %v5642_v13 = vld [vmem:[%s11789_s5 + $0x30] sm:$0xff]  ;;  %v5641_v23 = vld [vmem:[%s11789_s5 + $0x28] sm:$0xff] }
 0x7c4   :  { %5578 = vmatpush.msra.mxu1 %v5307_v5  ;;  %5598 = vmatpush.msra.mxu2 %v5323_v45  ;;  %v5797_v10 = vld [vmem:[%s11788_s4] ss:$0 sm:$0xff]  ;;  %v5639_v45 = vld [vmem:[%s11789_s5 + $0x18] sm:$0xff] }
 0x7c5   :  { %5539 = vmatpush.msra.mxu3 %v5274_v52  ;;  %5559 = vmatpush.msra.mxu0 %v5290_v58  ;;  %v5640_v61 = vld [vmem:[%s11789_s5 + $0x20] sm:$0xff]  ;;  %v5638_v52 = vld [vmem:[%s11789_s5 + $0x10] sm:$0xff] }
 0x7c6   :  { %5579 = vmatpush.msra.mxu1 %v5306_v42  ;;  %5599 = vmatpush.msra.mxu2 %v5322_v36  ;;  %v5358_v24 = vld.sshfl [vmem:[#allocation1 + $0x20] sm:$0xff pattern:$0x73625140]  ;;  %v5637_v36 = vld [vmem:[%s11789_s5 + $0x8] sm:$0xff] }
 0x7c7   :  { %5540 = vmatpush.msra.mxu3 %v5273_v12  ;;  %5560 = vmatpush.msra.mxu0 %v5289_v39  ;;  %v5636_v12 = vld [vmem:[%s11789_s5] sm:$0xff] }
 0x7c8   :  { %5580 = vmatpush.msra.mxu1 %v5305_v28  ;;  %5600 = vmatpush.msra.mxu2 %v5321_v56 }
 0x7c9   :  { %5541 = vmatpush.msra.mxu3 %v5272_v7  ;;  %5561 = vmatpush.msra.mxu0 %v5288_v63 }
 0x7ca   :  { %5581 = vmatpush.msra.mxu1 %v5304_v20  ;;  %5601 = vmatpush.msra.mxu2 %v5320_v19 }
 0x7cb   :  { %5542 = vmatpush.msra.mxu3 %v5271_v3  ;;  %5562 = vmatpush.msra.mxu0 %v5287_v55 }
 0x7cc   :  { %5582 = vmatpush.msra.mxu1 %v5303_v6  ;;  %5602 = vmatpush.msra.mxu2 %v5319_v25 }
 0x7cd   :  { %5543 = vmatpush.msra.mxu3 %v5270_v59  ;;  %5563 = vmatpush.msra.mxu0 %v5286_v43 }
 0x7ce   :  { %5583 = vmatpush.msra.mxu1 %v5302_v44  ;;  %5603 = vmatpush.msra.mxu2 %v5318_v31 }
 0x7cf   :  { %5544 = vmatpush.msra.mxu3 %v5269_v0  ;;  %5564 = vmatpush.msra.mxu0 %v5285_v18 }
 0x7d0   :  { %5584 = vmatpush.msra.mxu1 %v5301_v34  ;;  %5604 = vmatpush.msra.mxu2 %v5317_v9 }
 0x7d1   :  { %5545 = vmatpush.msra.mxu3 %v5268_v38  ;;  %5565 = vmatpush.msra.mxu0 %v5284_v15 }
 0x7d2   :  { %5585 = vmatpush.msra.mxu1 %v5300_v16  ;;  %5605 = vmatpush.msra.mxu2 %v5316_v60  ;;  %v5798_v60 = vld [vmem:[%s11790_s6] ss:$0 sm:$0xff] }
 0x7d3   :  { %5546 = vmatpush.msra.mxu3 %v5267_v57  ;;  %5566 = vmatpush.msra.mxu0 %v5283_v8 }
 0x7d4   :  { %5586 = vmatpush.msra.mxu1 %v5299_v35  ;;  %5606 = vmatpush.msra.mxu2 %v5315_v33 }
 0x7d5   :  { %5547 = vmatpush.msra.mxu3 %v5266_v32  ;;  %5567 = vmatpush.msra.mxu0 %v5282_v27 }
 0x7d6   :  { %5587 = vmatpush.msra.mxu1 %v5298_v22  ;;  %5607 = vmatpush.msra.mxu2 %v5314_v51 }
 0x7d7   :  { %5548 = vmatpush.msra.mxu3 %v5265_v48  ;;  %5568 = vmatpush.msra.mxu0 %v5281_v46 }
 0x7d8   :  { %5588 = vmatpush.msra.mxu1 %v5297_v21  ;;  %5608 = vmatpush.msra.mxu2 %v5313_v30 }
 0x7d9   :  { %5549 = vmatmul.f32.vlgmr.msra.gmra.mxu3 %v5354_v11  ;;  %5569 = vmatmul.f32.vlgmr.msra.gmra.mxu0 %v5355_v49 }
 0x7da   :  { %5589 = vmatmul.f32.vlgmr.msra.gmra.mxu1 %v5356_v62  ;;  %5609 = vmatmul.f32.vlgmr.msra.gmra.mxu2 %v5357_v4 }
 0x7db   :  { %5625 = vmatpush.msrb.mxu3 %v5332_v37  ;;  %5789 = vmatpush.msk.msrb.mxu0 %vm1313_vm2, %v5648_v14  ;;  %vm5653_vm2 = vcmask 818176  }
 0x7dd   :  { %5626 = vmatpush.msrb.mxu3 %v5331_v41  ;;  %5664 = vmatpush.msrb.mxu0 %v5647_v29 }
 0x7df   :  { %5627 = vmatpush.msrb.mxu3 %v5330_v1  ;;  %5665 = vmatpush.msrb.mxu0 %v5646_v40 }
 0x7e1   :  { %5628 = vmatpush.msrb.mxu3 %v5329_v53  ;;  %5666 = vmatpush.msrb.mxu0 %v5645_v26 }
 0x7e2   :  { %5788 = vmatmul.msk.f32.vlgmr.msrb.gmra.mxu3 %vm220_vm9, %v5358_v24 }
 0x7e3   :  { %5667 = vmatpush.msrb.mxu0 %v5644_v50 }
 0x7e5   :  { %5668 = vmatpush.msrb.mxu0 %v5643_v47 }
 0x7e7   :  { %5669 = vmatpush.msrb.mxu0 %v5642_v13 }
 0x7e9   :  { %5670 = vmatpush.msrb.mxu0 %v5641_v23 }
 0x7eb   :  { %5671 = vmatpush.msrb.mxu0 %v5640_v61 }
 0x7ed   :  { %5672 = vmatpush.msrb.mxu0 %v5639_v45 }
 0x7ef   :  { %5673 = vmatpush.msrb.mxu0 %v5638_v52 }
 0x7f1   :  { %5674 = vmatpush.msrb.mxu0 %v5637_v36 }
 0x7f3   :  { %5675 = vmatpush.msrb.mxu0 %v5636_v12 }
 0x832   :  { %v5410_v54 = vpop.f32.mrf.mxu0 }
 0x834   :  { %v5430_v58 = vpop.f32.mrf.mxu1 }
 0x838   :  { %v5390_v2 = vpop.f32.mrf.mxu3 }
 0x839   :  { %v5391_v17 = vadd.f32 %v5797_v10, %v5390_v2  ;;  %v5450_v39 = vpop.f32.mrf.mxu2 }
 0x83b   :  { %v5411_v5 = vadd.f32 %v5410_v54, %v5391_v17 }
 0x83c   :  { %v5490_v63 = vpop.f32.mrf.mxu0 }
 0x83d   :  { %v5431_v42 = vadd.f32 %v5430_v58, %v5411_v5  ;;  %v5510_v19 = vpop.f32.mrf.mxu1 }
 0x83f   :  { %v5451_v28 = vadd.f32 %v5450_v39, %v5431_v42 }
 0x842   :  { %v5470_v56 = vpop.f32.mrf.mxu3 }
 0x843   :  { %v5471_v7 = vadd.f32 %v5470_v56, %v5451_v28  ;;  %v5530_v55 = vpop.f32.mrf.mxu2 }
 0x845   :  { %v5491_v20 = vadd.f32 %v5490_v63, %v5471_v7 }
 0x847   :  { %v5511_v3 = vadd.f32 %v5510_v19, %v5491_v20 }
 0x849   :  { %v5531_v6 = vadd.f32 %v5530_v55, %v5511_v3 }
 0x856   :  { %v5570_v43 = vpop.f32.mrf.mxu0 }
 0x857   :  { %v5590_v31 = vpop.f32.mrf.mxu1 }
 0x85c   :  { %v5550_v25 = vpop.f32.mrf.mxu3 }
 0x85d   :  { %v5551_v59 = vadd.f32 %v5550_v25, %v5531_v6  ;;  %v5610_v18 = vpop.f32.mrf.mxu2 }
 0x85f   :  { %v5571_v44 = vadd.f32 %v5570_v43, %v5551_v59 }
 0x861   :  { %v5591_v0 = vadd.f32 %v5590_v31, %v5571_v44 }
 0x863   :  { %v5611_v34 = vadd.f32 %v5610_v18, %v5591_v0 }
 0x865   :  { %v5630_v9 = vpop.f32.mrf.mxu3 }
 0x866   :  { %v5631_v38 = vadd.f32 %v5630_v9, %v5611_v34 }
 0x868   :  { %vm5633_vm9 = vcmp.gt.f32.partialorder %v5631_v38, 0.0  ;;  %v5634_v15 = vmul.f32 0.01, %v5631_v38 }
 0x86a   :  { %v5635_v16 = vsel %vm5633_vm9, %v5631_v38, %v5634_v15 }
 0x86b   :  { %5790 = vmatmul.msk.f32.vlgmr.msrb.gmra.mxu0 %vm5653_vm2, %v5635_v16 }
 0x8e8   :  { %v5677_v57 = vpop.f32.mrf.mxu0 }
 0x8e9   :  { %v5678_v8 = vadd.f32 %v5798_v60, %v5677_v57 }
 0x8eb   :  { %5681 = vst.msk [vmem:[#allocation7] sm:$0x3] %vm5680_vm4, %v5678_v8 }
 0x8ec   :  { %5692 = dma.vmem_to_hbm [thread:$0]  %s5688_s26, 32, %s5690_s29, [#allocation8]  }
 0x8ed   :  { %5906 = dma.done.wait [#allocation8], 32  }
 0x8ee   :  { %5907 = vsyncadd [#allocation8], 4294967264 }
 0x8ef   :  { %5697 = vsyncpa [#allocation8], 1 }

</bundles_post_ra>
